<compile_context>
chip_gen: v6e
topology: v6e:2x2x1
jax: 0.10.0
libtpu: 0.0.40
codegen_flags: <defaults>
</compile_context>

<pallas_src>
import functools

import jax
import jax.numpy as jnp
from jax import lax
from jax.experimental import pallas as pl
from jax.experimental.pallas import tpu as pltpu


def _ceil_to(x, m):
    return (x + m - 1) // m * m


# ----------------------------------------------------------------------------
# Kernels
# ----------------------------------------------------------------------------
def edge_agg_kernel(eb_start_ref, eb_count_ref, head_ref, neigh_ref, out_ref,
                    acc_ref):
    """Masked scatter matmul for the attention aggregator entity branch.

    Grid: (entity blocks [parallel], edge blocks [arbitrary/reduction]).
    Per-edge softmax weights / mean counts are already folded into neigh_ref
    (bf16, (TE, D)).  head_ref is (1, TE) int32 (padded edges = sentinel).
    Scratch: acc (TN, D) f32.  Finalize fuses F.normalize(dim=1).
    """
    n_blk = pl.program_id(0)
    e_blk = pl.program_id(1)
    bn = out_ref.shape[0]
    te = head_ref.shape[1]

    @pl.when(e_blk == 0)
    def _():
        acc_ref[...] = jnp.zeros_like(acc_ref)

    # Only edge blocks inside this entity block's CSR range do work.
    @pl.when(e_blk < eb_count_ref[n_blk])
    def _():
        head = head_ref[...]                                        # (1, TE)
        row_ids = n_blk * bn + lax.broadcasted_iota(jnp.int32, (bn, te), 0)
        maskf = (row_ids == head).astype(jnp.bfloat16)              # (TN, TE)
        acc_ref[...] += jnp.dot(maskf, neigh_ref[...],
                                preferred_element_type=jnp.float32)  # (TN, D)

    @pl.when(e_blk == pl.num_programs(1) - 1)
    def _():
        agg = acc_ref[...]
        nrm2 = jnp.sum(agg * agg, axis=-1, keepdims=True)
        out_ref[...] = agg * lax.rsqrt(jnp.maximum(nrm2, 1e-24))


def user_agg_kernel(inter_ref, ent_ref, usr_ref, rel_ref, out_ref, acc_ref):
    """user_agg = inter @ E (K-tiled); += softmax(U R^T) R * user_agg; normalize.

    Grid: (user blocks [parallel], entity/K blocks [arbitrary/reduction]).
    inter/ent are bf16 (f32 accumulate); softmax math stays f32.
    """
    k_blk = pl.program_id(1)

    @pl.when(k_blk == 0)
    def _():
        acc_ref[...] = jnp.zeros_like(acc_ref)

    acc_ref[...] += jnp.dot(inter_ref[...], ent_ref[...],
                            preferred_element_type=jnp.float32)      # (TU, D)

    @pl.when(k_blk == pl.num_programs(1) - 1)
    def _():
        usr = usr_ref[...]                                           # (TU, D) f32
        rel = rel_ref[...]                                           # (R, D)  f32
        score = lax.dot_general(usr, rel, (((1,), (1,)), ((), ())),
                                preferred_element_type=jnp.float32)  # (TU, R)
        score = score - jnp.max(score, axis=-1, keepdims=True)
        e = jnp.exp(score)
        score = e / jnp.sum(e, axis=-1, keepdims=True)               # exact div
        ua = acc_ref[...]
        agg = ua + jnp.dot(score, rel, preferred_element_type=jnp.float32) * ua
        nrm2 = jnp.sum(agg * agg, axis=-1, keepdims=True)
        out_ref[...] = agg * lax.rsqrt(jnp.maximum(nrm2, 1e-24))


def sim_kernel(a_ref, b_ref, o_ref):
    """Cosine-similarity output tile: inputs are pre-normalized bf16 rows."""
    o_ref[...] = lax.dot_general(a_ref[...], b_ref[...],
                                 (((1,), (1,)), ((), ())),
                                 preferred_element_type=jnp.float32)


# ----------------------------------------------------------------------------
# Python wrappers (glue + pallas_call plumbing)
# ----------------------------------------------------------------------------
def edge_attention_aggregate(entity_emb, relation_emb, head, tail, edge_type,
                             *, block_n=256, block_e=512):
    """scatter_softmax-weighted scatter_mean of (entity[tail]*rel) onto head."""
    n_entities, dim = entity_emb.shape
    n_edges = head.shape[0]
    n_pad = _ceil_to(n_entities, block_n)
    e_pad = _ceil_to(n_edges, block_e)
    n_blocks = n_pad // block_n
    e_blocks = e_pad // block_e

    head = head.astype(jnp.int32)
    tail = tail.astype(jnp.int32)
    edge_type = edge_type.astype(jnp.int32)

    # CSR: sort edges by head so each entity block owns a contiguous edge range.
    order = jnp.argsort(head)
    head_s = head[order]
    tail_s = tail[order]
    type_s = edge_type[order]

    # Per-edge precompute (plain JAX, O(E*D)) — hoisted out of the kernel.
    rel_e = relation_emb[type_s]                                    # (E, D)
    eh = entity_emb[head_s]
    et = entity_emb[tail_s]
    neigh = et * rel_e                                              # (E, D)
    hr = eh * rel_e
    att = jnp.sum(hr * hr, axis=-1) * jnp.sum(neigh * neigh, axis=-1)  # (E,)

    # Exact segment softmax (shift by per-head max -> exponent <= 0) + mean count.
    seg_max = jax.ops.segment_max(att, head_s, num_segments=n_entities,
                                  indices_are_sorted=True)
    w = jnp.exp(att - seg_max[head_s])
    denom = jax.ops.segment_sum(w, head_s, num_segments=n_entities,
                                indices_are_sorted=True)
    count = jax.ops.segment_sum(jnp.ones_like(w), head_s,
                                num_segments=n_entities, indices_are_sorted=True)
    scale = w / (denom[head_s] * jnp.maximum(count[head_s], 1.0))
    neigh_w = (neigh * scale[:, None]).astype(jnp.bfloat16)         # (E, D)

    # Pad the edge stream; sentinel head never matches a real entity row.
    pad_e = e_pad - n_edges
    if pad_e:
        neigh_w = jnp.pad(neigh_w, ((0, pad_e), (0, 0)))
        head_s = jnp.pad(head_s, (0, pad_e), constant_values=n_pad)
    head_row = head_s.reshape(1, e_pad)

    # Per-entity-block edge-block ranges (scalar prefetch).
    bounds = jnp.arange(0, n_pad + 1, block_n, dtype=jnp.int32)
    start = jnp.searchsorted(head_s, bounds[:-1], side="left").astype(jnp.int32)
    end = jnp.searchsorted(head_s, bounds[1:], side="left").astype(jnp.int32)
    has = end > start
    eb_start = jnp.where(has, start // block_e, 0).astype(jnp.int32)
    eb_count = jnp.where(
        has, (end - 1) // block_e - start // block_e + 1, 0).astype(jnp.int32)

    def head_map(n, e, eb_start_ref, eb_count_ref):
        cnt = eb_count_ref[n]
        off = jnp.minimum(e, jnp.maximum(cnt - 1, 0))
        return (0, eb_start_ref[n] + off)

    def neigh_map(n, e, eb_start_ref, eb_count_ref):
        cnt = eb_count_ref[n]
        off = jnp.minimum(e, jnp.maximum(cnt - 1, 0))
        return (eb_start_ref[n] + off, 0)

    visited = n_blocks + e_blocks  # staircase bound on non-empty tiles
    out = pl.pallas_call(
        edge_agg_kernel,
        out_shape=jax.ShapeDtypeStruct((n_pad, dim), jnp.float32),
        grid_spec=pltpu.PrefetchScalarGridSpec(
            num_scalar_prefetch=2,
            grid=(n_blocks, e_blocks),
            in_specs=[
                pl.BlockSpec((1, block_e), head_map),
                pl.BlockSpec((block_e, dim), neigh_map),
            ],
            out_specs=pl.BlockSpec((block_n, dim),
                                   lambda n, e, s, c: (n, 0)),
            scratch_shapes=[pltpu.VMEM((block_n, dim), jnp.float32)]),
        compiler_params=pltpu.CompilerParams(
            dimension_semantics=("parallel", "arbitrary")),
        cost_estimate=pl.CostEstimate(
            flops=int(2 * visited * block_n * block_e * dim),
            transcendentals=0,
            bytes_accessed=int(visited * (2 * block_e * dim + 4 * block_e)
                               + 4 * n_pad * dim)),
    )(eb_start, eb_count, head_row, neigh_w)
    return out[:n_entities]


def user_aggregate(inter_dense, entity_emb, user_emb, relation_emb,
                   *, block_u=256, block_k=512):
    """inter @ E (K-tiled) ; += softmax(U R^T) R * user_agg ; F.normalize."""
    n_users, dim = user_emb.shape
    n_ent = entity_emb.shape[0]
    n_rel = relation_emb.shape[0]

    u_pad = _ceil_to(n_users, block_u)
    block_k = min(block_k, _ceil_to(n_ent, 128))
    k_pad = _ceil_to(n_ent, block_k)

    inter = jnp.pad(inter_dense,
                    ((0, u_pad - n_users), (0, k_pad - n_ent))).astype(jnp.bfloat16)
    ent = jnp.pad(entity_emb, ((0, k_pad - n_ent), (0, 0))).astype(jnp.bfloat16)
    usr = jnp.pad(user_emb, ((0, u_pad - n_users), (0, 0)))

    out = pl.pallas_call(
        user_agg_kernel,
        out_shape=jax.ShapeDtypeStruct((u_pad, dim), jnp.float32),
        grid=(u_pad // block_u, k_pad // block_k),
        in_specs=[
            pl.BlockSpec((block_u, block_k), lambda u, k: (u, k)),
            pl.BlockSpec((block_k, dim), lambda u, k: (k, 0)),
            pl.BlockSpec((block_u, dim), lambda u, k: (u, 0)),
            pl.BlockSpec((n_rel, dim), lambda u, k: (0, 0)),
        ],
        out_specs=pl.BlockSpec((block_u, dim), lambda u, k: (u, 0)),
        scratch_shapes=[pltpu.VMEM((block_u, dim), jnp.float32)],
        compiler_params=pltpu.CompilerParams(
            dimension_semantics=("parallel", "arbitrary")),
    )(inter, ent, usr, relation_emb)
    return out[:n_users]


def build_adj(context, topk, *, tile=512):
    """kNN item-item semantic graph with symmetric D^{-1/2} A D^{-1/2} scaling."""
    n, dim = context.shape

    # Normalize ONCE (hoisted out of the per-tile sim kernel).
    nrm = jnp.sqrt(jnp.sum(context * context, axis=-1, keepdims=True))
    ctx_n = context / jnp.maximum(nrm, 1e-12)

    n_pad = _ceil_to(n, tile)
    ctx_p = jnp.pad(ctx_n, ((0, n_pad - n), (0, 0))).astype(jnp.bfloat16)

    sim = pl.pallas_call(
        sim_kernel,
        out_shape=jax.ShapeDtypeStruct((n_pad, n_pad), jnp.float32),
        grid=(n_pad // tile, n_pad // tile),
        in_specs=[pl.BlockSpec((tile, dim), lambda i, j: (i, 0)),
                  pl.BlockSpec((tile, dim), lambda i, j: (j, 0))],
        out_specs=pl.BlockSpec((tile, tile), lambda i, j: (i, j)),
        compiler_params=pltpu.CompilerParams(
            dimension_semantics=("parallel", "parallel")),
        cost_estimate=pl.CostEstimate(
            flops=int(2 * n_pad * n_pad * dim),
            transcendentals=0,
            bytes_accessed=int(2 * (2 * n_pad * dim) * (n_pad // tile)
                               + 4 * n_pad * n_pad)),
    )(ctx_p, ctx_p)
    sim = sim[:n, :n]

    # Top-k + O(N*topk) symmetric normalization (the two N^2 passes are gone:
    # row sums of the scattered adjacency are exactly the row sums of knn_val).
    knn_val, knn_idx = lax.top_k(sim, topk)
    rowsum = jnp.sum(knn_val, axis=-1)
    d = lax.rsqrt(jnp.maximum(rowsum, 1e-12))
    val = knn_val * d[:, None] * d[knn_idx]

    rows = jnp.repeat(jnp.arange(n), topk)
    l_norm = jnp.zeros((n, n), jnp.float32).at[rows, knn_idx.reshape(-1)].set(
        val.reshape(-1))
    return l_norm


def graphconv_forward(user_emb, entity_emb, relation_emb, head, tail, edge_type,
                      inter_dense, *, n_hops, topk, lambda_coeff):
    # node_dropout_rate = mess_dropout_rate = 0.0 -> dropout paths are identity.
    origin_entity_emb = entity_emb
    entity_res = [entity_emb]
    user_res = [user_emb]

    for _ in range(n_hops):
        entity_new = edge_attention_aggregate(entity_emb, relation_emb,
                                              head, tail, edge_type)
        user_new = user_aggregate(inter_dense, entity_emb, user_emb, relation_emb)
        # F.normalize is fused into the kernels' epilogues.
        entity_emb, user_emb = entity_new, user_new
        entity_res.append(entity_emb)
        user_res.append(user_emb)

    entity_res_emb = jnp.mean(jnp.stack(entity_res, axis=1), axis=1)
    user_res_emb = jnp.mean(jnp.stack(user_res, axis=1), axis=1)

    # build_graph_separately = False branch (author's implementation)
    origin_item_adj = build_adj(origin_entity_emb, topk)
    item_adj = ((1.0 - lambda_coeff) * build_adj(entity_res_emb, topk)
                + lambda_coeff * origin_item_adj)
    return entity_res_emb, user_res_emb, item_adj


# ----------------------------------------------------------------------------
# Main
# ----------------------------------------------------------------------------
if __name__ == "__main__":
    # config sized to exercise padding and multi-block grids:
    # entities 600 -> 3 blocks of 256 (edge kernel), 2x2 sim tiles of 512,
    # edges 2000 -> 4 edge blocks of 512, users 48 -> one 256 block,
    # entity/K axis of user kernel -> 2 blocks of 512.
    N_ENT, N_USR, DIM, N_REL, N_EDGE = 600, 48, 32, 8, 2000
    N_HOPS, TOPK, LAMBDA = 2, 4, 0.5

    key = jax.random.PRNGKey(0)
    k_u, k_e, k_r, k_h, k_t, k_ty, k_i = jax.random.split(key, 7)

    user_emb = jax.random.normal(k_u, (N_USR, DIM), jnp.float32)
    entity_emb = jax.random.normal(k_e, (N_ENT, DIM), jnp.float32)
    # relation_embedding: xavier_normal_initialization
    rel_std = (2.0 / (N_REL + DIM)) ** 0.5
    relation_emb = rel_std * jax.random.normal(k_r, (N_REL, DIM), jnp.float32)

    head = jax.random.randint(k_h, (N_EDGE,), 0, N_ENT, dtype=jnp.int32)
    tail = jax.random.randint(k_t, (N_EDGE,), 0, N_ENT, dtype=jnp.int32)
    edge_type = jax.random.randint(k_ty, (N_EDGE,), 0, N_REL, dtype=jnp.int32)
    # dense stand-in for the sparse user-entity interaction matrix
    inter_dense = (jax.random.uniform(k_i, (N_USR, N_ENT)) < 0.1).astype(jnp.float32)

    fwd = jax.jit(functools.partial(graphconv_forward, n_hops=N_HOPS, topk=TOPK,
                                    lambda_coeff=LAMBDA))

    entity_res, user_res, item_adj = fwd(user_emb, entity_emb, relation_emb,
                                         head, tail, edge_type, inter_dense)
    jax.block_until_ready((entity_res, user_res, item_adj))
    assert entity_res.shape == (N_ENT, DIM)
    assert user_res.shape == (N_USR, DIM)
    assert item_adj.shape == (N_ENT, N_ENT)
    assert bool(jnp.all(jnp.isfinite(entity_res)))
    assert bool(jnp.all(jnp.isfinite(user_res)))
    assert bool(jnp.all(jnp.isfinite(item_adj)))
    print("KERNEL_OK")
</pallas_src>

<mosaic_0001>
module attributes {stable_mosaic.version = 11 : i64} {
  func.func private @main(%arg0: i32) attributes {dimension_semantics = [#tpu.dimension_semantics<core_parallel>], iteration_bounds = array<i64: 2>, tpu.core_type = #tpu.core_type<sc_scalar_subcore>, window_params = []} {
    return
  }
}

module attributes {stable_mosaic.version = 11 : i64} {
  func.func private @main(%arg0: i32) attributes {dimension_semantics = [#tpu.dimension_semantics<core_parallel>], iteration_bounds = array<i64: 2>, tpu.core_type = #tpu.core_type<sc_scalar_subcore>, window_params = []} {
    return
  }
}

module attributes {stable_mosaic.version = 11 : i64} {
  func.func @user_agg_kernel(%arg0: i32, %arg1: i32, %arg2: memref<256x512xbf16, #tpu.memory_space<vmem>>, %arg3: memref<512x32xbf16, #tpu.memory_space<vmem>>, %arg4: memref<256x32xf32, #tpu.memory_space<vmem>>, %arg5: memref<8x32xf32, #tpu.memory_space<vmem>>, %arg6: memref<256x32xf32, #tpu.memory_space<vmem>>, %arg7: memref<256x32xf32, #tpu.memory_space<vmem>>) attributes {dimension_semantics = [#tpu.dimension_semantics<parallel>, #tpu.dimension_semantics<arbitrary>], iteration_bounds = array<i64: 1, 2>, scalar_prefetch = 0 : i64, scratch_operands = 1 : i64, tpu.core_type = #tpu.core_type<tc>, window_params = [{transform_indices = @transform_0, window_bounds = array<i64: 256, 512>}, {transform_indices = @transform_1, window_bounds = array<i64: 512, 32>}, {transform_indices = @transform_2, window_bounds = array<i64: 256, 32>}, {pipeline_mode = #tpu.pipeline_mode<synchronous>, transform_indices = @transform_3, window_bounds = array<i64: 8, 32>}, {transform_indices = @transform_4, window_bounds = array<i64: 256, 32>}]} {
    %c0_i32 = arith.constant 0 : i32
    %0 = arith.cmpi eq, %arg1, %c0_i32 : i32
    %1 = arith.extui %0 : i1 to i32
    %c0_i32_0 = arith.constant 0 : i32
    %2 = arith.cmpi ne, %1, %c0_i32_0 : i32
    scf.if %2 {
      %cst_9 = arith.constant 0.000000e+00 : f32
      %12 = vector.broadcast %cst_9 : f32 to vector<256x32xf32>
      %c0_10 = arith.constant 0 : index
      %c0_11 = arith.constant 0 : index
      %13 = vector.load %arg7[%c0_10, %c0_11] : memref<256x32xf32, #tpu.memory_space<vmem>>, vector<256x32xf32>
      tpu.vector_store %arg7[%c0_10, %c0_11], %12 {strides = array<i32>} : memref<256x32xf32, #tpu.memory_space<vmem>>, vector<256x32xf32>,
    } else {
    }
    %c0 = arith.constant 0 : index
    %c0_1 = arith.constant 0 : index
    %3 = vector.load %arg7[%c0, %c0_1] : memref<256x32xf32, #tpu.memory_space<vmem>>, vector<256x32xf32>
    %c0_2 = arith.constant 0 : index
    %c0_3 = arith.constant 0 : index
    %4 = vector.load %arg2[%c0_2, %c0_3] : memref<256x512xbf16, #tpu.memory_space<vmem>>, vector<256x512xbf16>
    %c0_4 = arith.constant 0 : index
    %c0_5 = arith.constant 0 : index
    %5 = vector.load %arg3[%c0_4, %c0_5] : memref<512x32xbf16, #tpu.memory_space<vmem>>, vector<512x32xbf16>
    %cst = arith.constant dense<0.000000e+00> : vector<256x32xf32>
    %6 = tpu.matmul %4, %5, %cst {dimension_numbers = #tpu.dot_dimension_numbers<[1], [0], [0], [1], [0, 0, 1, 1], [], []>} : vector<256x512xbf16>, vector<512x32xbf16>, vector<256x32xf32> -> vector<256x32xf32>
    %7 = arith.addf %3, %6 : vector<256x32xf32>
    %c0_6 = arith.constant 0 : index
    %c0_7 = arith.constant 0 : index
    %8 = vector.load %arg7[%c0_6, %c0_7] : memref<256x32xf32, #tpu.memory_space<vmem>>, vector<256x32xf32>
    tpu.vector_store %arg7[%c0_6, %c0_7], %7 {strides = array<i32>} : memref<256x32xf32, #tpu.memory_space<vmem>>, vector<256x32xf32>,
    %c1_i32 = arith.constant 1 : i32
    %9 = arith.cmpi eq, %arg1, %c1_i32 : i32
    %10 = arith.extui %9 : i1 to i32
    %c0_i32_8 = arith.constant 0 : i32
    %11 = arith.cmpi ne, %10, %c0_i32_8 : i32
    scf.if %11 {
      %c0_9 = arith.constant 0 : index
      %c0_10 = arith.constant 0 : index
      %12 = vector.load %arg4[%c0_9, %c0_10] : memref<256x32xf32, #tpu.memory_space<vmem>>, vector<256x32xf32>
      %c0_11 = arith.constant 0 : index
      %c0_12 = arith.constant 0 : index
      %13 = vector.load %arg5[%c0_11, %c0_12] : memref<8x32xf32, #tpu.memory_space<vmem>>, vector<8x32xf32>
      %cst_13 = arith.constant dense<0.000000e+00> : vector<256x8xf32>
      %14 = tpu.matmul %12, %13, %cst_13 {dimension_numbers = #tpu.dot_dimension_numbers<[1], [1], [0], [0], [0, 0, 1, 0], [], []>} : vector<256x32xf32>, vector<8x32xf32>, vector<256x8xf32> -> vector<256x8xf32>
      %cst_14 = arith.constant dense<0xFF800000> : vector<256xf32>
      %15 = vector.multi_reduction <maximumf>, %14, %cst_14 [1] : vector<256x8xf32> to vector<256xf32>
      %16 = vector.shape_cast %15 : vector<256xf32> to vector<256x1xf32>
      %17 = vector.broadcast %16 : vector<256x1xf32> to vector<256x8xf32>
      %18 = arith.subf %14, %17 : vector<256x8xf32>
      %19 = math.exp %18 : vector<256x8xf32>
      %cst_15 = arith.constant dense<0.000000e+00> : vector<256xf32>
      %20 = vector.multi_reduction <add>, %19, %cst_15 [1] : vector<256x8xf32> to vector<256xf32>
      %21 = vector.shape_cast %20 : vector<256xf32> to vector<256x1xf32>
      %22 = vector.broadcast %21 : vector<256x1xf32> to vector<256x8xf32>
      %23 = arith.divf %19, %22 : vector<256x8xf32>
      %c0_16 = arith.constant 0 : index
      %c0_17 = arith.constant 0 : index
      %24 = vector.load %arg7[%c0_16, %c0_17] : memref<256x32xf32, #tpu.memory_space<vmem>>, vector<256x32xf32>
      %cst_18 = arith.constant dense<0.000000e+00> : vector<256x32xf32>
      %25 = tpu.matmul %23, %13, %cst_18 {dimension_numbers = #tpu.dot_dimension_numbers<[1], [0], [0], [1], [0, 0, 1, 1], [], []>} : vector<256x8xf32>, vector<8x32xf32>, vector<256x32xf32> -> vector<256x32xf32>
      %26 = arith.mulf %25, %24 : vector<256x32xf32>
      %27 = arith.addf %24, %26 : vector<256x32xf32>
      %28 = arith.mulf %27, %27 : vector<256x32xf32>
      %cst_19 = arith.constant dense<0.000000e+00> : vector<256xf32>
      %29 = vector.multi_reduction <add>, %28, %cst_19 [1] : vector<256x32xf32> to vector<256xf32>
      %30 = vector.shape_cast %29 : vector<256xf32> to vector<256x1xf32>
      %cst_20 = arith.constant 1.000000e-24 : f32
      %31 = vector.broadcast %cst_20 : f32 to vector<256x1xf32>
      %32 = arith.maximumf %30, %31 : vector<256x1xf32>
      %33 = math.rsqrt %32 : vector<256x1xf32>
      %34 = vector.broadcast %33 : vector<256x1xf32> to vector<256x32xf32>
      %35 = arith.mulf %27, %34 : vector<256x32xf32>
      %c0_21 = arith.constant 0 : index
      %c0_22 = arith.constant 0 : index
      %36 = vector.load %arg6[%c0_21, %c0_22] : memref<256x32xf32, #tpu.memory_space<vmem>>, vector<256x32xf32>
      tpu.vector_store %arg6[%c0_21, %c0_22], %35 {strides = array<i32>} : memref<256x32xf32, #tpu.memory_space<vmem>>, vector<256x32xf32>,
    } else {
    }
    return
  }
  func.func @transform_0(%arg0: i32, %arg1: i32) -> (i32, i32) {
    %c0_i32 = arith.constant 0 : i32
    return %arg0, %arg1 : i32, i32
  }
  func.func @transform_1(%arg0: i32, %arg1: i32) -> (i32, i32) {
    %c0_i32 = arith.constant 0 : i32
    %c0_i32_0 = arith.constant 0 : i32
    return %arg1, %c0_i32 : i32, i32
  }
  func.func @transform_2(%arg0: i32, %arg1: i32) -> (i32, i32) {
    %c0_i32 = arith.constant 0 : i32
    %c0_i32_0 = arith.constant 0 : i32
    return %arg0, %c0_i32 : i32, i32
  }
  func.func @transform_3(%arg0: i32, %arg1: i32) -> (i32, i32) {
    %c0_i32 = arith.constant 0 : i32
    %c0_i32_0 = arith.constant 0 : i32
    %c0_i32_1 = arith.constant 0 : i32
    return %c0_i32, %c0_i32_0 : i32, i32
  }
  func.func @transform_4(%arg0: i32, %arg1: i32) -> (i32, i32) {
    %c0_i32 = arith.constant 0 : i32
    %c0_i32_0 = arith.constant 0 : i32
    return %arg0, %c0_i32 : i32, i32
  }
}

module attributes {stable_mosaic.version = 11 : i64} {
  func.func @edge_agg_kernel(%arg0: i32, %arg1: i32, %arg2: memref<3xi32, #tpu.memory_space<smem>>, %arg3: memref<3xi32, #tpu.memory_space<smem>>, %arg4: memref<1x512xi32, #tpu.memory_space<vmem>>, %arg5: memref<512x32xbf16, #tpu.memory_space<vmem>>, %arg6: memref<256x32xf32, #tpu.memory_space<vmem>>, %arg7: memref<256x32xf32, #tpu.memory_space<vmem>>) attributes {dimension_semantics = [#tpu.dimension_semantics<parallel>, #tpu.dimension_semantics<arbitrary>], iteration_bounds = array<i64: 3, 4>, scalar_prefetch = 2 : i64, scratch_operands = 1 : i64, tpu.core_type = #tpu.core_type<tc>, window_params = [{transform_indices = @transform_0, window_bounds = array<i64: 1, 512>}, {transform_indices = @transform_1, window_bounds = array<i64: 512, 32>}, {transform_indices = @transform_2, window_bounds = array<i64: 256, 32>}]} {
    %c0_i32 = arith.constant 0 : i32
    %0 = arith.cmpi eq, %arg1, %c0_i32 : i32
    %1 = arith.extui %0 : i1 to i32
    %c0_i32_0 = arith.constant 0 : i32
    %2 = arith.cmpi ne, %1, %c0_i32_0 : i32
    scf.if %2 {
      %cst = arith.constant 0.000000e+00 : f32
      %11 = vector.broadcast %cst : f32 to vector<256x32xf32>
      %c0 = arith.constant 0 : index
      %c0_3 = arith.constant 0 : index
      %12 = vector.load %arg7[%c0, %c0_3] : memref<256x32xf32, #tpu.memory_space<vmem>>, vector<256x32xf32>
      tpu.vector_store %arg7[%c0, %c0_3], %11 {strides = array<i32>} : memref<256x32xf32, #tpu.memory_space<vmem>>, vector<256x32xf32>,
    } else {
    }
    %3 = arith.index_cast %arg0 : i32 to index
    %4 = memref.load %arg3[%3] : memref<3xi32, #tpu.memory_space<smem>>
    %5 = arith.cmpi slt, %arg1, %4 : i32
    %6 = arith.extui %5 : i1 to i32
    %c0_i32_1 = arith.constant 0 : i32
    %7 = arith.cmpi ne, %6, %c0_i32_1 : i32
    scf.if %7 {
      %c0 = arith.constant 0 : index
      %c0_3 = arith.constant 0 : index
      %11 = vector.load %arg4[%c0, %c0_3] : memref<1x512xi32, #tpu.memory_space<vmem>>, vector<1x512xi32>
      %c256_i32 = arith.constant 256 : i32
      %12 = arith.muli %arg0, %c256_i32 : i32
      %13 = tpu.iota {dimensions = array<i32: 0>} : vector<256x512xi32>
      %14 = vector.broadcast %12 : i32 to vector<256x512xi32>
      %15 = arith.addi %14, %13 : vector<256x512xi32>
      %16 = vector.broadcast %11 : vector<1x512xi32> to vector<256x512xi32>
      %17 = arith.cmpi eq, %15, %16 : vector<256x512xi32>
      %18 = arith.extui %17 : vector<256x512xi1> to vector<256x512xi32>
      %19 = arith.sitofp %18 : vector<256x512xi32> to vector<256x512xf32>
      %20 = arith.truncf %19 : vector<256x512xf32> to vector<256x512xbf16>
      %c0_4 = arith.constant 0 : index
      %c0_5 = arith.constant 0 : index
      %21 = vector.load %arg7[%c0_4, %c0_5] : memref<256x32xf32, #tpu.memory_space<vmem>>, vector<256x32xf32>
      %c0_6 = arith.constant 0 : index
      %c0_7 = arith.constant 0 : index
      %22 = vector.load %arg5[%c0_6, %c0_7] : memref<512x32xbf16, #tpu.memory_space<vmem>>, vector<512x32xbf16>
      %cst = arith.constant dense<0.000000e+00> : vector<256x32xf32>
      %23 = tpu.matmul %20, %22, %cst {dimension_numbers = #tpu.dot_dimension_numbers<[1], [0], [0], [1], [0, 0, 1, 1], [], []>} : vector<256x512xbf16>, vector<512x32xbf16>, vector<256x32xf32> -> vector<256x32xf32>
      %24 = arith.addf %21, %23 : vector<256x32xf32>
      %c0_8 = arith.constant 0 : index
      %c0_9 = arith.constant 0 : index
      %25 = vector.load %arg7[%c0_8, %c0_9] : memref<256x32xf32, #tpu.memory_space<vmem>>, vector<256x32xf32>
      tpu.vector_store %arg7[%c0_8, %c0_9], %24 {strides = array<i32>} : memref<256x32xf32, #tpu.memory_space<vmem>>, vector<256x32xf32>,
    } else {
    }
    %c3_i32 = arith.constant 3 : i32
    %8 = arith.cmpi eq, %arg1, %c3_i32 : i32
    %9 = arith.extui %8 : i1 to i32
    %c0_i32_2 = arith.constant 0 : i32
    %10 = arith.cmpi ne, %9, %c0_i32_2 : i32
    scf.if %10 {
      %c0 = arith.constant 0 : index
      %c0_3 = arith.constant 0 : index
      %11 = vector.load %arg7[%c0, %c0_3] : memref<256x32xf32, #tpu.memory_space<vmem>>, vector<256x32xf32>
      %12 = arith.mulf %11, %11 : vector<256x32xf32>
      %cst = arith.constant dense<0.000000e+00> : vector<256xf32>
      %13 = vector.multi_reduction <add>, %12, %cst [1] : vector<256x32xf32> to vector<256xf32>
      %14 = vector.shape_cast %13 : vector<256xf32> to vector<256x1xf32>
      %cst_4 = arith.constant 1.000000e-24 : f32
      %15 = vector.broadcast %cst_4 : f32 to vector<256x1xf32>
      %16 = arith.maximumf %14, %15 : vector<256x1xf32>
      %17 = math.rsqrt %16 : vector<256x1xf32>
      %18 = vector.broadcast %17 : vector<256x1xf32> to vector<256x32xf32>
      %19 = arith.mulf %11, %18 : vector<256x32xf32>
      %c0_5 = arith.constant 0 : index
      %c0_6 = arith.constant 0 : index
      %20 = vector.load %arg6[%c0_5, %c0_6] : memref<256x32xf32, #tpu.memory_space<vmem>>, vector<256x32xf32>
      tpu.vector_store %arg6[%c0_5, %c0_6], %19 {strides = array<i32>} : memref<256x32xf32, #tpu.memory_space<vmem>>, vector<256x32xf32>,
    } else {
    }
    return
  }
  func.func @transform_0(%arg0: i32, %arg1: i32, %arg2: memref<3xi32, #tpu.memory_space<smem>>, %arg3: memref<3xi32, #tpu.memory_space<smem>>) -> (i32, i32) {
    %0 = arith.index_cast %arg0 : i32 to index
    %1 = memref.load %arg3[%0] : memref<3xi32, #tpu.memory_space<smem>>
    %c1_i32 = arith.constant 1 : i32
    %2 = arith.subi %1, %c1_i32 : i32
    %c0_i32 = arith.constant 0 : i32
    %3 = arith.maxsi %2, %c0_i32 : i32
    %4 = arith.minsi %arg1, %3 : i32
    %5 = arith.index_cast %arg0 : i32 to index
    %6 = memref.load %arg2[%5] : memref<3xi32, #tpu.memory_space<smem>>
    %7 = arith.addi %6, %4 : i32
    %c0_i32_0 = arith.constant 0 : i32
    %c0_i32_1 = arith.constant 0 : i32
    return %c0_i32_0, %7 : i32, i32
  }
  func.func @transform_1(%arg0: i32, %arg1: i32, %arg2: memref<3xi32, #tpu.memory_space<smem>>, %arg3: memref<3xi32, #tpu.memory_space<smem>>) -> (i32, i32) {
    %0 = arith.index_cast %arg0 : i32 to index
    %1 = memref.load %arg3[%0] : memref<3xi32, #tpu.memory_space<smem>>
    %c1_i32 = arith.constant 1 : i32
    %2 = arith.subi %1, %c1_i32 : i32
    %c0_i32 = arith.constant 0 : i32
    %3 = arith.maxsi %2, %c0_i32 : i32
    %4 = arith.minsi %arg1, %3 : i32
    %5 = arith.index_cast %arg0 : i32 to index
    %6 = memref.load %arg2[%5] : memref<3xi32, #tpu.memory_space<smem>>
    %7 = arith.addi %6, %4 : i32
    %c0_i32_0 = arith.constant 0 : i32
    %c0_i32_1 = arith.constant 0 : i32
    return %7, %c0_i32_0 : i32, i32
  }
  func.func @transform_2(%arg0: i32, %arg1: i32, %arg2: memref<3xi32, #tpu.memory_space<smem>>, %arg3: memref<3xi32, #tpu.memory_space<smem>>) -> (i32, i32) {
    %c0_i32 = arith.constant 0 : i32
    %c0_i32_0 = arith.constant 0 : i32
    return %arg0, %c0_i32 : i32, i32
  }
}

module attributes {stable_mosaic.version = 11 : i64} {
  func.func @sim_kernel(%arg0: i32, %arg1: i32, %arg2: memref<512x32xbf16, #tpu.memory_space<vmem>>, %arg3: memref<512x32xbf16, #tpu.memory_space<vmem>>, %arg4: memref<512x512xf32, #tpu.memory_space<vmem>>) attributes {dimension_semantics = [#tpu.dimension_semantics<parallel>, #tpu.dimension_semantics<parallel>], iteration_bounds = array<i64: 2, 2>, scalar_prefetch = 0 : i64, scratch_operands = 0 : i64, tpu.core_type = #tpu.core_type<tc>, window_params = [{transform_indices = @transform_0, window_bounds = array<i64: 512, 32>}, {transform_indices = @transform_1, window_bounds = array<i64: 512, 32>}, {transform_indices = @transform_2, window_bounds = array<i64: 512, 512>}]} {
    %c0 = arith.constant 0 : index
    %c0_0 = arith.constant 0 : index
    %0 = vector.load %arg2[%c0, %c0_0] : memref<512x32xbf16, #tpu.memory_space<vmem>>, vector<512x32xbf16>
    %c0_1 = arith.constant 0 : index
    %c0_2 = arith.constant 0 : index
    %1 = vector.load %arg3[%c0_1, %c0_2] : memref<512x32xbf16, #tpu.memory_space<vmem>>, vector<512x32xbf16>
    %cst = arith.constant dense<0.000000e+00> : vector<512x512xf32>
    %2 = tpu.matmul %0, %1, %cst {dimension_numbers = #tpu.dot_dimension_numbers<[1], [1], [0], [0], [0, 0, 1, 0], [], []>} : vector<512x32xbf16>, vector<512x32xbf16>, vector<512x512xf32> -> vector<512x512xf32>
    %c0_3 = arith.constant 0 : index
    %c0_4 = arith.constant 0 : index
    %3 = vector.load %arg4[%c0_3, %c0_4] : memref<512x512xf32, #tpu.memory_space<vmem>>, vector<512x512xf32>
    tpu.vector_store %arg4[%c0_3, %c0_4], %2 {strides = array<i32>} : memref<512x512xf32, #tpu.memory_space<vmem>>, vector<512x512xf32>,
    return
  }
  func.func @transform_0(%arg0: i32, %arg1: i32) -> (i32, i32) {
    %c0_i32 = arith.constant 0 : i32
    %c0_i32_0 = arith.constant 0 : i32
    return %arg0, %c0_i32 : i32, i32
  }
  func.func @transform_1(%arg0: i32, %arg1: i32) -> (i32, i32) {
    %c0_i32 = arith.constant 0 : i32
    %c0_i32_0 = arith.constant 0 : i32
    return %arg1, %c0_i32 : i32, i32
  }
  func.func @transform_2(%arg0: i32, %arg1: i32) -> (i32, i32) {
    %c0_i32 = arith.constant 0 : i32
    return %arg0, %arg1 : i32, i32
  }
}

</mosaic_0001>

<bundles_post_ra>
// kernel: custom-call.5
= control target key start
LH: loop header
LB: loop body
LE: loop exit
PB: predicated region body
PF: predicated region fallthrough
CT: control target
= control target key end

     0   :  { %s6_s0 = inlined_call_operand.vmem [shape: u32[3], index: 0, kind: output, shape index: {}]  }

// kernel: mul.10
= control target key start
LH: loop header
LB: loop body
LE: loop exit
PB: predicated region body
PF: predicated region fallthrough
CT: control target
= control target key end

     0   :  { %3 = vsyncpa [#allocation1], 0  ;;  %s87_s0 = inlined_call_operand.vmem [shape: f32[2000], index: 0, kind: input, shape index: {}]   ;;  %s88_s1 = inlined_call_operand.vmem [shape: f32[2000], index: 1, kind: input, shape index: {}]   ;;  %s89_s2 = inlined_call_operand.hbm [shape: f32[2000], index: 2, kind: output, shape index: {}]  }
   0x1   :  { %v4_v0 = vld [vmem:[%s87_s0] sm:$0xff]  ;;  %v31_v3 = vld [vmem:[%s87_s0 + $0x8] sm:$0xff] }
   0x2   :  { %v5_v1 = vld [vmem:[%s88_s1] sm:$0xff]  ;;  %v32_v4 = vld [vmem:[%s88_s1 + $0x8] sm:$0xff]  ;;  %s56_s1 = smov [#allocation0]  }
   0x3   :  { %v8_v2 = vmul.f32 %v5_v1, %v4_v0  ;;  %s25_s16 = sshll.u32 %s56_s1, 4  ;;  %v17_v5 = vmul.f32 %v32_v4, %v31_v3  ;;  %s26_s16 = int_to_ptr.vmem [resolvable:$true] %s25_s16 }
   0x4   :  { %s34_s17 = scalar_lea.vmem %s26_s16, 256  ;;  %p39_p1 = scmp.lt.s32.totalorder %s26_s16, %s26_s16 }
   0x5   :  { %10 = vst [vmem:[#allocation0] sm:$0xff] %v8_v2  ;;  %20 = vst [vmem:[#allocation0 + $0x8] sm:$0xff] %v17_v5  ;;  %p35_p0 = scmp.ne.s32.totalorder %s26_s16, %s34_s17  ;;  %p40_p2 = scmp.lt.s32.totalorder %s34_s17, %s34_s17 }
   0x7   :  { %p41_p3 = por %p40_p2, %p39_p1 }
   0x9   :  { %p42_p4 = pnand %p41_p3, %p35_p0 }
   0xb   :  { %45 = shalt.err (!%p42_p4)
}
   0xc   :  { %28 = dma.vmem_to_hbm [thread:$0]  %s26_s16, 256, %s89_s2, [#allocation1]  }
   0xd   :  { %54 = dma.done.wait [#allocation1], 256  }
   0xe   :  { %55 = vsyncadd [#allocation1], 4294967040 }
   0xf   :  { %30 = vsyncpa [#allocation1], 1 }

// kernel: graphconv_forward.7
= control target key start
LH: loop header
LB: loop body
LE: loop exit
PB: predicated region body
PF: predicated region fallthrough
CT: control target
= control target key end

     0   :  { %s3986_s15 = smov 0   ;;  %s3988_s16 = smov 0   ;;  %s5154_s0 = inlined_call_operand.vmem [shape: bf16[256,1024], index: 0, kind: input, shape index: {}]   ;;  %s5155_s1 = inlined_call_operand.vmem [shape: bf16[1024,32], index: 1, kind: input, shape index: {}]   ;;  %s5156_s2 = inlined_call_operand.vmem [shape: f32[256,32], index: 2, kind: input, shape index: {}]   ;;  %s5157_s3 = inlined_call_operand.vmem [shape: f32[8,32], index: 3, kind: input, shape index: {}]   ;;  %s5158_s4 = inlined_call_operand.vmem [shape: f32[256,32], index: 4, kind: output, shape index: {}]  }
   0x1   :  { %s3990_s17 = smov 0   ;;  %s3992_s18 = smov 0  }
   0x2   :  { %s3994_s19 = smov 0  }
   0x3 LB: > { %s23_s20 = sadd.s32 1, %s3954_s18  ;;  %p42_p1 = scmp.ne.s32.totalorder %s3946_s16, %s3942_s15  ;;  %s3958_s19 = sphi %s3994_s19, %s14_s19   ;;  %s3954_s18 = sphi %s3992_s18, %s5162_s18   ;;  %s3950_s17 = sphi %s3990_s17, %s5161_s17   ;;  %s3946_s16 = sphi %s3988_s16, %s5160_s16   ;;  %s3942_s15 = sphi %s3986_s15, %s5159_s15  }
   0x4   : > { %p24_p0 = scmp.ge.s32.totalorder %s23_s20, 2  ;;  %p43_p2 = scmp.eq.s32.totalorder %s3958_s19, 0 }
   0x5   : > { %s35_s22 = sadd.s32 1, %s3946_s16  ;;  %p2993_p5 = scmp.ge.s32.totalorder %s3958_s19, 2 }
   0x6   : > { %s5164_s20 = smov (%p24_p0, %s23_s20), 0  ;;  %p44_p3 = por %p43_p2, %p42_p1 }
   0x7   : > { %s31_s21 = ssub.s32 %s3954_s18, %s5164_s20  ;;  %179 = sbr.rel (%p2993_p5) target bundleno = 48 (0x30), region = 24 }
   0x8   : > { %p33_p4 = scmp.eq.s32.totalorder %s31_s21, 0 }
   0xa   : > { %s4021_s23 = scalar_select %p33_p4, %s3946_s16, %s35_s22  }
   0xc   : > { %182 = sbr.rel (!%p44_p3) target bundleno = 48 (0x30), region = 28  ;;  %s184_s24 = sand.u32 (%p44_p3), 1, %s3946_s16  }
   0xd   : > { %s3168_s25 = sshll.u32 (%p44_p3), %s3954_s18, 4  ;;  %s2994_s26 = sshll.u32 (%p44_p3), %s184_s24, 9 }
   0xe   : > { %s4029_s29 = scalar_lea.vmem (%p44_p3), %s5154_s0, %s3168_s25  ;;  %s4034_s30 = scalar_lea.vmem (%p44_p3), [#allocation3], %s2994_s26 }
   0xf   : > { %v205_v0 = vld [vmem:[%s4029_s29] sm:$0xff] (%p44_p3)  ;;  %v207_v1 = vld [vmem:[%s4029_s29 + $0x8] sm:$0xff] (%p44_p3) }
  0x10   : > { %v209_v2 = vld [vmem:[%s4029_s29 + $0x20] sm:$0xff] (%p44_p3)  ;;  %206 = vst [vmem:[%s4034_s30] sm:$0xff] (%p44_p3), %v205_v0  ;;  %208 = vst [vmem:[%s4034_s30 + $0x8] sm:$0xff] (%p44_p3), %v207_v1  ;;  %v211_v3 = vld [vmem:[%s4029_s29 + $0x28] sm:$0xff] (%p44_p3) }
  0x11   : > { %210 = vst [vmem:[%s4034_s30 + $0x10] sm:$0xff] %v209_v2  ;;  %v213_v4 = vld [vmem:[%s4029_s29 + $0x40] sm:$0xff]  ;;  %v215_v5 = vld [vmem:[%s4029_s29 + $0x48] sm:$0xff]  ;;  %212 = vst [vmem:[%s4034_s30 + $0x18] sm:$0xff] %v211_v3 }
  0x12   : > { %214 = vst [vmem:[%s4034_s30 + $0x20] sm:$0xff] %v213_v4  ;;  %216 = vst [vmem:[%s4034_s30 + $0x28] sm:$0xff] %v215_v5  ;;  %v217_v6 = vld [vmem:[%s4029_s29 + $0x60] sm:$0xff]  ;;  %v219_v7 = vld [vmem:[%s4029_s29 + $0x68] sm:$0xff] }
  0x13   : > { %v221_v8 = vld [vmem:[%s4029_s29 + $0x80] sm:$0xff]  ;;  %218 = vst [vmem:[%s4034_s30 + $0x30] sm:$0xff] %v217_v6  ;;  %220 = vst [vmem:[%s4034_s30 + $0x38] sm:$0xff] %v219_v7  ;;  %v223_v9 = vld [vmem:[%s4029_s29 + $0x88] sm:$0xff] }
  0x14   : > { %222 = vst [vmem:[%s4034_s30 + $0x40] sm:$0xff] %v221_v8  ;;  %v225_v10 = vld [vmem:[%s4029_s29 + $0xa0] sm:$0xff]  ;;  %v227_v11 = vld [vmem:[%s4029_s29 + $0xa8] sm:$0xff]  ;;  %224 = vst [vmem:[%s4034_s30 + $0x48] sm:$0xff] %v223_v9 }
  0x15   : > { %226 = vst [vmem:[%s4034_s30 + $0x50] sm:$0xff] %v225_v10  ;;  %228 = vst [vmem:[%s4034_s30 + $0x58] sm:$0xff] %v227_v11  ;;  %v229_v12 = vld [vmem:[%s4029_s29 + $0xc0] sm:$0xff]  ;;  %v231_v13 = vld [vmem:[%s4029_s29 + $0xc8] sm:$0xff] }
  0x16   : > { %v233_v14 = vld [vmem:[%s4029_s29 + $0xe0] sm:$0xff]  ;;  %230 = vst [vmem:[%s4034_s30 + $0x60] sm:$0xff] %v229_v12  ;;  %232 = vst [vmem:[%s4034_s30 + $0x68] sm:$0xff] %v231_v13  ;;  %v235_v15 = vld [vmem:[%s4029_s29 + $0xe8] sm:$0xff] }
  0x17   : > { %234 = vst [vmem:[%s4034_s30 + $0x70] sm:$0xff] %v233_v14  ;;  %v237_v16 = vld [vmem:[%s4029_s29 + $0x100] sm:$0xff]  ;;  %v239_v17 = vld [vmem:[%s4029_s29 + $0x108] sm:$0xff]  ;;  %236 = vst [vmem:[%s4034_s30 + $0x78] sm:$0xff] %v235_v15 }
  0x18   : > { %238 = vst [vmem:[%s4034_s30 + $0x80] sm:$0xff] %v237_v16  ;;  %240 = vst [vmem:[%s4034_s30 + $0x88] sm:$0xff] %v239_v17  ;;  %v241_v18 = vld [vmem:[%s4029_s29 + $0x120] sm:$0xff]  ;;  %v243_v19 = vld [vmem:[%s4029_s29 + $0x128] sm:$0xff] }
  0x19   : > { %v245_v20 = vld [vmem:[%s4029_s29 + $0x140] sm:$0xff]  ;;  %242 = vst [vmem:[%s4034_s30 + $0x90] sm:$0xff] %v241_v18  ;;  %244 = vst [vmem:[%s4034_s30 + $0x98] sm:$0xff] %v243_v19  ;;  %v247_v21 = vld [vmem:[%s4029_s29 + $0x148] sm:$0xff] }
  0x1a   : > { %246 = vst [vmem:[%s4034_s30 + $0xa0] sm:$0xff] %v245_v20  ;;  %v249_v22 = vld [vmem:[%s4029_s29 + $0x160] sm:$0xff]  ;;  %v251_v23 = vld [vmem:[%s4029_s29 + $0x168] sm:$0xff]  ;;  %248 = vst [vmem:[%s4034_s30 + $0xa8] sm:$0xff] %v247_v21 }
  0x1b   : > { %250 = vst [vmem:[%s4034_s30 + $0xb0] sm:$0xff] %v249_v22  ;;  %252 = vst [vmem:[%s4034_s30 + $0xb8] sm:$0xff] %v251_v23  ;;  %v253_v24 = vld [vmem:[%s4029_s29 + $0x180] sm:$0xff]  ;;  %v255_v25 = vld [vmem:[%s4029_s29 + $0x188] sm:$0xff] }
  0x1c   : > { %v257_v26 = vld [vmem:[%s4029_s29 + $0x1a0] sm:$0xff]  ;;  %254 = vst [vmem:[%s4034_s30 + $0xc0] sm:$0xff] %v253_v24  ;;  %256 = vst [vmem:[%s4034_s30 + $0xc8] sm:$0xff] %v255_v25  ;;  %v259_v27 = vld [vmem:[%s4029_s29 + $0x1a8] sm:$0xff] }
  0x1d   : > { %258 = vst [vmem:[%s4034_s30 + $0xd0] sm:$0xff] %v257_v26  ;;  %v261_v28 = vld [vmem:[%s4029_s29 + $0x1c0] sm:$0xff]  ;;  %v263_v29 = vld [vmem:[%s4029_s29 + $0x1c8] sm:$0xff]  ;;  %260 = vst [vmem:[%s4034_s30 + $0xd8] sm:$0xff] %v259_v27 }
  0x1e   : > { %262 = vst [vmem:[%s4034_s30 + $0xe0] sm:$0xff] %v261_v28  ;;  %264 = vst [vmem:[%s4034_s30 + $0xe8] sm:$0xff] %v263_v29  ;;  %v265_v30 = vld [vmem:[%s4029_s29 + $0x1e0] sm:$0xff]  ;;  %v267_v31 = vld [vmem:[%s4029_s29 + $0x1e8] sm:$0xff] }
  0x1f   : > { %v269_v32 = vld [vmem:[%s4029_s29 + $0x200] sm:$0xff]  ;;  %266 = vst [vmem:[%s4034_s30 + $0xf0] sm:$0xff] %v265_v30  ;;  %268 = vst [vmem:[%s4034_s30 + $0xf8] sm:$0xff] %v267_v31  ;;  %v271_v33 = vld [vmem:[%s4029_s29 + $0x208] sm:$0xff] }
  0x20   : > { %270 = vst [vmem:[%s4034_s30 + $0x100] sm:$0xff] %v269_v32  ;;  %v273_v34 = vld [vmem:[%s4029_s29 + $0x220] sm:$0xff]  ;;  %v275_v35 = vld [vmem:[%s4029_s29 + $0x228] sm:$0xff]  ;;  %272 = vst [vmem:[%s4034_s30 + $0x108] sm:$0xff] %v271_v33 }
  0x21   : > { %274 = vst [vmem:[%s4034_s30 + $0x110] sm:$0xff] %v273_v34  ;;  %276 = vst [vmem:[%s4034_s30 + $0x118] sm:$0xff] %v275_v35  ;;  %v277_v36 = vld [vmem:[%s4029_s29 + $0x240] sm:$0xff]  ;;  %v279_v37 = vld [vmem:[%s4029_s29 + $0x248] sm:$0xff] }
  0x22   : > { %v281_v38 = vld [vmem:[%s4029_s29 + $0x260] sm:$0xff]  ;;  %278 = vst [vmem:[%s4034_s30 + $0x120] sm:$0xff] %v277_v36  ;;  %280 = vst [vmem:[%s4034_s30 + $0x128] sm:$0xff] %v279_v37  ;;  %v283_v39 = vld [vmem:[%s4029_s29 + $0x268] sm:$0xff] }
  0x23   : > { %282 = vst [vmem:[%s4034_s30 + $0x130] sm:$0xff] %v281_v38  ;;  %v285_v40 = vld [vmem:[%s4029_s29 + $0x280] sm:$0xff]  ;;  %v287_v41 = vld [vmem:[%s4029_s29 + $0x288] sm:$0xff]  ;;  %284 = vst [vmem:[%s4034_s30 + $0x138] sm:$0xff] %v283_v39 }
  0x24   : > { %286 = vst [vmem:[%s4034_s30 + $0x140] sm:$0xff] %v285_v40  ;;  %288 = vst [vmem:[%s4034_s30 + $0x148] sm:$0xff] %v287_v41  ;;  %v289_v42 = vld [vmem:[%s4029_s29 + $0x2a0] sm:$0xff]  ;;  %v291_v43 = vld [vmem:[%s4029_s29 + $0x2a8] sm:$0xff] }
  0x25   : > { %v293_v44 = vld [vmem:[%s4029_s29 + $0x2c0] sm:$0xff]  ;;  %290 = vst [vmem:[%s4034_s30 + $0x150] sm:$0xff] %v289_v42  ;;  %292 = vst [vmem:[%s4034_s30 + $0x158] sm:$0xff] %v291_v43  ;;  %v295_v45 = vld [vmem:[%s4029_s29 + $0x2c8] sm:$0xff] }
  0x26   : > { %294 = vst [vmem:[%s4034_s30 + $0x160] sm:$0xff] %v293_v44  ;;  %v297_v46 = vld [vmem:[%s4029_s29 + $0x2e0] sm:$0xff]  ;;  %v299_v47 = vld [vmem:[%s4029_s29 + $0x2e8] sm:$0xff]  ;;  %296 = vst [vmem:[%s4034_s30 + $0x168] sm:$0xff] %v295_v45 }
  0x27   : > { %298 = vst [vmem:[%s4034_s30 + $0x170] sm:$0xff] %v297_v46  ;;  %300 = vst [vmem:[%s4034_s30 + $0x178] sm:$0xff] %v299_v47  ;;  %v301_v48 = vld [vmem:[%s4029_s29 + $0x300] sm:$0xff]  ;;  %v303_v49 = vld [vmem:[%s4029_s29 + $0x308] sm:$0xff] }
  0x28   : > { %v305_v50 = vld [vmem:[%s4029_s29 + $0x320] sm:$0xff]  ;;  %302 = vst [vmem:[%s4034_s30 + $0x180] sm:$0xff] %v301_v48  ;;  %304 = vst [vmem:[%s4034_s30 + $0x188] sm:$0xff] %v303_v49  ;;  %v307_v51 = vld [vmem:[%s4029_s29 + $0x328] sm:$0xff] }
  0x29   : > { %306 = vst [vmem:[%s4034_s30 + $0x190] sm:$0xff] %v305_v50  ;;  %v309_v52 = vld [vmem:[%s4029_s29 + $0x340] sm:$0xff]  ;;  %v311_v53 = vld [vmem:[%s4029_s29 + $0x348] sm:$0xff]  ;;  %308 = vst [vmem:[%s4034_s30 + $0x198] sm:$0xff] %v307_v51 }
  0x2a   : > { %310 = vst [vmem:[%s4034_s30 + $0x1a0] sm:$0xff] %v309_v52  ;;  %312 = vst [vmem:[%s4034_s30 + $0x1a8] sm:$0xff] %v311_v53  ;;  %v313_v54 = vld [vmem:[%s4029_s29 + $0x360] sm:$0xff]  ;;  %v315_v55 = vld [vmem:[%s4029_s29 + $0x368] sm:$0xff] }
  0x2b   : > { %v317_v56 = vld [vmem:[%s4029_s29 + $0x380] sm:$0xff]  ;;  %314 = vst [vmem:[%s4034_s30 + $0x1b0] sm:$0xff] %v313_v54  ;;  %316 = vst [vmem:[%s4034_s30 + $0x1b8] sm:$0xff] %v315_v55  ;;  %v319_v57 = vld [vmem:[%s4029_s29 + $0x388] sm:$0xff] }
  0x2c   : > { %318 = vst [vmem:[%s4034_s30 + $0x1c0] sm:$0xff] %v317_v56  ;;  %v321_v58 = vld [vmem:[%s4029_s29 + $0x3a0] sm:$0xff]  ;;  %v323_v59 = vld [vmem:[%s4029_s29 + $0x3a8] sm:$0xff]  ;;  %320 = vst [vmem:[%s4034_s30 + $0x1c8] sm:$0xff] %v319_v57 }
  0x2d   : > { %322 = vst [vmem:[%s4034_s30 + $0x1d0] sm:$0xff] %v321_v58  ;;  %324 = vst [vmem:[%s4034_s30 + $0x1d8] sm:$0xff] %v323_v59  ;;  %v325_v60 = vld [vmem:[%s4029_s29 + $0x3c0] sm:$0xff]  ;;  %v327_v61 = vld [vmem:[%s4029_s29 + $0x3c8] sm:$0xff] }
  0x2e   : > { %v329_v62 = vld [vmem:[%s4029_s29 + $0x3e0] sm:$0xff]  ;;  %326 = vst [vmem:[%s4034_s30 + $0x1e0] sm:$0xff] %v325_v60  ;;  %328 = vst [vmem:[%s4034_s30 + $0x1e8] sm:$0xff] %v327_v61  ;;  %v331_v63 = vld [vmem:[%s4029_s29 + $0x3e8] sm:$0xff] }
  0x2f   : > { %330 = vst [vmem:[%s4034_s30 + $0x1f0] sm:$0xff] %v329_v62  ;;  %332 = vst [vmem:[%s4034_s30 + $0x1f8] sm:$0xff] %v331_v63 }
  0x30 PF: > { %p2997_p6 = scmp.ge.s32.totalorder %s3958_s19, 1  ;;  %p346_p7 = scmp.lt.s32.totalorder %s3958_s19, 3 }
  0x32   : > { %p347_p8 = pnand %p2997_p6, %p346_p7 }
  0x33   : > { %s353_s5 = sand.u32 (!%p347_p8), 1, %s3942_s15   ;;  %s2999_s6 = sshll.u32 (!%p347_p8), %s3950_s17, 6 }
  0x34   : > { %350 = sbr.rel (%p347_p8) target bundleno = 1375 (0x55f), region = 55  ;;  %s2998_s7 = sshll.u32 (!%p347_p8), %s353_s5, 9 }
  0x35   : > { %p391_p9 = scmp.lt.s32.totalorder (!%p347_p8), %s2999_s6, 127  ;;  %s4170_s12 = scalar_lea.vmem (!%p347_p8), [#allocation3], %s2998_s7 }
  0x36   : > { %p3001_p10 = scmp.ne.s32.totalorder (!%p347_p8), %s3950_s17, 0 }
  0x39   : > { %s5166_s6 = smov (!%p391_p9, %s2999_s6), 127  ;;  %412 = sbr.rel (%p3001_p10) target bundleno = 79 (0x4f), region = 63 }
  0x3a   : > { %s3000_s8 = sshll.u32 %s5166_s6, 2 }
  0x3b   : > { %s4168_s11 = scalar_lea.vmem %s5155_s1, %s3000_s8 }
  0x3e   : > { %vm413_vm0 = vcmask 261120   ;;  %v3960_v0 = vmov 0.0  }
  0x3f   : > { %414 = vst.msk [vmem:[#allocation2] sm:$0xff] %vm413_vm0, %v3960_v0  ;;  %415 = vst.msk [vmem:[#allocation2 + $0x8] sm:$0xff] %vm413_vm0, %v3960_v0 }
  0x40   : > { %416 = vst.msk [vmem:[#allocation2 + $0x10] sm:$0xff] %vm413_vm0, %v3960_v0  ;;  %417 = vst.msk [vmem:[#allocation2 + $0x18] sm:$0xff] %vm413_vm0, %v3960_v0 }
  0x41   : > { %418 = vst.msk [vmem:[#allocation2 + $0x20] sm:$0xff] %vm413_vm0, %v3960_v0  ;;  %419 = vst.msk [vmem:[#allocation2 + $0x28] sm:$0xff] %vm413_vm0, %v3960_v0 }
  0x42   : > { %420 = vst.msk [vmem:[#allocation2 + $0x30] sm:$0xff] %vm413_vm0, %v3960_v0  ;;  %421 = vst.msk [vmem:[#allocation2 + $0x38] sm:$0xff] %vm413_vm0, %v3960_v0 }
  0x43   : > { %422 = vst.msk [vmem:[#allocation2 + $0x40] sm:$0xff] %vm413_vm0, %v3960_v0  ;;  %423 = vst.msk [vmem:[#allocation2 + $0x48] sm:$0xff] %vm413_vm0, %v3960_v0 }
  0x44   : > { %424 = vst.msk [vmem:[#allocation2 + $0x50] sm:$0xff] %vm413_vm0, %v3960_v0  ;;  %425 = vst.msk [vmem:[#allocation2 + $0x58] sm:$0xff] %vm413_vm0, %v3960_v0 }
  0x45   : > { %426 = vst.msk [vmem:[#allocation2 + $0x60] sm:$0xff] %vm413_vm0, %v3960_v0  ;;  %427 = vst.msk [vmem:[#allocation2 + $0x68] sm:$0xff] %vm413_vm0, %v3960_v0 }
  0x46   : > { %428 = vst.msk [vmem:[#allocation2 + $0x70] sm:$0xff] %vm413_vm0, %v3960_v0  ;;  %429 = vst.msk [vmem:[#allocation2 + $0x78] sm:$0xff] %vm413_vm0, %v3960_v0 }
  0x47   : > { %430 = vst.msk [vmem:[#allocation2 + $0x80] sm:$0xff] %vm413_vm0, %v3960_v0  ;;  %431 = vst.msk [vmem:[#allocation2 + $0x88] sm:$0xff] %vm413_vm0, %v3960_v0 }
  0x48   : > { %432 = vst.msk [vmem:[#allocation2 + $0x90] sm:$0xff] %vm413_vm0, %v3960_v0  ;;  %433 = vst.msk [vmem:[#allocation2 + $0x98] sm:$0xff] %vm413_vm0, %v3960_v0 }
  0x49   : > { %434 = vst.msk [vmem:[#allocation2 + $0xa0] sm:$0xff] %vm413_vm0, %v3960_v0  ;;  %435 = vst.msk [vmem:[#allocation2 + $0xa8] sm:$0xff] %vm413_vm0, %v3960_v0 }
  0x4a   : > { %436 = vst.msk [vmem:[#allocation2 + $0xb0] sm:$0xff] %vm413_vm0, %v3960_v0  ;;  %437 = vst.msk [vmem:[#allocation2 + $0xb8] sm:$0xff] %vm413_vm0, %v3960_v0 }
  0x4b   : > { %438 = vst.msk [vmem:[#allocation2 + $0xc0] sm:$0xff] %vm413_vm0, %v3960_v0  ;;  %439 = vst.msk [vmem:[#allocation2 + $0xc8] sm:$0xff] %vm413_vm0, %v3960_v0 }
  0x4c   : > { %440 = vst.msk [vmem:[#allocation2 + $0xd0] sm:$0xff] %vm413_vm0, %v3960_v0  ;;  %441 = vst.msk [vmem:[#allocation2 + $0xd8] sm:$0xff] %vm413_vm0, %v3960_v0 }
  0x4d   : > { %442 = vst.msk [vmem:[#allocation2 + $0xe0] sm:$0xff] %vm413_vm0, %v3960_v0  ;;  %443 = vst.msk [vmem:[#allocation2 + $0xe8] sm:$0xff] %vm413_vm0, %v3960_v0 }
  0x4e   : > { %444 = vst.msk [vmem:[#allocation2 + $0xf0] sm:$0xff] %vm413_vm0, %v3960_v0  ;;  %445 = vst.msk [vmem:[#allocation2 + $0xf8] sm:$0xff] %vm413_vm0, %v3960_v0 }
  0x4f PF: > { %v3600_v1 = vld [vmem:[%s4168_s11 + $0x78] sm:$0xff]   ;;  %v3604_v5 = vld [vmem:[%s4168_s11 + $0x70] sm:$0xff]   ;;  %v3608_v9 = vld [vmem:[%s4168_s11 + $0x68] sm:$0xff]   ;;  %vm1472_vm1 = vcmask 261120   ;;  %p3098_p11 = scmp.ne.s32.totalorder %s3950_s17, 1 }
  0x50   : > { %v3601_v2 = vld [vmem:[%s4168_s11 + $0xf8] sm:$0xff]   ;;  %3169 = vmatprep.subr.bf16.mxu0 %v3600_v1  ;;  %v3605_v6 = vld [vmem:[%s4168_s11 + $0xf0] sm:$0xff]   ;;  %v3609_v10 = vld [vmem:[%s4168_s11 + $0xe8] sm:$0xff]  }
  0x51   : > { %v3602_v3 = vld [vmem:[%s4168_s11 + $0x38] sm:$0xff]   ;;  %3281 = vmatprep.subr.bf16.mxu1 %v3601_v2  ;;  %v3606_v7 = vld [vmem:[%s4168_s11 + $0x30] sm:$0xff]   ;;  %v3610_v11 = vld [vmem:[%s4168_s11 + $0x28] sm:$0xff]  }
  0x52   : > { %v3603_v4 = vld [vmem:[%s4168_s11 + $0xb8] sm:$0xff]   ;;  %3170 = vmatpush3.bf16.msra.mxu0 %v3602_v3  ;;  %v3607_v8 = vld [vmem:[%s4168_s11 + $0xb0] sm:$0xff]   ;;  %v3611_v12 = vld [vmem:[%s4168_s11 + $0xa8] sm:$0xff]  }
  0x53   : > { %3282 = vmatpush3.bf16.msra.mxu1 %v3603_v4  ;;  %3171 = vmatprep.subr.bf16.mxu0 %v3604_v5  ;;  %v3612_v13 = vld [vmem:[%s4168_s11 + $0x60] sm:$0xff]   ;;  %v3616_v17 = vld [vmem:[%s4168_s11 + $0x58] sm:$0xff]   ;;  %v3620_v21 = vld [vmem:[%s4168_s11 + $0x50] sm:$0xff]  }
  0x54   : > { %3283 = vmatprep.subr.bf16.mxu1 %v3605_v6  ;;  %v3613_v14 = vld [vmem:[%s4168_s11 + $0xe0] sm:$0xff]   ;;  %v3617_v18 = vld [vmem:[%s4168_s11 + $0xd8] sm:$0xff]   ;;  %v3621_v22 = vld [vmem:[%s4168_s11 + $0xd0] sm:$0xff]  }
  0x55   : > { %v3614_v15 = vld [vmem:[%s4168_s11 + $0x20] sm:$0xff]   ;;  %v3618_v19 = vld [vmem:[%s4168_s11 + $0x18] sm:$0xff]   ;;  %v3622_v23 = vld [vmem:[%s4168_s11 + $0x10] sm:$0xff]  }
  0x56   : > { %3172 = vmatpush3.bf16.msra.mxu0 %v3606_v7  ;;  %v3615_v16 = vld [vmem:[%s4168_s11 + $0xa0] sm:$0xff]   ;;  %v3619_v20 = vld [vmem:[%s4168_s11 + $0x98] sm:$0xff]   ;;  %v3623_v24 = vld [vmem:[%s4168_s11 + $0x90] sm:$0xff]  }
  0x57   : > { %3284 = vmatpush3.bf16.msra.mxu1 %v3607_v8  ;;  %3173 = vmatprep.subr.bf16.mxu0 %v3608_v9  ;;  %v3624_v25 = vld [vmem:[%s4168_s11 + $0x48] sm:$0xff]   ;;  %v3628_v29 = vld [vmem:[%s4168_s11 + $0x40] sm:$0xff]  }
  0x58   : > { %3285 = vmatprep.subr.bf16.mxu1 %v3609_v10  ;;  %v3625_v26 = vld [vmem:[%s4168_s11 + $0xc8] sm:$0xff]   ;;  %v3629_v30 = vld [vmem:[%s4168_s11 + $0xc0] sm:$0xff]  }
  0x59   : > { %v3626_v27 = vld [vmem:[%s4168_s11 + $0x8] sm:$0xff]   ;;  %v3630_v31 = vld [vmem:[%s4168_s11] sm:$0xff]  }
  0x5a   : > { %3174 = vmatpush3.bf16.msra.mxu0 %v3610_v11  ;;  %v3627_v28 = vld [vmem:[%s4168_s11 + $0x88] sm:$0xff]   ;;  %v3631_v32 = vld [vmem:[%s4168_s11 + $0x80] sm:$0xff]  }
  0x5b   : > { %3286 = vmatpush3.bf16.msra.mxu1 %v3611_v12  ;;  %3175 = vmatprep.subr.bf16.mxu0 %v3612_v13  ;;  %v3632_v33 = vld [vmem:[%s4170_s12] ss:$16 sps:$4 sm:$0xff]   ;;  %v3634_v34 = vld [vmem:[%s4170_s12 + $0x4] ss:$16 sps:$4 sm:$0xff]   ;;  %v3635_v35 = vld [vmem:[%s4170_s12 + $0x8] ss:$16 sps:$4 sm:$0xff]  }
  0x5c   : > { %3287 = vmatprep.subr.bf16.mxu1 %v3613_v14  ;;  %v3637_v36 = vld [vmem:[%s4170_s12 + $0xc] ss:$16 sps:$4 sm:$0xff]   ;;  %1150 = vmatprep.mubr.bf16.mxu0 %v3634_v34  ;;  %v3638_v37 = vld [vmem:[%s4170_s12 + $0x24] ss:$16 sps:$4 sm:$0xff]   ;;  %v3642_v39 = vld [vmem:[%s4170_s12 + $0x20] ss:$16 sps:$4 sm:$0xff]  }
  0x5d   : > { %1311 = vmatprep.mubr.bf16.mxu1 %v3637_v36  ;;  %v3640_v38 = vld [vmem:[%s4170_s12 + $0x2c] ss:$16 sps:$4 sm:$0xff]   ;;  %v3643_v40 = vld [vmem:[%s4170_s12 + $0x28] ss:$16 sps:$4 sm:$0xff]   ;;  %v3644_v41 = vld [vmem:[%s4170_s12 + $0x44] ss:$16 sps:$4 sm:$0xff]  }
  0x5e   : > { %3176 = vmatpush3.bf16.msra.mxu0 %v3614_v15  ;;  %v3646_v42 = vld [vmem:[%s4170_s12 + $0x4c] ss:$16 sps:$4 sm:$0xff]   ;;  %v3648_v43 = vld [vmem:[%s4170_s12 + $0x40] ss:$16 sps:$4 sm:$0xff]   ;;  %v3649_v44 = vld [vmem:[%s4170_s12 + $0x48] ss:$16 sps:$4 sm:$0xff]  }
  0x5f   : > { %3288 = vmatpush3.bf16.msra.mxu1 %v3615_v16  ;;  %3177 = vmatprep.subr.bf16.mxu0 %v3616_v17  ;;  %v3650_v45 = vld [vmem:[%s4170_s12 + $0x64] ss:$16 sps:$4 sm:$0xff]   ;;  %v3652_v46 = vld [vmem:[%s4170_s12 + $0x6c] ss:$16 sps:$4 sm:$0xff]   ;;  %v3654_v47 = vld [vmem:[%s4170_s12 + $0x60] ss:$16 sps:$4 sm:$0xff]  }
  0x60   : > { %3289 = vmatprep.subr.bf16.mxu1 %v3617_v18  ;;  %v3655_v48 = vld [vmem:[%s4170_s12 + $0x68] ss:$16 sps:$4 sm:$0xff]   ;;  %v3656_v49 = vld [vmem:[%s4170_s12 + $0x84] ss:$16 sps:$4 sm:$0xff]   ;;  %v3658_v50 = vld [vmem:[%s4170_s12 + $0x8c] ss:$16 sps:$4 sm:$0xff]  }
  0x61   : > { %v3660_v51 = vld [vmem:[%s4170_s12 + $0x80] ss:$16 sps:$4 sm:$0xff]   ;;  %v3661_v52 = vld [vmem:[%s4170_s12 + $0x88] ss:$16 sps:$4 sm:$0xff]   ;;  %v3662_v53 = vld [vmem:[%s4170_s12 + $0xa4] ss:$16 sps:$4 sm:$0xff]  }
  0x62   : > { %3178 = vmatpush3.bf16.msra.mxu0 %v3618_v19  ;;  %v3664_v54 = vld [vmem:[%s4170_s12 + $0xac] ss:$16 sps:$4 sm:$0xff]   ;;  %v3666_v55 = vld [vmem:[%s4170_s12 + $0xa0] ss:$16 sps:$4 sm:$0xff]   ;;  %v3667_v56 = vld [vmem:[%s4170_s12 + $0xa8] ss:$16 sps:$4 sm:$0xff]  }
  0x63   : > { %3290 = vmatpush3.bf16.msra.mxu1 %v3619_v20  ;;  %3179 = vmatprep.subr.bf16.mxu0 %v3620_v21  ;;  %v3668_v57 = vld [vmem:[%s4170_s12 + $0xc4] ss:$16 sps:$4 sm:$0xff]   ;;  %v3670_v58 = vld [vmem:[%s4170_s12 + $0xcc] ss:$16 sps:$4 sm:$0xff]   ;;  %v3672_v59 = vld [vmem:[%s4170_s12 + $0xc0] ss:$16 sps:$4 sm:$0xff]  }
  0x64   : > { %3291 = vmatprep.subr.bf16.mxu1 %v3621_v22  ;;  %v3673_v60 = vld [vmem:[%s4170_s12 + $0xc8] ss:$16 sps:$4 sm:$0xff]   ;;  %v3674_v61 = vld [vmem:[%s4170_s12 + $0xe4] ss:$16 sps:$4 sm:$0xff]   ;;  %v3676_v62 = vld [vmem:[%s4170_s12 + $0xec] ss:$16 sps:$4 sm:$0xff]  }
  0x65   : > { %v3678_v63 = vld [vmem:[%s4170_s12 + $0xe0] ss:$16 sps:$4 sm:$0xff]   ;;  %v3679_v0 = vld [vmem:[%s4170_s12 + $0xe8] ss:$16 sps:$4 sm:$0xff]   ;;  %v3680_v1 = vld [vmem:[%s4170_s12 + $0x104] ss:$16 sps:$4 sm:$0xff]  }
  0x66   : > { %3180 = vmatpush3.bf16.msra.mxu0 %v3622_v23  ;;  %v3682_v2 = vld [vmem:[%s4170_s12 + $0x10c] ss:$16 sps:$4 sm:$0xff]   ;;  %v3684_v3 = vld [vmem:[%s4170_s12 + $0x100] ss:$16 sps:$4 sm:$0xff]   ;;  %v3685_v4 = vld [vmem:[%s4170_s12 + $0x108] ss:$16 sps:$4 sm:$0xff]  }
  0x67   : > { %3292 = vmatpush3.bf16.msra.mxu1 %v3623_v24  ;;  %3181 = vmatprep.subr.bf16.mxu0 %v3624_v25  ;;  %v3686_v5 = vld [vmem:[%s4170_s12 + $0x124] ss:$16 sps:$4 sm:$0xff]   ;;  %v3688_v6 = vld [vmem:[%s4170_s12 + $0x12c] ss:$16 sps:$4 sm:$0xff]   ;;  %v3690_v7 = vld [vmem:[%s4170_s12 + $0x120] ss:$16 sps:$4 sm:$0xff]  }
  0x68   : > { %3293 = vmatprep.subr.bf16.mxu1 %v3625_v26  ;;  %v3691_v8 = vld [vmem:[%s4170_s12 + $0x128] ss:$16 sps:$4 sm:$0xff]   ;;  %v3692_v9 = vld [vmem:[%s4170_s12 + $0x144] ss:$16 sps:$4 sm:$0xff]   ;;  %v3694_v10 = vld [vmem:[%s4170_s12 + $0x14c] ss:$16 sps:$4 sm:$0xff]  }
  0x69   : > { %v3696_v11 = vld [vmem:[%s4170_s12 + $0x140] ss:$16 sps:$4 sm:$0xff]   ;;  %v3697_v12 = vld [vmem:[%s4170_s12 + $0x148] ss:$16 sps:$4 sm:$0xff]   ;;  %v3698_v13 = vld [vmem:[%s4170_s12 + $0x164] ss:$16 sps:$4 sm:$0xff]  }
  0x6a   : > { %3182 = vmatpush3.bf16.msra.mxu0 %v3626_v27  ;;  %v3700_v14 = vld [vmem:[%s4170_s12 + $0x16c] ss:$16 sps:$4 sm:$0xff]   ;;  %v3702_v15 = vld [vmem:[%s4170_s12 + $0x160] ss:$16 sps:$4 sm:$0xff]   ;;  %v3703_v16 = vld [vmem:[%s4170_s12 + $0x168] ss:$16 sps:$4 sm:$0xff]  }
  0x6b   : > { %3294 = vmatpush3.bf16.msra.mxu1 %v3627_v28  ;;  %3183 = vmatprep.subr.bf16.mxu0 %v3628_v29  ;;  %v3704_v17 = vld [vmem:[%s4170_s12 + $0x184] ss:$16 sps:$4 sm:$0xff]   ;;  %v3706_v18 = vld [vmem:[%s4170_s12 + $0x18c] ss:$16 sps:$4 sm:$0xff]   ;;  %v3708_v19 = vld [vmem:[%s4170_s12 + $0x180] ss:$16 sps:$4 sm:$0xff]  }
  0x6c   : > { %3295 = vmatprep.subr.bf16.mxu1 %v3629_v30  ;;  %v3709_v20 = vld [vmem:[%s4170_s12 + $0x188] ss:$16 sps:$4 sm:$0xff]   ;;  %v3710_v21 = vld [vmem:[%s4170_s12 + $0x1a4] ss:$16 sps:$4 sm:$0xff]   ;;  %v3712_v22 = vld [vmem:[%s4170_s12 + $0x1ac] ss:$16 sps:$4 sm:$0xff]  }
  0x6d   : > { %v3714_v23 = vld [vmem:[%s4170_s12 + $0x1a0] ss:$16 sps:$4 sm:$0xff]   ;;  %v3715_v24 = vld [vmem:[%s4170_s12 + $0x1a8] ss:$16 sps:$4 sm:$0xff]   ;;  %v3716_v25 = vld [vmem:[%s4170_s12 + $0x1c4] ss:$16 sps:$4 sm:$0xff]  }
  0x6e   : > { %3184 = vmatpush3.bf16.msra.mxu0 %v3630_v31  ;;  %v3718_v26 = vld [vmem:[%s4170_s12 + $0x1cc] ss:$16 sps:$4 sm:$0xff]   ;;  %v3720_v27 = vld [vmem:[%s4170_s12 + $0x1c0] ss:$16 sps:$4 sm:$0xff]   ;;  %v3721_v28 = vld [vmem:[%s4170_s12 + $0x1c8] ss:$16 sps:$4 sm:$0xff]  }
  0x6f   : > { %3296 = vmatpush3.bf16.msra.mxu1 %v3631_v32  ;;  %v3722_v29 = vld [vmem:[%s4170_s12 + $0x1e4] ss:$16 sps:$4 sm:$0xff]   ;;  %v3724_v30 = vld [vmem:[%s4170_s12 + $0x1ec] ss:$16 sps:$4 sm:$0xff]   ;;  %v3726_v31 = vld [vmem:[%s4170_s12 + $0x1e0] ss:$16 sps:$4 sm:$0xff]  }
  0x70   : > { %v3727_v32 = vld [vmem:[%s4170_s12 + $0x1e8] ss:$16 sps:$4 sm:$0xff]  }
  0x71   : > { %1151 = vmatmul.mubr.bf16.vlgmr.msra.gmra.mxu0 %v3632_v33 }
  0x72   : > { %1312 = vmatmul.mubr.bf16.vlgmr.msra.gmra.mxu1 %v3635_v35  ;;  %1158 = vmatprep.mubr.bf16.mxu0 %v3638_v37 }
  0x73   : > { %1319 = vmatprep.mubr.bf16.mxu1 %v3640_v38 }
  0x79   : > { %1159 = vmatmul.mubr.bf16.gmra.mxu0 %v3642_v39 }
  0x7a   : > { %1320 = vmatmul.mubr.bf16.gmra.mxu1 %v3643_v40  ;;  %1166 = vmatprep.mubr.bf16.mxu0 %v3644_v41  ;;  %v446_v40 = vld [vmem:[#allocation2] sm:$0xff] }
  0x7b   : > { %1327 = vmatprep.mubr.bf16.mxu1 %v3646_v42 }
  0x81   : > { %1167 = vmatmul.mubr.bf16.gmra.mxu0 %v3648_v43 }
  0x82   : > { %1328 = vmatmul.mubr.bf16.gmra.mxu1 %v3649_v44  ;;  %1174 = vmatprep.mubr.bf16.mxu0 %v3650_v45 }
  0x83   : > { %1335 = vmatprep.mubr.bf16.mxu1 %v3652_v46 }
  0x89   : > { %1175 = vmatmul.mubr.bf16.gmra.mxu0 %v3654_v47 }
  0x8a   : > { %1336 = vmatmul.mubr.bf16.gmra.mxu1 %v3655_v48  ;;  %1182 = vmatprep.mubr.bf16.mxu0 %v3656_v49  ;;  %v447_v49 = vld [vmem:[#allocation2 + $0x8] sm:$0xff] }
  0x8b   : > { %1343 = vmatprep.mubr.bf16.mxu1 %v3658_v50 }
  0x91   : > { %1183 = vmatmul.mubr.bf16.gmra.mxu0 %v3660_v51 }
  0x92   : > { %1344 = vmatmul.mubr.bf16.gmra.mxu1 %v3661_v52  ;;  %1190 = vmatprep.mubr.bf16.mxu0 %v3662_v53 }
  0x93   : > { %1351 = vmatprep.mubr.bf16.mxu1 %v3664_v54 }
  0x99   : > { %1191 = vmatmul.mubr.bf16.gmra.mxu0 %v3666_v55 }
  0x9a   : > { %1352 = vmatmul.mubr.bf16.gmra.mxu1 %v3667_v56  ;;  %1198 = vmatprep.mubr.bf16.mxu0 %v3668_v57 }
  0x9b   : > { %1359 = vmatprep.mubr.bf16.mxu1 %v3670_v58  ;;  %v448_v58 = vld [vmem:[#allocation2 + $0x10] sm:$0xff] }
  0xa1   : > { %1199 = vmatmul.mubr.bf16.gmra.mxu0 %v3672_v59 }
  0xa2   : > { %1360 = vmatmul.mubr.bf16.gmra.mxu1 %v3673_v60  ;;  %1206 = vmatprep.mubr.bf16.mxu0 %v3674_v61 }
  0xa3   : > { %1367 = vmatprep.mubr.bf16.mxu1 %v3676_v62 }
  0xa9   : > { %1207 = vmatmul.mubr.bf16.gmra.mxu0 %v3678_v63 }
  0xaa   : > { %1368 = vmatmul.mubr.bf16.gmra.mxu1 %v3679_v0  ;;  %1214 = vmatprep.mubr.bf16.mxu0 %v3680_v1 }
  0xab   : > { %1375 = vmatprep.mubr.bf16.mxu1 %v3682_v2 }
  0xb1   : > { %1215 = vmatmul.mubr.bf16.gmra.mxu0 %v3684_v3  ;;  %v449_v3 = vld [vmem:[#allocation2 + $0x18] sm:$0xff] }
  0xb2   : > { %1376 = vmatmul.mubr.bf16.gmra.mxu1 %v3685_v4  ;;  %1222 = vmatprep.mubr.bf16.mxu0 %v3686_v5 }
  0xb3   : > { %1383 = vmatprep.mubr.bf16.mxu1 %v3688_v6 }
  0xb9   : > { %1223 = vmatmul.mubr.bf16.gmra.mxu0 %v3690_v7 }
  0xba   : > { %1384 = vmatmul.mubr.bf16.gmra.mxu1 %v3691_v8  ;;  %1230 = vmatprep.mubr.bf16.mxu0 %v3692_v9 }
  0xbb   : > { %1391 = vmatprep.mubr.bf16.mxu1 %v3694_v10 }
  0xc1   : > { %1231 = vmatmul.mubr.bf16.gmra.mxu0 %v3696_v11 }
  0xc2   : > { %1392 = vmatmul.mubr.bf16.gmra.mxu1 %v3697_v12  ;;  %1238 = vmatprep.mubr.bf16.mxu0 %v3698_v13  ;;  %v450_v12 = vld [vmem:[#allocation2 + $0x20] sm:$0xff] }
  0xc3   : > { %1399 = vmatprep.mubr.bf16.mxu1 %v3700_v14 }
  0xc9   : > { %1239 = vmatmul.mubr.bf16.gmra.mxu0 %v3702_v15 }
  0xca   : > { %1400 = vmatmul.mubr.bf16.gmra.mxu1 %v3703_v16  ;;  %1246 = vmatprep.mubr.bf16.mxu0 %v3704_v17 }
  0xcb   : > { %1407 = vmatprep.mubr.bf16.mxu1 %v3706_v18 }
  0xd1   : > { %1247 = vmatmul.mubr.bf16.gmra.mxu0 %v3708_v19 }
  0xd2   : > { %1408 = vmatmul.mubr.bf16.gmra.mxu1 %v3709_v20  ;;  %1254 = vmatprep.mubr.bf16.mxu0 %v3710_v21  ;;  %v451_v21 = vld [vmem:[#allocation2 + $0x28] sm:$0xff] }
  0xd3   : > { %1415 = vmatprep.mubr.bf16.mxu1 %v3712_v22 }
  0xd9   : > { %1255 = vmatmul.mubr.bf16.gmra.mxu0 %v3714_v23 }
  0xda   : > { %1416 = vmatmul.mubr.bf16.gmra.mxu1 %v3715_v24  ;;  %1262 = vmatprep.mubr.bf16.mxu0 %v3716_v25 }
  0xdb   : > { %1423 = vmatprep.mubr.bf16.mxu1 %v3718_v26 }
  0xe1   : > { %1263 = vmatmul.mubr.bf16.gmra.mxu0 %v3720_v27 }
  0xe2   : > { %1424 = vmatmul.mubr.bf16.gmra.mxu1 %v3721_v28  ;;  %1270 = vmatprep.mubr.bf16.mxu0 %v3722_v29 }
  0xe3   : > { %1431 = vmatprep.mubr.bf16.mxu1 %v3724_v30  ;;  %v452_v30 = vld [vmem:[#allocation2 + $0x30] sm:$0xff] }
  0xe9   : > { %1271 = vmatmul.mubr.bf16.gmra.mxu0 %v3726_v31 }
  0xea   : > { %1432 = vmatmul.mubr.bf16.gmra.mxu1 %v3727_v32 }
 0x131   : > { %v3185_v33 = vpop.f32.mrf.mxu0 }
 0x132   : > { %v3297_v34 = vpop.f32.mrf.mxu1 }
 0x133   : > { %v3186_v35 = vpop.f32.mrf.mxu0 }
 0x134   : > { %v3187_v36 = vadd.f32 %v3186_v35, %v3185_v33  ;;  %v3298_v37 = vpop.f32.mrf.mxu1 }
 0x135   : > { %v3299_v38 = vadd.f32 %v3298_v37, %v3297_v34  ;;  %v3188_v39 = vpop.f32.mrf.mxu0 }
 0x136   : > { %v3300_v41 = vpop.f32.mrf.mxu1 }
 0x137   : > { %v1314_v42 = vadd.f32 %v3299_v38, %v3187_v36  ;;  %v3189_v43 = vpop.f32.mrf.mxu0 }
 0x138   : > { %v3190_v44 = vadd.f32 %v3189_v43, %v3188_v39  ;;  %v3301_v45 = vpop.f32.mrf.mxu1  ;;  %v453_v39 = vld [vmem:[#allocation2 + $0x38] sm:$0xff] }
 0x139   : > { %v1440_v46 = vadd.f32 %v1314_v42, %v446_v40  ;;  %v3302_v47 = vadd.f32 %v3301_v45, %v3300_v41  ;;  %v3191_v48 = vpop.f32.mrf.mxu0 }
 0x13a   : > { %v3303_v50 = vpop.f32.mrf.mxu1 }
 0x13b   : > { %1473 = vst.msk [vmem:[#allocation2] sm:$0xff] %vm1472_vm1, %v1440_v46  ;;  %v1317_v51 = vadd.f32 %v3302_v47, %v3190_v44  ;;  %v3192_v52 = vpop.f32.mrf.mxu0 }
 0x13c   : > { %v3193_v53 = vadd.f32 %v3192_v52, %v3191_v48  ;;  %v3304_v54 = vpop.f32.mrf.mxu1  ;;  %v454_v48 = vld [vmem:[#allocation2 + $0x40] sm:$0xff] }
 0x13d   : > { %v1441_v55 = vadd.f32 %v1317_v51, %v447_v49  ;;  %v3305_v56 = vadd.f32 %v3304_v54, %v3303_v50  ;;  %v3194_v57 = vpop.f32.mrf.mxu0 }
 0x13e   : > { %v3306_v59 = vpop.f32.mrf.mxu1 }
 0x13f   : > { %1474 = vst.msk [vmem:[#allocation2 + $0x8] sm:$0xff] %vm1472_vm1, %v1441_v55  ;;  %v1322_v60 = vadd.f32 %v3305_v56, %v3193_v53  ;;  %v3195_v61 = vpop.f32.mrf.mxu0 }
 0x140   : > { %v3196_v62 = vadd.f32 %v3195_v61, %v3194_v57  ;;  %v3307_v63 = vpop.f32.mrf.mxu1  ;;  %v455_v57 = vld [vmem:[#allocation2 + $0x48] sm:$0xff] }
 0x141   : > { %v1442_v0 = vadd.f32 %v1322_v60, %v448_v58  ;;  %v3308_v1 = vadd.f32 %v3307_v63, %v3306_v59  ;;  %v3197_v2 = vpop.f32.mrf.mxu0 }
 0x142   : > { %v3309_v4 = vpop.f32.mrf.mxu1 }
 0x143   : > { %1475 = vst.msk [vmem:[#allocation2 + $0x10] sm:$0xff] %vm1472_vm1, %v1442_v0  ;;  %v1325_v5 = vadd.f32 %v3308_v1, %v3196_v62  ;;  %v3198_v6 = vpop.f32.mrf.mxu0 }
 0x144   : > { %v3199_v7 = vadd.f32 %v3198_v6, %v3197_v2  ;;  %v3310_v8 = vpop.f32.mrf.mxu1  ;;  %v456_v2 = vld [vmem:[#allocation2 + $0x50] sm:$0xff] }
 0x145   : > { %v1443_v9 = vadd.f32 %v1325_v5, %v449_v3  ;;  %v3311_v10 = vadd.f32 %v3310_v8, %v3309_v4  ;;  %v3200_v11 = vpop.f32.mrf.mxu0 }
 0x146   : > { %v3312_v13 = vpop.f32.mrf.mxu1 }
 0x147   : > { %1476 = vst.msk [vmem:[#allocation2 + $0x18] sm:$0xff] %vm1472_vm1, %v1443_v9  ;;  %v1330_v14 = vadd.f32 %v3311_v10, %v3199_v7  ;;  %v3201_v15 = vpop.f32.mrf.mxu0 }
 0x148   : > { %v3202_v16 = vadd.f32 %v3201_v15, %v3200_v11  ;;  %v3313_v17 = vpop.f32.mrf.mxu1  ;;  %v457_v11 = vld [vmem:[#allocation2 + $0x58] sm:$0xff] }
 0x149   : > { %v1444_v18 = vadd.f32 %v1330_v14, %v450_v12  ;;  %v3314_v19 = vadd.f32 %v3313_v17, %v3312_v13  ;;  %v3203_v20 = vpop.f32.mrf.mxu0 }
 0x14a   : > { %v3315_v22 = vpop.f32.mrf.mxu1 }
 0x14b   : > { %1477 = vst.msk [vmem:[#allocation2 + $0x20] sm:$0xff] %vm1472_vm1, %v1444_v18  ;;  %v1333_v23 = vadd.f32 %v3314_v19, %v3202_v16  ;;  %v3204_v24 = vpop.f32.mrf.mxu0 }
 0x14c   : > { %v3205_v25 = vadd.f32 %v3204_v24, %v3203_v20  ;;  %v3316_v26 = vpop.f32.mrf.mxu1  ;;  %v458_v20 = vld [vmem:[#allocation2 + $0x60] sm:$0xff] }
 0x14d   : > { %v1445_v27 = vadd.f32 %v1333_v23, %v451_v21  ;;  %v3317_v28 = vadd.f32 %v3316_v26, %v3315_v22  ;;  %v3206_v29 = vpop.f32.mrf.mxu0 }
 0x14e   : > { %v3318_v31 = vpop.f32.mrf.mxu1 }
 0x14f   : > { %1478 = vst.msk [vmem:[#allocation2 + $0x28] sm:$0xff] %vm1472_vm1, %v1445_v27  ;;  %v1338_v32 = vadd.f32 %v3317_v28, %v3205_v25  ;;  %v3207_v33 = vpop.f32.mrf.mxu0 }
 0x150   : > { %v3208_v34 = vadd.f32 %v3207_v33, %v3206_v29  ;;  %v3319_v35 = vpop.f32.mrf.mxu1  ;;  %v459_v29 = vld [vmem:[#allocation2 + $0x68] sm:$0xff] }
 0x151   : > { %v1446_v36 = vadd.f32 %v1338_v32, %v452_v30  ;;  %v3320_v37 = vadd.f32 %v3319_v35, %v3318_v31  ;;  %v3209_v38 = vpop.f32.mrf.mxu0 }
 0x152   : > { %v3321_v40 = vpop.f32.mrf.mxu1 }
 0x153   : > { %1479 = vst.msk [vmem:[#allocation2 + $0x30] sm:$0xff] %vm1472_vm1, %v1446_v36  ;;  %v1341_v41 = vadd.f32 %v3320_v37, %v3208_v34  ;;  %v3210_v42 = vpop.f32.mrf.mxu0 }
 0x154   : > { %v3211_v43 = vadd.f32 %v3210_v42, %v3209_v38  ;;  %v3322_v44 = vpop.f32.mrf.mxu1  ;;  %v460_v38 = vld [vmem:[#allocation2 + $0x70] sm:$0xff] }
 0x155   : > { %v1447_v45 = vadd.f32 %v1341_v41, %v453_v39  ;;  %v3323_v46 = vadd.f32 %v3322_v44, %v3321_v40  ;;  %v3212_v47 = vpop.f32.mrf.mxu0 }
 0x156   : > { %v3324_v49 = vpop.f32.mrf.mxu1 }
 0x157   : > { %1480 = vst.msk [vmem:[#allocation2 + $0x38] sm:$0xff] %vm1472_vm1, %v1447_v45  ;;  %v1346_v50 = vadd.f32 %v3323_v46, %v3211_v43  ;;  %v3213_v51 = vpop.f32.mrf.mxu0 }
 0x158   : > { %v3214_v52 = vadd.f32 %v3213_v51, %v3212_v47  ;;  %v3325_v53 = vpop.f32.mrf.mxu1  ;;  %v461_v47 = vld [vmem:[#allocation2 + $0x78] sm:$0xff] }
 0x159   : > { %v1448_v54 = vadd.f32 %v1346_v50, %v454_v48  ;;  %v3326_v55 = vadd.f32 %v3325_v53, %v3324_v49  ;;  %v3215_v56 = vpop.f32.mrf.mxu0 }
 0x15a   : > { %v3327_v58 = vpop.f32.mrf.mxu1 }
 0x15b   : > { %1481 = vst.msk [vmem:[#allocation2 + $0x40] sm:$0xff] %vm1472_vm1, %v1448_v54  ;;  %v1349_v59 = vadd.f32 %v3326_v55, %v3214_v52  ;;  %v3216_v60 = vpop.f32.mrf.mxu0 }
 0x15c   : > { %v3217_v61 = vadd.f32 %v3216_v60, %v3215_v56  ;;  %v3328_v62 = vpop.f32.mrf.mxu1  ;;  %v462_v56 = vld [vmem:[#allocation2 + $0x80] sm:$0xff] }
 0x15d   : > { %v1449_v63 = vadd.f32 %v1349_v59, %v455_v57  ;;  %v3329_v0 = vadd.f32 %v3328_v62, %v3327_v58  ;;  %v3218_v1 = vpop.f32.mrf.mxu0 }
 0x15e   : > { %v3330_v3 = vpop.f32.mrf.mxu1 }
 0x15f   : > { %1482 = vst.msk [vmem:[#allocation2 + $0x48] sm:$0xff] %vm1472_vm1, %v1449_v63  ;;  %v1354_v4 = vadd.f32 %v3329_v0, %v3217_v61  ;;  %v3219_v5 = vpop.f32.mrf.mxu0 }
 0x160   : > { %v3220_v6 = vadd.f32 %v3219_v5, %v3218_v1  ;;  %v3331_v7 = vpop.f32.mrf.mxu1  ;;  %v463_v1 = vld [vmem:[#allocation2 + $0x88] sm:$0xff] }
 0x161   : > { %v1450_v8 = vadd.f32 %v1354_v4, %v456_v2  ;;  %v3332_v9 = vadd.f32 %v3331_v7, %v3330_v3  ;;  %v3221_v10 = vpop.f32.mrf.mxu0 }
 0x162   : > { %v3333_v12 = vpop.f32.mrf.mxu1 }
 0x163   : > { %1483 = vst.msk [vmem:[#allocation2 + $0x50] sm:$0xff] %vm1472_vm1, %v1450_v8  ;;  %v1357_v13 = vadd.f32 %v3332_v9, %v3220_v6  ;;  %v3222_v14 = vpop.f32.mrf.mxu0 }
 0x164   : > { %v3223_v15 = vadd.f32 %v3222_v14, %v3221_v10  ;;  %v3334_v16 = vpop.f32.mrf.mxu1  ;;  %v464_v10 = vld [vmem:[#allocation2 + $0x90] sm:$0xff] }
 0x165   : > { %v1451_v17 = vadd.f32 %v1357_v13, %v457_v11  ;;  %v3335_v18 = vadd.f32 %v3334_v16, %v3333_v12  ;;  %v3224_v19 = vpop.f32.mrf.mxu0 }
 0x166   : > { %v3336_v21 = vpop.f32.mrf.mxu1 }
 0x167   : > { %1484 = vst.msk [vmem:[#allocation2 + $0x58] sm:$0xff] %vm1472_vm1, %v1451_v17  ;;  %v1362_v22 = vadd.f32 %v3335_v18, %v3223_v15  ;;  %v3225_v23 = vpop.f32.mrf.mxu0 }
 0x168   : > { %v3226_v24 = vadd.f32 %v3225_v23, %v3224_v19  ;;  %v3337_v25 = vpop.f32.mrf.mxu1  ;;  %v465_v19 = vld [vmem:[#allocation2 + $0x98] sm:$0xff] }
 0x169   : > { %v1452_v26 = vadd.f32 %v1362_v22, %v458_v20  ;;  %v3338_v27 = vadd.f32 %v3337_v25, %v3336_v21  ;;  %v3227_v28 = vpop.f32.mrf.mxu0 }
 0x16a   : > { %v3339_v30 = vpop.f32.mrf.mxu1 }
 0x16b   : > { %1485 = vst.msk [vmem:[#allocation2 + $0x60] sm:$0xff] %vm1472_vm1, %v1452_v26  ;;  %v1365_v31 = vadd.f32 %v3338_v27, %v3226_v24  ;;  %v3228_v32 = vpop.f32.mrf.mxu0 }
 0x16c   : > { %v3229_v33 = vadd.f32 %v3228_v32, %v3227_v28  ;;  %v3340_v34 = vpop.f32.mrf.mxu1  ;;  %v466_v28 = vld [vmem:[#allocation2 + $0xa0] sm:$0xff] }
 0x16d   : > { %v1453_v35 = vadd.f32 %v1365_v31, %v459_v29  ;;  %v3341_v36 = vadd.f32 %v3340_v34, %v3339_v30  ;;  %v3230_v37 = vpop.f32.mrf.mxu0 }
 0x16e   : > { %v3342_v39 = vpop.f32.mrf.mxu1 }
 0x16f   : > { %1486 = vst.msk [vmem:[#allocation2 + $0x68] sm:$0xff] %vm1472_vm1, %v1453_v35  ;;  %v1370_v40 = vadd.f32 %v3341_v36, %v3229_v33  ;;  %v3231_v41 = vpop.f32.mrf.mxu0 }
 0x170   : > { %v3232_v42 = vadd.f32 %v3231_v41, %v3230_v37  ;;  %v3343_v43 = vpop.f32.mrf.mxu1  ;;  %v467_v37 = vld [vmem:[#allocation2 + $0xa8] sm:$0xff] }
 0x171   : > { %v1454_v44 = vadd.f32 %v1370_v40, %v460_v38  ;;  %v3344_v45 = vadd.f32 %v3343_v43, %v3342_v39  ;;  %v3233_v46 = vpop.f32.mrf.mxu0 }
 0x172   : > { %v3345_v48 = vpop.f32.mrf.mxu1 }
 0x173   : > { %1487 = vst.msk [vmem:[#allocation2 + $0x70] sm:$0xff] %vm1472_vm1, %v1454_v44  ;;  %v1373_v49 = vadd.f32 %v3344_v45, %v3232_v42  ;;  %v3234_v50 = vpop.f32.mrf.mxu0 }
 0x174   : > { %v3235_v51 = vadd.f32 %v3234_v50, %v3233_v46  ;;  %v3346_v52 = vpop.f32.mrf.mxu1  ;;  %v468_v46 = vld [vmem:[#allocation2 + $0xb0] sm:$0xff] }
 0x175   : > { %v1455_v53 = vadd.f32 %v1373_v49, %v461_v47  ;;  %v3347_v54 = vadd.f32 %v3346_v52, %v3345_v48  ;;  %v3236_v55 = vpop.f32.mrf.mxu0 }
 0x176   : > { %v3348_v57 = vpop.f32.mrf.mxu1 }
 0x177   : > { %1488 = vst.msk [vmem:[#allocation2 + $0x78] sm:$0xff] %vm1472_vm1, %v1455_v53  ;;  %v1378_v58 = vadd.f32 %v3347_v54, %v3235_v51  ;;  %v3237_v59 = vpop.f32.mrf.mxu0 }
 0x178   : > { %v3238_v60 = vadd.f32 %v3237_v59, %v3236_v55  ;;  %v3349_v61 = vpop.f32.mrf.mxu1  ;;  %v469_v55 = vld [vmem:[#allocation2 + $0xb8] sm:$0xff] }
 0x179   : > { %v1456_v62 = vadd.f32 %v1378_v58, %v462_v56  ;;  %v3350_v63 = vadd.f32 %v3349_v61, %v3348_v57  ;;  %v3239_v0 = vpop.f32.mrf.mxu0 }
 0x17a   : > { %v3351_v2 = vpop.f32.mrf.mxu1 }
 0x17b   : > { %1489 = vst.msk [vmem:[#allocation2 + $0x80] sm:$0xff] %vm1472_vm1, %v1456_v62  ;;  %v1381_v3 = vadd.f32 %v3350_v63, %v3238_v60  ;;  %v3240_v4 = vpop.f32.mrf.mxu0 }
 0x17c   : > { %v3241_v5 = vadd.f32 %v3240_v4, %v3239_v0  ;;  %v3352_v6 = vpop.f32.mrf.mxu1  ;;  %v470_v0 = vld [vmem:[#allocation2 + $0xc0] sm:$0xff] }
 0x17d   : > { %v1457_v7 = vadd.f32 %v1381_v3, %v463_v1  ;;  %v3353_v8 = vadd.f32 %v3352_v6, %v3351_v2  ;;  %v3242_v9 = vpop.f32.mrf.mxu0 }
 0x17e   : > { %v3354_v11 = vpop.f32.mrf.mxu1 }
 0x17f   : > { %1490 = vst.msk [vmem:[#allocation2 + $0x88] sm:$0xff] %vm1472_vm1, %v1457_v7  ;;  %v1386_v12 = vadd.f32 %v3353_v8, %v3241_v5  ;;  %v3243_v13 = vpop.f32.mrf.mxu0 }
 0x180   : > { %v3244_v14 = vadd.f32 %v3243_v13, %v3242_v9  ;;  %v3355_v15 = vpop.f32.mrf.mxu1  ;;  %v471_v9 = vld [vmem:[#allocation2 + $0xc8] sm:$0xff] }
 0x181   : > { %v1458_v16 = vadd.f32 %v1386_v12, %v464_v10  ;;  %v3356_v17 = vadd.f32 %v3355_v15, %v3354_v11  ;;  %v3245_v18 = vpop.f32.mrf.mxu0 }
 0x182   : > { %v3357_v20 = vpop.f32.mrf.mxu1 }
 0x183   : > { %1491 = vst.msk [vmem:[#allocation2 + $0x90] sm:$0xff] %vm1472_vm1, %v1458_v16  ;;  %v1389_v21 = vadd.f32 %v3356_v17, %v3244_v14  ;;  %v3246_v22 = vpop.f32.mrf.mxu0 }
 0x184   : > { %v3247_v23 = vadd.f32 %v3246_v22, %v3245_v18  ;;  %v3358_v24 = vpop.f32.mrf.mxu1  ;;  %v472_v18 = vld [vmem:[#allocation2 + $0xd0] sm:$0xff] }
 0x185   : > { %v1459_v25 = vadd.f32 %v1389_v21, %v465_v19  ;;  %v3359_v26 = vadd.f32 %v3358_v24, %v3357_v20  ;;  %v3248_v27 = vpop.f32.mrf.mxu0 }
 0x186   : > { %v3360_v29 = vpop.f32.mrf.mxu1 }
 0x187   : > { %1492 = vst.msk [vmem:[#allocation2 + $0x98] sm:$0xff] %vm1472_vm1, %v1459_v25  ;;  %v1394_v30 = vadd.f32 %v3359_v26, %v3247_v23  ;;  %v3249_v31 = vpop.f32.mrf.mxu0 }
 0x188   : > { %v3250_v32 = vadd.f32 %v3249_v31, %v3248_v27  ;;  %v3361_v33 = vpop.f32.mrf.mxu1  ;;  %v473_v27 = vld [vmem:[#allocation2 + $0xd8] sm:$0xff] }
 0x189   : > { %v1460_v34 = vadd.f32 %v1394_v30, %v466_v28  ;;  %v3362_v35 = vadd.f32 %v3361_v33, %v3360_v29  ;;  %v3251_v36 = vpop.f32.mrf.mxu0 }
 0x18a   : > { %v3363_v38 = vpop.f32.mrf.mxu1 }
 0x18b   : > { %1493 = vst.msk [vmem:[#allocation2 + $0xa0] sm:$0xff] %vm1472_vm1, %v1460_v34  ;;  %v1397_v39 = vadd.f32 %v3362_v35, %v3250_v32  ;;  %v3252_v40 = vpop.f32.mrf.mxu0 }
 0x18c   : > { %v3253_v41 = vadd.f32 %v3252_v40, %v3251_v36  ;;  %v3364_v42 = vpop.f32.mrf.mxu1  ;;  %v474_v36 = vld [vmem:[#allocation2 + $0xe0] sm:$0xff] }
 0x18d   : > { %v1461_v43 = vadd.f32 %v1397_v39, %v467_v37  ;;  %v3365_v44 = vadd.f32 %v3364_v42, %v3363_v38  ;;  %v3254_v45 = vpop.f32.mrf.mxu0 }
 0x18e   : > { %v3366_v47 = vpop.f32.mrf.mxu1 }
 0x18f   : > { %1494 = vst.msk [vmem:[#allocation2 + $0xa8] sm:$0xff] %vm1472_vm1, %v1461_v43  ;;  %v1402_v48 = vadd.f32 %v3365_v44, %v3253_v41  ;;  %v3255_v49 = vpop.f32.mrf.mxu0 }
 0x190   : > { %v3256_v50 = vadd.f32 %v3255_v49, %v3254_v45  ;;  %v3367_v51 = vpop.f32.mrf.mxu1  ;;  %v475_v45 = vld [vmem:[#allocation2 + $0xe8] sm:$0xff] }
 0x191   : > { %v1462_v52 = vadd.f32 %v1402_v48, %v468_v46  ;;  %v3368_v53 = vadd.f32 %v3367_v51, %v3366_v47  ;;  %v3257_v54 = vpop.f32.mrf.mxu0 }
 0x192   : > { %v3369_v56 = vpop.f32.mrf.mxu1 }
 0x193   : > { %1495 = vst.msk [vmem:[#allocation2 + $0xb0] sm:$0xff] %vm1472_vm1, %v1462_v52  ;;  %v1405_v57 = vadd.f32 %v3368_v53, %v3256_v50  ;;  %v3258_v58 = vpop.f32.mrf.mxu0 }
 0x194   : > { %v3259_v59 = vadd.f32 %v3258_v58, %v3257_v54  ;;  %v3370_v60 = vpop.f32.mrf.mxu1  ;;  %v476_v54 = vld [vmem:[#allocation2 + $0xf0] sm:$0xff] }
 0x195   : > { %v1463_v61 = vadd.f32 %v1405_v57, %v469_v55  ;;  %v3371_v62 = vadd.f32 %v3370_v60, %v3369_v56  ;;  %v3260_v63 = vpop.f32.mrf.mxu0 }
 0x196   : > { %v3372_v1 = vpop.f32.mrf.mxu1 }
 0x197   : > { %1496 = vst.msk [vmem:[#allocation2 + $0xb8] sm:$0xff] %vm1472_vm1, %v1463_v61  ;;  %v1410_v2 = vadd.f32 %v3371_v62, %v3259_v59  ;;  %v3261_v3 = vpop.f32.mrf.mxu0  ;;  %v477_v62 = vld [vmem:[#allocation2 + $0xf8] sm:$0xff] }
 0x198   : > { %v3262_v4 = vadd.f32 %v3261_v3, %v3260_v63  ;;  %v3373_v5 = vpop.f32.mrf.mxu1 }
 0x199   : > { %v1464_v6 = vadd.f32 %v1410_v2, %v470_v0  ;;  %v3374_v7 = vadd.f32 %v3373_v5, %v3372_v1  ;;  %v3263_v8 = vpop.f32.mrf.mxu0 }
 0x19a   : > { %v3375_v10 = vpop.f32.mrf.mxu1 }
 0x19b   : > { %1497 = vst.msk [vmem:[#allocation2 + $0xc0] sm:$0xff] %vm1472_vm1, %v1464_v6  ;;  %v1413_v11 = vadd.f32 %v3374_v7, %v3262_v4  ;;  %v3264_v12 = vpop.f32.mrf.mxu0 }
 0x19c   : > { %v3265_v13 = vadd.f32 %v3264_v12, %v3263_v8  ;;  %v3376_v14 = vpop.f32.mrf.mxu1 }
 0x19d   : > { %v1465_v15 = vadd.f32 %v1413_v11, %v471_v9  ;;  %v3377_v16 = vadd.f32 %v3376_v14, %v3375_v10  ;;  %v3266_v17 = vpop.f32.mrf.mxu0 }
 0x19e   : > { %v3378_v19 = vpop.f32.mrf.mxu1 }
 0x19f   : > { %1498 = vst.msk [vmem:[#allocation2 + $0xc8] sm:$0xff] %vm1472_vm1, %v1465_v15  ;;  %v1418_v20 = vadd.f32 %v3377_v16, %v3265_v13  ;;  %v3267_v21 = vpop.f32.mrf.mxu0 }
 0x1a0   : > { %v3268_v22 = vadd.f32 %v3267_v21, %v3266_v17  ;;  %v3379_v23 = vpop.f32.mrf.mxu1 }
 0x1a1   : > { %v1466_v24 = vadd.f32 %v1418_v20, %v472_v18  ;;  %v3380_v25 = vadd.f32 %v3379_v23, %v3378_v19  ;;  %v3269_v26 = vpop.f32.mrf.mxu0 }
 0x1a2   : > { %v3381_v28 = vpop.f32.mrf.mxu1 }
 0x1a3   : > { %1499 = vst.msk [vmem:[#allocation2 + $0xd0] sm:$0xff] %vm1472_vm1, %v1466_v24  ;;  %v1421_v29 = vadd.f32 %v3380_v25, %v3268_v22  ;;  %v3270_v30 = vpop.f32.mrf.mxu0 }
 0x1a4   : > { %v3271_v31 = vadd.f32 %v3270_v30, %v3269_v26  ;;  %v3382_v32 = vpop.f32.mrf.mxu1 }
 0x1a5   : > { %v1467_v33 = vadd.f32 %v1421_v29, %v473_v27  ;;  %v3383_v34 = vadd.f32 %v3382_v32, %v3381_v28  ;;  %v3272_v35 = vpop.f32.mrf.mxu0 }
 0x1a6   : > { %v3384_v37 = vpop.f32.mrf.mxu1 }
 0x1a7   : > { %1500 = vst.msk [vmem:[#allocation2 + $0xd8] sm:$0xff] %vm1472_vm1, %v1467_v33  ;;  %v1426_v38 = vadd.f32 %v3383_v34, %v3271_v31  ;;  %v3273_v39 = vpop.f32.mrf.mxu0 }
 0x1a8   : > { %v3274_v40 = vadd.f32 %v3273_v39, %v3272_v35  ;;  %v3385_v41 = vpop.f32.mrf.mxu1 }
 0x1a9   : > { %v1468_v42 = vadd.f32 %v1426_v38, %v474_v36  ;;  %v3386_v43 = vadd.f32 %v3385_v41, %v3384_v37  ;;  %v3275_v44 = vpop.f32.mrf.mxu0 }
 0x1aa   : > { %v3387_v46 = vpop.f32.mrf.mxu1 }
 0x1ab   : > { %1501 = vst.msk [vmem:[#allocation2 + $0xe0] sm:$0xff] %vm1472_vm1, %v1468_v42  ;;  %v1429_v47 = vadd.f32 %v3386_v43, %v3274_v40  ;;  %v3276_v48 = vpop.f32.mrf.mxu0 }
 0x1ac   : > { %v3277_v49 = vadd.f32 %v3276_v48, %v3275_v44  ;;  %v3388_v50 = vpop.f32.mrf.mxu1 }
 0x1ad   : > { %v1469_v51 = vadd.f32 %v1429_v47, %v475_v45  ;;  %v3389_v52 = vadd.f32 %v3388_v50, %v3387_v46  ;;  %v3278_v53 = vpop.f32.mrf.mxu0 }
 0x1ae   : > { %v3390_v55 = vpop.f32.mrf.mxu1 }
 0x1af   : > { %1502 = vst.msk [vmem:[#allocation2 + $0xe8] sm:$0xff] %vm1472_vm1, %v1469_v51  ;;  %v1434_v56 = vadd.f32 %v3389_v52, %v3277_v49  ;;  %v3279_v57 = vpop.f32.mrf.mxu0 }
 0x1b0   : > { %v3280_v58 = vadd.f32 %v3279_v57, %v3278_v53  ;;  %v3391_v59 = vpop.f32.mrf.mxu1 }
 0x1b1   : > { %v1470_v60 = vadd.f32 %v1434_v56, %v476_v54  ;;  %v3392_v61 = vadd.f32 %v3391_v59, %v3390_v55 }
 0x1b3   : > { %1503 = vst.msk [vmem:[#allocation2 + $0xf0] sm:$0xff] %vm1472_vm1, %v1470_v60  ;;  %v1437_v63 = vadd.f32 %v3392_v61, %v3280_v58  ;;  %1508 = sbr.rel (%p3098_p11) target bundleno = 1375 (0x55f), region = 67 }
 0x1b5   : > { %v1471_v0 = vadd.f32 %v1437_v63, %v477_v62 }
 0x1b7   : > { %1504 = vst.msk [vmem:[#allocation2 + $0xf8] sm:$0xff] %vm1472_vm1, %v1471_v0 }
 0x1b8   : > { %v1541_v1 = vld [vmem:[%s5157_s3] sm:$0xff]  ;;  %v1510_v3 = vld [vmem:[%s5156_s2 + $0x8] sm:$0xff]  ;;  %v1511_v4 = vld [vmem:[%s5156_s2 + $0x10] sm:$0xff]  ;;  %vm1866_vm2 = vcmask 64512  }
 0x1b9   : > { %v1509_v2 = vld [vmem:[%s5156_s2] sm:$0xff]  ;;  %3459 = vmatprep.subr.msk.mxu0 %vm1472_vm1, %v1541_v1  ;;  %3509 = vmatprep.subr.mxu1 %v1541_v1  ;;  %v1512_v5 = vld [vmem:[%s5156_s2 + $0x18] sm:$0xff]  ;;  %v1514_v7 = vld [vmem:[%s5156_s2 + $0x28] sm:$0xff] }
 0x1ba   : > { %3461 = vmatprep.mubr.msk.f32.mxu0 %vm1472_vm1, %v1509_v2  ;;  %3460 = vmatpush3.xpose.msk.msra.mxu0 %vm1472_vm1, %v1541_v1  ;;  %v1513_v6 = vld [vmem:[%s5156_s2 + $0x20] sm:$0xff]  ;;  %v1515_v8 = vld [vmem:[%s5156_s2 + $0x30] sm:$0xff]  ;;  %v1516_v9 = vld [vmem:[%s5156_s2 + $0x38] sm:$0xff] }
 0x1bb   : > { %3510 = vmatpush3.msra.mxu1 %v1541_v1  ;;  %v1517_v10 = vld [vmem:[%s5156_s2 + $0x40] sm:$0xff]  ;;  %v1518_v11 = vld [vmem:[%s5156_s2 + $0x48] sm:$0xff]  ;;  %v1519_v12 = vld [vmem:[%s5156_s2 + $0x50] sm:$0xff] }
 0x1bc   : > { %v1520_v13 = vld [vmem:[%s5156_s2 + $0x58] sm:$0xff]  ;;  %v1521_v14 = vld [vmem:[%s5156_s2 + $0x60] sm:$0xff]  ;;  %v1522_v15 = vld [vmem:[%s5156_s2 + $0x68] sm:$0xff] }
 0x1bd   : > { %3462 = vmatmul.mubr.msk.f32.vlgmr.msra.gmra.mxu0 %vm1472_vm1, %v1510_v3  ;;  %v1523_v16 = vld [vmem:[%s5156_s2 + $0x70] sm:$0xff]  ;;  %v1524_v17 = vld [vmem:[%s5156_s2 + $0x78] sm:$0xff]  ;;  %v1525_v18 = vld [vmem:[%s5156_s2 + $0x80] sm:$0xff] }
 0x1be   : > { %3464 = vmatprep.mubr.msk.f32.mxu0 %vm1472_vm1, %v1511_v4  ;;  %v1526_v19 = vld [vmem:[%s5156_s2 + $0x88] sm:$0xff]  ;;  %v1527_v20 = vld [vmem:[%s5156_s2 + $0x90] sm:$0xff]  ;;  %v1528_v21 = vld [vmem:[%s5156_s2 + $0x98] sm:$0xff] }
 0x1bf   : > { %v1529_v22 = vld [vmem:[%s5156_s2 + $0xa0] sm:$0xff]  ;;  %v1530_v23 = vld [vmem:[%s5156_s2 + $0xa8] sm:$0xff]  ;;  %v1531_v24 = vld [vmem:[%s5156_s2 + $0xb0] sm:$0xff] }
 0x1c0   : > { %v1532_v25 = vld [vmem:[%s5156_s2 + $0xb8] sm:$0xff]  ;;  %v1533_v26 = vld [vmem:[%s5156_s2 + $0xc0] sm:$0xff]  ;;  %v1534_v27 = vld [vmem:[%s5156_s2 + $0xc8] sm:$0xff] }
 0x1c1   : > { %3465 = vmatmul.mubr.msk.f32.gmra.mxu0 %vm1472_vm1, %v1512_v5  ;;  %v1535_v28 = vld [vmem:[%s5156_s2 + $0xd0] sm:$0xff]  ;;  %v1536_v29 = vld [vmem:[%s5156_s2 + $0xd8] sm:$0xff]  ;;  %v1537_v30 = vld [vmem:[%s5156_s2 + $0xe0] sm:$0xff] }
 0x1c2   : > { %3467 = vmatprep.mubr.msk.f32.mxu0 %vm1472_vm1, %v1513_v6  ;;  %v1538_v31 = vld [vmem:[%s5156_s2 + $0xe8] sm:$0xff]  ;;  %v1539_v32 = vld [vmem:[%s5156_s2 + $0xf0] sm:$0xff]  ;;  %v1540_v33 = vld [vmem:[%s5156_s2 + $0xf8] sm:$0xff] }
 0x1c5   : > { %3468 = vmatmul.mubr.msk.f32.gmra.mxu0 %vm1472_vm1, %v1514_v7 }
 0x1c6   : > { %3470 = vmatprep.mubr.msk.f32.mxu0 %vm1472_vm1, %v1515_v8 }
 0x1c9   : > { %3471 = vmatmul.mubr.msk.f32.gmra.mxu0 %vm1472_vm1, %v1516_v9 }
 0x1ca   : > { %3473 = vmatprep.mubr.msk.f32.mxu0 %vm1472_vm1, %v1517_v10 }
 0x1cd   : > { %3474 = vmatmul.mubr.msk.f32.gmra.mxu0 %vm1472_vm1, %v1518_v11 }
 0x1ce   : > { %3476 = vmatprep.mubr.msk.f32.mxu0 %vm1472_vm1, %v1519_v12 }
 0x1d1   : > { %3477 = vmatmul.mubr.msk.f32.gmra.mxu0 %vm1472_vm1, %v1520_v13 }
 0x1d2   : > { %3479 = vmatprep.mubr.msk.f32.mxu0 %vm1472_vm1, %v1521_v14 }
 0x1d5   : > { %3480 = vmatmul.mubr.msk.f32.gmra.mxu0 %vm1472_vm1, %v1522_v15 }
 0x1d6   : > { %3482 = vmatprep.mubr.msk.f32.mxu0 %vm1472_vm1, %v1523_v16 }
 0x1d9   : > { %3483 = vmatmul.mubr.msk.f32.gmra.mxu0 %vm1472_vm1, %v1524_v17 }
 0x1da   : > { %3485 = vmatprep.mubr.msk.f32.mxu0 %vm1472_vm1, %v1525_v18 }
 0x1dd   : > { %3486 = vmatmul.mubr.msk.f32.gmra.mxu0 %vm1472_vm1, %v1526_v19 }
 0x1de   : > { %3488 = vmatprep.mubr.msk.f32.mxu0 %vm1472_vm1, %v1527_v20 }
 0x1e1   : > { %3489 = vmatmul.mubr.msk.f32.gmra.mxu0 %vm1472_vm1, %v1528_v21 }
 0x1e2   : > { %3491 = vmatprep.mubr.msk.f32.mxu0 %vm1472_vm1, %v1529_v22 }
 0x1e5   : > { %3492 = vmatmul.mubr.msk.f32.gmra.mxu0 %vm1472_vm1, %v1530_v23 }
 0x1e6   : > { %3494 = vmatprep.mubr.msk.f32.mxu0 %vm1472_vm1, %v1531_v24 }
 0x1e9   : > { %3495 = vmatmul.mubr.msk.f32.gmra.mxu0 %vm1472_vm1, %v1532_v25 }
 0x1ea   : > { %3497 = vmatprep.mubr.msk.f32.mxu0 %vm1472_vm1, %v1533_v26 }
 0x1ed   : > { %3498 = vmatmul.mubr.msk.f32.gmra.mxu0 %vm1472_vm1, %v1534_v27 }
 0x1ee   : > { %3500 = vmatprep.mubr.msk.f32.mxu0 %vm1472_vm1, %v1535_v28 }
 0x1f1   : > { %3501 = vmatmul.mubr.msk.f32.gmra.mxu0 %vm1472_vm1, %v1536_v29 }
 0x1f2   : > { %3503 = vmatprep.mubr.msk.f32.mxu0 %vm1472_vm1, %v1537_v30 }
 0x1f5   : > { %3504 = vmatmul.mubr.msk.f32.gmra.mxu0 %vm1472_vm1, %v1538_v31 }
 0x1f6   : > { %3506 = vmatprep.mubr.msk.f32.mxu0 %vm1472_vm1, %v1539_v32 }
 0x1f9   : > { %3507 = vmatmul.mubr.msk.f32.gmra.mxu0 %vm1472_vm1, %v1540_v33 }
 0x27d   : > { %v4467_v34 = vpop.f32.mrf.mxu0 }
 0x27e   : > { %v1870_v39 = vsel %vm1866_vm2, %v4467_v34, -inf }
 0x27f   : > { %v4469_v35 = vpop.f32.mrf.mxu0 }
 0x280   : > { %v1867_v36 = vsel %vm1866_vm2, %v4469_v35, -inf }
 0x281   : > { %1868 = vmax.xlane.f32.xlu0 %v1867_v36  ;;  %v4473_v37 = vpop.f32.mrf.mxu0 }
 0x282   : > { %v1876_v43 = vsel %vm1866_vm2, %v4473_v37, -inf }
 0x283   : > { %v4475_v38 = vpop.f32.mrf.mxu0 }
 0x284   : > { %v1873_v40 = vsel %vm1866_vm2, %v4475_v38, -inf }
 0x285   : > { %1871 = vmax.xlane.f32.xlu0 %v1870_v39  ;;  %1874 = vmax.xlane.f32.xlu1 %v1873_v40  ;;  %v4481_v41 = vpop.f32.mrf.mxu0 }
 0x286   : > { %v1882_v47 = vsel %vm1866_vm2, %v4481_v41, -inf }
 0x287   : > { %v4483_v42 = vpop.f32.mrf.mxu0 }
 0x288   : > { %v1879_v44 = vsel %vm1866_vm2, %v4483_v42, -inf }
 0x289   : > { %1877 = vmax.xlane.f32.xlu1 %v1876_v43  ;;  %1880 = vmax.xlane.f32.xlu0 %v1879_v44  ;;  %v4489_v45 = vpop.f32.mrf.mxu0 }
 0x28a   : > { %v1888_v51 = vsel %vm1866_vm2, %v4489_v45, -inf }
 0x28b   : > { %v4491_v46 = vpop.f32.mrf.mxu0 }
 0x28c   : > { %v1885_v48 = vsel %vm1866_vm2, %v4491_v46, -inf }
 0x28d   : > { %1883 = vmax.xlane.f32.xlu1 %v1882_v47  ;;  %1886 = vmax.xlane.f32.xlu0 %v1885_v48  ;;  %v4497_v49 = vpop.f32.mrf.mxu0 }
 0x28e   : > { %v1894_v55 = vsel %vm1866_vm2, %v4497_v49, -inf }
 0x28f   : > { %v4499_v50 = vpop.f32.mrf.mxu0 }
 0x290   : > { %v1891_v52 = vsel %vm1866_vm2, %v4499_v50, -inf }
 0x291   : > { %1889 = vmax.xlane.f32.xlu1 %v1888_v51  ;;  %1892 = vmax.xlane.f32.xlu0 %v1891_v52  ;;  %v4505_v53 = vpop.f32.mrf.mxu0 }
 0x292   : > { %v1900_v59 = vsel %vm1866_vm2, %v4505_v53, -inf }
 0x293   : > { %v4507_v54 = vpop.f32.mrf.mxu0 }
 0x294   : > { %v1897_v56 = vsel %vm1866_vm2, %v4507_v54, -inf }
 0x295   : > { %1895 = vmax.xlane.f32.xlu1 %v1894_v55  ;;  %1898 = vmax.xlane.f32.xlu0 %v1897_v56  ;;  %v4513_v57 = vpop.f32.mrf.mxu0 }
 0x296   : > { %v1906_v63 = vsel %vm1866_vm2, %v4513_v57, -inf }
 0x297   : > { %v4515_v58 = vpop.f32.mrf.mxu0 }
 0x298   : > { %v1903_v60 = vsel %vm1866_vm2, %v4515_v58, -inf }
 0x299   : > { %1901 = vmax.xlane.f32.xlu1 %v1900_v59  ;;  %1904 = vmax.xlane.f32.xlu0 %v1903_v60  ;;  %v4521_v61 = vpop.f32.mrf.mxu0 }
 0x29a   : > { %v1912_v3 = vsel %vm1866_vm2, %v4521_v61, -inf }
 0x29b   : > { %v4523_v62 = vpop.f32.mrf.mxu0 }
 0x29c   : > { %v1909_v0 = vsel %vm1866_vm2, %v4523_v62, -inf }
 0x29d   : > { %1907 = vmax.xlane.f32.xlu1 %v1906_v63  ;;  %1910 = vmax.xlane.f32.xlu0 %v1909_v0  ;;  %v4529_v1 = vpop.f32.mrf.mxu0 }
 0x29e   : > { %v1918_v7 = vsel %vm1866_vm2, %v4529_v1, -inf }
 0x29f   : > { %v4531_v2 = vpop.f32.mrf.mxu0 }
 0x2a0   : > { %v1915_v4 = vsel %vm1866_vm2, %v4531_v2, -inf }
 0x2a1   : > { %1913 = vmax.xlane.f32.xlu1 %v1912_v3  ;;  %1916 = vmax.xlane.f32.xlu0 %v1915_v4  ;;  %v4537_v5 = vpop.f32.mrf.mxu0 }
 0x2a2   : > { %v1924_v11 = vsel %vm1866_vm2, %v4537_v5, -inf }
 0x2a3   : > { %v4539_v6 = vpop.f32.mrf.mxu0 }
 0x2a4   : > { %v1921_v8 = vsel %vm1866_vm2, %v4539_v6, -inf }
 0x2a5   : > { %1919 = vmax.xlane.f32.xlu1 %v1918_v7  ;;  %1922 = vmax.xlane.f32.xlu0 %v1921_v8  ;;  %v4545_v9 = vpop.f32.mrf.mxu0 }
 0x2a6   : > { %v1930_v15 = vsel %vm1866_vm2, %v4545_v9, -inf }
 0x2a7   : > { %v4547_v10 = vpop.f32.mrf.mxu0 }
 0x2a8   : > { %v1927_v12 = vsel %vm1866_vm2, %v4547_v10, -inf }
 0x2a9   : > { %1925 = vmax.xlane.f32.xlu1 %v1924_v11  ;;  %1928 = vmax.xlane.f32.xlu0 %v1927_v12  ;;  %v4553_v13 = vpop.f32.mrf.mxu0 }
 0x2aa   : > { %v1936_v19 = vsel %vm1866_vm2, %v4553_v13, -inf }
 0x2ab   : > { %v4555_v14 = vpop.f32.mrf.mxu0 }
 0x2ac   : > { %v1933_v16 = vsel %vm1866_vm2, %v4555_v14, -inf }
 0x2ad   : > { %1931 = vmax.xlane.f32.xlu1 %v1930_v15  ;;  %1934 = vmax.xlane.f32.xlu0 %v1933_v16  ;;  %v4561_v17 = vpop.f32.mrf.mxu0 }
 0x2ae   : > { %v1942_v23 = vsel %vm1866_vm2, %v4561_v17, -inf }
 0x2af   : > { %v4563_v18 = vpop.f32.mrf.mxu0 }
 0x2b0   : > { %v1939_v20 = vsel %vm1866_vm2, %v4563_v18, -inf }
 0x2b1   : > { %1937 = vmax.xlane.f32.xlu1 %v1936_v19  ;;  %1940 = vmax.xlane.f32.xlu0 %v1939_v20  ;;  %v4569_v21 = vpop.f32.mrf.mxu0 }
 0x2b2   : > { %v1948_v27 = vsel %vm1866_vm2, %v4569_v21, -inf }
 0x2b3   : > { %v4571_v22 = vpop.f32.mrf.mxu0 }
 0x2b4   : > { %v1945_v24 = vsel %vm1866_vm2, %v4571_v22, -inf }
 0x2b5   : > { %1943 = vmax.xlane.f32.xlu1 %v1942_v23  ;;  %1946 = vmax.xlane.f32.xlu0 %v1945_v24  ;;  %v4577_v25 = vpop.f32.mrf.mxu0 }
 0x2b6   : > { %v1954_v31 = vsel %vm1866_vm2, %v4577_v25, -inf }
 0x2b7   : > { %v4579_v26 = vpop.f32.mrf.mxu0 }
 0x2b8   : > { %v1951_v28 = vsel %vm1866_vm2, %v4579_v26, -inf }
 0x2b9   : > { %1949 = vmax.xlane.f32.xlu1 %v1948_v27  ;;  %1952 = vmax.xlane.f32.xlu0 %v1951_v28  ;;  %v4585_v29 = vpop.f32.mrf.mxu0 }
 0x2ba   : > { %v1960_v33 = vsel %vm1866_vm2, %v4585_v29, -inf }
 0x2bb   : > { %v4587_v30 = vpop.f32.mrf.mxu0 }
 0x2bc   : > { %v1957_v32 = vsel %vm1866_vm2, %v4587_v30, -inf }
 0x2bd   : > { %1955 = vmax.xlane.f32.xlu1 %v1954_v31  ;;  %1958 = vmax.xlane.f32.xlu0 %v1957_v32 }
 0x2c1   : > { %1961 = vmax.xlane.f32.xlu1 %v1960_v33 }
 0x30a   : > { %v1869_v36 = vpop.xlane.xlu0 %1868 }
 0x30b   : > { %v1963_v39 = vsub.f32 %v4469_v35, %v1869_v36 }
 0x30d   : > { %v1995_v40 = vmul.f32 1.442695, %v1963_v39 }
 0x30e   : > { %v1872_v43 = vpop.xlane.xlu0 %1871  ;;  %v1875_v44 = vpop.xlane.xlu1 %1874 }
 0x30f   : > { %3728 = vpow2.f32 %v1995_v40  ;;  %v1964_v47 = vsub.f32 %v4467_v34, %v1872_v43  ;;  %v1965_v48 = vsub.f32 %v4475_v38, %v1875_v44 }
 0x311   : > { %v1997_v51 = vmul.f32 1.442695, %v1964_v47  ;;  %v1999_v52 = vmul.f32 1.442695, %v1965_v48 }
 0x312   : > { %v1878_v55 = vpop.xlane.xlu1 %1877  ;;  %v1881_v56 = vpop.xlane.xlu0 %1880 }
 0x313   : > { %3730 = vpow2.f32 %v1997_v51  ;;  %v1966_v59 = vsub.f32 %v4473_v37, %v1878_v55  ;;  %v1967_v60 = vsub.f32 %v4483_v42, %v1881_v56 }
 0x314   : > { %3732 = vpow2.f32 %v1999_v52 }
 0x315   : > { %v2001_v63 = vmul.f32 1.442695, %v1966_v59  ;;  %v2003_v35 = vmul.f32 1.442695, %v1967_v60 }
 0x316   : > { %v1884_v0 = vpop.xlane.xlu1 %1883  ;;  %v1887_v3 = vpop.xlane.xlu0 %1886 }
 0x317   : > { %3734 = vpow2.f32 %v2001_v63  ;;  %v1968_v4 = vsub.f32 %v4481_v41, %v1884_v0  ;;  %v1969_v34 = vsub.f32 %v4491_v46, %v1887_v3 }
 0x318   : > { %3736 = vpow2.f32 %v2003_v35 }
 0x319   : > { %v2005_v38 = vmul.f32 1.442695, %v1968_v4  ;;  %v2007_v7 = vmul.f32 1.442695, %v1969_v34 }
 0x31a   : > { %v1890_v8 = vpop.xlane.xlu1 %1889  ;;  %v1893_v11 = vpop.xlane.xlu0 %1892 }
 0x31b   : > { %3738 = vpow2.f32 %v2005_v38  ;;  %v1970_v37 = vsub.f32 %v4489_v45, %v1890_v8  ;;  %v1971_v42 = vsub.f32 %v4499_v50, %v1893_v11 }
 0x31c   : > { %v4604_v12 = vpop.eup %3728  ;;  %3740 = vpow2.f32 %v2007_v7 }
 0x31d   : > { %v2009_v15 = vmul.f32 1.442695, %v1970_v37  ;;  %v2011_v16 = vmul.f32 1.442695, %v1971_v42  ;;  %v2059_v41 = vsel %vm1866_vm2, %v4604_v12, 0.0 }
 0x31e   : > { %v1896_v19 = vpop.xlane.xlu1 %1895  ;;  %v1899_v46 = vpop.xlane.xlu0 %1898  ;;  %2060 = vadd.xlane.f32.xlu0 %v2059_v41 }
 0x31f   : > { %3742 = vpow2.f32 %v2009_v15  ;;  %v1972_v20 = vsub.f32 %v4497_v49, %v1896_v19  ;;  %v1973_v23 = vsub.f32 %v4507_v54, %v1899_v46 }
 0x320   : > { %v4610_v24 = vpop.eup %3730  ;;  %3744 = vpow2.f32 %v2011_v16 }
 0x321   : > { %v4612_v45 = vpop.eup %3732  ;;  %v2013_v50 = vmul.f32 1.442695, %v1972_v20  ;;  %v2015_v27 = vmul.f32 1.442695, %v1973_v23  ;;  %v2062_v28 = vsel %vm1866_vm2, %v4610_v24, 0.0 }
 0x322   : > { %v1902_v31 = vpop.xlane.xlu1 %1901  ;;  %v1905_v32 = vpop.xlane.xlu0 %1904  ;;  %2063 = vadd.xlane.f32.xlu1 %v2062_v28  ;;  %v2065_v33 = vsel %vm1866_vm2, %v4612_v45, 0.0 }
 0x323   : > { %3746 = vpow2.f32 %v2013_v50  ;;  %v1974_v49 = vsub.f32 %v4505_v53, %v1902_v31  ;;  %v1975_v54 = vsub.f32 %v4515_v58, %v1905_v32  ;;  %2066 = vadd.xlane.f32.xlu0 %v2065_v33 }
 0x324   : > { %v4620_v36 = vpop.eup %3734  ;;  %3748 = vpow2.f32 %v2015_v27 }
 0x325   : > { %v4622_v39 = vpop.eup %3736  ;;  %v2017_v40 = vmul.f32 1.442695, %v1974_v49  ;;  %v2019_v43 = vmul.f32 1.442695, %v1975_v54  ;;  %v2068_v44 = vsel %vm1866_vm2, %v4620_v36, 0.0 }
 0x326   : > { %v1908_v47 = vpop.xlane.xlu1 %1907  ;;  %v1911_v48 = vpop.xlane.xlu0 %1910  ;;  %2069 = vadd.xlane.f32.xlu1 %v2068_v44  ;;  %v2071_v51 = vsel %vm1866_vm2, %v4622_v39, 0.0 }
 0x327   : > { %3750 = vpow2.f32 %v2017_v40  ;;  %v1976_v53 = vsub.f32 %v4513_v57, %v1908_v47  ;;  %v1977_v58 = vsub.f32 %v4523_v62, %v1911_v48  ;;  %2072 = vadd.xlane.f32.xlu0 %v2071_v51 }
 0x328   : > { %v4630_v52 = vpop.eup %3738  ;;  %3752 = vpow2.f32 %v2019_v43 }
 0x329   : > { %v4632_v55 = vpop.eup %3740  ;;  %v2021_v56 = vmul.f32 1.442695, %v1976_v53  ;;  %v2023_v59 = vmul.f32 1.442695, %v1977_v58  ;;  %v2074_v60 = vsel %vm1866_vm2, %v4630_v52, 0.0 }
 0x32a   : > { %v1914_v63 = vpop.xlane.xlu1 %1913  ;;  %v1917_v35 = vpop.xlane.xlu0 %1916  ;;  %2075 = vadd.xlane.f32.xlu1 %v2074_v60  ;;  %v2077_v0 = vsel %vm1866_vm2, %v4632_v55, 0.0 }
 0x32b   : > { %3754 = vpow2.f32 %v2021_v56  ;;  %v1978_v57 = vsub.f32 %v4521_v61, %v1914_v63  ;;  %v1979_v62 = vsub.f32 %v4531_v2, %v1917_v35  ;;  %2078 = vadd.xlane.f32.xlu0 %v2077_v0 }
 0x32c   : > { %v4640_v3 = vpop.eup %3742  ;;  %3756 = vpow2.f32 %v2023_v59 }
 0x32d   : > { %v4642_v4 = vpop.eup %3744  ;;  %v2025_v34 = vmul.f32 1.442695, %v1978_v57  ;;  %v2027_v38 = vmul.f32 1.442695, %v1979_v62  ;;  %v2080_v7 = vsel %vm1866_vm2, %v4640_v3, 0.0 }
 0x32e   : > { %v1920_v8 = vpop.xlane.xlu1 %1919  ;;  %v1923_v11 = vpop.xlane.xlu0 %1922  ;;  %2081 = vadd.xlane.f32.xlu1 %v2080_v7  ;;  %v2083_v37 = vsel %vm1866_vm2, %v4642_v4, 0.0 }
 0x32f   : > { %3758 = vpow2.f32 %v2025_v34  ;;  %v1980_v61 = vsub.f32 %v4529_v1, %v1920_v8  ;;  %v1981_v2 = vsub.f32 %v4539_v6, %v1923_v11  ;;  %2084 = vadd.xlane.f32.xlu0 %v2083_v37 }
 0x330   : > { %v4650_v42 = vpop.eup %3746  ;;  %3760 = vpow2.f32 %v2027_v38 }
 0x331   : > { %v4652_v15 = vpop.eup %3748  ;;  %v2029_v16 = vmul.f32 1.442695, %v1980_v61  ;;  %v2031_v41 = vmul.f32 1.442695, %v1981_v2  ;;  %v2086_v19 = vsel %vm1866_vm2, %v4650_v42, 0.0 }
 0x332   : > { %v1926_v46 = vpop.xlane.xlu1 %1925  ;;  %v1929_v20 = vpop.xlane.xlu0 %1928  ;;  %2087 = vadd.xlane.f32.xlu1 %v2086_v19  ;;  %v2089_v23 = vsel %vm1866_vm2, %v4652_v15, 0.0 }
 0x333   : > { %3762 = vpow2.f32 %v2029_v16  ;;  %v1982_v1 = vsub.f32 %v4537_v5, %v1926_v46  ;;  %v1983_v6 = vsub.f32 %v4547_v10, %v1929_v20  ;;  %2090 = vadd.xlane.f32.xlu0 %v2089_v23 }
 0x334   : > { %v4660_v50 = vpop.eup %3750  ;;  %3764 = vpow2.f32 %v2031_v41 }
 0x335   : > { %v4662_v27 = vpop.eup %3752  ;;  %v2033_v28 = vmul.f32 1.442695, %v1982_v1  ;;  %v2035_v31 = vmul.f32 1.442695, %v1983_v6  ;;  %v2092_v32 = vsel %vm1866_vm2, %v4660_v50, 0.0 }
 0x336   : > { %v1932_v33 = vpop.xlane.xlu1 %1931  ;;  %v1935_v49 = vpop.xlane.xlu0 %1934  ;;  %2093 = vadd.xlane.f32.xlu1 %v2092_v32  ;;  %v2095_v54 = vsel %vm1866_vm2, %v4662_v27, 0.0 }
 0x337   : > { %3766 = vpow2.f32 %v2033_v28  ;;  %v1984_v5 = vsub.f32 %v4545_v9, %v1932_v33  ;;  %v1985_v10 = vsub.f32 %v4555_v14, %v1935_v49  ;;  %2096 = vadd.xlane.f32.xlu0 %v2095_v54 }
 0x338   : > { %v4670_v40 = vpop.eup %3754  ;;  %3768 = vpow2.f32 %v2035_v31 }
 0x339   : > { %v4672_v43 = vpop.eup %3756  ;;  %v2037_v44 = vmul.f32 1.442695, %v1984_v5  ;;  %v2039_v47 = vmul.f32 1.442695, %v1985_v10  ;;  %v2098_v48 = vsel %vm1866_vm2, %v4670_v40, 0.0 }
 0x33a   : > { %v1938_v51 = vpop.xlane.xlu1 %1937  ;;  %v1941_v53 = vpop.xlane.xlu0 %1940  ;;  %2099 = vadd.xlane.f32.xlu1 %v2098_v48  ;;  %v2101_v58 = vsel %vm1866_vm2, %v4672_v43, 0.0 }
 0x33b   : > { %3770 = vpow2.f32 %v2037_v44  ;;  %v1986_v9 = vsub.f32 %v4553_v13, %v1938_v51  ;;  %v1987_v14 = vsub.f32 %v4563_v18, %v1941_v53  ;;  %2102 = vadd.xlane.f32.xlu0 %v2101_v58 }
 0x33c   : > { %v4680_v56 = vpop.eup %3758  ;;  %3772 = vpow2.f32 %v2039_v47 }
 0x33d   : > { %v4682_v59 = vpop.eup %3760  ;;  %v2041_v60 = vmul.f32 1.442695, %v1986_v9  ;;  %v2043_v63 = vmul.f32 1.442695, %v1987_v14  ;;  %v2104_v35 = vsel %vm1866_vm2, %v4680_v56, 0.0 }
 0x33e   : > { %v1944_v0 = vpop.xlane.xlu1 %1943  ;;  %v1947_v57 = vpop.xlane.xlu0 %1946  ;;  %2105 = vadd.xlane.f32.xlu1 %v2104_v35  ;;  %v2107_v62 = vsel %vm1866_vm2, %v4682_v59, 0.0 }
 0x33f   : > { %3774 = vpow2.f32 %v2041_v60  ;;  %v1988_v13 = vsub.f32 %v4561_v17, %v1944_v0  ;;  %v1989_v18 = vsub.f32 %v4571_v22, %v1947_v57  ;;  %2108 = vadd.xlane.f32.xlu0 %v2107_v62 }
 0x340   : > { %v4690_v34 = vpop.eup %3762  ;;  %3776 = vpow2.f32 %v2043_v63 }
 0x341   : > { %v4692_v38 = vpop.eup %3764  ;;  %v2045_v7 = vmul.f32 1.442695, %v1988_v13  ;;  %v2047_v8 = vmul.f32 1.442695, %v1989_v18  ;;  %v2110_v11 = vsel %vm1866_vm2, %v4690_v34, 0.0 }
 0x342   : > { %v1950_v37 = vpop.xlane.xlu1 %1949  ;;  %v1953_v61 = vpop.xlane.xlu0 %1952  ;;  %2111 = vadd.xlane.f32.xlu1 %v2110_v11  ;;  %v2113_v2 = vsel %vm1866_vm2, %v4692_v38, 0.0 }
 0x343   : > { %3778 = vpow2.f32 %v2045_v7  ;;  %v1990_v17 = vsub.f32 %v4569_v21, %v1950_v37  ;;  %v1991_v22 = vsub.f32 %v4579_v26, %v1953_v61  ;;  %2114 = vadd.xlane.f32.xlu0 %v2113_v2 }
 0x344   : > { %v4700_v16 = vpop.eup %3766  ;;  %3780 = vpow2.f32 %v2047_v8 }
 0x345   : > { %v4702_v41 = vpop.eup %3768  ;;  %v2049_v19 = vmul.f32 1.442695, %v1990_v17  ;;  %v2051_v46 = vmul.f32 1.442695, %v1991_v22  ;;  %v2116_v20 = vsel %vm1866_vm2, %v4700_v16, 0.0 }
 0x346   : > { %v1956_v23 = vpop.xlane.xlu1 %1955  ;;  %2117 = vadd.xlane.f32.xlu1 %v2116_v20  ;;  %v2119_v1 = vsel %vm1866_vm2, %v4702_v41, 0.0  ;;  %v1959_v6 = vpop.xlane.xlu0 %1958 }
 0x347   : > { %3782 = vpow2.f32 %v2049_v19  ;;  %v1992_v21 = vsub.f32 %v4577_v25, %v1956_v23  ;;  %2120 = vadd.xlane.f32.xlu0 %v2119_v1  ;;  %v1993_v26 = vsub.f32 %v4587_v30, %v1959_v6 }
 0x348   : > { %v4710_v28 = vpop.eup %3770  ;;  %3784 = vpow2.f32 %v2051_v46 }
 0x349   : > { %v4712_v31 = vpop.eup %3772  ;;  %v2053_v32 = vmul.f32 1.442695, %v1992_v21  ;;  %v2055_v33 = vmul.f32 1.442695, %v1993_v26  ;;  %v2122_v49 = vsel %vm1866_vm2, %v4710_v28, 0.0 }
 0x34a   : > { %2123 = vadd.xlane.f32.xlu1 %v2122_v49  ;;  %v1962_v54 = vpop.xlane.xlu1 %1961  ;;  %v2125_v5 = vsel %vm1866_vm2, %v4712_v31, 0.0 }
 0x34b   : > { %3786 = vpow2.f32 %v2053_v32  ;;  %v1994_v25 = vsub.f32 %v4585_v29, %v1962_v54  ;;  %2126 = vadd.xlane.f32.xlu0 %v2125_v5 }
 0x34c   : > { %v4719_v30 = vpop.eup %3774  ;;  %3788 = vpow2.f32 %v2055_v33 }
 0x34d   : > { %v4721_v10 = vpop.eup %3776  ;;  %v2057_v44 = vmul.f32 1.442695, %v1994_v25  ;;  %v2128_v47 = vsel %vm1866_vm2, %v4719_v30, 0.0 }
 0x34e   : > { %2129 = vadd.xlane.f32.xlu1 %v2128_v47  ;;  %v2131_v48 = vsel %vm1866_vm2, %v4721_v10, 0.0 }
 0x34f   : > { %3790 = vpow2.f32 %v2057_v44  ;;  %2132 = vadd.xlane.f32.xlu0 %v2131_v48 }
 0x350   : > { %v4727_v51 = vpop.eup %3778 }
 0x351   : > { %v4729_v53 = vpop.eup %3780  ;;  %v2134_v29 = vsel %vm1866_vm2, %v4727_v51, 0.0 }
 0x352   : > { %2135 = vadd.xlane.f32.xlu1 %v2134_v29  ;;  %v2137_v58 = vsel %vm1866_vm2, %v4729_v53, 0.0 }
 0x353   : > { %2138 = vadd.xlane.f32.xlu0 %v2137_v58 }
 0x354   : > { %v4735_v9 = vpop.eup %3782 }
 0x355   : > { %v4737_v14 = vpop.eup %3784  ;;  %v2140_v60 = vsel %vm1866_vm2, %v4735_v9, 0.0 }
 0x356   : > { %2141 = vadd.xlane.f32.xlu1 %v2140_v60  ;;  %v2143_v63 = vsel %vm1866_vm2, %v4737_v14, 0.0 }
 0x357   : > { %2144 = vadd.xlane.f32.xlu0 %v2143_v63 }
 0x358   : > { %v4743_v35 = vpop.eup %3786 }
 0x359   : > { %v4745_v0 = vpop.eup %3788  ;;  %v2146_v57 = vsel %vm1866_vm2, %v4743_v35, 0.0 }
 0x35a   : > { %2147 = vadd.xlane.f32.xlu1 %v2146_v57  ;;  %v2149_v62 = vsel %vm1866_vm2, %v4745_v0, 0.0 }
 0x35b   : > { %2150 = vadd.xlane.f32.xlu0 %v2149_v62 }
 0x35c   : > { %v4751_v13 = vpop.eup %3790 }
 0x35d   : > { %v2152_v18 = vsel %vm1866_vm2, %v4751_v13, 0.0 }
 0x35e   : > { %2153 = vadd.xlane.f32.xlu1 %v2152_v18 }
 0x3a7   : > { %v2061_v7 = vpop.xlane.xlu0 %2060 }
 0x3a8   : > { %3792 = vrcp.f32 %v2061_v7 }
 0x3ab   : > { %v2064_v8 = vpop.xlane.xlu1 %2063 }
 0x3ac   : > { %3794 = vrcp.f32 %v2064_v8  ;;  %v2067_v11 = vpop.xlane.xlu0 %2066 }
 0x3ad   : > { %3796 = vrcp.f32 %v2067_v11 }
 0x3af   : > { %v2070_v37 = vpop.xlane.xlu1 %2069 }
 0x3b0   : > { %3798 = vrcp.f32 %v2070_v37  ;;  %v2073_v61 = vpop.xlane.xlu0 %2072 }
 0x3b1   : > { %3800 = vrcp.f32 %v2073_v61 }
 0x3b3   : > { %v2076_v2 = vpop.xlane.xlu1 %2075 }
 0x3b4   : > { %3802 = vrcp.f32 %v2076_v2  ;;  %v2079_v17 = vpop.xlane.xlu0 %2078 }
 0x3b5   : > { %v3793_v22 = vpop.eup %3792  ;;  %3804 = vrcp.f32 %v2079_v17 }
 0x3b6   : > { %v2156_v19 = vmul.f32 %v3793_v22, %v4604_v12 }
 0x3b7   : > { %v2082_v46 = vpop.xlane.xlu1 %2081 }
 0x3b8   : > { %3806 = vrcp.f32 %v2082_v46  ;;  %v2085_v20 = vpop.xlane.xlu0 %2084  ;;  %3511 = vmatprep.mubr.msk.f32.mxu1 %vm1866_vm2, %v2156_v19 }
 0x3b9   : > { %v3795_v23 = vpop.eup %3794  ;;  %3808 = vrcp.f32 %v2085_v20 }
 0x3ba   : > { %v3797_v1 = vpop.eup %3796  ;;  %v2158_v6 = vmul.f32 %v3795_v23, %v4610_v24 }
 0x3bb   : > { %v2088_v21 = vpop.xlane.xlu1 %2087  ;;  %v2160_v26 = vmul.f32 %v3797_v1, %v4612_v45 }
 0x3bc   : > { %3810 = vrcp.f32 %v2088_v21  ;;  %v2091_v32 = vpop.xlane.xlu0 %2090  ;;  %3512 = vmatmul.mubr.msk.f32.vlgmr.msra.gmra.mxu1 %vm1866_vm2, %v2158_v6 }
 0x3bd   : > { %v3799_v33 = vpop.eup %3798  ;;  %3812 = vrcp.f32 %v2091_v32  ;;  %3514 = vmatprep.mubr.msk.f32.mxu1 %vm1866_vm2, %v2160_v26 }
 0x3be   : > { %v3801_v12 = vpop.eup %3800  ;;  %v2162_v49 = vmul.f32 %v3799_v33, %v4620_v36 }
 0x3bf   : > { %v2094_v54 = vpop.xlane.xlu1 %2093  ;;  %v2164_v5 = vmul.f32 %v3801_v12, %v4622_v39 }
 0x3c0   : > { %3814 = vrcp.f32 %v2094_v54  ;;  %v2097_v25 = vpop.xlane.xlu0 %2096  ;;  %3515 = vmatmul.mubr.msk.f32.gmra.mxu1 %vm1866_vm2, %v2162_v49 }
 0x3c1   : > { %v3803_v24 = vpop.eup %3802  ;;  %3816 = vrcp.f32 %v2097_v25  ;;  %3517 = vmatprep.mubr.msk.f32.mxu1 %vm1866_vm2, %v2164_v5 }
 0x3c2   : > { %v3805_v45 = vpop.eup %3804  ;;  %v2166_v44 = vmul.f32 %v3803_v24, %v4630_v52 }
 0x3c3   : > { %v2100_v47 = vpop.xlane.xlu1 %2099  ;;  %v2168_v48 = vmul.f32 %v3805_v45, %v4632_v55 }
 0x3c4   : > { %3818 = vrcp.f32 %v2100_v47  ;;  %v2103_v29 = vpop.xlane.xlu0 %2102  ;;  %3518 = vmatmul.mubr.msk.f32.gmra.mxu1 %vm1866_vm2, %v2166_v44 }
 0x3c5   : > { %v3807_v36 = vpop.eup %3806  ;;  %3820 = vrcp.f32 %v2103_v29  ;;  %3520 = vmatprep.mubr.msk.f32.mxu1 %vm1866_vm2, %v2168_v48 }
 0x3c6   : > { %v3809_v39 = vpop.eup %3808  ;;  %v2170_v58 = vmul.f32 %v3807_v36, %v4640_v3 }
 0x3c7   : > { %v2106_v60 = vpop.xlane.xlu1 %2105  ;;  %v2172_v63 = vmul.f32 %v3809_v39, %v4642_v4 }
 0x3c8   : > { %3822 = vrcp.f32 %v2106_v60  ;;  %v2109_v57 = vpop.xlane.xlu0 %2108  ;;  %3521 = vmatmul.mubr.msk.f32.gmra.mxu1 %vm1866_vm2, %v2170_v58 }
 0x3c9   : > { %v3811_v52 = vpop.eup %3810  ;;  %3824 = vrcp.f32 %v2109_v57  ;;  %3523 = vmatprep.mubr.msk.f32.mxu1 %vm1866_vm2, %v2172_v63 }
 0x3ca   : > { %v3813_v55 = vpop.eup %3812  ;;  %v2174_v62 = vmul.f32 %v3811_v52, %v4650_v42 }
 0x3cb   : > { %v2112_v18 = vpop.xlane.xlu1 %2111  ;;  %v2176_v7 = vmul.f32 %v3813_v55, %v4652_v15 }
 0x3cc   : > { %3826 = vrcp.f32 %v2112_v18  ;;  %v2115_v8 = vpop.xlane.xlu0 %2114  ;;  %3524 = vmatmul.mubr.msk.f32.gmra.mxu1 %vm1866_vm2, %v2174_v62  ;;  %v2219_v62 = vld [vmem:[#allocation2] sm:$0xff] }
 0x3cd   : > { %v3815_v3 = vpop.eup %3814  ;;  %3828 = vrcp.f32 %v2115_v8  ;;  %3526 = vmatprep.mubr.msk.f32.mxu1 %vm1866_vm2, %v2176_v7  ;;  %v2222_v8 = vld [vmem:[#allocation2 + $0x18] sm:$0xff] }
 0x3ce   : > { %v3817_v4 = vpop.eup %3816  ;;  %v2178_v11 = vmul.f32 %v3815_v3, %v4660_v50 }
 0x3cf   : > { %v2118_v37 = vpop.xlane.xlu1 %2117  ;;  %v2180_v61 = vmul.f32 %v3817_v4, %v4662_v27 }
 0x3d0   : > { %3830 = vrcp.f32 %v2118_v37  ;;  %v2121_v2 = vpop.xlane.xlu0 %2120  ;;  %3527 = vmatmul.mubr.msk.f32.gmra.mxu1 %vm1866_vm2, %v2178_v11 }
 0x3d1   : > { %v3819_v42 = vpop.eup %3818  ;;  %3832 = vrcp.f32 %v2121_v2  ;;  %3529 = vmatprep.mubr.msk.f32.mxu1 %vm1866_vm2, %v2180_v61  ;;  %v2224_v2 = vld [vmem:[#allocation2 + $0x28] sm:$0xff] }
 0x3d2   : > { %v3821_v15 = vpop.eup %3820  ;;  %v2182_v17 = vmul.f32 %v3819_v42, %v4670_v40 }
 0x3d3   : > { %v2124_v22 = vpop.xlane.xlu1 %2123  ;;  %v2184_v19 = vmul.f32 %v3821_v15, %v4672_v43 }
 0x3d4   : > { %3834 = vrcp.f32 %v2124_v22  ;;  %v2127_v46 = vpop.xlane.xlu0 %2126  ;;  %3530 = vmatmul.mubr.msk.f32.gmra.mxu1 %vm1866_vm2, %v2182_v17 }
 0x3d5   : > { %v3823_v50 = vpop.eup %3822  ;;  %3836 = vrcp.f32 %v2127_v46  ;;  %3532 = vmatprep.mubr.msk.f32.mxu1 %vm1866_vm2, %v2184_v19  ;;  %v2223_v46 = vld [vmem:[#allocation2 + $0x20] sm:$0xff] }
 0x3d6   : > { %v3825_v27 = vpop.eup %3824  ;;  %v2186_v20 = vmul.f32 %v3823_v50, %v4680_v56 }
 0x3d7   : > { %v2130_v23 = vpop.xlane.xlu1 %2129  ;;  %v2188_v1 = vmul.f32 %v3825_v27, %v4682_v59 }
 0x3d8   : > { %3838 = vrcp.f32 %v2130_v23  ;;  %v2133_v6 = vpop.xlane.xlu0 %2132  ;;  %3533 = vmatmul.mubr.msk.f32.gmra.mxu1 %vm1866_vm2, %v2186_v20 }
 0x3d9   : > { %v3827_v40 = vpop.eup %3826  ;;  %3840 = vrcp.f32 %v2133_v6  ;;  %3535 = vmatprep.mubr.msk.f32.mxu1 %vm1866_vm2, %v2188_v1  ;;  %v2226_v6 = vld [vmem:[#allocation2 + $0x38] sm:$0xff] }
 0x3da   : > { %v3829_v43 = vpop.eup %3828  ;;  %v2190_v21 = vmul.f32 %v3827_v40, %v4690_v34 }
 0x3db   : > { %v2136_v26 = vpop.xlane.xlu1 %2135  ;;  %v2192_v32 = vmul.f32 %v3829_v43, %v4692_v38 }
 0x3dc   : > { %3842 = vrcp.f32 %v2136_v26  ;;  %v2139_v33 = vpop.xlane.xlu0 %2138  ;;  %3536 = vmatmul.mubr.msk.f32.gmra.mxu1 %vm1866_vm2, %v2190_v21 }
 0x3dd   : > { %v3831_v56 = vpop.eup %3830  ;;  %3844 = vrcp.f32 %v2139_v33  ;;  %3538 = vmatprep.mubr.msk.f32.mxu1 %vm1866_vm2, %v2192_v32  ;;  %v2225_v33 = vld [vmem:[#allocation2 + $0x30] sm:$0xff] }
 0x3de   : > { %v3833_v59 = vpop.eup %3832  ;;  %v2194_v12 = vmul.f32 %v3831_v56, %v4700_v16 }
 0x3df   : > { %v2142_v49 = vpop.xlane.xlu1 %2141  ;;  %v2196_v54 = vmul.f32 %v3833_v59, %v4702_v41 }
 0x3e0   : > { %3846 = vrcp.f32 %v2142_v49  ;;  %v2145_v5 = vpop.xlane.xlu0 %2144  ;;  %3539 = vmatmul.mubr.msk.f32.gmra.mxu1 %vm1866_vm2, %v2194_v12 }
 0x3e1   : > { %v3835_v34 = vpop.eup %3834  ;;  %3848 = vrcp.f32 %v2145_v5  ;;  %3541 = vmatprep.mubr.msk.f32.mxu1 %vm1866_vm2, %v2196_v54  ;;  %v2228_v5 = vld [vmem:[#allocation2 + $0x48] sm:$0xff] }
 0x3e2   : > { %v3837_v38 = vpop.eup %3836  ;;  %v2198_v25 = vmul.f32 %v3835_v34, %v4710_v28 }
 0x3e3   : > { %v2148_v24 = vpop.xlane.xlu1 %2147  ;;  %v2200_v45 = vmul.f32 %v3837_v38, %v4712_v31 }
 0x3e4   : > { %3850 = vrcp.f32 %v2148_v24  ;;  %v2151_v44 = vpop.xlane.xlu0 %2150  ;;  %3542 = vmatmul.mubr.msk.f32.gmra.mxu1 %vm1866_vm2, %v2198_v25 }
 0x3e5   : > { %v3839_v16 = vpop.eup %3838  ;;  %3852 = vrcp.f32 %v2151_v44  ;;  %3544 = vmatprep.mubr.msk.f32.mxu1 %vm1866_vm2, %v2200_v45  ;;  %v2227_v44 = vld [vmem:[#allocation2 + $0x40] sm:$0xff] }
 0x3e6   : > { %v3841_v41 = vpop.eup %3840  ;;  %v2202_v47 = vmul.f32 %v3839_v16, %v4719_v30 }
 0x3e7   : > { %v2154_v48 = vpop.xlane.xlu1 %2153  ;;  %v2204_v29 = vmul.f32 %v3841_v41, %v4721_v10 }
 0x3e8   : > { %3854 = vrcp.f32 %v2154_v48  ;;  %3545 = vmatmul.mubr.msk.f32.gmra.mxu1 %vm1866_vm2, %v2202_v47 }
 0x3e9   : > { %v3843_v28 = vpop.eup %3842  ;;  %3547 = vmatprep.mubr.msk.f32.mxu1 %vm1866_vm2, %v2204_v29 }
 0x3ea   : > { %v3845_v31 = vpop.eup %3844  ;;  %v2206_v36 = vmul.f32 %v3843_v28, %v4727_v51  ;;  %v2230_v28 = vld [vmem:[#allocation2 + $0x58] sm:$0xff] }
 0x3eb   : > { %v2208_v39 = vmul.f32 %v3845_v31, %v4729_v53 }
 0x3ec   : > { %3548 = vmatmul.mubr.msk.f32.gmra.mxu1 %vm1866_vm2, %v2206_v36 }
 0x3ed   : > { %v3847_v58 = vpop.eup %3846  ;;  %3550 = vmatprep.mubr.msk.f32.mxu1 %vm1866_vm2, %v2208_v39 }
 0x3ee   : > { %v3849_v30 = vpop.eup %3848  ;;  %v2210_v60 = vmul.f32 %v3847_v58, %v4735_v9  ;;  %v2220_v9 = vld [vmem:[#allocation2 + $0x8] sm:$0xff] }
 0x3ef   : > { %v2212_v10 = vmul.f32 %v3849_v30, %v4737_v14 }
 0x3f0   : > { %3551 = vmatmul.mubr.msk.f32.gmra.mxu1 %vm1866_vm2, %v2210_v60  ;;  %v2229_v60 = vld [vmem:[#allocation2 + $0x50] sm:$0xff] }
 0x3f1   : > { %v3851_v63 = vpop.eup %3850  ;;  %3553 = vmatprep.mubr.msk.f32.mxu1 %vm1866_vm2, %v2212_v10 }
 0x3f2   : > { %v3853_v57 = vpop.eup %3852  ;;  %v2214_v51 = vmul.f32 %v3851_v63, %v4743_v35 }
 0x3f3   : > { %v2216_v53 = vmul.f32 %v3853_v57, %v4745_v0  ;;  %v2221_v0 = vld [vmem:[#allocation2 + $0x10] sm:$0xff] }
 0x3f4   : > { %3554 = vmatmul.mubr.msk.f32.gmra.mxu1 %vm1866_vm2, %v2214_v51 }
 0x3f5   : > { %v3855_v52 = vpop.eup %3854  ;;  %3556 = vmatprep.mubr.msk.f32.mxu1 %vm1866_vm2, %v2216_v53 }
 0x3f6   : > { %v2218_v55 = vmul.f32 %v3855_v52, %v4751_v13  ;;  %v2232_v52 = vld [vmem:[#allocation2 + $0x68] sm:$0xff] }
 0x3f8   : > { %3557 = vmatmul.mubr.msk.f32.gmra.mxu1 %vm1866_vm2, %v2218_v55 }
 0x47c   : > { %v3513_v14 = vpop.f32.mrf.mxu1 }
 0x47d   : > { %v2573_v18 = vmul.f32 %v3513_v14, %v2220_v9 }
 0x47e   : > { %v2413_v7 = vpop.f32.mrf.mxu1 }
 0x47f   : > { %v4819_v3 = vadd.f32 %v2573_v18, %v2220_v9  ;;  %v2572_v35 = vmul.f32 %v2413_v7, %v2219_v62  ;;  %v2231_v7 = vld [vmem:[#allocation2 + $0x60] sm:$0xff] }
 0x480   : > { %v3516_v4 = vpop.f32.mrf.mxu1 }
 0x481   : > { %v4821_v11 = vadd.f32 %v2572_v35, %v2219_v62  ;;  %v2575_v37 = vmul.f32 %v3516_v4, %v2222_v8  ;;  %v2637_v61 = vmul.f32 %v4819_v3, %v4819_v3 }
 0x482   : > { %v2423_v13 = vpop.f32.mrf.mxu1 }
 0x483   : > { %v4825_v42 = vadd.f32 %v2575_v37, %v2222_v8  ;;  %v2574_v15 = vmul.f32 %v2423_v13, %v2221_v0  ;;  %v2671_v17 = vsel %vm1472_vm1, %v2637_v61, 0.0  ;;  %v2636_v22 = vmul.f32 %v4821_v11, %v4821_v11  ;;  %v2234_v61 = vld [vmem:[#allocation2 + $0x78] sm:$0xff] }
 0x484   : > { %2672 = vadd.xlane.f32.xlu1 %v2671_v17  ;;  %v3519_v19 = vpop.f32.mrf.mxu1 }
 0x485   : > { %v4830_v50 = vadd.f32 %v2574_v15, %v2221_v0  ;;  %v2577_v27 = vmul.f32 %v3519_v19, %v2224_v2  ;;  %v2668_v20 = vsel %vm1472_vm1, %v2636_v22, 0.0  ;;  %v2639_v23 = vmul.f32 %v4825_v42, %v4825_v42  ;;  %v2233_v19 = vld [vmem:[#allocation2 + $0x70] sm:$0xff] }
 0x486   : > { %2669 = vadd.xlane.f32.xlu0 %v2668_v20  ;;  %v2433_v1 = vpop.f32.mrf.mxu1 }
 0x487   : > { %v4835_v40 = vadd.f32 %v2577_v27, %v2224_v2  ;;  %v2576_v43 = vmul.f32 %v2433_v1, %v2223_v46  ;;  %v2677_v21 = vsel %vm1472_vm1, %v2639_v23, 0.0  ;;  %v2638_v26 = vmul.f32 %v4830_v50, %v4830_v50 }
 0x488   : > { %2678 = vadd.xlane.f32.xlu1 %v2677_v21  ;;  %v3522_v32 = vpop.f32.mrf.mxu1 }
 0x489   : > { %v4840_v56 = vadd.f32 %v2576_v43, %v2223_v46  ;;  %v2579_v59 = vmul.f32 %v3522_v32, %v2226_v6  ;;  %v2674_v12 = vsel %vm1472_vm1, %v2638_v26, 0.0  ;;  %v2641_v49 = vmul.f32 %v4835_v40, %v4835_v40 }
 0x48a   : > { %2675 = vadd.xlane.f32.xlu0 %v2674_v12  ;;  %v2443_v54 = vpop.f32.mrf.mxu1 }
 0x48b   : > { %v4845_v34 = vadd.f32 %v2579_v59, %v2226_v6  ;;  %v2578_v38 = vmul.f32 %v2443_v54, %v2225_v33  ;;  %v2683_v25 = vsel %vm1472_vm1, %v2641_v49, 0.0  ;;  %v2640_v24 = vmul.f32 %v4840_v56, %v4840_v56  ;;  %v2236_v6 = vld [vmem:[#allocation2 + $0x88] sm:$0xff]  ;;  %v2235_v59 = vld [vmem:[#allocation2 + $0x80] sm:$0xff] }
 0x48c   : > { %2684 = vadd.xlane.f32.xlu1 %v2683_v25  ;;  %v3525_v45 = vpop.f32.mrf.mxu1  ;;  %v2238_v25 = vld [vmem:[#allocation2 + $0x98] sm:$0xff] }
 0x48d   : > { %v4850_v16 = vadd.f32 %v2578_v38, %v2225_v33  ;;  %v2581_v41 = vmul.f32 %v3525_v45, %v2228_v5  ;;  %v2680_v47 = vsel %vm1472_vm1, %v2640_v24, 0.0  ;;  %v2643_v48 = vmul.f32 %v4845_v34, %v4845_v34 }
 0x48e   : > { %2681 = vadd.xlane.f32.xlu0 %v2680_v47  ;;  %v2453_v29 = vpop.f32.mrf.mxu1 }
 0x48f   : > { %v4855_v31 = vadd.f32 %v2581_v41, %v2228_v5  ;;  %v2580_v36 = vmul.f32 %v2453_v29, %v2227_v44  ;;  %v2689_v39 = vsel %vm1472_vm1, %v2643_v48, 0.0  ;;  %v2642_v58 = vmul.f32 %v4850_v16, %v4850_v16  ;;  %v2237_v48 = vld [vmem:[#allocation2 + $0x90] sm:$0xff] }
 0x490   : > { %2690 = vadd.xlane.f32.xlu1 %v2689_v39  ;;  %v3528_v30 = vpop.f32.mrf.mxu1 }
 0x491   : > { %v4860_v10 = vadd.f32 %v2580_v36, %v2227_v44  ;;  %v2583_v63 = vmul.f32 %v3528_v30, %v2230_v28  ;;  %v2686_v57 = vsel %vm1472_vm1, %v2642_v58, 0.0  ;;  %v2645_v51 = vmul.f32 %v4855_v31, %v4855_v31  ;;  %v2240_v30 = vld [vmem:[#allocation2 + $0xa8] sm:$0xff] }
 0x492   : > { %2687 = vadd.xlane.f32.xlu0 %v2686_v57  ;;  %v2463_v53 = vpop.f32.mrf.mxu1 }
 0x493   : > { %v4865_v55 = vadd.f32 %v2583_v63, %v2230_v28  ;;  %v2582_v9 = vmul.f32 %v2463_v53, %v2229_v60  ;;  %v2695_v14 = vsel %vm1472_vm1, %v2645_v51, 0.0  ;;  %v2644_v62 = vmul.f32 %v4860_v10, %v4860_v10 }
 0x494   : > { %2696 = vadd.xlane.f32.xlu1 %v2695_v14  ;;  %v3531_v18 = vpop.f32.mrf.mxu1 }
 0x495   : > { %v4870_v8 = vadd.f32 %v2582_v9, %v2229_v60  ;;  %v2585_v35 = vmul.f32 %v3531_v18, %v2232_v52  ;;  %v2692_v4 = vsel %vm1472_vm1, %v2644_v62, 0.0  ;;  %v2647_v0 = vmul.f32 %v4865_v55, %v4865_v55 }
 0x496   : > { %2693 = vadd.xlane.f32.xlu0 %v2692_v4  ;;  %v2473_v37 = vpop.f32.mrf.mxu1 }
 0x497   : > { %v4875_v13 = vadd.f32 %v2585_v35, %v2232_v52  ;;  %v2584_v2 = vmul.f32 %v2473_v37, %v2231_v7  ;;  %v2701_v15 = vsel %vm1472_vm1, %v2647_v0, 0.0  ;;  %v2646_v17 = vmul.f32 %v4870_v8, %v4870_v8  ;;  %v2239_v52 = vld [vmem:[#allocation2 + $0xa0] sm:$0xff]  ;;  %v2242_v35 = vld [vmem:[#allocation2 + $0xb8] sm:$0xff] }
 0x498   : > { %2702 = vadd.xlane.f32.xlu1 %v2701_v15  ;;  %v3534_v22 = vpop.f32.mrf.mxu1  ;;  %v2241_v15 = vld [vmem:[#allocation2 + $0xb0] sm:$0xff] }
 0x499   : > { %v4880_v46 = vadd.f32 %v2584_v2, %v2231_v7  ;;  %v2587_v27 = vmul.f32 %v3534_v22, %v2234_v61  ;;  %v2698_v20 = vsel %vm1472_vm1, %v2646_v17, 0.0  ;;  %v2649_v23 = vmul.f32 %v4875_v13, %v4875_v13 }
 0x49a   : > { %2699 = vadd.xlane.f32.xlu0 %v2698_v20  ;;  %v2483_v1 = vpop.f32.mrf.mxu1 }
 0x49b   : > { %v4885_v43 = vadd.f32 %v2587_v27, %v2234_v61  ;;  %v2586_v21 = vmul.f32 %v2483_v1, %v2233_v19  ;;  %v2707_v26 = vsel %vm1472_vm1, %v2649_v23, 0.0  ;;  %v2648_v32 = vmul.f32 %v4880_v46, %v4880_v46  ;;  %v2244_v23 = vld [vmem:[#allocation2 + $0xc8] sm:$0xff] }
 0x49c   : > { %2708 = vadd.xlane.f32.xlu1 %v2707_v26  ;;  %v3537_v33 = vpop.f32.mrf.mxu1 }
 0x49d   : > { %v4890_v12 = vadd.f32 %v2586_v21, %v2233_v19  ;;  %v2589_v49 = vmul.f32 %v3537_v33, %v2236_v6  ;;  %v2704_v54 = vsel %vm1472_vm1, %v2648_v32, 0.0  ;;  %v2651_v5 = vmul.f32 %v4885_v43, %v4885_v43  ;;  %v2243_v33 = vld [vmem:[#allocation2 + $0xc0] sm:$0xff] }
 0x49e   : > { %2705 = vadd.xlane.f32.xlu0 %v2704_v54  ;;  %v2493_v38 = vpop.f32.mrf.mxu1 }
 0x49f   : > { %v4895_v24 = vadd.f32 %v2589_v49, %v2236_v6  ;;  %v2588_v45 = vmul.f32 %v2493_v38, %v2235_v59  ;;  %v2713_v44 = vsel %vm1472_vm1, %v2651_v5, 0.0  ;;  %v2650_v41 = vmul.f32 %v4890_v12, %v4890_v12 }
 0x4a0   : > { %2714 = vadd.xlane.f32.xlu1 %v2713_v44  ;;  %v3540_v47 = vpop.f32.mrf.mxu1 }
 0x4a1   : > { %v4900_v29 = vadd.f32 %v2588_v45, %v2235_v59  ;;  %v2591_v28 = vmul.f32 %v3540_v47, %v2238_v25  ;;  %v2710_v36 = vsel %vm1472_vm1, %v2650_v41, 0.0  ;;  %v2653_v39 = vmul.f32 %v4895_v24, %v4895_v24 }
 0x4a2   : > { %2711 = vadd.xlane.f32.xlu0 %v2710_v36  ;;  %v2503_v58 = vpop.f32.mrf.mxu1 }
 0x4a3   : > { %v4905_v60 = vadd.f32 %v2591_v28, %v2238_v25  ;;  %v2590_v63 = vmul.f32 %v2503_v58, %v2237_v48  ;;  %v2719_v57 = vsel %vm1472_vm1, %v2653_v39, 0.0  ;;  %v2652_v51 = vmul.f32 %v4900_v29, %v4900_v29  ;;  %v2246_v25 = vld [vmem:[#allocation2 + $0xd8] sm:$0xff]  ;;  %v2245_v28 = vld [vmem:[#allocation2 + $0xd0] sm:$0xff] }
 0x4a4   : > { %2720 = vadd.xlane.f32.xlu1 %v2719_v57  ;;  %v3543_v53 = vpop.f32.mrf.mxu1  ;;  %v2248_v57 = vld [vmem:[#allocation2 + $0xe8] sm:$0xff] }
 0x4a5   : > { %v4910_v9 = vadd.f32 %v2590_v63, %v2237_v48  ;;  %v2593_v14 = vmul.f32 %v3543_v53, %v2240_v30  ;;  %v2716_v62 = vsel %vm1472_vm1, %v2652_v51, 0.0  ;;  %v2655_v18 = vmul.f32 %v4905_v60, %v4905_v60 }
 0x4a6   : > { %2717 = vadd.xlane.f32.xlu0 %v2716_v62  ;;  %v2513_v7 = vpop.f32.mrf.mxu1 }
 0x4a7   : > { %v4915_v4 = vadd.f32 %v2593_v14, %v2240_v30  ;;  %v2592_v0 = vmul.f32 %v2513_v7, %v2239_v52  ;;  %v2725_v37 = vsel %vm1472_vm1, %v2655_v18, 0.0  ;;  %v2654_v61 = vmul.f32 %v4910_v9, %v4910_v9  ;;  %v2247_v18 = vld [vmem:[#allocation2 + $0xe0] sm:$0xff] }
 0x4a8   : > { %2726 = vadd.xlane.f32.xlu1 %v2725_v37  ;;  %v3546_v2 = vpop.f32.mrf.mxu1 }
 0x4a9   : > { %v4920_v17 = vadd.f32 %v2592_v0, %v2239_v52  ;;  %v2595_v22 = vmul.f32 %v3546_v2, %v2242_v35  ;;  %v2722_v19 = vsel %vm1472_vm1, %v2654_v61, 0.0  ;;  %v2657_v27 = vmul.f32 %v4915_v4, %v4915_v4  ;;  %v2250_v2 = vld [vmem:[#allocation2 + $0xf8] sm:$0xff] }
 0x4aa   : > { %2723 = vadd.xlane.f32.xlu0 %v2722_v19  ;;  %v2523_v20 = vpop.f32.mrf.mxu1 }
 0x4ab   : > { %v4925_v1 = vadd.f32 %v2595_v22, %v2242_v35  ;;  %v2594_v6 = vmul.f32 %v2523_v20, %v2241_v15  ;;  %v2731_v21 = vsel %vm1472_vm1, %v2657_v27, 0.0  ;;  %v2656_v26 = vmul.f32 %v4920_v17, %v4920_v17 }
 0x4ac   : > { %2732 = vadd.xlane.f32.xlu1 %v2731_v21  ;;  %v3549_v32 = vpop.f32.mrf.mxu1 }
 0x4ad   : > { %v4930_v59 = vadd.f32 %v2594_v6, %v2241_v15  ;;  %v2597_v49 = vmul.f32 %v3549_v32, %v2244_v23  ;;  %v2728_v54 = vsel %vm1472_vm1, %v2656_v26, 0.0  ;;  %v2659_v5 = vmul.f32 %v4925_v1, %v4925_v1 }
 0x4ae   : > { %2729 = vadd.xlane.f32.xlu0 %v2728_v54  ;;  %v2533_v38 = vpop.f32.mrf.mxu1 }
 0x4af   : > { %v4935_v45 = vadd.f32 %v2597_v49, %v2244_v23  ;;  %v2596_v44 = vmul.f32 %v2533_v38, %v2243_v33  ;;  %v2737_v41 = vsel %vm1472_vm1, %v2659_v5, 0.0  ;;  %v2658_v47 = vmul.f32 %v4930_v59, %v4930_v59  ;;  %v2249_v23 = vld [vmem:[#allocation2 + $0xf0] sm:$0xff] }
 0x4b0   : > { %2738 = vadd.xlane.f32.xlu1 %v2737_v41  ;;  %v3552_v48 = vpop.f32.mrf.mxu1 }
 0x4b1   : > { %v4940_v36 = vadd.f32 %v2596_v44, %v2243_v33  ;;  %v2599_v39 = vmul.f32 %v3552_v48, %v2246_v25  ;;  %v2734_v58 = vsel %vm1472_vm1, %v2658_v47, 0.0  ;;  %v2661_v30 = vmul.f32 %v4935_v45, %v4935_v45 }
 0x4b2   : > { %2735 = vadd.xlane.f32.xlu0 %v2734_v58  ;;  %v2543_v63 = vpop.f32.mrf.mxu1 }
 0x4b3   : > { %v4945_v51 = vadd.f32 %v2599_v39, %v2246_v25  ;;  %v2598_v53 = vmul.f32 %v2543_v63, %v2245_v28  ;;  %v2743_v52 = vsel %vm1472_vm1, %v2661_v30, 0.0  ;;  %v2660_v14 = vmul.f32 %v4940_v36, %v4940_v36 }
 0x4b4   : > { %2744 = vadd.xlane.f32.xlu1 %v2743_v52  ;;  %v3555_v62 = vpop.f32.mrf.mxu1 }
 0x4b5   : > { %v4950_v7 = vadd.f32 %v2598_v53, %v2245_v28  ;;  %v2601_v35 = vmul.f32 %v3555_v62, %v2248_v57  ;;  %v2740_v0 = vsel %vm1472_vm1, %v2660_v14, 0.0  ;;  %v2663_v37 = vmul.f32 %v4945_v51, %v4945_v51 }
 0x4b6   : > { %2741 = vadd.xlane.f32.xlu0 %v2740_v0  ;;  %v2553_v61 = vpop.f32.mrf.mxu1 }
 0x4b7   : > { %v4955_v15 = vadd.f32 %v2601_v35, %v2248_v57  ;;  %v2600_v22 = vmul.f32 %v2553_v61, %v2247_v18  ;;  %v2749_v19 = vsel %vm1472_vm1, %v2663_v37, 0.0  ;;  %v2662_v27 = vmul.f32 %v4950_v7, %v4950_v7 }
 0x4b8   : > { %2750 = vadd.xlane.f32.xlu1 %v2749_v19  ;;  %v3558_v20 = vpop.f32.mrf.mxu1 }
 0x4b9   : > { %v4960_v6 = vadd.f32 %v2600_v22, %v2247_v18  ;;  %v2603_v21 = vmul.f32 %v3558_v20, %v2250_v2  ;;  %v2746_v26 = vsel %vm1472_vm1, %v2662_v27, 0.0  ;;  %v2665_v32 = vmul.f32 %v4955_v15, %v4955_v15 }
 0x4ba   : > { %2747 = vadd.xlane.f32.xlu0 %v2746_v26  ;;  %v2563_v33 = vpop.f32.mrf.mxu1 }
 0x4bb   : > { %v4965_v49 = vadd.f32 %v2603_v21, %v2250_v2  ;;  %v2602_v54 = vmul.f32 %v2563_v33, %v2249_v23  ;;  %v2755_v5 = vsel %vm1472_vm1, %v2665_v32, 0.0  ;;  %v2664_v38 = vmul.f32 %v4960_v6, %v4960_v6 }
 0x4bc   : > { %2756 = vadd.xlane.f32.xlu1 %v2755_v5 }
 0x4bd   : > { %v4970_v25 = vadd.f32 %v2602_v54, %v2249_v23  ;;  %v2752_v44 = vsel %vm1472_vm1, %v2664_v38, 0.0  ;;  %v2667_v41 = vmul.f32 %v4965_v49, %v4965_v49 }
 0x4be   : > { %2753 = vadd.xlane.f32.xlu0 %v2752_v44 }
 0x4bf   : > { %v2761_v47 = vsel %vm1472_vm1, %v2667_v41, 0.0  ;;  %v2666_v48 = vmul.f32 %v4970_v25, %v4970_v25 }
 0x4c0   : > { %2762 = vadd.xlane.f32.xlu1 %v2761_v47 }
 0x4c1   : > { %v2758_v28 = vsel %vm1472_vm1, %v2666_v48, 0.0 }
 0x4c2   : > { %2759 = vadd.xlane.f32.xlu0 %v2758_v28 }
 0x50d   : > { %v2673_v39 = vpop.xlane.xlu1 %2672 }
 0x50e   : > { %v2765_v58 = vmax.f32 %v2673_v39, 1e-24 }
 0x50f   : > { %v2670_v30 = vpop.xlane.xlu0 %2669 }
 0x510   : > { %3856 = vrsqrt.f32 %v2765_v58  ;;  %v2764_v63 = vmax.f32 %v2670_v30, 1e-24 }
 0x511   : > { %v2679_v57 = vpop.xlane.xlu1 %2678 }
 0x512   : > { %3858 = vrsqrt.f32 %v2764_v63  ;;  %v2767_v53 = vmax.f32 %v2679_v57, 1e-24 }
 0x513   : > { %v2676_v52 = vpop.xlane.xlu0 %2675 }
 0x514   : > { %3860 = vrsqrt.f32 %v2767_v53  ;;  %v2766_v14 = vmax.f32 %v2676_v52, 1e-24 }
 0x515   : > { %v2685_v62 = vpop.xlane.xlu1 %2684 }
 0x516   : > { %3862 = vrsqrt.f32 %v2766_v14  ;;  %v2769_v18 = vmax.f32 %v2685_v62, 1e-24 }
 0x517   : > { %v2682_v35 = vpop.xlane.xlu0 %2681 }
 0x518   : > { %3864 = vrsqrt.f32 %v2769_v18  ;;  %v2768_v0 = vmax.f32 %v2682_v35, 1e-24 }
 0x519   : > { %v2691_v37 = vpop.xlane.xlu1 %2690 }
 0x51a   : > { %3866 = vrsqrt.f32 %v2768_v0  ;;  %v2771_v61 = vmax.f32 %v2691_v37, 1e-24 }
 0x51b   : > { %v2688_v2 = vpop.xlane.xlu0 %2687 }
 0x51c   : > { %3868 = vrsqrt.f32 %v2771_v61  ;;  %v2770_v22 = vmax.f32 %v2688_v2, 1e-24 }
 0x51d   : > { %v3857_v19 = vpop.eup %3856  ;;  %v2697_v27 = vpop.xlane.xlu1 %2696 }
 0x51e   : > { %v2829_v20 = vmul.f32 %v3857_v19, %v4819_v3  ;;  %3870 = vrsqrt.f32 %v2770_v22  ;;  %v2773_v23 = vmax.f32 %v2697_v27, 1e-24 }
 0x51f   : > { %v3859_v21 = vpop.eup %3858  ;;  %v2694_v26 = vpop.xlane.xlu0 %2693 }
 0x520   : > { %2861 = vst.msk [vmem:[%s5158_s4 + $0x8] sm:$0xff] %vm1472_vm1, %v2829_v20  ;;  %v2828_v32 = vmul.f32 %v3859_v21, %v4821_v11  ;;  %3872 = vrsqrt.f32 %v2773_v23  ;;  %v2772_v33 = vmax.f32 %v2694_v26, 1e-24 }
 0x521   : > { %v3861_v54 = vpop.eup %3860  ;;  %v2703_v5 = vpop.xlane.xlu1 %2702 }
 0x522   : > { %2860 = vst.msk [vmem:[%s5158_s4] sm:$0xff] %vm1472_vm1, %v2828_v32  ;;  %v2831_v3 = vmul.f32 %v3861_v54, %v4825_v42  ;;  %3874 = vrsqrt.f32 %v2772_v33  ;;  %v2775_v38 = vmax.f32 %v2703_v5, 1e-24 }
 0x523   : > { %v3863_v44 = vpop.eup %3862  ;;  %v2700_v41 = vpop.xlane.xlu0 %2699 }
 0x524   : > { %2863 = vst.msk [vmem:[%s5158_s4 + $0x18] sm:$0xff] %vm1472_vm1, %v2831_v3  ;;  %v2830_v11 = vmul.f32 %v3863_v44, %v4830_v50  ;;  %3876 = vrsqrt.f32 %v2775_v38  ;;  %v2774_v47 = vmax.f32 %v2700_v41, 1e-24 }
 0x525   : > { %v3865_v48 = vpop.eup %3864  ;;  %v2709_v28 = vpop.xlane.xlu1 %2708 }
 0x526   : > { %2862 = vst.msk [vmem:[%s5158_s4 + $0x10] sm:$0xff] %vm1472_vm1, %v2830_v11  ;;  %v2833_v42 = vmul.f32 %v3865_v48, %v4835_v40  ;;  %3878 = vrsqrt.f32 %v2774_v47  ;;  %v2777_v39 = vmax.f32 %v2709_v28, 1e-24 }
 0x527   : > { %v3867_v58 = vpop.eup %3866  ;;  %v2706_v30 = vpop.xlane.xlu0 %2705 }
 0x528   : > { %2865 = vst.msk [vmem:[%s5158_s4 + $0x28] sm:$0xff] %vm1472_vm1, %v2833_v42  ;;  %v2832_v50 = vmul.f32 %v3867_v58, %v4840_v56  ;;  %3880 = vrsqrt.f32 %v2777_v39  ;;  %v2776_v63 = vmax.f32 %v2706_v30, 1e-24 }
 0x529   : > { %v3869_v57 = vpop.eup %3868  ;;  %v2715_v53 = vpop.xlane.xlu1 %2714 }
 0x52a   : > { %2864 = vst.msk [vmem:[%s5158_s4 + $0x20] sm:$0xff] %vm1472_vm1, %v2832_v50  ;;  %v2835_v40 = vmul.f32 %v3869_v57, %v4845_v34  ;;  %3882 = vrsqrt.f32 %v2776_v63  ;;  %v2779_v52 = vmax.f32 %v2715_v53, 1e-24 }
 0x52b   : > { %v3871_v14 = vpop.eup %3870  ;;  %v2712_v62 = vpop.xlane.xlu0 %2711 }
 0x52c   : > { %2867 = vst.msk [vmem:[%s5158_s4 + $0x38] sm:$0xff] %vm1472_vm1, %v2835_v40  ;;  %v2834_v56 = vmul.f32 %v3871_v14, %v4850_v16  ;;  %3884 = vrsqrt.f32 %v2779_v52  ;;  %v2778_v18 = vmax.f32 %v2712_v62, 1e-24 }
 0x52d   : > { %v3873_v35 = vpop.eup %3872  ;;  %v2721_v0 = vpop.xlane.xlu1 %2720 }
 0x52e   : > { %2866 = vst.msk [vmem:[%s5158_s4 + $0x30] sm:$0xff] %vm1472_vm1, %v2834_v56  ;;  %v2837_v34 = vmul.f32 %v3873_v35, %v4855_v31  ;;  %3886 = vrsqrt.f32 %v2778_v18  ;;  %v2781_v37 = vmax.f32 %v2721_v0, 1e-24 }
 0x52f   : > { %v3875_v61 = vpop.eup %3874  ;;  %v2718_v2 = vpop.xlane.xlu0 %2717 }
 0x530   : > { %2869 = vst.msk [vmem:[%s5158_s4 + $0x48] sm:$0xff] %vm1472_vm1, %v2837_v34  ;;  %v2836_v16 = vmul.f32 %v3875_v61, %v4860_v10  ;;  %3888 = vrsqrt.f32 %v2781_v37  ;;  %v2780_v22 = vmax.f32 %v2718_v2, 1e-24 }
 0x531   : > { %v3877_v19 = vpop.eup %3876  ;;  %v2727_v27 = vpop.xlane.xlu1 %2726 }
 0x532   : > { %2868 = vst.msk [vmem:[%s5158_s4 + $0x40] sm:$0xff] %vm1472_vm1, %v2836_v16  ;;  %v2839_v31 = vmul.f32 %v3877_v19, %v4865_v55  ;;  %3890 = vrsqrt.f32 %v2780_v22  ;;  %v2783_v20 = vmax.f32 %v2727_v27, 1e-24 }
 0x533   : > { %v3879_v23 = vpop.eup %3878  ;;  %v2724_v21 = vpop.xlane.xlu0 %2723 }
 0x534   : > { %2871 = vst.msk [vmem:[%s5158_s4 + $0x58] sm:$0xff] %vm1472_vm1, %v2839_v31  ;;  %v2838_v10 = vmul.f32 %v3879_v23, %v4870_v8  ;;  %3892 = vrsqrt.f32 %v2783_v20  ;;  %v2782_v26 = vmax.f32 %v2724_v21, 1e-24 }
 0x535   : > { %v3881_v32 = vpop.eup %3880  ;;  %v2733_v33 = vpop.xlane.xlu1 %2732 }
 0x536   : > { %2870 = vst.msk [vmem:[%s5158_s4 + $0x50] sm:$0xff] %vm1472_vm1, %v2838_v10  ;;  %v2841_v55 = vmul.f32 %v3881_v32, %v4875_v13  ;;  %3894 = vrsqrt.f32 %v2782_v26  ;;  %v2785_v54 = vmax.f32 %v2733_v33, 1e-24 }
 0x537   : > { %v3883_v5 = vpop.eup %3882  ;;  %v2730_v3 = vpop.xlane.xlu0 %2729 }
 0x538   : > { %2873 = vst.msk [vmem:[%s5158_s4 + $0x68] sm:$0xff] %vm1472_vm1, %v2841_v55  ;;  %v2840_v8 = vmul.f32 %v3883_v5, %v4880_v46  ;;  %3896 = vrsqrt.f32 %v2785_v54  ;;  %v2784_v38 = vmax.f32 %v2730_v3, 1e-24 }
 0x539   : > { %v3885_v44 = vpop.eup %3884  ;;  %v2739_v41 = vpop.xlane.xlu1 %2738 }
 0x53a   : > { %2872 = vst.msk [vmem:[%s5158_s4 + $0x60] sm:$0xff] %vm1472_vm1, %v2840_v8  ;;  %v2843_v13 = vmul.f32 %v3885_v44, %v4885_v43  ;;  %3898 = vrsqrt.f32 %v2784_v38  ;;  %v2787_v11 = vmax.f32 %v2739_v41, 1e-24 }
 0x53b   : > { %v3887_v47 = vpop.eup %3886  ;;  %v2736_v48 = vpop.xlane.xlu0 %2735 }
 0x53c   : > { %2875 = vst.msk [vmem:[%s5158_s4 + $0x78] sm:$0xff] %vm1472_vm1, %v2843_v13  ;;  %v2842_v46 = vmul.f32 %v3887_v47, %v4890_v12  ;;  %3900 = vrsqrt.f32 %v2787_v11  ;;  %v2786_v28 = vmax.f32 %v2736_v48, 1e-24 }
 0x53d   : > { %v3889_v42 = vpop.eup %3888  ;;  %v2745_v39 = vpop.xlane.xlu1 %2744 }
 0x53e   : > { %2874 = vst.msk [vmem:[%s5158_s4 + $0x70] sm:$0xff] %vm1472_vm1, %v2842_v46  ;;  %v2845_v43 = vmul.f32 %v3889_v42, %v4895_v24  ;;  %3902 = vrsqrt.f32 %v2786_v28  ;;  %v2789_v58 = vmax.f32 %v2745_v39, 1e-24 }
 0x53f   : > { %v3891_v30 = vpop.eup %3890  ;;  %v2742_v50 = vpop.xlane.xlu0 %2741 }
 0x540   : > { %2877 = vst.msk [vmem:[%s5158_s4 + $0x88] sm:$0xff] %vm1472_vm1, %v2845_v43  ;;  %v2844_v12 = vmul.f32 %v3891_v30, %v4900_v29  ;;  %3904 = vrsqrt.f32 %v2789_v58  ;;  %v2788_v63 = vmax.f32 %v2742_v50, 1e-24 }
 0x541   : > { %v3893_v57 = vpop.eup %3892  ;;  %v2751_v53 = vpop.xlane.xlu1 %2750 }
 0x542   : > { %2876 = vst.msk [vmem:[%s5158_s4 + $0x80] sm:$0xff] %vm1472_vm1, %v2844_v12  ;;  %v2847_v24 = vmul.f32 %v3893_v57, %v4905_v60  ;;  %3906 = vrsqrt.f32 %v2788_v63  ;;  %v2791_v40 = vmax.f32 %v2751_v53, 1e-24 }
 0x543   : > { %v3895_v52 = vpop.eup %3894  ;;  %v2748_v14 = vpop.xlane.xlu0 %2747 }
 0x544   : > { %2879 = vst.msk [vmem:[%s5158_s4 + $0x98] sm:$0xff] %vm1472_vm1, %v2847_v24  ;;  %v2846_v29 = vmul.f32 %v3895_v52, %v4910_v9  ;;  %3908 = vrsqrt.f32 %v2791_v40  ;;  %v2790_v62 = vmax.f32 %v2748_v14, 1e-24 }
 0x545   : > { %v3897_v56 = vpop.eup %3896  ;;  %v2757_v18 = vpop.xlane.xlu1 %2756 }
 0x546   : > { %2878 = vst.msk [vmem:[%s5158_s4 + $0x90] sm:$0xff] %vm1472_vm1, %v2846_v29  ;;  %v2849_v60 = vmul.f32 %v3897_v56, %v4915_v4  ;;  %3910 = vrsqrt.f32 %v2790_v62  ;;  %v2793_v35 = vmax.f32 %v2757_v18, 1e-24 }
 0x547   : > { %v3899_v0 = vpop.eup %3898  ;;  %v2754_v34 = vpop.xlane.xlu0 %2753 }
 0x548   : > { %2881 = vst.msk [vmem:[%s5158_s4 + $0xa8] sm:$0xff] %vm1472_vm1, %v2849_v60  ;;  %v2848_v9 = vmul.f32 %v3899_v0, %v4920_v17  ;;  %3912 = vrsqrt.f32 %v2793_v35  ;;  %v2792_v37 = vmax.f32 %v2754_v34, 1e-24 }
 0x549   : > { %v3901_v61 = vpop.eup %3900  ;;  %v2763_v2 = vpop.xlane.xlu1 %2762 }
 0x54a   : > { %2880 = vst.msk [vmem:[%s5158_s4 + $0xa0] sm:$0xff] %vm1472_vm1, %v2848_v9  ;;  %v2851_v4 = vmul.f32 %v3901_v61, %v4925_v1  ;;  %3914 = vrsqrt.f32 %v2792_v37  ;;  %v2795_v16 = vmax.f32 %v2763_v2, 1e-24 }
 0x54b   : > { %v3903_v22 = vpop.eup %3902  ;;  %v2760_v19 = vpop.xlane.xlu0 %2759 }
 0x54c   : > { %2883 = vst.msk [vmem:[%s5158_s4 + $0xb8] sm:$0xff] %vm1472_vm1, %v2851_v4  ;;  %v2850_v17 = vmul.f32 %v3903_v22, %v4930_v59  ;;  %3916 = vrsqrt.f32 %v2795_v16  ;;  %v2794_v27 = vmax.f32 %v2760_v19, 1e-24 }
 0x54d   : > { %v3905_v31 = vpop.eup %3904 }
 0x54e   : > { %2882 = vst.msk [vmem:[%s5158_s4 + $0xb0] sm:$0xff] %vm1472_vm1, %v2850_v17  ;;  %v2853_v1 = vmul.f32 %v3905_v31, %v4935_v45  ;;  %3918 = vrsqrt.f32 %v2794_v27 }
 0x54f   : > { %v3907_v20 = vpop.eup %3906 }
 0x550   : > { %2885 = vst.msk [vmem:[%s5158_s4 + $0xc8] sm:$0xff] %vm1472_vm1, %v2853_v1  ;;  %v2852_v23 = vmul.f32 %v3907_v20, %v4940_v36 }
 0x551   : > { %v3909_v59 = vpop.eup %3908 }
 0x552   : > { %2884 = vst.msk [vmem:[%s5158_s4 + $0xc0] sm:$0xff] %vm1472_vm1, %v2852_v23  ;;  %v2855_v21 = vmul.f32 %v3909_v59, %v4945_v51 }
 0x553   : > { %v3911_v10 = vpop.eup %3910 }
 0x554   : > { %2887 = vst.msk [vmem:[%s5158_s4 + $0xd8] sm:$0xff] %vm1472_vm1, %v2855_v21  ;;  %v2854_v45 = vmul.f32 %v3911_v10, %v4950_v7 }
 0x555   : > { %v3913_v26 = vpop.eup %3912 }
 0x556   : > { %2886 = vst.msk [vmem:[%s5158_s4 + $0xd0] sm:$0xff] %vm1472_vm1, %v2854_v45  ;;  %v2857_v36 = vmul.f32 %v3913_v26, %v4955_v15 }
 0x557   : > { %v3915_v32 = vpop.eup %3914 }
 0x558   : > { %2889 = vst.msk [vmem:[%s5158_s4 + $0xe8] sm:$0xff] %vm1472_vm1, %v2857_v36  ;;  %v2856_v51 = vmul.f32 %v3915_v32, %v4960_v6 }
 0x559   : > { %v3917_v33 = vpop.eup %3916 }
 0x55a   : > { %2888 = vst.msk [vmem:[%s5158_s4 + $0xe0] sm:$0xff] %vm1472_vm1, %v2856_v51  ;;  %v2859_v7 = vmul.f32 %v3917_v33, %v4965_v49 }
 0x55b   : > { %v3919_v55 = vpop.eup %3918 }
 0x55c   : > { %2891 = vst.msk [vmem:[%s5158_s4 + $0xf8] sm:$0xff] %vm1472_vm1, %v2859_v7  ;;  %v2858_v15 = vmul.f32 %v3919_v55, %v4970_v25 }
 0x55e   : > { %2890 = vst.msk [vmem:[%s5158_s4 + $0xf0] sm:$0xff] %vm1472_vm1, %v2858_v15 }
 0x55f PF: > { %s14_s19 = sadd.s32 1, %s3958_s19   ;;  %s5159_s15 = smov %s3946_s16 }
 0x560   : > { %p11_p12 = scmp.ge.s32.totalorder %s14_s19, 4   ;;  %s5160_s16 = smov %s4021_s23 }
 0x561   : > { %s5161_s17 = smov %s3954_s18  ;;  %s5162_s18 = smov %s5164_s20 }
 0x562   :  { %13 = sbr.rel (!%p11_p12) target bundleno = 3 (0x3), region = 108 }

// kernel: graphconv_forward.6
= control target key start
LH: loop header
LB: loop body
LE: loop exit
PB: predicated region body
PF: predicated region fallthrough
CT: control target
= control target key end

     0   :  { %s4100_s0 = inlined_call_operand.vmem [shape: s32[3], index: 0, kind: input, shape index: {}]   ;;  %s4101_s2 = inlined_call_operand.vmem [shape: s32[1,2048], index: 2, kind: input, shape index: {}]   ;;  %s4102_s3 = inlined_call_operand.vmem [shape: bf16[2048,32], index: 3, kind: input, shape index: {}]   ;;  %s4103_s4 = inlined_call_operand.vmem [shape: f32[768,32], index: 4, kind: output, shape index: {}]   ;;  %s4104_s1 = inlined_call_operand.vmem [shape: s32[3], index: 1, kind: input, shape index: {}]  }
   0x1   :  { %s9_s17 = sshll.u32 %s4100_s0, 4  ;;  %s13_s20 = sshll.u32 %s4104_s1, 4  ;;  %s10_s17 = int_to_ptr.vmem [resolvable:$true] %s9_s17  ;;  %s14_s20 = int_to_ptr.vmem [resolvable:$true] %s13_s20 }
   0x2   :  { %s2596_s21 = scalar_lea.vmem %s10_s17, 16  ;;  %p2601_p1 = scmp.lt.s32.totalorder %s10_s17, %s10_s17 }
   0x3   :  { %p2597_p0 = scmp.ne.s32.totalorder %s10_s17, %s2596_s21  ;;  %p2602_p2 = scmp.lt.s32.totalorder %s2596_s21, %s2596_s21 }
   0x5   :  { %p2603_p3 = por %p2602_p2, %p2601_p1 }
   0x7   :  { %p2604_p4 = pnand %p2603_p3, %p2597_p0 }
   0x9   :  { %2607 = shalt.err (!%p2604_p4)  }
   0xa   :  { %s2662_s22 = smov [#allocation4]   ;;  %s2608_s23 = scalar_lea.vmem %s14_s20, 16 }
   0xb   :  { %12 = dma.vmem_to_smem %s10_s17, 16, %s2662_s22, [#allocation3] }
   0xc   :  { %p2609_p5 = scmp.ne.s32.totalorder %s14_s20, %s2608_s23  ;;  %p2613_p6 = scmp.lt.s32.totalorder %s14_s20, %s14_s20 }
   0xd   :  { %p2614_p7 = scmp.lt.s32.totalorder %s2608_s23, %s2608_s23 }
   0xf   :  { %p2615_p8 = por %p2614_p7, %p2613_p6 }
  0x11   :  { %p2616_p9 = pnand %p2615_p8, %p2609_p5 }
  0x13   :  { %2619 = shalt.err (!%p2616_p9)  }
  0x14   :  { %s2663_s0 = smov [#allocation5]  }
  0x15   :  { %16 = dma.vmem_to_smem %s14_s20, 16, %s2663_s0, [#allocation3] }
  0x16   :  { %2640 = dma.done.wait [#allocation3], 32 }
  0x17   :  { %2641 = vsyncadd [#allocation3], 4294967264 }
  0x18   :  { %18 = sfence }
  0x19   :  { %s2697_s1 = smov 0   ;;  %s2699_s24 = smov 0  }
  0x1a   :  { %s2701_s25 = smov 0   ;;  %s2703_s26 = smov 0  }
  0x1b   :  { %s2705_s27 = smov 0  }
  0x1c LB: > { %s33_s28 = sadd.s32 1, %s2652_s25  ;;  %s36_s29 = sadd.s32 1, %s2656_s26  ;;  %s2660_s27 = sphi %s2705_s27, %s24_s27   ;;  %s2656_s26 = sphi %s2703_s26, %s4308_s26   ;;  %s2652_s25 = sphi %s2701_s25, %s4307_s25   ;;  %s2648_s24 = sphi %s2699_s24, %s4306_s24   ;;  %s2644_s1 = sphi %s2697_s1, %s4305_s1  }
  0x1d   : > { %p34_p10 = scmp.ge.s32.totalorder %s33_s28, 4  ;;  %p1930_p11 = scmp.ge.s32.totalorder %s2660_s27, 1 }
  0x1e   : > { %p211_p12 = scmp.lt.s32.totalorder %s2660_s27, 13 }
  0x1f   : > { %s4310_s28 = smov (%p34_p10, %s33_s28), 0  ;;  %s4312_s29 = smov (!%p34_p10, %s36_s29), %s2656_s26 }
  0x20   : > { %p212_p13 = pnand %p1930_p11, %p211_p12  ;;  %p38_p0 = scmp.ge.s32.totalorder %s4312_s29, 3 }
  0x21   : > { %s253_s30 = sld [smem:[#allocation5 + %s2648_s24]] (!%p212_p13)  ;;  %s1936_s5 = sshll.u32 (!%p212_p13), %s2648_s24, 5 }
  0x22   : > { %s4314_s29 = smov (%p38_p0, %s4312_s29), 0  ;;  %215 = sbr.rel (%p212_p13) target bundleno = 685 (0x2ad), region = 28 }
  0x23   : > { %p297_p1 = scmp.lt.s32.totalorder (!%p212_p13), %s1936_s5, 95  ;;  %s274_s6 = sld [smem:[#allocation5 + %s2648_s24]] (!%p212_p13) }
  0x24   : > { %s259_s7 = sld [smem:[#allocation4 + %s2648_s24]] (!%p212_p13)  ;;  %p1938_p8 = scmp.ne.s32.totalorder (!%p212_p13), %s2644_s1, 0 }
  0x25   : > { %s280_s14 = sld [smem:[#allocation4 + %s2648_s24]] (!%p212_p13) }
  0x27   : > { %s4316_s5 = smov (!%p297_p1, %s1936_s5), 95  ;;  %s1931_s8 = sadd.s32 4294967295, %s253_s30 }
  0x28   : > { %s1937_s9 = sshll.u32 %s4316_s5, 3  ;;  %p255_p2 = scmp.gt.s32.totalorder %s1931_s8, 0 }
  0x29   : > { %s2738_s12 = scalar_lea.vmem %s4103_s4, %s1937_s9  ;;  %s1933_s13 = sadd.s32 4294967295, %s274_s6 }
  0x2a   : > { %s4318_s8 = smov (!%p255_p2, %s1931_s8), 0  ;;  %p276_p3 = scmp.gt.s32.totalorder %s1933_s13, 0 }
  0x2b   : > { %p257_p4 = scmp.lt.s32.totalorder %s2644_s1, %s4318_s8 }
  0x2c   : > { %s4320_s13 = smov (!%p276_p3, %s1933_s13), 0 }
  0x2d   : > { %s258_s15 = scalar_select %p257_p4, %s2644_s1, %s4318_s8 }
  0x2e   : > { %p278_p5 = scmp.lt.s32.totalorder %s2644_s1, %s4320_s13 }
  0x2f   : > { %s260_s16 = sadd.s32 %s259_s7, %s258_s15 }
  0x30   : > { %s1932_s17 = sshll.u32 %s260_s16, 2 }
  0x31   : > { %p262_p6 = scmp.lt.s32.totalorder %s1932_s17, 15 }
  0x32   : > { %s279_s18 = scalar_select %p278_p5, %s2644_s1, %s4320_s13 }
  0x33   : > { %s4322_s17 = smov (!%p262_p6, %s1932_s17), 15 }
  0x34   : > { %s281_s19 = sadd.s32 %s280_s14, %s279_s18  ;;  %s264_s22 = scalar_lea.vmem %s4101_s2, %s4322_s17 }
  0x35   : > { %s1934_s23 = sshll.u32 %s281_s19, 6 }
  0x36   : > { %p283_p7 = scmp.lt.s32.totalorder %s1934_s23, 255  ;;  %306 = sbr.rel (%p1938_p8) target bundleno = 76 (0x4c), region = 32 }
  0x38   : > { %s4324_s23 = smov (!%p283_p7, %s1934_s23), 255 }
  0x39   : > { %s1935_s0 = sshll.u32 %s4324_s23, 2 }
  0x3a   : > { %s2754_s6 = scalar_lea.vmem %s4102_s3, %s1935_s0 }
  0x3b   : > { %vm307_vm0 = vcmask 261120   ;;  %v2664_v0 = vmov 0.0  }
  0x3c   : > { %308 = vst.msk [vmem:[#allocation2] sm:$0xff] %vm307_vm0, %v2664_v0  ;;  %309 = vst.msk [vmem:[#allocation2 + $0x8] sm:$0xff] %vm307_vm0, %v2664_v0 }
  0x3d   : > { %310 = vst.msk [vmem:[#allocation2 + $0x10] sm:$0xff] %vm307_vm0, %v2664_v0  ;;  %311 = vst.msk [vmem:[#allocation2 + $0x18] sm:$0xff] %vm307_vm0, %v2664_v0 }
  0x3e   : > { %312 = vst.msk [vmem:[#allocation2 + $0x20] sm:$0xff] %vm307_vm0, %v2664_v0  ;;  %313 = vst.msk [vmem:[#allocation2 + $0x28] sm:$0xff] %vm307_vm0, %v2664_v0 }
  0x3f   : > { %314 = vst.msk [vmem:[#allocation2 + $0x30] sm:$0xff] %vm307_vm0, %v2664_v0  ;;  %315 = vst.msk [vmem:[#allocation2 + $0x38] sm:$0xff] %vm307_vm0, %v2664_v0 }
  0x40   : > { %316 = vst.msk [vmem:[#allocation2 + $0x40] sm:$0xff] %vm307_vm0, %v2664_v0  ;;  %317 = vst.msk [vmem:[#allocation2 + $0x48] sm:$0xff] %vm307_vm0, %v2664_v0 }
  0x41   : > { %318 = vst.msk [vmem:[#allocation2 + $0x50] sm:$0xff] %vm307_vm0, %v2664_v0  ;;  %319 = vst.msk [vmem:[#allocation2 + $0x58] sm:$0xff] %vm307_vm0, %v2664_v0 }
  0x42   : > { %320 = vst.msk [vmem:[#allocation2 + $0x60] sm:$0xff] %vm307_vm0, %v2664_v0  ;;  %321 = vst.msk [vmem:[#allocation2 + $0x68] sm:$0xff] %vm307_vm0, %v2664_v0 }
  0x43   : > { %322 = vst.msk [vmem:[#allocation2 + $0x70] sm:$0xff] %vm307_vm0, %v2664_v0  ;;  %323 = vst.msk [vmem:[#allocation2 + $0x78] sm:$0xff] %vm307_vm0, %v2664_v0 }
  0x44   : > { %324 = vst.msk [vmem:[#allocation2 + $0x80] sm:$0xff] %vm307_vm0, %v2664_v0  ;;  %325 = vst.msk [vmem:[#allocation2 + $0x88] sm:$0xff] %vm307_vm0, %v2664_v0 }
  0x45   : > { %326 = vst.msk [vmem:[#allocation2 + $0x90] sm:$0xff] %vm307_vm0, %v2664_v0  ;;  %327 = vst.msk [vmem:[#allocation2 + $0x98] sm:$0xff] %vm307_vm0, %v2664_v0 }
  0x46   : > { %328 = vst.msk [vmem:[#allocation2 + $0xa0] sm:$0xff] %vm307_vm0, %v2664_v0  ;;  %329 = vst.msk [vmem:[#allocation2 + $0xa8] sm:$0xff] %vm307_vm0, %v2664_v0 }
  0x47   : > { %330 = vst.msk [vmem:[#allocation2 + $0xb0] sm:$0xff] %vm307_vm0, %v2664_v0  ;;  %331 = vst.msk [vmem:[#allocation2 + $0xb8] sm:$0xff] %vm307_vm0, %v2664_v0 }
  0x48   : > { %332 = vst.msk [vmem:[#allocation2 + $0xc0] sm:$0xff] %vm307_vm0, %v2664_v0  ;;  %333 = vst.msk [vmem:[#allocation2 + $0xc8] sm:$0xff] %vm307_vm0, %v2664_v0 }
  0x49   : > { %334 = vst.msk [vmem:[#allocation2 + $0xd0] sm:$0xff] %vm307_vm0, %v2664_v0  ;;  %335 = vst.msk [vmem:[#allocation2 + $0xd8] sm:$0xff] %vm307_vm0, %v2664_v0 }
  0x4a   : > { %336 = vst.msk [vmem:[#allocation2 + $0xe0] sm:$0xff] %vm307_vm0, %v2664_v0  ;;  %337 = vst.msk [vmem:[#allocation2 + $0xe8] sm:$0xff] %vm307_vm0, %v2664_v0 }
  0x4b   : > { %338 = vst.msk [vmem:[#allocation2 + $0xf0] sm:$0xff] %vm307_vm0, %v2664_v0  ;;  %339 = vst.msk [vmem:[#allocation2 + $0xf8] sm:$0xff] %vm307_vm0, %v2664_v0 }
  0x4c PF: > { %s340_s7 = sld [smem:[#allocation5 + %s2648_s24]] }
  0x52   : > { %p1939_p9 = scmp.ge.s32.totalorder %s2644_s1, %s340_s7 }
  0x53   : > { %s1940_s8 = sshll.u32 (!%p1939_p9), %s2648_s24, 8 }
  0x54   : > { %344 = sbr.rel (%p1939_p9) target bundleno = 456 (0x1c8), region = 36 }
  0x59   : > { %v2500_v1 = vld [vmem:[%s2754_s6 + $0x78] sm:$0xff]   ;;  %v2504_v5 = vld [vmem:[%s2754_s6 + $0x70] sm:$0xff]   ;;  %v2508_v9 = vld [vmem:[%s2754_s6 + $0x68] sm:$0xff]   ;;  %v347_v11 = vlaneseq  ;;  %v2834_v39 = vstv %s1940_s8 }
  0x5a   : > { %v2501_v2 = vld [vmem:[%s2754_s6 + $0xf8] sm:$0xff]   ;;  %2232 = vmatprep.subr.bf16.mxu0 %v2500_v1  ;;  %v2505_v6 = vld [vmem:[%s2754_s6 + $0xf0] sm:$0xff]   ;;  %v2509_v10 = vld [vmem:[%s2754_s6 + $0xe8] sm:$0xff]  }
  0x5b   : > { %v2502_v3 = vld [vmem:[%s2754_s6 + $0x38] sm:$0xff]   ;;  %2344 = vmatprep.subr.bf16.mxu1 %v2501_v2  ;;  %v2506_v7 = vld [vmem:[%s2754_s6 + $0x30] sm:$0xff]   ;;  %v2510_v12 = vld [vmem:[%s2754_s6 + $0x28] sm:$0xff]   ;;  %v2805_v16 = vshrl.u32 %v347_v11, 7 }
  0x5c   : > { %v2503_v4 = vld [vmem:[%s2754_s6 + $0xb8] sm:$0xff]   ;;  %2233 = vmatpush3.bf16.msra.mxu0 %v2502_v3  ;;  %v2507_v8 = vld [vmem:[%s2754_s6 + $0xb0] sm:$0xff]   ;;  %v2511_v13 = vld [vmem:[%s2754_s6 + $0xa8] sm:$0xff]  }
  0x5d   : > { %2345 = vmatpush3.bf16.msra.mxu1 %v2503_v4  ;;  %2234 = vmatprep.subr.bf16.mxu0 %v2504_v5  ;;  %v2512_v14 = vld [vmem:[%s2754_s6 + $0x60] sm:$0xff]   ;;  %v2516_v19 = vld [vmem:[%s2754_s6 + $0x58] sm:$0xff]   ;;  %v349_v21 = vadd.s32 8, %v2805_v16  ;;  %v419_v23 = vsub.s32 1, %v2805_v16  ;;  %v427_v25 = vsub.s32 3, %v2805_v16  ;;  %v2520_v26 = vld [vmem:[%s2754_s6 + $0x50] sm:$0xff]   ;;  %v381_v51 = vadd.s32 %v2834_v39, %v2805_v16 }
  0x5e   : > { %2346 = vmatprep.subr.bf16.mxu1 %v2505_v6  ;;  %v2513_v15 = vld [vmem:[%s2754_s6 + $0xe0] sm:$0xff]   ;;  %v2517_v20 = vld [vmem:[%s2754_s6 + $0xd8] sm:$0xff]   ;;  %v415_v27 = vsub.s32 0, %v2805_v16  ;;  %v2521_v28 = vld [vmem:[%s2754_s6 + $0xd0] sm:$0xff]   ;;  %v423_v29 = vsub.s32 2, %v2805_v16  ;;  %v350_v31 = vadd.s32 16, %v2805_v16 }
  0x5f   : > { %v2514_v17 = vld [vmem:[%s2754_s6 + $0x20] sm:$0xff]   ;;  %v2518_v22 = vld [vmem:[%s2754_s6 + $0x18] sm:$0xff]   ;;  %v2522_v30 = vld [vmem:[%s2754_s6 + $0x10] sm:$0xff]   ;;  %v351_v33 = vadd.s32 24, %v2805_v16  ;;  %v2827_v35 = vadd.s32 32, %v2805_v16  ;;  %v366_v37 = vadd.s32 144, %v2805_v16  ;;  %v382_v52 = vadd.s32 %v2834_v39, %v349_v21 }
  0x60   : > { %2235 = vmatpush3.bf16.msra.mxu0 %v2506_v7  ;;  %v2515_v18 = vld [vmem:[%s2754_s6 + $0xa0] sm:$0xff]   ;;  %v2519_v24 = vld [vmem:[%s2754_s6 + $0x98] sm:$0xff]   ;;  %v2523_v32 = vld [vmem:[%s2754_s6 + $0x90] sm:$0xff]   ;;  %v367_v40 = vadd.s32 152, %v2805_v16  ;;  %v368_v43 = vadd.s32 160, %v2805_v16  ;;  %v369_v46 = vadd.s32 168, %v2805_v16  ;;  %v383_v56 = vadd.s32 %v2834_v39, %v350_v31 }
  0x61   : > { %2347 = vmatpush3.bf16.msra.mxu1 %v2507_v8  ;;  %2236 = vmatprep.subr.bf16.mxu0 %v2508_v9  ;;  %v2524_v34 = vld [vmem:[%s2754_s6 + $0x48] sm:$0xff]   ;;  %v2839_v42 = vadd.s32 %v2834_v39, %v366_v37  ;;  %v2528_v44 = vld [vmem:[%s2754_s6 + $0x40] sm:$0xff]   ;;  %v370_v49 = vadd.s32 176, %v2805_v16  ;;  %v371_v54 = vadd.s32 184, %v2805_v16  ;;  %v384_v57 = vadd.s32 %v2834_v39, %v351_v33 }
  0x62   : > { %2348 = vmatprep.subr.bf16.mxu1 %v2509_v10  ;;  %v2525_v36 = vld [vmem:[%s2754_s6 + $0xc8] sm:$0xff]   ;;  %v2844_v45 = vadd.s32 %v2834_v39, %v367_v40  ;;  %v2529_v47 = vld [vmem:[%s2754_s6 + $0xc0] sm:$0xff]   ;;  %v2849_v48 = vadd.s32 %v2834_v39, %v368_v43  ;;  %v2857_v53 = vadd.s32 %v2834_v39, %v369_v46  ;;  %v372_v59 = vadd.s32 192, %v2805_v16 }
  0x63   : > { %v2526_v38 = vld [vmem:[%s2754_s6 + $0x8] sm:$0xff]   ;;  %v2530_v50 = vld [vmem:[%s2754_s6] sm:$0xff]   ;;  %v2864_v58 = vadd.s32 %v2834_v39, %v370_v49  ;;  %v353_v61 = vadd.s32 40, %v2805_v16  ;;  %v2874_v62 = vadd.s32 %v2834_v39, %v371_v54  ;;  %v373_v63 = vadd.s32 200, %v2805_v16 }
  0x64   : > { %2237 = vmatpush3.bf16.msra.mxu0 %v2510_v12  ;;  %v2527_v41 = vld [vmem:[%s2754_s6 + $0x88] sm:$0xff]   ;;  %v2531_v55 = vld [vmem:[%s2754_s6 + $0x80] sm:$0xff]   ;;  %v374_v0 = vadd.s32 208, %v2805_v16  ;;  %v2887_v5 = vadd.s32 %v2834_v39, %v372_v59  ;;  %v2665_v8 = vmov 1.0|1.0   ;;  %v385_v9 = vadd.s32 %v2834_v39, %v2827_v35 }
  0x65   : > { %2349 = vmatpush3.bf16.msra.mxu1 %v2511_v13  ;;  %2238 = vmatprep.subr.bf16.mxu0 %v2512_v14  ;;  %v345_v60 = vld [vmem:[%s264_s22] sm:$0xf]  ;;  %v2890_v6 = vadd.s32 %v2834_v39, %v373_v63  ;;  %v386_v10 = vadd.s32 %v2834_v39, %v353_v61  ;;  %v354_v11 = vadd.s32 48, %v2805_v16  ;;  %v355_v12 = vadd.s32 56, %v2805_v16 }
  0x66   : > { %2350 = vmatprep.subr.bf16.mxu1 %v2513_v15  ;;  %v2878_v1 = vrot.slane %v345_v60, %v419_v23  ;;  %v2880_v2 = vrot.slane %v345_v60, %v427_v25  ;;  %v2882_v3 = vrot.slane %v345_v60, %v415_v27  ;;  %v2884_v4 = vrot.slane %v345_v60, %v423_v29 }
  0x67   : > { %v2893_v7 = vadd.s32 %v2834_v39, %v374_v0  ;;  %v356_v13 = vadd.s32 64, %v2805_v16  ;;  %v357_v14 = vadd.s32 72, %v2805_v16  ;;  %v358_v15 = vadd.s32 80, %v2805_v16 }
  0x68   : > { %2239 = vmatpush3.bf16.msra.mxu0 %v2514_v17  ;;  %vm430_vm1 = vcmp.eq.s32.totalorder %v381_v51, %v2878_v1  ;;  %vm434_vm2 = vcmp.eq.s32.totalorder %v382_v52, %v2878_v1  ;;  %vm432_vm3 = vcmp.eq.s32.totalorder %v381_v51, %v2880_v2  ;;  %vm436_vm4 = vcmp.eq.s32.totalorder %v382_v52, %v2880_v2 }
  0x69   : > { %2351 = vmatpush3.bf16.msra.mxu1 %v2515_v18  ;;  %2240 = vmatprep.subr.bf16.mxu0 %v2516_v19  ;;  %vm2101_vm5 = vmpackc.low %vm434_vm2, %vm430_vm1  ;;  %vm429_vm6 = vcmp.eq.s32.totalorder %v381_v51, %v2882_v3  ;;  %vm433_vm7 = vcmp.eq.s32.totalorder %v382_v52, %v2882_v3  ;;  %vm431_vm8 = vcmp.eq.s32.totalorder %v381_v51, %v2884_v4  ;;  %v359_v17 = vadd.s32 88, %v2805_v16 }
  0x6a   : > { %2352 = vmatprep.subr.bf16.mxu1 %v2517_v20  ;;  %vm435_vm9 = vcmp.eq.s32.totalorder %v382_v52, %v2884_v4  ;;  %2102 = vmatprep.mubr.msk.bf16.mxu0 %vm2101_vm5, %v2665_v8  ;;  %vm2165_vm10 = vmpackc.low %vm436_vm4, %vm432_vm3  ;;  %vm438_vm11 = vcmp.eq.s32.totalorder %v383_v56, %v2878_v1  ;;  %vm442_vm12 = vcmp.eq.s32.totalorder %v384_v57, %v2878_v1  ;;  %v360_v18 = vadd.s32 96, %v2805_v16 }
  0x6b   : > { %2166 = vmatprep.mubr.msk.bf16.mxu1 %vm2165_vm10, %v2665_v8  ;;  %vm2103_vm13 = vmpackc.low %vm433_vm7, %vm429_vm6  ;;  %vm440_vm14 = vcmp.eq.s32.totalorder %v383_v56, %v2880_v2  ;;  %vm444_vm15 = vcmp.eq.s32.totalorder %v384_v57, %v2880_v2  ;;  %vm437_vm2 = vcmp.eq.s32.totalorder %v383_v56, %v2882_v3  ;;  %vm441_vm3 = vcmp.eq.s32.totalorder %v384_v57, %v2882_v3 }
  0x6c   : > { %2241 = vmatpush3.bf16.msra.mxu0 %v2518_v22  ;;  %vm2167_vm0 = vmpackc.low %vm435_vm9, %vm431_vm8  ;;  %vm439_vm5 = vcmp.eq.s32.totalorder %v383_v56, %v2884_v4  ;;  %vm443_vm6 = vcmp.eq.s32.totalorder %v384_v57, %v2884_v4  ;;  %vm446_vm7 = vcmp.eq.s32.totalorder %v385_v9, %v2878_v1  ;;  %vm450_vm8 = vcmp.eq.s32.totalorder %v386_v10, %v2878_v1 }
  0x6d   : > { %2353 = vmatpush3.bf16.msra.mxu1 %v2519_v24  ;;  %2242 = vmatprep.subr.bf16.mxu0 %v2520_v26  ;;  %vm2105_vm1 = vmpackc.low %vm442_vm12, %vm438_vm11  ;;  %vm448_vm10 = vcmp.eq.s32.totalorder %v385_v9, %v2880_v2  ;;  %vm452_vm11 = vcmp.eq.s32.totalorder %v386_v10, %v2880_v2  ;;  %v361_v19 = vadd.s32 104, %v2805_v16  ;;  %v2933_v20 = vadd.s32 %v2834_v39, %v354_v11 }
  0x6e   : > { %2354 = vmatprep.subr.bf16.mxu1 %v2521_v28  ;;  %vm2169_vm4 = vmpackc.low %vm444_vm15, %vm440_vm14  ;;  %v2936_v21 = vadd.s32 %v2834_v39, %v355_v12  ;;  %v2939_v22 = vadd.s32 %v2834_v39, %v356_v13  ;;  %v2943_v23 = vadd.s32 %v2834_v39, %v357_v14  ;;  %v2946_v24 = vadd.s32 %v2834_v39, %v358_v15 }
  0x6f   : > { %vm2107_vm9 = vmpackc.low %vm441_vm3, %vm437_vm2  ;;  %v2949_v25 = vadd.s32 %v2834_v39, %v359_v17  ;;  %v2952_v26 = vadd.s32 %v2834_v39, %v360_v18  ;;  %vm445_vm15 = vcmp.eq.s32.totalorder %v385_v9, %v2882_v3  ;;  %v2959_v27 = vadd.s32 %v2834_v39, %v361_v19 }
  0x70   : > { %2243 = vmatpush3.bf16.msra.mxu0 %v2522_v30  ;;  %vm2171_vm12 = vmpackc.low %vm443_vm6, %vm439_vm5  ;;  %v2962_v28 = vadd.s32 112, %v2805_v16  ;;  %vm451_vm2 = vcmp.eq.s32.totalorder %v386_v10, %v2884_v4  ;;  %v2968_v29 = vadd.s32 120, %v2805_v16  ;;  %v2971_v30 = vadd.s32 216, %v2805_v16 }
  0x71   : > { %2355 = vmatpush3.bf16.msra.mxu1 %v2523_v32  ;;  %2244 = vmatprep.subr.bf16.mxu0 %v2524_v34  ;;  %vm2173_vm14 = vmpackc.low %vm452_vm11, %vm448_vm10  ;;  %vm454_vm3 = vcmp.eq.s32.totalorder %v2933_v20, %v2878_v1  ;;  %vm456_vm5 = vcmp.eq.s32.totalorder %v2933_v20, %v2880_v2  ;;  %vm460_vm6 = vcmp.eq.s32.totalorder %v2936_v21, %v2880_v2  ;;  %v376_v34 = vadd.s32 224, %v2805_v16 }
  0x72   : > { %2356 = vmatprep.subr.bf16.mxu1 %v2525_v36  ;;  %vm459_vm11 = vcmp.eq.s32.totalorder %v2936_v21, %v2884_v4  ;;  %v377_v36 = vadd.s32 232, %v2805_v16  ;;  %v378_v49 = vadd.s32 240, %v2805_v16  ;;  %v379_v51 = vadd.s32 248, %v2805_v16 }
  0x73   : > { %v4138_v57 = vmov 0  ;;  %v395_v59 = vadd.s32 %v2834_v39, %v2962_v28  ;;  %v396_v60 = vadd.s32 %v2834_v39, %v2968_v29  ;;  %v4140_v61 = vmov 0 }
  0x74   : > { %2245 = vmatpush3.bf16.msra.mxu0 %v2526_v38  ;;  %v3265_v56 = vadd.s32 %v2834_v39, %v379_v51  ;;  %v4142_v63 = vmov 0  ;;  %v4145_v0 = vmov 0  ;;  %v365_v11 = vadd.s32 136, %v2805_v16 }
  0x75   : > { %2357 = vmatpush3.bf16.msra.mxu1 %v2527_v41  ;;  %2246 = vmatprep.subr.bf16.mxu0 %v2528_v44  ;;  %v3151_v41 = vadd.s32 %v2834_v39, %v2971_v30  ;;  %v3172_v44 = vadd.s32 %v2834_v39, %v376_v34  ;;  %v4153_v12 = vmov 0  ;;  %v4161_v13 = vmov 0 }
  0x76   : > { %2358 = vmatprep.subr.bf16.mxu1 %v2529_v47  ;;  %v3202_v47 = vadd.s32 %v2834_v39, %v377_v36  ;;  %v4163_v14 = vmov 0  ;;  %v4167_v15 = vmov 0  ;;  %v4175_v17 = vmov 0 }
  0x77   : > { %v4177_v18 = vmov 0  ;;  %v4230_v29 = vmov 0  ;;  %v4245_v30 = vmov 0  ;;  %v4249_v31 = vmov 0 }
  0x78   : > { %2247 = vmatpush3.bf16.msra.mxu0 %v2530_v50  ;;  %v4253_v32 = vmov 0  ;;  %v4261_v33 = vmov 0  ;;  %v4265_v34 = vmov 0  ;;  %v4269_v35 = vmov 0 }
  0x79   : > { %2359 = vmatpush3.bf16.msra.mxu1 %v2531_v55  ;;  %v3262_v55 = vadd.s32 %v2834_v39, %v378_v49 }
  0x7b   : > { %2104 = vmatmul.mubr.msk.bf16.vlgmr.msra.gmra.mxu0 %vm2103_vm13, %v2665_v8  ;;  %vm2109_vm13 = vmpackc.low %vm450_vm8, %vm446_vm7  ;;  %vm453_vm8 = vcmp.eq.s32.totalorder %v2933_v20, %v2882_v3 }
  0x7c   : > { %2168 = vmatmul.mubr.msk.bf16.vlgmr.msra.gmra.mxu1 %vm2167_vm0, %v2665_v8  ;;  %2106 = vmatprep.mubr.msk.bf16.mxu0 %vm2105_vm1, %v2665_v8  ;;  %vm449_vm0 = vcmp.eq.s32.totalorder %v386_v10, %v2882_v3  ;;  %vm447_vm1 = vcmp.eq.s32.totalorder %v385_v9, %v2884_v4  ;;  %v4149_v9 = vmov 0  ;;  %v364_v10 = vadd.s32 128, %v2805_v16 }
  0x7d   : > { %2170 = vmatprep.mubr.msk.bf16.mxu1 %vm2169_vm4, %v2665_v8  ;;  %vm458_vm4 = vcmp.eq.s32.totalorder %v2936_v21, %v2878_v1  ;;  %vm2981_vm7 = vmpackc.low %vm449_vm0, %vm445_vm15  ;;  %vm468_vm0 = vcmp.eq.s32.totalorder %v2943_v23, %v2880_v2  ;;  %vm4115_vm15 = vcmp.eq.s32.totalorder %v2933_v20, %v2884_v4  ;;  %v4157_v16 = vmov 0 }
  0x7e   : > { %vm3005_vm10 = vmpackc.low %vm458_vm4, %vm454_vm3  ;;  %vm463_vm4 = vcmp.eq.s32.totalorder %v2939_v22, %v2884_v4  ;;  %v397_v19 = vadd.s32 %v2834_v39, %v364_v10  ;;  %v398_v20 = vadd.s32 %v2834_v39, %v365_v11  ;;  %v4186_v39 = vmov 0  ;;  %v879_v10 = vld [vmem:[#allocation2 + $0x10] sm:$0xff] }
  0x7f   : > { %vm3026_vm3 = vmpackc.low %vm460_vm6, %vm456_vm5  ;;  %vm470_vm6 = vcmp.eq.s32.totalorder %v2946_v24, %v2878_v1  ;;  %vm4155_vm5 = vcmp.eq.s32.totalorder %v2839_v42, %v2882_v3 }
  0x83   : > { %2108 = vmatmul.mubr.msk.bf16.gmra.mxu0 %vm2107_vm9, %v2665_v8  ;;  %vm457_vm9 = vcmp.eq.s32.totalorder %v2936_v21, %v2882_v3  ;;  %v4181_v21 = vmov 0 }
  0x84   : > { %2172 = vmatmul.mubr.msk.bf16.gmra.mxu1 %vm2171_vm12, %v2665_v8  ;;  %2110 = vmatprep.mubr.msk.bf16.mxu0 %vm2109_vm13, %v2665_v8  ;;  %vm2993_vm12 = vmpackc.low %vm451_vm2, %vm447_vm1  ;;  %vm461_vm1 = vcmp.eq.s32.totalorder %v2939_v22, %v2882_v3  ;;  %vm4122_vm2 = vcmp.eq.s32.totalorder %v2939_v22, %v2880_v2 }
  0x85   : > { %2174 = vmatprep.mubr.msk.bf16.mxu1 %vm2173_vm14, %v2665_v8  ;;  %vm474_vm14 = vcmp.eq.s32.totalorder %v2949_v25, %v2878_v1  ;;  %vm3105_vm13 = vmpackc.low %vm457_vm9, %vm453_vm8 }
  0x86   : > { %vm3123_vm8 = vmpackc.low %vm459_vm11, %vm4115_vm15  ;;  %vm4119_vm11 = vcmp.eq.s32.totalorder %v2943_v23, %v2878_v1 }
  0x8b   : > { %2112 = vmatmul.mubr.msk.bf16.gmra.mxu0 %vm2981_vm7, %v2665_v8  ;;  %vm472_vm7 = vcmp.eq.s32.totalorder %v2946_v24, %v2880_v2 }
  0x8c   : > { %2176 = vmatmul.mubr.msk.bf16.gmra.mxu1 %vm2993_vm12, %v2665_v8  ;;  %2114 = vmatprep.mubr.msk.bf16.mxu0 %vm3005_vm10, %v2665_v8  ;;  %vm4118_vm10 = vcmp.eq.s32.totalorder %v2939_v22, %v2878_v1  ;;  %vm4136_vm12 = vcmp.eq.s32.totalorder %v2946_v24, %v2882_v3  ;;  %v4201_v22 = vmov 0 }
  0x8d   : > { %2178 = vmatprep.mubr.msk.bf16.mxu1 %vm3026_vm3, %v2665_v8  ;;  %vm471_vm3 = vcmp.eq.s32.totalorder %v2946_v24, %v2884_v4  ;;  %vm3141_vm15 = vmpackc.low %vm4119_vm11, %vm4118_vm10  ;;  %vm484_vm11 = vcmp.eq.s32.totalorder %v2959_v27, %v2880_v2 }
  0x8e   : > { %vm3161_vm10 = vmpackc.low %vm468_vm0, %vm4122_vm2  ;;  %vm4147_vm2 = vcmp.eq.s32.totalorder %v2839_v42, %v2878_v1  ;;  %vm4156_vm0 = vcmp.eq.s32.totalorder %v2844_v45, %v2882_v3 }
  0x93   : > { %2116 = vmatmul.mubr.msk.bf16.gmra.mxu0 %vm3105_vm13, %v2665_v8  ;;  %vm4125_vm13 = vcmp.eq.s32.totalorder %v2943_v23, %v2882_v3 }
  0x94   : > { %2180 = vmatmul.mubr.msk.bf16.gmra.mxu1 %vm3123_vm8, %v2665_v8  ;;  %2118 = vmatprep.mubr.msk.bf16.mxu0 %vm3141_vm15, %v2665_v8  ;;  %vm3197_vm9 = vmpackc.low %vm4125_vm13, %vm461_vm1  ;;  %vm4128_vm1 = vcmp.eq.s32.totalorder %v2943_v23, %v2884_v4  ;;  %vm475_vm13 = vcmp.eq.s32.totalorder %v2949_v25, %v2884_v4  ;;  %v881_v23 = vld [vmem:[#allocation2 + $0x20] sm:$0xff] }
  0x95   : > { %2182 = vmatprep.mubr.msk.bf16.mxu1 %vm3161_vm10, %v2665_v8  ;;  %vm3218_vm15 = vmpackc.low %vm4128_vm1, %vm463_vm4  ;;  %vm478_vm10 = vcmp.eq.s32.totalorder %v2952_v26, %v2878_v1  ;;  %vm482_vm1 = vcmp.eq.s32.totalorder %v2959_v27, %v2878_v1 }
  0x96   : > { %vm3235_vm4 = vmpackc.low %vm474_vm14, %vm470_vm6  ;;  %vm4133_vm14 = vcmp.eq.s32.totalorder %v2949_v25, %v2880_v2 }
  0x97   : > { %vm3253_vm6 = vmpackc.low %vm4133_vm14, %vm472_vm7  ;;  %vm4137_vm7 = vcmp.eq.s32.totalorder %v2949_v25, %v2882_v3 }
  0x98   : > { %vm3273_vm14 = vmpackc.low %vm4137_vm7, %vm4136_vm12 }
  0x99   : > { %v4139_v57 = vsel %vm3273_vm14, 4294967295, %v4138_v57  ;;  %vm3291_vm12 = vmpackc.low %vm475_vm13, %vm471_vm3  ;;  %vm486_vm13 = vcmp.eq.s32.totalorder %v395_v59, %v2878_v1  ;;  %vm490_vm3 = vcmp.eq.s32.totalorder %v396_v60, %v2878_v1 }
  0x9a   : > { %v4141_v61 = vsel %vm3291_vm12, 4294967295, %v4140_v61  ;;  %vm3303_vm8 = vmpackc.low %vm482_vm1, %vm478_vm10  ;;  %vm4144_vm10 = vcmp.eq.s32.totalorder %v2952_v26, %v2880_v2 }
  0x9b   : > { %v4143_v63 = vsel %vm3303_vm8, 4294967295, %v4142_v63  ;;  %2120 = vmatmul.mubr.msk.bf16.gmra.mxu0 %vm3197_vm9, %v2665_v8  ;;  %vm3321_vm1 = vmpackc.low %vm484_vm11, %vm4144_vm10  ;;  %vm4148_vm9 = vcmp.eq.s32.totalorder %v2844_v45, %v2878_v1  ;;  %vm477_vm11 = vcmp.eq.s32.totalorder %v2952_v26, %v2882_v3 }
  0x9c   : > { %v4146_v0 = vsel %vm3321_vm1, 4294967295, %v4145_v0  ;;  %2184 = vmatmul.mubr.msk.bf16.gmra.mxu1 %vm3218_vm15, %v2665_v8  ;;  %2122 = vmatprep.mubr.msk.bf16.mxu0 %vm3235_vm4, %v2665_v8  ;;  %vm3337_vm7 = vmpackc.low %vm4148_vm9, %vm4147_vm2  ;;  %vm481_vm15 = vcmp.eq.s32.totalorder %v2959_v27, %v2882_v3  ;;  %vm4151_vm2 = vcmp.eq.s32.totalorder %v2839_v42, %v2880_v2  ;;  %vm4152_vm4 = vcmp.eq.s32.totalorder %v2844_v45, %v2880_v2 }
  0x9d   : > { %v4150_v9 = vsel %vm3337_vm7, 4294967295, %v4149_v9  ;;  %2186 = vmatprep.mubr.msk.bf16.mxu1 %vm3253_vm6, %v2665_v8  ;;  %vm3356_vm10 = vmpackc.low %vm4152_vm4, %vm4151_vm2  ;;  %vm479_vm6 = vcmp.eq.s32.totalorder %v2952_v26, %v2884_v4  ;;  %vm483_vm9 = vcmp.eq.s32.totalorder %v2959_v27, %v2884_v4  ;;  %vm488_vm4 = vcmp.eq.s32.totalorder %v395_v59, %v2880_v2 }
  0x9e   : > { %v4154_v12 = vsel %vm3356_vm10, 4294967295, %v4153_v12  ;;  %vm3372_vm2 = vmpackc.low %vm4156_vm0, %vm4155_vm5  ;;  %vm492_vm10 = vcmp.eq.s32.totalorder %v396_v60, %v2880_v2  ;;  %vm4159_vm7 = vcmp.eq.s32.totalorder %v2839_v42, %v2884_v4  ;;  %vm4160_vm1 = vcmp.eq.s32.totalorder %v2844_v45, %v2884_v4 }
  0x9f   : > { %v4158_v16 = vsel %vm3372_vm2, 4294967295, %v4157_v16  ;;  %vm3384_vm8 = vmpackc.low %vm4160_vm1, %vm4159_vm7  ;;  %vm4165_vm5 = vcmp.eq.s32.totalorder %v2849_v48, %v2878_v1  ;;  %vm4166_vm0 = vcmp.eq.s32.totalorder %v2857_v53, %v2878_v1  ;;  %v4169_v42 = vmov 0 }
  0xa0   : > { %v4162_v13 = vsel %vm3384_vm8, 4294967295, %v4161_v13  ;;  %vm3388_vm12 = vmpackc.low %vm481_vm15, %vm477_vm11  ;;  %v4171_v45 = vmov 0  ;;  %vm4173_vm1 = vcmp.eq.s32.totalorder %v2849_v48, %v2880_v2  ;;  %vm4174_vm11 = vcmp.eq.s32.totalorder %v2857_v53, %v2880_v2 }
  0xa1   : > { %v4164_v14 = vsel %vm3388_vm12, 4294967295, %v4163_v14  ;;  %vm3398_vm2 = vmpackc.low %vm4166_vm0, %vm4165_vm5 }
  0xa2   : > { %v4168_v15 = vsel %vm3398_vm2, 4294967295, %v4167_v15  ;;  %vm3402_vm14 = vmpackc.low %vm483_vm9, %vm479_vm6  ;;  %vm4184_vm9 = vcmp.eq.s32.totalorder %v2849_v48, %v2884_v4  ;;  %vm4200_vm2 = vcmp.eq.s32.totalorder %v2874_v62, %v2882_v3 }
  0xa3   : > { %v4170_v42 = vsel %vm3402_vm14, 4294967295, %v4169_v42  ;;  %vm3406_vm7 = vmpackc.low %vm490_vm3, %vm486_vm13  ;;  %vm4179_vm3 = vcmp.eq.s32.totalorder %v2849_v48, %v2882_v3  ;;  %vm4180_vm13 = vcmp.eq.s32.totalorder %v2857_v53, %v2882_v3  ;;  %v4192_v48 = vmov 0 }
  0xa4   : > { %v4172_v45 = vsel %vm3406_vm7, 4294967295, %v4171_v45  ;;  %vm3416_vm15 = vmpackc.low %vm4174_vm11, %vm4173_vm1  ;;  %vm4188_vm1 = vnez %v4141_v61  ;;  %vm4189_vm11 = vnez %v4143_v63 }
  0xa5   : > { %v4176_v17 = vsel %vm3416_vm15, 4294967295, %v4175_v17  ;;  %vm3420_vm5 = vmpackc.low %vm492_vm10, %vm488_vm4  ;;  %vm4183_vm10 = vnez %v4139_v57  ;;  %vm4185_vm4 = vcmp.eq.s32.totalorder %v2857_v53, %v2884_v4  ;;  %2188 = vmatmul.mubr.msk.bf16.gmra.mxu1 %vm4188_vm1, %v2665_v8  ;;  %vm489_vm1 = vcmp.eq.s32.totalorder %v396_v60, %v2882_v3 }
  0xa6   : > { %v4178_v18 = vsel %vm3420_vm5, 4294967295, %v4177_v18  ;;  %vm3432_vm6 = vmpackc.low %vm4180_vm13, %vm4179_vm3  ;;  %2124 = vmatmul.mubr.msk.bf16.gmra.mxu0 %vm4183_vm10, %v2665_v8  ;;  %vm4190_vm3 = vcmp.eq.s32.totalorder %v2864_v58, %v2878_v1  ;;  %vm4191_vm13 = vcmp.eq.s32.totalorder %v2874_v62, %v2878_v1  ;;  %v4197_v53 = vmov 0 }
  0xa7   : > { %v4182_v21 = vsel %vm3432_vm6, 4294967295, %v4181_v21  ;;  %vm3445_vm0 = vmpackc.low %vm4185_vm4, %vm4184_vm9  ;;  %2126 = vmatprep.mubr.msk.bf16.mxu0 %vm4189_vm11, %v2665_v8  ;;  %vm4194_vm9 = vnez %v4146_v0  ;;  %vm485_vm4 = vcmp.eq.s32.totalorder %v395_v59, %v2882_v3  ;;  %vm4195_vm11 = vcmp.eq.s32.totalorder %v2864_v58, %v2880_v2 }
  0xa8   : > { %v4187_v39 = vsel %vm3445_vm0, 4294967295, %v4186_v39  ;;  %vm3461_vm10 = vmpackc.low %vm4191_vm13, %vm4190_vm3  ;;  %2190 = vmatprep.mubr.msk.bf16.mxu1 %vm4194_vm9, %v2665_v8  ;;  %vm4196_vm0 = vcmp.eq.s32.totalorder %v2874_v62, %v2880_v2  ;;  %vm487_vm3 = vcmp.eq.s32.totalorder %v395_v59, %v2884_v4  ;;  %vm491_vm13 = vcmp.eq.s32.totalorder %v396_v60, %v2884_v4 }
  0xa9   : > { %v4193_v48 = vsel %vm3461_vm10, 4294967295, %v4192_v48  ;;  %vm3476_vm6 = vmpackc.low %vm4196_vm0, %vm4195_vm11  ;;  %vm494_vm9 = vcmp.eq.s32.totalorder %v397_v19, %v2878_v1  ;;  %vm498_vm10 = vcmp.eq.s32.totalorder %v398_v20, %v2878_v1  ;;  %vm4199_vm15 = vcmp.eq.s32.totalorder %v2864_v58, %v2882_v3 }
  0xaa   : > { %v4198_v53 = vsel %vm3476_vm6, 4294967295, %v4197_v53  ;;  %vm3490_vm8 = vmpackc.low %vm4200_vm2, %vm4199_vm15  ;;  %vm496_vm0 = vcmp.eq.s32.totalorder %v397_v19, %v2880_v2  ;;  %vm500_vm11 = vcmp.eq.s32.totalorder %v398_v20, %v2880_v2  ;;  %vm4203_vm6 = vcmp.eq.s32.totalorder %v2864_v58, %v2884_v4 }
  0xab   : > { %v4202_v22 = vsel %vm3490_vm8, 4294967295, %v4201_v22  ;;  %vm4204_vm5 = vcmp.eq.s32.totalorder %v2874_v62, %v2884_v4  ;;  %vm3506_vm14 = vmpackc.low %vm489_vm1, %vm485_vm4  ;;  %vm4209_vm2 = vcmp.eq.s32.totalorder %v2887_v5, %v2878_v1  ;;  %vm4210_vm15 = vcmp.eq.s32.totalorder %v2890_v6, %v2878_v1 }
  0xac   : > { %vm3502_vm7 = vmpackc.low %vm4204_vm5, %vm4203_vm6  ;;  %vm4217_vm6 = vcmp.eq.s32.totalorder %v2887_v5, %v2880_v2  ;;  %vm4218_vm4 = vcmp.eq.s32.totalorder %v2890_v6, %v2880_v2 }
  0xad   : > { %vm3516_vm8 = vmpackc.low %vm4210_vm15, %vm4209_vm2 }
  0xae   : > { %vm3520_vm12 = vmpackc.low %vm491_vm13, %vm487_vm3  ;;  %vm4224_vm3 = vcmp.eq.s32.totalorder %v2890_v6, %v2882_v3 }
  0xaf   : > { %vm3524_vm5 = vmpackc.low %vm498_vm10, %vm494_vm9  ;;  %vm4223_vm10 = vcmp.eq.s32.totalorder %v2887_v5, %v2882_v3  ;;  %vm4227_vm9 = vnez %v4164_v14 }
  0xb0   : > { %vm3534_vm1 = vmpackc.low %vm4218_vm4, %vm4217_vm6  ;;  %2128 = vmatmul.mubr.msk.bf16.gmra.mxu0 %vm4227_vm9, %v2665_v8  ;;  %vm4232_vm6 = vnez %v4170_v42  ;;  %vm4233_vm4 = vnez %v4172_v45 }
  0xb1   : > { %vm3538_vm2 = vmpackc.low %vm500_vm11, %vm496_vm0  ;;  %vm4228_vm0 = vcmp.eq.s32.totalorder %v2887_v5, %v2884_v4  ;;  %vm4229_vm11 = vcmp.eq.s32.totalorder %v2890_v6, %v2884_v4  ;;  %2192 = vmatmul.mubr.msk.bf16.gmra.mxu1 %vm4232_vm6, %v2665_v8  ;;  %2130 = vmatprep.mubr.msk.bf16.mxu0 %vm4233_vm4, %v2665_v8  ;;  %v4236_v5 = vmov 0  ;;  %vm4240_vm6 = vcmp.eq.s32.totalorder %v3151_v41, %v2880_v2 }
  0xb2   : > { %vm3548_vm13 = vmpackc.low %vm4224_vm3, %vm4223_vm10  ;;  %vm4234_vm10 = vcmp.eq.s32.totalorder %v2893_v7, %v2878_v1  ;;  %vm4235_vm3 = vcmp.eq.s32.totalorder %v3151_v41, %v2878_v1  ;;  %v4241_v6 = vmov 0 }
  0xb3   : > { %vm3561_vm15 = vmpackc.low %vm4229_vm11, %vm4228_vm0  ;;  %vm4238_vm0 = vnez %v4178_v18  ;;  %vm4239_vm11 = vcmp.eq.s32.totalorder %v2893_v7, %v2880_v2 }
  0xb4   : > { %v4231_v29 = vsel %vm3561_vm15, 4294967295, %v4230_v29  ;;  %vm3577_vm9 = vmpackc.low %vm4235_vm3, %vm4234_vm10  ;;  %2194 = vmatprep.mubr.msk.bf16.mxu1 %vm4238_vm0, %v2665_v8  ;;  %vm4243_vm10 = vcmp.eq.s32.totalorder %v2893_v7, %v2882_v3  ;;  %vm4244_vm3 = vcmp.eq.s32.totalorder %v3151_v41, %v2882_v3  ;;  %vm4247_vm0 = vcmp.eq.s32.totalorder %v2893_v7, %v2884_v4 }
  0xb5   : > { %v4237_v5 = vsel %vm3577_vm9, 4294967295, %v4236_v5  ;;  %vm3590_vm4 = vmpackc.low %vm4240_vm6, %vm4239_vm11  ;;  %vm4248_vm15 = vcmp.eq.s32.totalorder %v3151_v41, %v2884_v4  ;;  %vm4251_vm6 = vcmp.eq.s32.totalorder %v3172_v44, %v2878_v1  ;;  %v4257_v7 = vmov 0 }
  0xb6   : > { %v4242_v6 = vsel %vm3590_vm4, 4294967295, %v4241_v6  ;;  %vm3600_vm9 = vmpackc.low %vm4244_vm3, %vm4243_vm10  ;;  %vm4252_vm4 = vcmp.eq.s32.totalorder %v3202_v47, %v2878_v1  ;;  %vm4255_vm3 = vcmp.eq.s32.totalorder %v3172_v44, %v2880_v2 }
  0xb7   : > { %v4246_v30 = vsel %vm3600_vm9, 4294967295, %v4245_v30  ;;  %vm3610_vm11 = vmpackc.low %vm4248_vm15, %vm4247_vm0  ;;  %vm4256_vm9 = vcmp.eq.s32.totalorder %v3202_v47, %v2880_v2  ;;  %vm4259_vm0 = vcmp.eq.s32.totalorder %v3172_v44, %v2882_v3 }
  0xb8   : > { %v4250_v31 = vsel %vm3610_vm11, 4294967295, %v4249_v31  ;;  %vm3620_vm10 = vmpackc.low %vm4252_vm4, %vm4251_vm6  ;;  %vm4260_vm11 = vcmp.eq.s32.totalorder %v3202_v47, %v2882_v3  ;;  %2132 = vmatmul.mubr.msk.bf16.gmra.mxu0 %vm3506_vm14, %v2665_v8  ;;  %vm4264_vm6 = vcmp.eq.s32.totalorder %v3202_v47, %v2884_v4  ;;  %vm4267_vm14 = vcmp.eq.s32.totalorder %v3262_v55, %v2878_v1 }
  0xb9   : > { %v4254_v32 = vsel %vm3620_vm10, 4294967295, %v4253_v32  ;;  %vm3630_vm15 = vmpackc.low %vm4256_vm9, %vm4255_vm3  ;;  %vm4263_vm9 = vcmp.eq.s32.totalorder %v3172_v44, %v2884_v4  ;;  %2196 = vmatmul.mubr.msk.bf16.gmra.mxu1 %vm3520_vm12, %v2665_v8  ;;  %2134 = vmatprep.mubr.msk.bf16.mxu0 %vm3524_vm5, %v2665_v8  ;;  %vm493_vm12 = vcmp.eq.s32.totalorder %v397_v19, %v2882_v3  ;;  %vm4271_vm5 = vcmp.eq.s32.totalorder %v3262_v55, %v2880_v2  ;;  %v877_v44 = vld [vmem:[#allocation2] sm:$0xff] }
  0xba   : > { %v4258_v7 = vsel %vm3630_vm15, 4294967295, %v4257_v7  ;;  %vm3640_vm4 = vmpackc.low %vm4260_vm11, %vm4259_vm0  ;;  %vm4268_vm11 = vcmp.eq.s32.totalorder %v3265_v56, %v2878_v1  ;;  %2198 = vmatprep.mubr.msk.bf16.mxu1 %vm3538_vm2, %v2665_v8  ;;  %v4273_v1 = vmov 0  ;;  %vm4275_vm2 = vcmp.eq.s32.totalorder %v3262_v55, %v2882_v3 }
  0xbb   : > { %v4262_v33 = vsel %vm3640_vm4, 4294967295, %v4261_v33  ;;  %vm3653_vm3 = vmpackc.low %vm4264_vm6, %vm4263_vm9  ;;  %vm497_vm9 = vcmp.eq.s32.totalorder %v398_v20, %v2882_v3  ;;  %vm4272_vm6 = vcmp.eq.s32.totalorder %v3265_v56, %v2880_v2 }
  0xbc   : > { %v4266_v34 = vsel %vm3653_vm3, 4294967295, %v4265_v34  ;;  %vm3669_vm0 = vmpackc.low %vm4268_vm11, %vm4267_vm14  ;;  %vm495_vm14 = vcmp.eq.s32.totalorder %v397_v19, %v2884_v4  ;;  %vm499_vm11 = vcmp.eq.s32.totalorder %v398_v20, %v2884_v4 }
  0xbd   : > { %v4270_v35 = vsel %vm3669_vm0, 4294967295, %v4269_v35  ;;  %vm3684_vm3 = vmpackc.low %vm4272_vm6, %vm4271_vm5  ;;  %vm4276_vm0 = vcmp.eq.s32.totalorder %v3265_v56, %v2882_v3  ;;  %vm4279_vm5 = vcmp.eq.s32.totalorder %v3262_v55, %v2884_v4  ;;  %vm4280_vm6 = vcmp.eq.s32.totalorder %v3265_v56, %v2884_v4  ;;  %v878_v56 = vld [vmem:[#allocation2 + $0x8] sm:$0xff] }
  0xbe   : > { %v4274_v1 = vsel %vm3684_vm3, 4294967295, %v4273_v1  ;;  %vm3696_vm4 = vmpackc.low %vm4276_vm0, %vm4275_vm2  ;;  %vm4283_vm0 = vnez %v4150_v9  ;;  %vm4284_vm2 = vnez %v4154_v12 }
  0xbf   : > { %vm3706_vm3 = vmpackc.low %vm4280_vm6, %vm4279_vm5  ;;  %vm4285_vm5 = vnez %v4158_v16  ;;  %vm4292_vm6 = vnez %v4198_v53 }
  0xc0   : > { %vm2135_vm15 = vmpackc.low %vm497_vm9, %vm493_vm12  ;;  %vm4286_vm12 = vnez %v4162_v13  ;;  %vm4289_vm9 = vnez %v4182_v21 }
  0xc1   : > { %vm2199_vm10 = vmpackc.low %vm499_vm11, %vm495_vm14  ;;  %2136 = vmatmul.mubr.msk.bf16.gmra.mxu0 %vm2135_vm15, %v2665_v8  ;;  %vm4287_vm15 = vnez %v4168_v15  ;;  %vm4290_vm14 = vnez %v4187_v39  ;;  %vm4291_vm11 = vnez %v4193_v48 }
  0xc2   : > { %2200 = vmatmul.mubr.msk.bf16.gmra.mxu1 %vm2199_vm10, %v2665_v8  ;;  %2138 = vmatprep.mubr.msk.bf16.mxu0 %vm4283_vm0, %v2665_v8  ;;  %vm4288_vm10 = vnez %v4176_v17  ;;  %vm4293_vm0 = vnez %v4202_v22  ;;  %v880_v17 = vld [vmem:[#allocation2 + $0x18] sm:$0xff] }
  0xc3   : > { %2202 = vmatprep.mubr.msk.bf16.mxu1 %vm4284_vm2, %v2665_v8  ;;  %vm4294_vm2 = vnez %v4231_v29 }
  0xc9   : > { %2140 = vmatmul.mubr.msk.bf16.gmra.mxu0 %vm4285_vm5, %v2665_v8  ;;  %vm4295_vm5 = vnez %v4237_v5  ;;  %v882_v5 = vld [vmem:[#allocation2 + $0x28] sm:$0xff] }
  0xca   : > { %2204 = vmatmul.mubr.msk.bf16.gmra.mxu1 %vm4286_vm12, %v2665_v8  ;;  %2142 = vmatprep.mubr.msk.bf16.mxu0 %vm4287_vm15, %v2665_v8  ;;  %vm4300_vm12 = vnez %v4258_v7  ;;  %vm4301_vm15 = vnez %v4262_v33 }
  0xcb   : > { %2206 = vmatprep.mubr.msk.bf16.mxu1 %vm4288_vm10, %v2665_v8  ;;  %vm4302_vm10 = vnez %v4266_v34 }
  0xd1   : > { %2144 = vmatmul.mubr.msk.bf16.gmra.mxu0 %vm4289_vm9, %v2665_v8  ;;  %vm4303_vm9 = vnez %v4270_v35 }
  0xd2   : > { %2208 = vmatmul.mubr.msk.bf16.gmra.mxu1 %vm4290_vm14, %v2665_v8  ;;  %2146 = vmatprep.mubr.msk.bf16.mxu0 %vm4291_vm11, %v2665_v8  ;;  %vm4304_vm14 = vnez %v4274_v1  ;;  %vm1519_vm11 = vcmask 261120   ;;  %v883_v1 = vld [vmem:[#allocation2 + $0x30] sm:$0xff] }
  0xd3   : > { %2210 = vmatprep.mubr.msk.bf16.mxu1 %vm4292_vm6, %v2665_v8 }
  0xd9   : > { %2148 = vmatmul.mubr.msk.bf16.gmra.mxu0 %vm4293_vm0, %v2665_v8 }
  0xda   : > { %2212 = vmatmul.mubr.msk.bf16.gmra.mxu1 %vm3502_vm7, %v2665_v8  ;;  %2150 = vmatprep.mubr.msk.bf16.mxu0 %vm3516_vm8, %v2665_v8  ;;  %vm4296_vm7 = vnez %v4242_v6  ;;  %vm4297_vm8 = vnez %v4246_v30 }
  0xdb   : > { %2214 = vmatprep.mubr.msk.bf16.mxu1 %vm3534_vm1, %v2665_v8  ;;  %vm4298_vm1 = vnez %v4250_v31 }
  0xe1   : > { %2152 = vmatmul.mubr.msk.bf16.gmra.mxu0 %vm3548_vm13, %v2665_v8  ;;  %vm4299_vm13 = vnez %v4254_v32 }
  0xe2   : > { %2216 = vmatmul.mubr.msk.bf16.gmra.mxu1 %vm4294_vm2, %v2665_v8  ;;  %2154 = vmatprep.mubr.msk.bf16.mxu0 %vm4295_vm5, %v2665_v8 }
  0xe3   : > { %2218 = vmatprep.mubr.msk.bf16.mxu1 %vm4296_vm7, %v2665_v8 }
  0xe9   : > { %2156 = vmatmul.mubr.msk.bf16.gmra.mxu0 %vm4297_vm8, %v2665_v8 }
  0xea   : > { %2220 = vmatmul.mubr.msk.bf16.gmra.mxu1 %vm4298_vm1, %v2665_v8  ;;  %2158 = vmatprep.mubr.msk.bf16.mxu0 %vm4299_vm13, %v2665_v8 }
  0xeb   : > { %2222 = vmatprep.mubr.msk.bf16.mxu1 %vm4300_vm12, %v2665_v8 }
  0xf1   : > { %2160 = vmatmul.mubr.msk.bf16.gmra.mxu0 %vm4301_vm15, %v2665_v8 }
  0xf2   : > { %2224 = vmatmul.mubr.msk.bf16.gmra.mxu1 %vm4302_vm10, %v2665_v8  ;;  %2162 = vmatprep.mubr.msk.bf16.mxu0 %vm4303_vm9, %v2665_v8 }
  0xf3   : > { %2226 = vmatprep.mubr.msk.bf16.mxu1 %vm4304_vm14, %v2665_v8 }
  0xf9   : > { %2164 = vmatmul.mubr.msk.bf16.gmra.mxu0 %vm3696_vm4, %v2665_v8 }
  0xfa   : > { %2228 = vmatmul.mubr.msk.bf16.gmra.mxu1 %vm3706_vm3, %v2665_v8 }
 0x13b   : > { %v2248_v3 = vpop.f32.mrf.mxu0 }
 0x13c   : > { %v2360_v4 = vpop.f32.mrf.mxu1 }
 0x13d   : > { %v2249_v37 = vpop.f32.mrf.mxu0 }
 0x13e   : > { %v2250_v38 = vadd.f32 %v2249_v37, %v2248_v3  ;;  %v2361_v40 = vpop.f32.mrf.mxu1 }
 0x13f   : > { %v2362_v41 = vadd.f32 %v2361_v40, %v2360_v4  ;;  %v2251_v43 = vpop.f32.mrf.mxu0 }
 0x140   : > { %v2363_v46 = vpop.f32.mrf.mxu1 }
 0x141   : > { %v1361_v47 = vadd.f32 %v2362_v41, %v2250_v38  ;;  %v2252_v49 = vpop.f32.mrf.mxu0 }
 0x142   : > { %v2253_v50 = vadd.f32 %v2252_v49, %v2251_v43  ;;  %v2364_v51 = vpop.f32.mrf.mxu1  ;;  %v884_v43 = vld [vmem:[#allocation2 + $0x38] sm:$0xff] }
 0x143   : > { %v1487_v52 = vadd.f32 %v1361_v47, %v877_v44  ;;  %v2365_v54 = vadd.f32 %v2364_v51, %v2363_v46  ;;  %v2254_v55 = vpop.f32.mrf.mxu0 }
 0x144   : > { %v2366_v57 = vpop.f32.mrf.mxu1 }
 0x145   : > { %1520 = vst.msk [vmem:[#allocation2] sm:$0xff] %vm1519_vm11, %v1487_v52  ;;  %v1364_v8 = vadd.f32 %v2365_v54, %v2253_v50  ;;  %v2255_v59 = vpop.f32.mrf.mxu0 }
 0x146   : > { %v2256_v60 = vadd.f32 %v2255_v59, %v2254_v55  ;;  %v2367_v61 = vpop.f32.mrf.mxu1  ;;  %v885_v55 = vld [vmem:[#allocation2 + $0x40] sm:$0xff] }
 0x147   : > { %v1488_v63 = vadd.f32 %v1364_v8, %v878_v56  ;;  %v2368_v0 = vadd.f32 %v2367_v61, %v2366_v57  ;;  %v2257_v9 = vpop.f32.mrf.mxu0 }
 0x148   : > { %v2369_v11 = vpop.f32.mrf.mxu1 }
 0x149   : > { %1521 = vst.msk [vmem:[#allocation2 + $0x8] sm:$0xff] %vm1519_vm11, %v1488_v63  ;;  %v1369_v12 = vadd.f32 %v2368_v0, %v2256_v60  ;;  %v2258_v16 = vpop.f32.mrf.mxu0 }
 0x14a   : > { %v2259_v13 = vadd.f32 %v2258_v16, %v2257_v9  ;;  %v2370_v14 = vpop.f32.mrf.mxu1  ;;  %v886_v9 = vld [vmem:[#allocation2 + $0x48] sm:$0xff] }
 0x14b   : > { %v1489_v15 = vadd.f32 %v1369_v12, %v879_v10  ;;  %v2371_v42 = vadd.f32 %v2370_v14, %v2369_v11  ;;  %v2260_v45 = vpop.f32.mrf.mxu0 }
 0x14c   : > { %v2372_v18 = vpop.f32.mrf.mxu1 }
 0x14d   : > { %1522 = vst.msk [vmem:[#allocation2 + $0x10] sm:$0xff] %vm1519_vm11, %v1489_v15  ;;  %v1372_v19 = vadd.f32 %v2371_v42, %v2259_v13  ;;  %v2261_v20 = vpop.f32.mrf.mxu0 }
 0x14e   : > { %v2262_v21 = vadd.f32 %v2261_v20, %v2260_v45  ;;  %v2373_v39 = vpop.f32.mrf.mxu1  ;;  %v887_v45 = vld [vmem:[#allocation2 + $0x50] sm:$0xff] }
 0x14f   : > { %v1490_v48 = vadd.f32 %v1372_v19, %v880_v17  ;;  %v2374_v53 = vadd.f32 %v2373_v39, %v2372_v18  ;;  %v2263_v22 = vpop.f32.mrf.mxu0 }
 0x150   : > { %v2375_v24 = vpop.f32.mrf.mxu1 }
 0x151   : > { %1523 = vst.msk [vmem:[#allocation2 + $0x18] sm:$0xff] %vm1519_vm11, %v1490_v48  ;;  %v1377_v25 = vadd.f32 %v2374_v53, %v2262_v21  ;;  %v2264_v58 = vpop.f32.mrf.mxu0 }
 0x152   : > { %v2265_v62 = vadd.f32 %v2264_v58, %v2263_v22  ;;  %v2376_v26 = vpop.f32.mrf.mxu1  ;;  %v888_v22 = vld [vmem:[#allocation2 + $0x58] sm:$0xff] }
 0x153   : > { %v1491_v27 = vadd.f32 %v1377_v25, %v881_v23  ;;  %v2377_v28 = vadd.f32 %v2376_v26, %v2375_v24  ;;  %v2266_v29 = vpop.f32.mrf.mxu0 }
 0x154   : > { %v2378_v6 = vpop.f32.mrf.mxu1 }
 0x155   : > { %1524 = vst.msk [vmem:[#allocation2 + $0x20] sm:$0xff] %vm1519_vm11, %v1491_v27  ;;  %v1380_v30 = vadd.f32 %v2377_v28, %v2265_v62  ;;  %v2267_v31 = vpop.f32.mrf.mxu0 }
 0x156   : > { %v2268_v32 = vadd.f32 %v2267_v31, %v2266_v29  ;;  %v2379_v7 = vpop.f32.mrf.mxu1  ;;  %v889_v29 = vld [vmem:[#allocation2 + $0x60] sm:$0xff] }
 0x157   : > { %v1492_v33 = vadd.f32 %v1380_v30, %v882_v5  ;;  %v2380_v34 = vadd.f32 %v2379_v7, %v2378_v6  ;;  %v2269_v35 = vpop.f32.mrf.mxu0 }
 0x158   : > { %v2381_v36 = vpop.f32.mrf.mxu1 }
 0x159   : > { %1525 = vst.msk [vmem:[#allocation2 + $0x28] sm:$0xff] %vm1519_vm11, %v1492_v33  ;;  %v1385_v2 = vadd.f32 %v2380_v34, %v2268_v32  ;;  %v2270_v3 = vpop.f32.mrf.mxu0 }
 0x15a   : > { %v2271_v4 = vadd.f32 %v2270_v3, %v2269_v35  ;;  %v2382_v37 = vpop.f32.mrf.mxu1  ;;  %v890_v35 = vld [vmem:[#allocation2 + $0x68] sm:$0xff] }
 0x15b   : > { %v1493_v38 = vadd.f32 %v1385_v2, %v883_v1  ;;  %v2383_v40 = vadd.f32 %v2382_v37, %v2381_v36  ;;  %v2272_v41 = vpop.f32.mrf.mxu0 }
 0x15c   : > { %v2384_v44 = vpop.f32.mrf.mxu1 }
 0x15d   : > { %1526 = vst.msk [vmem:[#allocation2 + $0x30] sm:$0xff] %vm1519_vm11, %v1493_v38  ;;  %v1388_v46 = vadd.f32 %v2383_v40, %v2271_v4  ;;  %v2273_v47 = vpop.f32.mrf.mxu0 }
 0x15e   : > { %v2274_v49 = vadd.f32 %v2273_v47, %v2272_v41  ;;  %v2385_v50 = vpop.f32.mrf.mxu1  ;;  %v891_v41 = vld [vmem:[#allocation2 + $0x70] sm:$0xff] }
 0x15f   : > { %v1494_v51 = vadd.f32 %v1388_v46, %v884_v43  ;;  %v2386_v52 = vadd.f32 %v2385_v50, %v2384_v44  ;;  %v2275_v54 = vpop.f32.mrf.mxu0 }
 0x160   : > { %v2387_v56 = vpop.f32.mrf.mxu1 }
 0x161   : > { %1527 = vst.msk [vmem:[#allocation2 + $0x38] sm:$0xff] %vm1519_vm11, %v1494_v51  ;;  %v1393_v57 = vadd.f32 %v2386_v52, %v2274_v49  ;;  %v2276_v8 = vpop.f32.mrf.mxu0 }
 0x162   : > { %v2277_v59 = vadd.f32 %v2276_v8, %v2275_v54  ;;  %v2388_v60 = vpop.f32.mrf.mxu1  ;;  %v892_v54 = vld [vmem:[#allocation2 + $0x78] sm:$0xff] }
 0x163   : > { %v1495_v61 = vadd.f32 %v1393_v57, %v885_v55  ;;  %v2389_v63 = vadd.f32 %v2388_v60, %v2387_v56 }
 0x165   : > { %v2390_v10 = vpop.f32.mrf.mxu1  ;;  %1528 = vst.msk [vmem:[#allocation2 + $0x40] sm:$0xff] %vm1519_vm11, %v1495_v61  ;;  %v1396_v11 = vadd.f32 %v2389_v63, %v2277_v59 }
 0x166   : > { %v2278_v0 = vpop.f32.mrf.mxu0 }
 0x167   : > { %v2391_v13 = vpop.f32.mrf.mxu1  ;;  %v1496_v14 = vadd.f32 %v1396_v11, %v886_v9 }
 0x168   : > { %v2279_v12 = vpop.f32.mrf.mxu0  ;;  %v2392_v15 = vadd.f32 %v2391_v13, %v2390_v10 }
 0x169   : > { %v2280_v16 = vadd.f32 %v2279_v12, %v2278_v0  ;;  %v2393_v17 = vpop.f32.mrf.mxu1  ;;  %1529 = vst.msk [vmem:[#allocation2 + $0x48] sm:$0xff] %vm1519_vm11, %v1496_v14  ;;  %v893_v0 = vld [vmem:[#allocation2 + $0x80] sm:$0xff] }
 0x16a   : > { %v2281_v42 = vpop.f32.mrf.mxu0 }
 0x16b   : > { %v1401_v18 = vadd.f32 %v2392_v15, %v2280_v16  ;;  %v2394_v21 = vpop.f32.mrf.mxu1 }
 0x16c   : > { %v2282_v19 = vpop.f32.mrf.mxu0  ;;  %v2395_v48 = vadd.f32 %v2394_v21, %v2393_v17 }
 0x16d   : > { %v2283_v20 = vadd.f32 %v2282_v19, %v2281_v42  ;;  %v1497_v39 = vadd.f32 %v1401_v18, %v887_v45  ;;  %v894_v42 = vld [vmem:[#allocation2 + $0x88] sm:$0xff] }
 0x16f   : > { %1530 = vst.msk [vmem:[#allocation2 + $0x50] sm:$0xff] %vm1519_vm11, %v1497_v39  ;;  %v1404_v24 = vadd.f32 %v2395_v48, %v2283_v20 }
 0x170   : > { %v2284_v53 = vpop.f32.mrf.mxu0 }
 0x171   : > { %v2396_v23 = vpop.f32.mrf.mxu1  ;;  %v1498_v26 = vadd.f32 %v1404_v24, %v888_v22 }
 0x172   : > { %v2285_v25 = vpop.f32.mrf.mxu0 }
 0x173   : > { %v2286_v58 = vadd.f32 %v2285_v25, %v2284_v53  ;;  %v2397_v62 = vpop.f32.mrf.mxu1  ;;  %1531 = vst.msk [vmem:[#allocation2 + $0x58] sm:$0xff] %vm1519_vm11, %v1498_v26  ;;  %v895_v53 = vld [vmem:[#allocation2 + $0x90] sm:$0xff] }
 0x174   : > { %v2398_v27 = vadd.f32 %v2397_v62, %v2396_v23  ;;  %v2287_v28 = vpop.f32.mrf.mxu0 }
 0x175   : > { %v2399_v5 = vpop.f32.mrf.mxu1 }
 0x176   : > { %v1409_v6 = vadd.f32 %v2398_v27, %v2286_v58  ;;  %v2288_v30 = vpop.f32.mrf.mxu0 }
 0x177   : > { %v2289_v31 = vadd.f32 %v2288_v30, %v2287_v28  ;;  %v2400_v32 = vpop.f32.mrf.mxu1  ;;  %v896_v28 = vld [vmem:[#allocation2 + $0x98] sm:$0xff] }
 0x178   : > { %v1499_v7 = vadd.f32 %v1409_v6, %v889_v29  ;;  %v2401_v33 = vadd.f32 %v2400_v32, %v2399_v5  ;;  %v2290_v34 = vpop.f32.mrf.mxu0 }
 0x179   : > { %v2402_v1 = vpop.f32.mrf.mxu1 }
 0x17a   : > { %1532 = vst.msk [vmem:[#allocation2 + $0x60] sm:$0xff] %vm1519_vm11, %v1499_v7  ;;  %v1412_v36 = vadd.f32 %v2401_v33, %v2289_v31  ;;  %v2291_v2 = vpop.f32.mrf.mxu0 }
 0x17b   : > { %v2292_v3 = vadd.f32 %v2291_v2, %v2290_v34  ;;  %v2403_v4 = vpop.f32.mrf.mxu1  ;;  %v897_v34 = vld [vmem:[#allocation2 + $0xa0] sm:$0xff] }
 0x17c   : > { %v1500_v37 = vadd.f32 %v1412_v36, %v890_v35  ;;  %v2404_v38 = vadd.f32 %v2403_v4, %v2402_v1  ;;  %v2293_v40 = vpop.f32.mrf.mxu0 }
 0x17d   : > { %v2405_v43 = vpop.f32.mrf.mxu1 }
 0x17e   : > { %1533 = vst.msk [vmem:[#allocation2 + $0x68] sm:$0xff] %vm1519_vm11, %v1500_v37  ;;  %v1417_v44 = vadd.f32 %v2404_v38, %v2292_v3  ;;  %v2294_v46 = vpop.f32.mrf.mxu0 }
 0x17f   : > { %v2295_v47 = vadd.f32 %v2294_v46, %v2293_v40  ;;  %v2406_v49 = vpop.f32.mrf.mxu1  ;;  %v898_v40 = vld [vmem:[#allocation2 + $0xa8] sm:$0xff] }
 0x180   : > { %v1501_v50 = vadd.f32 %v1417_v44, %v891_v41  ;;  %v2407_v51 = vadd.f32 %v2406_v49, %v2405_v43 }
 0x181   : > { %v2296_v52 = vpop.f32.mrf.mxu0 }
 0x182   : > { %v2408_v55 = vpop.f32.mrf.mxu1  ;;  %1534 = vst.msk [vmem:[#allocation2 + $0x70] sm:$0xff] %vm1519_vm11, %v1501_v50  ;;  %v1420_v56 = vadd.f32 %v2407_v51, %v2295_v47 }
 0x183   : > { %v2297_v57 = vpop.f32.mrf.mxu0 }
 0x184   : > { %v2298_v8 = vadd.f32 %v2297_v57, %v2296_v52  ;;  %v2409_v59 = vpop.f32.mrf.mxu1  ;;  %v1502_v60 = vadd.f32 %v1420_v56, %v892_v54  ;;  %v899_v52 = vld [vmem:[#allocation2 + $0xb0] sm:$0xff] }
 0x185   : > { %v2410_v61 = vadd.f32 %v2409_v59, %v2408_v55  ;;  %v2299_v63 = vpop.f32.mrf.mxu0 }
 0x186   : > { %v2411_v9 = vpop.f32.mrf.mxu1  ;;  %1535 = vst.msk [vmem:[#allocation2 + $0x78] sm:$0xff] %vm1519_vm11, %v1502_v60 }
 0x187   : > { %v1425_v10 = vadd.f32 %v2410_v61, %v2298_v8  ;;  %v2300_v11 = vpop.f32.mrf.mxu0 }
 0x188   : > { %v2301_v12 = vadd.f32 %v2300_v11, %v2299_v63  ;;  %v2412_v16 = vpop.f32.mrf.mxu1  ;;  %v900_v63 = vld [vmem:[#allocation2 + $0xb8] sm:$0xff] }
 0x189   : > { %v1503_v13 = vadd.f32 %v1425_v10, %v893_v0  ;;  %v2413_v14 = vadd.f32 %v2412_v16, %v2411_v9  ;;  %v2302_v15 = vpop.f32.mrf.mxu0 }
 0x18a   : > { %v2414_v45 = vpop.f32.mrf.mxu1 }
 0x18b   : > { %1536 = vst.msk [vmem:[#allocation2 + $0x80] sm:$0xff] %vm1519_vm11, %v1503_v13  ;;  %v1428_v17 = vadd.f32 %v2413_v14, %v2301_v12  ;;  %v2303_v18 = vpop.f32.mrf.mxu0 }
 0x18c   : > { %v2304_v19 = vadd.f32 %v2303_v18, %v2302_v15  ;;  %v2415_v20 = vpop.f32.mrf.mxu1  ;;  %v901_v15 = vld [vmem:[#allocation2 + $0xc0] sm:$0xff] }
 0x18d   : > { %v1504_v21 = vadd.f32 %v1428_v17, %v894_v42  ;;  %v2416_v39 = vadd.f32 %v2415_v20, %v2414_v45  ;;  %v2305_v48 = vpop.f32.mrf.mxu0 }
 0x18e   : > { %v2417_v22 = vpop.f32.mrf.mxu1 }
 0x18f   : > { %1537 = vst.msk [vmem:[#allocation2 + $0x88] sm:$0xff] %vm1519_vm11, %v1504_v21  ;;  %v1433_v23 = vadd.f32 %v2416_v39, %v2304_v19  ;;  %v2306_v24 = vpop.f32.mrf.mxu0 }
 0x190   : > { %v2307_v25 = vadd.f32 %v2306_v24, %v2305_v48  ;;  %v2418_v58 = vpop.f32.mrf.mxu1  ;;  %v902_v48 = vld [vmem:[#allocation2 + $0xc8] sm:$0xff] }
 0x191   : > { %v1505_v62 = vadd.f32 %v1433_v23, %v895_v53  ;;  %v2419_v26 = vadd.f32 %v2418_v58, %v2417_v22  ;;  %v2308_v27 = vpop.f32.mrf.mxu0 }
 0x192   : > { %v2420_v29 = vpop.f32.mrf.mxu1 }
 0x193   : > { %1538 = vst.msk [vmem:[#allocation2 + $0x90] sm:$0xff] %vm1519_vm11, %v1505_v62  ;;  %v1436_v5 = vadd.f32 %v2419_v26, %v2307_v25  ;;  %v2309_v6 = vpop.f32.mrf.mxu0 }
 0x194   : > { %v2310_v30 = vadd.f32 %v2309_v6, %v2308_v27  ;;  %v2421_v31 = vpop.f32.mrf.mxu1  ;;  %v903_v27 = vld [vmem:[#allocation2 + $0xd0] sm:$0xff] }
 0x195   : > { %v1506_v32 = vadd.f32 %v1436_v5, %v896_v28  ;;  %v2422_v7 = vadd.f32 %v2421_v31, %v2420_v29  ;;  %v2311_v33 = vpop.f32.mrf.mxu0 }
 0x196   : > { %v2423_v35 = vpop.f32.mrf.mxu1 }
 0x197   : > { %1539 = vst.msk [vmem:[#allocation2 + $0x98] sm:$0xff] %vm1519_vm11, %v1506_v32  ;;  %v1441_v1 = vadd.f32 %v2422_v7, %v2310_v30  ;;  %v2312_v36 = vpop.f32.mrf.mxu0 }
 0x198   : > { %v2313_v2 = vadd.f32 %v2312_v36, %v2311_v33  ;;  %v2424_v3 = vpop.f32.mrf.mxu1  ;;  %v904_v33 = vld [vmem:[#allocation2 + $0xd8] sm:$0xff] }
 0x199   : > { %v1507_v4 = vadd.f32 %v1441_v1, %v897_v34  ;;  %v2425_v37 = vadd.f32 %v2424_v3, %v2423_v35  ;;  %v2314_v38 = vpop.f32.mrf.mxu0 }
 0x19a   : > { %v2426_v41 = vpop.f32.mrf.mxu1 }
 0x19b   : > { %1540 = vst.msk [vmem:[#allocation2 + $0xa0] sm:$0xff] %vm1519_vm11, %v1507_v4  ;;  %v1444_v43 = vadd.f32 %v2425_v37, %v2313_v2  ;;  %v2315_v44 = vpop.f32.mrf.mxu0 }
 0x19c   : > { %v2316_v46 = vadd.f32 %v2315_v44, %v2314_v38  ;;  %v2427_v47 = vpop.f32.mrf.mxu1  ;;  %v905_v38 = vld [vmem:[#allocation2 + $0xe0] sm:$0xff] }
 0x19d   : > { %v1508_v49 = vadd.f32 %v1444_v43, %v898_v40  ;;  %v2428_v50 = vadd.f32 %v2427_v47, %v2426_v41  ;;  %v2317_v51 = vpop.f32.mrf.mxu0 }
 0x19e   : > { %v2429_v54 = vpop.f32.mrf.mxu1 }
 0x19f   : > { %1541 = vst.msk [vmem:[#allocation2 + $0xa8] sm:$0xff] %vm1519_vm11, %v1508_v49  ;;  %v1449_v55 = vadd.f32 %v2428_v50, %v2316_v46  ;;  %v2318_v56 = vpop.f32.mrf.mxu0 }
 0x1a0   : > { %v2319_v57 = vadd.f32 %v2318_v56, %v2317_v51  ;;  %v2430_v8 = vpop.f32.mrf.mxu1  ;;  %v906_v51 = vld [vmem:[#allocation2 + $0xe8] sm:$0xff] }
 0x1a1   : > { %v1509_v59 = vadd.f32 %v1449_v55, %v899_v52  ;;  %v2431_v60 = vadd.f32 %v2430_v8, %v2429_v54  ;;  %v2320_v61 = vpop.f32.mrf.mxu0 }
 0x1a2   : > { %v2432_v0 = vpop.f32.mrf.mxu1 }
 0x1a3   : > { %1542 = vst.msk [vmem:[#allocation2 + $0xb0] sm:$0xff] %vm1519_vm11, %v1509_v59  ;;  %v1452_v9 = vadd.f32 %v2431_v60, %v2319_v57  ;;  %v2321_v10 = vpop.f32.mrf.mxu0 }
 0x1a4   : > { %v2322_v11 = vadd.f32 %v2321_v10, %v2320_v61  ;;  %v2433_v12 = vpop.f32.mrf.mxu1  ;;  %v907_v61 = vld [vmem:[#allocation2 + $0xf0] sm:$0xff] }
 0x1a5   : > { %v1510_v16 = vadd.f32 %v1452_v9, %v900_v63  ;;  %v2434_v13 = vadd.f32 %v2433_v12, %v2432_v0  ;;  %v2323_v14 = vpop.f32.mrf.mxu0 }
 0x1a6   : > { %v2435_v42 = vpop.f32.mrf.mxu1 }
 0x1a7   : > { %1543 = vst.msk [vmem:[#allocation2 + $0xb8] sm:$0xff] %vm1519_vm11, %v1510_v16  ;;  %v1457_v45 = vadd.f32 %v2434_v13, %v2322_v11  ;;  %v2324_v17 = vpop.f32.mrf.mxu0  ;;  %v908_v13 = vld [vmem:[#allocation2 + $0xf8] sm:$0xff] }
 0x1a8   : > { %v2325_v18 = vadd.f32 %v2324_v17, %v2323_v14  ;;  %v2436_v19 = vpop.f32.mrf.mxu1 }
 0x1a9   : > { %v1511_v20 = vadd.f32 %v1457_v45, %v901_v15  ;;  %v2437_v21 = vadd.f32 %v2436_v19, %v2435_v42  ;;  %v2326_v39 = vpop.f32.mrf.mxu0 }
 0x1aa   : > { %v2438_v53 = vpop.f32.mrf.mxu1 }
 0x1ab   : > { %1544 = vst.msk [vmem:[#allocation2 + $0xc0] sm:$0xff] %vm1519_vm11, %v1511_v20  ;;  %v1460_v22 = vadd.f32 %v2437_v21, %v2325_v18  ;;  %v2327_v23 = vpop.f32.mrf.mxu0 }
 0x1ac   : > { %v2328_v24 = vadd.f32 %v2327_v23, %v2326_v39  ;;  %v2439_v25 = vpop.f32.mrf.mxu1 }
 0x1ad   : > { %v1512_v58 = vadd.f32 %v1460_v22, %v902_v48  ;;  %v2440_v62 = vadd.f32 %v2439_v25, %v2438_v53  ;;  %v2329_v26 = vpop.f32.mrf.mxu0 }
 0x1ae   : > { %v2441_v28 = vpop.f32.mrf.mxu1 }
 0x1af   : > { %1545 = vst.msk [vmem:[#allocation2 + $0xc8] sm:$0xff] %vm1519_vm11, %v1512_v58  ;;  %v1465_v29 = vadd.f32 %v2440_v62, %v2328_v24  ;;  %v2330_v5 = vpop.f32.mrf.mxu0 }
 0x1b0   : > { %v2331_v6 = vadd.f32 %v2330_v5, %v2329_v26  ;;  %v2442_v30 = vpop.f32.mrf.mxu1 }
 0x1b1   : > { %v1513_v31 = vadd.f32 %v1465_v29, %v903_v27  ;;  %v2443_v32 = vadd.f32 %v2442_v30, %v2441_v28  ;;  %v2332_v7 = vpop.f32.mrf.mxu0 }
 0x1b2   : > { %v2444_v34 = vpop.f32.mrf.mxu1 }
 0x1b3   : > { %1546 = vst.msk [vmem:[#allocation2 + $0xd0] sm:$0xff] %vm1519_vm11, %v1513_v31  ;;  %v1468_v35 = vadd.f32 %v2443_v32, %v2331_v6  ;;  %v2333_v1 = vpop.f32.mrf.mxu0 }
 0x1b4   : > { %v2334_v36 = vadd.f32 %v2333_v1, %v2332_v7  ;;  %v2445_v2 = vpop.f32.mrf.mxu1 }
 0x1b5   : > { %v1514_v3 = vadd.f32 %v1468_v35, %v904_v33  ;;  %v2446_v4 = vadd.f32 %v2445_v2, %v2444_v34  ;;  %v2335_v37 = vpop.f32.mrf.mxu0 }
 0x1b6   : > { %v2447_v40 = vpop.f32.mrf.mxu1 }
 0x1b7   : > { %1547 = vst.msk [vmem:[#allocation2 + $0xd8] sm:$0xff] %vm1519_vm11, %v1514_v3  ;;  %v1473_v41 = vadd.f32 %v2446_v4, %v2334_v36  ;;  %v2336_v43 = vpop.f32.mrf.mxu0 }
 0x1b8   : > { %v2337_v44 = vadd.f32 %v2336_v43, %v2335_v37  ;;  %v2448_v46 = vpop.f32.mrf.mxu1 }
 0x1b9   : > { %v1515_v47 = vadd.f32 %v1473_v41, %v905_v38  ;;  %v2449_v49 = vadd.f32 %v2448_v46, %v2447_v40  ;;  %v2338_v50 = vpop.f32.mrf.mxu0 }
 0x1ba   : > { %v2450_v52 = vpop.f32.mrf.mxu1 }
 0x1bb   : > { %1548 = vst.msk [vmem:[#allocation2 + $0xe0] sm:$0xff] %vm1519_vm11, %v1515_v47  ;;  %v1476_v54 = vadd.f32 %v2449_v49, %v2337_v44  ;;  %v2339_v55 = vpop.f32.mrf.mxu0 }
 0x1bc   : > { %v2340_v56 = vadd.f32 %v2339_v55, %v2338_v50  ;;  %v2451_v57 = vpop.f32.mrf.mxu1 }
 0x1bd   : > { %v1516_v8 = vadd.f32 %v1476_v54, %v906_v51  ;;  %v2452_v59 = vadd.f32 %v2451_v57, %v2450_v52  ;;  %v2341_v60 = vpop.f32.mrf.mxu0 }
 0x1be   : > { %v2453_v63 = vpop.f32.mrf.mxu1 }
 0x1bf   : > { %1549 = vst.msk [vmem:[#allocation2 + $0xe8] sm:$0xff] %vm1519_vm11, %v1516_v8  ;;  %v1481_v0 = vadd.f32 %v2452_v59, %v2340_v56  ;;  %v2342_v9 = vpop.f32.mrf.mxu0 }
 0x1c0   : > { %v2343_v10 = vadd.f32 %v2342_v9, %v2341_v60  ;;  %v2454_v11 = vpop.f32.mrf.mxu1 }
 0x1c1   : > { %v1517_v12 = vadd.f32 %v1481_v0, %v907_v61  ;;  %v2455_v16 = vadd.f32 %v2454_v11, %v2453_v63 }
 0x1c3   : > { %1550 = vst.msk [vmem:[#allocation2 + $0xf0] sm:$0xff] %vm1519_vm11, %v1517_v12  ;;  %v1484_v14 = vadd.f32 %v2455_v16, %v2343_v10 }
 0x1c5   : > { %v1518_v15 = vadd.f32 %v1484_v14, %v908_v13 }
 0x1c7   : > { %1551 = vst.msk [vmem:[#allocation2 + $0xf8] sm:$0xff] %vm1519_vm11, %v1518_v15 }
 0x1c8 PF: > { %p2229_p10 = scmp.ne.s32.totalorder %s2644_s1, 3 }
 0x1ca   : > { %1555 = sbr.rel (%p2229_p10) target bundleno = 685 (0x2ad), region = 40 }
 0x1cf   : > { %v3829_v42 = vld [vmem:[#allocation2 + $0x10] sm:$0xff]  ;;  %vm1620_vm4 = vcmask 261120   ;;  %v3831_v45 = vld [vmem:[#allocation2] sm:$0xff]  ;;  %v3833_v17 = vld [vmem:[#allocation2 + $0x18] sm:$0xff] }
 0x1d0   : > { %v1590_v18 = vmul.f32 %v3829_v42, %v3829_v42  ;;  %v1588_v19 = vmul.f32 %v3831_v45, %v3831_v45  ;;  %v1591_v20 = vmul.f32 %v3833_v17, %v3833_v17  ;;  %v3841_v21 = vld [vmem:[#allocation2 + $0x8] sm:$0xff]  ;;  %v3847_v53 = vld [vmem:[#allocation2 + $0x20] sm:$0xff]  ;;  %v3857_v26 = vld [vmem:[#allocation2 + $0x38] sm:$0xff] }
 0x1d1   : > { %v1589_v39 = vmul.f32 %v3841_v21, %v3841_v21  ;;  %v3845_v48 = vld [vmem:[#allocation2 + $0x28] sm:$0xff]  ;;  %v1592_v62 = vmul.f32 %v3847_v53, %v3847_v53  ;;  %v3859_v27 = vld [vmem:[#allocation2 + $0x30] sm:$0xff]  ;;  %v1595_v5 = vmul.f32 %v3857_v26, %v3857_v26  ;;  %v3869_v31 = vld [vmem:[#allocation2 + $0x40] sm:$0xff] }
 0x1d2   : > { %v1627_v22 = vsel %vm1620_vm4, %v1590_v18, 0.0  ;;  %v1621_v23 = vsel %vm1620_vm4, %v1588_v19, 0.0  ;;  %v1630_v24 = vsel %vm1620_vm4, %v1591_v20, 0.0  ;;  %v1593_v58 = vmul.f32 %v3845_v48, %v3845_v48  ;;  %v3867_v30 = vld [vmem:[#allocation2 + $0x48] sm:$0xff]  ;;  %v3877_v35 = vld [vmem:[#allocation2 + $0x58] sm:$0xff]  ;;  %v3879_v1 = vld [vmem:[#allocation2 + $0x50] sm:$0xff] }
 0x1d3   : > { %1628 = vadd.xlane.f32.xlu1 %v1627_v22  ;;  %1622 = vadd.xlane.f32.xlu0 %v1621_v23  ;;  %v1624_v25 = vsel %vm1620_vm4, %v1589_v39, 0.0  ;;  %v1633_v29 = vsel %vm1620_vm4, %v1592_v62, 0.0  ;;  %v1594_v6 = vmul.f32 %v3859_v27, %v3859_v27  ;;  %v1642_v32 = vsel %vm1620_vm4, %v1595_v5, 0.0  ;;  %v3887_v37 = vld [vmem:[#allocation2 + $0x68] sm:$0xff]  ;;  %v3889_v38 = vld [vmem:[#allocation2 + $0x60] sm:$0xff]  ;;  %v3897_v46 = vld [vmem:[#allocation2 + $0x78] sm:$0xff] }
 0x1d4   : > { %v1636_v28 = vsel %vm1620_vm4, %v1593_v58, 0.0  ;;  %v1597_v33 = vmul.f32 %v3867_v30, %v3867_v30  ;;  %v1596_v34 = vmul.f32 %v3869_v31, %v3869_v31  ;;  %v1599_v3 = vmul.f32 %v3877_v35, %v3877_v35  ;;  %v3899_v47 = vld [vmem:[#allocation2 + $0x70] sm:$0xff]  ;;  %v3907_v54 = vld [vmem:[#allocation2 + $0x88] sm:$0xff]  ;;  %v3909_v55 = vld [vmem:[#allocation2 + $0x80] sm:$0xff] }
 0x1d5   : > { %v1639_v7 = vsel %vm1620_vm4, %v1594_v6, 0.0  ;;  %v1598_v4 = vmul.f32 %v3879_v1, %v3879_v1  ;;  %v1601_v43 = vmul.f32 %v3887_v37, %v3887_v37  ;;  %v1600_v44 = vmul.f32 %v3889_v38, %v3889_v38  ;;  %v3917_v60 = vld [vmem:[#allocation2 + $0x98] sm:$0xff]  ;;  %v3919_v61 = vld [vmem:[#allocation2 + $0x90] sm:$0xff]  ;;  %v3927_v11 = vld [vmem:[#allocation2 + $0xa8] sm:$0xff] }
 0x1d6   : > { %v1648_v36 = vsel %vm1620_vm4, %v1597_v33, 0.0  ;;  %v1645_v2 = vsel %vm1620_vm4, %v1596_v34, 0.0  ;;  %v1654_v40 = vsel %vm1620_vm4, %v1599_v3, 0.0  ;;  %v1603_v51 = vmul.f32 %v3897_v46, %v3897_v46  ;;  %v3929_v12 = vld [vmem:[#allocation2 + $0xa0] sm:$0xff]  ;;  %v3937_v18 = vld [vmem:[#allocation2 + $0xb8] sm:$0xff]  ;;  %v3939_v19 = vld [vmem:[#allocation2 + $0xb0] sm:$0xff] }
 0x1d7   : > { %1631 = vadd.xlane.f32.xlu1 %v1630_v24  ;;  %1625 = vadd.xlane.f32.xlu0 %v1624_v25  ;;  %v1651_v41 = vsel %vm1620_vm4, %v1598_v4, 0.0  ;;  %v1660_v49 = vsel %vm1620_vm4, %v1601_v43, 0.0  ;;  %v1657_v50 = vsel %vm1620_vm4, %v1600_v44, 0.0  ;;  %v1602_v52 = vmul.f32 %v3899_v47, %v3899_v47  ;;  %v3947_v24 = vld [vmem:[#allocation2 + $0xc8] sm:$0xff]  ;;  %v3949_v25 = vld [vmem:[#allocation2 + $0xc0] sm:$0xff]  ;;  %v3957_v5 = vld [vmem:[#allocation2 + $0xd8] sm:$0xff] }
 0x1d8   : > { %v1666_v56 = vsel %vm1620_vm4, %v1603_v51, 0.0  ;;  %v1605_v8 = vmul.f32 %v3907_v54, %v3907_v54  ;;  %v1604_v59 = vmul.f32 %v3909_v55, %v3909_v55  ;;  %v1607_v9 = vmul.f32 %v3917_v60, %v3917_v60  ;;  %v3959_v6 = vld [vmem:[#allocation2 + $0xd0] sm:$0xff]  ;;  %v3977_v43 = vld [vmem:[#allocation2 + $0xf8] sm:$0xff] }
 0x1d9   : > { %v1663_v57 = vsel %vm1620_vm4, %v1602_v52, 0.0  ;;  %v1606_v10 = vmul.f32 %v3919_v61, %v3919_v61  ;;  %v1609_v14 = vmul.f32 %v3927_v11, %v3927_v11  ;;  %v1608_v15 = vmul.f32 %v3929_v12, %v3929_v12  ;;  %v3979_v44 = vld [vmem:[#allocation2 + $0xf0] sm:$0xff] }
 0x1da   : > { %v1672_v63 = vsel %vm1620_vm4, %v1605_v8, 0.0  ;;  %v1669_v0 = vsel %vm1620_vm4, %v1604_v59, 0.0  ;;  %v1678_v16 = vsel %vm1620_vm4, %v1607_v9, 0.0  ;;  %v1611_v22 = vmul.f32 %v3937_v18, %v3937_v18 }
 0x1db   : > { %1637 = vadd.xlane.f32.xlu1 %v1636_v28  ;;  %1634 = vadd.xlane.f32.xlu0 %v1633_v29  ;;  %v1675_v13 = vsel %vm1620_vm4, %v1606_v10, 0.0  ;;  %v1684_v20 = vsel %vm1620_vm4, %v1609_v14, 0.0  ;;  %v1681_v39 = vsel %vm1620_vm4, %v1608_v15, 0.0  ;;  %v1610_v23 = vmul.f32 %v3939_v19, %v3939_v19 }
 0x1dc   : > { %v1690_v58 = vsel %vm1620_vm4, %v1611_v22, 0.0  ;;  %v1613_v28 = vmul.f32 %v3947_v24, %v3947_v24  ;;  %v1612_v29 = vmul.f32 %v3949_v25, %v3949_v25  ;;  %v1615_v33 = vmul.f32 %v3957_v5, %v3957_v5 }
 0x1dd   : > { %v1687_v62 = vsel %vm1620_vm4, %v1610_v23, 0.0  ;;  %v1614_v34 = vmul.f32 %v3959_v6, %v3959_v6  ;;  %v1619_v51 = vmul.f32 %v3977_v43, %v3977_v43  ;;  %v1618_v52 = vmul.f32 %v3979_v44, %v3979_v44 }
 0x1de   : > { %v1702_v3 = vsel %vm1620_vm4, %v1615_v33, 0.0 }
 0x1df   : > { %1643 = vadd.xlane.f32.xlu1 %v1642_v32  ;;  %1640 = vadd.xlane.f32.xlu0 %v1639_v7  ;;  %v1696_v32 = vsel %vm1620_vm4, %v1613_v28, 0.0  ;;  %v1693_v7 = vsel %vm1620_vm4, %v1612_v29, 0.0  ;;  %v1699_v4 = vsel %vm1620_vm4, %v1614_v34, 0.0 }
 0x1e3   : > { %1649 = vadd.xlane.f32.xlu1 %v1648_v36  ;;  %1646 = vadd.xlane.f32.xlu0 %v1645_v2  ;;  %v3967_v36 = vld [vmem:[#allocation2 + $0xe8] sm:$0xff]  ;;  %v3969_v2 = vld [vmem:[#allocation2 + $0xe0] sm:$0xff] }
 0x1e7   : > { %1655 = vadd.xlane.f32.xlu1 %v1654_v40  ;;  %1652 = vadd.xlane.f32.xlu0 %v1651_v41  ;;  %v1617_v40 = vmul.f32 %v3967_v36, %v3967_v36  ;;  %v1616_v41 = vmul.f32 %v3969_v2, %v3969_v2 }
 0x1eb   : > { %1661 = vadd.xlane.f32.xlu1 %v1660_v49  ;;  %1658 = vadd.xlane.f32.xlu0 %v1657_v50  ;;  %v1708_v49 = vsel %vm1620_vm4, %v1617_v40, 0.0  ;;  %v1705_v50 = vsel %vm1620_vm4, %v1616_v41, 0.0 }
 0x1ef   : > { %1667 = vadd.xlane.f32.xlu1 %v1666_v56  ;;  %1664 = vadd.xlane.f32.xlu0 %v1663_v57  ;;  %v1714_v56 = vsel %vm1620_vm4, %v1619_v51, 0.0  ;;  %v1711_v57 = vsel %vm1620_vm4, %v1618_v52, 0.0 }
 0x1f3   : > { %1673 = vadd.xlane.f32.xlu1 %v1672_v63  ;;  %1670 = vadd.xlane.f32.xlu0 %v1669_v0 }
 0x1f7   : > { %1679 = vadd.xlane.f32.xlu1 %v1678_v16  ;;  %1676 = vadd.xlane.f32.xlu0 %v1675_v13 }
 0x1fb   : > { %1685 = vadd.xlane.f32.xlu1 %v1684_v20  ;;  %1682 = vadd.xlane.f32.xlu0 %v1681_v39 }
 0x1ff   : > { %1691 = vadd.xlane.f32.xlu1 %v1690_v58  ;;  %1688 = vadd.xlane.f32.xlu0 %v1687_v62 }
 0x203   : > { %1697 = vadd.xlane.f32.xlu1 %v1696_v32  ;;  %1694 = vadd.xlane.f32.xlu0 %v1693_v7 }
 0x207   : > { %1703 = vadd.xlane.f32.xlu1 %v1702_v3  ;;  %1700 = vadd.xlane.f32.xlu0 %v1699_v4 }
 0x20b   : > { %1709 = vadd.xlane.f32.xlu1 %v1708_v49  ;;  %1706 = vadd.xlane.f32.xlu0 %v1705_v50 }
 0x20f   : > { %1715 = vadd.xlane.f32.xlu1 %v1714_v56  ;;  %1712 = vadd.xlane.f32.xlu0 %v1711_v57 }
 0x25c   : > { %v1629_v8 = vpop.xlane.xlu1 %1628  ;;  %v1623_v59 = vpop.xlane.xlu0 %1622 }
 0x25d   : > { %v1719_v63 = vmax.f32 %v1629_v8, 1e-24  ;;  %v1717_v0 = vmax.f32 %v1623_v59, 1e-24 }
 0x25f   : > { %2532 = vrsqrt.f32 %v1719_v63 }
 0x260   : > { %2534 = vrsqrt.f32 %v1717_v0  ;;  %v1632_v9 = vpop.xlane.xlu1 %1631  ;;  %v1626_v10 = vpop.xlane.xlu0 %1625 }
 0x261   : > { %v1720_v16 = vmax.f32 %v1632_v9, 1e-24  ;;  %v1718_v13 = vmax.f32 %v1626_v10, 1e-24 }
 0x263   : > { %2536 = vrsqrt.f32 %v1720_v16 }
 0x264   : > { %2538 = vrsqrt.f32 %v1718_v13  ;;  %v1638_v14 = vpop.xlane.xlu1 %1637  ;;  %v1635_v15 = vpop.xlane.xlu0 %1634 }
 0x265   : > { %v1722_v20 = vmax.f32 %v1638_v14, 1e-24  ;;  %v1721_v39 = vmax.f32 %v1635_v15, 1e-24 }
 0x267   : > { %2540 = vrsqrt.f32 %v1722_v20 }
 0x268   : > { %2542 = vrsqrt.f32 %v1721_v39  ;;  %v1644_v22 = vpop.xlane.xlu1 %1643  ;;  %v1641_v23 = vpop.xlane.xlu0 %1640 }
 0x269   : > { %v1724_v58 = vmax.f32 %v1644_v22, 1e-24  ;;  %v1723_v62 = vmax.f32 %v1641_v23, 1e-24 }
 0x26b   : > { %2544 = vrsqrt.f32 %v1724_v58 }
 0x26c   : > { %v2533_v28 = vpop.eup %2532  ;;  %2546 = vrsqrt.f32 %v1723_v62  ;;  %v1650_v29 = vpop.xlane.xlu1 %1649 }
 0x26d   : > { %v1647_v32 = vpop.xlane.xlu0 %1646  ;;  %v2535_v7 = vpop.eup %2534  ;;  %v1783_v33 = vmul.f32 %v2533_v28, %v3829_v42  ;;  %v1726_v34 = vmax.f32 %v1650_v29, 1e-24 }
 0x26e   : > { %v1725_v3 = vmax.f32 %v1647_v32, 1e-24  ;;  %v1781_v4 = vmul.f32 %v2535_v7, %v3831_v45 }
 0x26f   : > { %1815 = vst.msk [vmem:[%s2738_s12 + $0x10] sm:$0xff] %vm1620_vm4, %v1783_v33  ;;  %2548 = vrsqrt.f32 %v1726_v34 }
 0x270   : > { %v2537_v40 = vpop.eup %2536  ;;  %1813 = vst.msk [vmem:[%s2738_s12] sm:$0xff] %vm1620_vm4, %v1781_v4  ;;  %2550 = vrsqrt.f32 %v1725_v3  ;;  %v1656_v41 = vpop.xlane.xlu1 %1655 }
 0x271   : > { %v1653_v49 = vpop.xlane.xlu0 %1652  ;;  %v2539_v50 = vpop.eup %2538  ;;  %v1784_v51 = vmul.f32 %v2537_v40, %v3833_v17  ;;  %v1728_v42 = vmax.f32 %v1656_v41, 1e-24 }
 0x272   : > { %v1727_v52 = vmax.f32 %v1653_v49, 1e-24  ;;  %v1782_v56 = vmul.f32 %v2539_v50, %v3841_v21 }
 0x273   : > { %1816 = vst.msk [vmem:[%s2738_s12 + $0x18] sm:$0xff] %vm1620_vm4, %v1784_v51  ;;  %2552 = vrsqrt.f32 %v1728_v42 }
 0x274   : > { %v2541_v45 = vpop.eup %2540  ;;  %1814 = vst.msk [vmem:[%s2738_s12 + $0x8] sm:$0xff] %vm1620_vm4, %v1782_v56  ;;  %2554 = vrsqrt.f32 %v1727_v52  ;;  %v1662_v57 = vpop.xlane.xlu1 %1661 }
 0x275   : > { %v1659_v8 = vpop.xlane.xlu0 %1658  ;;  %v2543_v59 = vpop.eup %2542  ;;  %v1786_v63 = vmul.f32 %v2541_v45, %v3845_v48  ;;  %v1730_v17 = vmax.f32 %v1662_v57, 1e-24 }
 0x276   : > { %v1729_v0 = vmax.f32 %v1659_v8, 1e-24  ;;  %v1785_v9 = vmul.f32 %v2543_v59, %v3847_v53 }
 0x277   : > { %1818 = vst.msk [vmem:[%s2738_s12 + $0x28] sm:$0xff] %vm1620_vm4, %v1786_v63  ;;  %2556 = vrsqrt.f32 %v1730_v17 }
 0x278   : > { %v2545_v21 = vpop.eup %2544  ;;  %1817 = vst.msk [vmem:[%s2738_s12 + $0x20] sm:$0xff] %vm1620_vm4, %v1785_v9  ;;  %2558 = vrsqrt.f32 %v1729_v0  ;;  %v1668_v10 = vpop.xlane.xlu1 %1667 }
 0x279   : > { %v1665_v16 = vpop.xlane.xlu0 %1664  ;;  %v2547_v13 = vpop.eup %2546  ;;  %v1788_v14 = vmul.f32 %v2545_v21, %v3857_v26  ;;  %v1732_v48 = vmax.f32 %v1668_v10, 1e-24 }
 0x27a   : > { %v1731_v15 = vmax.f32 %v1665_v16, 1e-24  ;;  %v1787_v20 = vmul.f32 %v2547_v13, %v3859_v27 }
 0x27b   : > { %1820 = vst.msk [vmem:[%s2738_s12 + $0x38] sm:$0xff] %vm1620_vm4, %v1788_v14  ;;  %2560 = vrsqrt.f32 %v1732_v48 }
 0x27c   : > { %v2549_v53 = vpop.eup %2548  ;;  %1819 = vst.msk [vmem:[%s2738_s12 + $0x30] sm:$0xff] %vm1620_vm4, %v1787_v20  ;;  %2562 = vrsqrt.f32 %v1731_v15  ;;  %v1674_v39 = vpop.xlane.xlu1 %1673 }
 0x27d   : > { %v1671_v22 = vpop.xlane.xlu0 %1670  ;;  %v2551_v23 = vpop.eup %2550  ;;  %v1790_v58 = vmul.f32 %v2549_v53, %v3867_v30  ;;  %v1734_v26 = vmax.f32 %v1674_v39, 1e-24 }
 0x27e   : > { %v1733_v62 = vmax.f32 %v1671_v22, 1e-24  ;;  %v1789_v28 = vmul.f32 %v2551_v23, %v3869_v31 }
 0x27f   : > { %1822 = vst.msk [vmem:[%s2738_s12 + $0x48] sm:$0xff] %vm1620_vm4, %v1790_v58  ;;  %2564 = vrsqrt.f32 %v1734_v26 }
 0x280   : > { %v2553_v27 = vpop.eup %2552  ;;  %1821 = vst.msk [vmem:[%s2738_s12 + $0x40] sm:$0xff] %vm1620_vm4, %v1789_v28  ;;  %2566 = vrsqrt.f32 %v1733_v62  ;;  %v1680_v29 = vpop.xlane.xlu1 %1679 }
 0x281   : > { %v1677_v32 = vpop.xlane.xlu0 %1676  ;;  %v2555_v7 = vpop.eup %2554  ;;  %v1792_v33 = vmul.f32 %v2553_v27, %v3877_v35  ;;  %v1736_v30 = vmax.f32 %v1680_v29, 1e-24 }
 0x282   : > { %v1735_v34 = vmax.f32 %v1677_v32, 1e-24  ;;  %v1791_v3 = vmul.f32 %v2555_v7, %v3879_v1 }
 0x283   : > { %1824 = vst.msk [vmem:[%s2738_s12 + $0x58] sm:$0xff] %vm1620_vm4, %v1792_v33  ;;  %2568 = vrsqrt.f32 %v1736_v30 }
 0x284   : > { %v2557_v31 = vpop.eup %2556  ;;  %1823 = vst.msk [vmem:[%s2738_s12 + $0x50] sm:$0xff] %vm1620_vm4, %v1791_v3  ;;  %2570 = vrsqrt.f32 %v1735_v34  ;;  %v1686_v4 = vpop.xlane.xlu1 %1685 }
 0x285   : > { %v1683_v40 = vpop.xlane.xlu0 %1682  ;;  %v2559_v41 = vpop.eup %2558  ;;  %v1794_v49 = vmul.f32 %v2557_v31, %v3887_v37  ;;  %v1738_v35 = vmax.f32 %v1686_v4, 1e-24 }
 0x286   : > { %v1737_v50 = vmax.f32 %v1683_v40, 1e-24  ;;  %v1793_v51 = vmul.f32 %v2559_v41, %v3889_v38 }
 0x287   : > { %1826 = vst.msk [vmem:[%s2738_s12 + $0x68] sm:$0xff] %vm1620_vm4, %v1794_v49  ;;  %2572 = vrsqrt.f32 %v1738_v35 }
 0x288   : > { %v2561_v1 = vpop.eup %2560  ;;  %1825 = vst.msk [vmem:[%s2738_s12 + $0x60] sm:$0xff] %vm1620_vm4, %v1793_v51  ;;  %2574 = vrsqrt.f32 %v1737_v50  ;;  %v1692_v42 = vpop.xlane.xlu1 %1691 }
 0x289   : > { %v1689_v52 = vpop.xlane.xlu0 %1688  ;;  %v2563_v56 = vpop.eup %2562  ;;  %v1796_v45 = vmul.f32 %v2561_v1, %v3897_v46  ;;  %v1740_v37 = vmax.f32 %v1692_v42, 1e-24 }
 0x28a   : > { %v1739_v57 = vmax.f32 %v1689_v52, 1e-24  ;;  %v1795_v8 = vmul.f32 %v2563_v56, %v3899_v47 }
 0x28b   : > { %1828 = vst.msk [vmem:[%s2738_s12 + $0x78] sm:$0xff] %vm1620_vm4, %v1796_v45  ;;  %2576 = vrsqrt.f32 %v1740_v37 }
 0x28c   : > { %v2565_v38 = vpop.eup %2564  ;;  %1827 = vst.msk [vmem:[%s2738_s12 + $0x70] sm:$0xff] %vm1620_vm4, %v1795_v8  ;;  %2578 = vrsqrt.f32 %v1739_v57  ;;  %v1698_v59 = vpop.xlane.xlu1 %1697 }
 0x28d   : > { %v1695_v63 = vpop.xlane.xlu0 %1694  ;;  %v2567_v17 = vpop.eup %2566  ;;  %v1798_v0 = vmul.f32 %v2565_v38, %v3907_v54  ;;  %v1742_v46 = vmax.f32 %v1698_v59, 1e-24 }
 0x28e   : > { %v1741_v9 = vmax.f32 %v1695_v63, 1e-24  ;;  %v1797_v21 = vmul.f32 %v2567_v17, %v3909_v55 }
 0x28f   : > { %1830 = vst.msk [vmem:[%s2738_s12 + $0x88] sm:$0xff] %vm1620_vm4, %v1798_v0  ;;  %2580 = vrsqrt.f32 %v1742_v46 }
 0x290   : > { %v2569_v47 = vpop.eup %2568  ;;  %1829 = vst.msk [vmem:[%s2738_s12 + $0x80] sm:$0xff] %vm1620_vm4, %v1797_v21  ;;  %2582 = vrsqrt.f32 %v1741_v9  ;;  %v1704_v10 = vpop.xlane.xlu1 %1703 }
 0x291   : > { %v1701_v16 = vpop.xlane.xlu0 %1700  ;;  %v2571_v13 = vpop.eup %2570  ;;  %v1800_v14 = vmul.f32 %v2569_v47, %v3917_v60  ;;  %v1744_v54 = vmax.f32 %v1704_v10, 1e-24 }
 0x292   : > { %v1743_v48 = vmax.f32 %v1701_v16, 1e-24  ;;  %v1799_v15 = vmul.f32 %v2571_v13, %v3919_v61 }
 0x293   : > { %1832 = vst.msk [vmem:[%s2738_s12 + $0x98] sm:$0xff] %vm1620_vm4, %v1800_v14  ;;  %2584 = vrsqrt.f32 %v1744_v54 }
 0x294   : > { %v2573_v55 = vpop.eup %2572  ;;  %1831 = vst.msk [vmem:[%s2738_s12 + $0x90] sm:$0xff] %vm1620_vm4, %v1799_v15  ;;  %2586 = vrsqrt.f32 %v1743_v48  ;;  %v1710_v20 = vpop.xlane.xlu1 %1709 }
 0x295   : > { %v1707_v53 = vpop.xlane.xlu0 %1706  ;;  %v2575_v39 = vpop.eup %2574  ;;  %v1802_v22 = vmul.f32 %v2573_v55, %v3927_v11  ;;  %v1746_v60 = vmax.f32 %v1710_v20, 1e-24 }
 0x296   : > { %v1745_v23 = vmax.f32 %v1707_v53, 1e-24  ;;  %v1801_v58 = vmul.f32 %v2575_v39, %v3929_v12 }
 0x297   : > { %1834 = vst.msk [vmem:[%s2738_s12 + $0xa8] sm:$0xff] %vm1620_vm4, %v1802_v22  ;;  %2588 = vrsqrt.f32 %v1746_v60 }
 0x298   : > { %v2577_v61 = vpop.eup %2576  ;;  %1833 = vst.msk [vmem:[%s2738_s12 + $0xa0] sm:$0xff] %vm1620_vm4, %v1801_v58  ;;  %2590 = vrsqrt.f32 %v1745_v23  ;;  %v1716_v26 = vpop.xlane.xlu1 %1715 }
 0x299   : > { %v1713_v62 = vpop.xlane.xlu0 %1712  ;;  %v2579_v28 = vpop.eup %2578  ;;  %v1804_v11 = vmul.f32 %v2577_v61, %v3937_v18  ;;  %v1748_v27 = vmax.f32 %v1716_v26, 1e-24 }
 0x29a   : > { %v1747_v29 = vmax.f32 %v1713_v62, 1e-24  ;;  %v1803_v12 = vmul.f32 %v2579_v28, %v3939_v19 }
 0x29b   : > { %1836 = vst.msk [vmem:[%s2738_s12 + $0xb8] sm:$0xff] %vm1620_vm4, %v1804_v11  ;;  %2592 = vrsqrt.f32 %v1748_v27 }
 0x29c   : > { %v2581_v32 = vpop.eup %2580  ;;  %1835 = vst.msk [vmem:[%s2738_s12 + $0xb0] sm:$0xff] %vm1620_vm4, %v1803_v12  ;;  %2594 = vrsqrt.f32 %v1747_v29 }
 0x29d   : > { %v2583_v7 = vpop.eup %2582  ;;  %v1806_v33 = vmul.f32 %v2581_v32, %v3947_v24 }
 0x29e   : > { %v1805_v18 = vmul.f32 %v2583_v7, %v3949_v25 }
 0x29f   : > { %1838 = vst.msk [vmem:[%s2738_s12 + $0xc8] sm:$0xff] %vm1620_vm4, %v1806_v33 }
 0x2a0   : > { %v2585_v30 = vpop.eup %2584  ;;  %1837 = vst.msk [vmem:[%s2738_s12 + $0xc0] sm:$0xff] %vm1620_vm4, %v1805_v18 }
 0x2a1   : > { %v2587_v19 = vpop.eup %2586  ;;  %v1808_v34 = vmul.f32 %v2585_v30, %v3957_v5 }
 0x2a2   : > { %v1807_v3 = vmul.f32 %v2587_v19, %v3959_v6 }
 0x2a3   : > { %1840 = vst.msk [vmem:[%s2738_s12 + $0xd8] sm:$0xff] %vm1620_vm4, %v1808_v34 }
 0x2a4   : > { %v2589_v31 = vpop.eup %2588  ;;  %1839 = vst.msk [vmem:[%s2738_s12 + $0xd0] sm:$0xff] %vm1620_vm4, %v1807_v3 }
 0x2a5   : > { %v2591_v24 = vpop.eup %2590  ;;  %v1810_v25 = vmul.f32 %v2589_v31, %v3967_v36 }
 0x2a6   : > { %v1809_v4 = vmul.f32 %v2591_v24, %v3969_v2 }
 0x2a7   : > { %1842 = vst.msk [vmem:[%s2738_s12 + $0xe8] sm:$0xff] %vm1620_vm4, %v1810_v25 }
 0x2a8   : > { %v2593_v40 = vpop.eup %2592  ;;  %1841 = vst.msk [vmem:[%s2738_s12 + $0xe0] sm:$0xff] %vm1620_vm4, %v1809_v4 }
 0x2a9   : > { %v2595_v41 = vpop.eup %2594  ;;  %v1812_v5 = vmul.f32 %v2593_v40, %v3977_v43 }
 0x2aa   : > { %v1811_v6 = vmul.f32 %v2595_v41, %v3979_v44 }
 0x2ab   : > { %1844 = vst.msk [vmem:[%s2738_s12 + $0xf8] sm:$0xff] %vm1620_vm4, %v1812_v5 }
 0x2ac   : > { %1843 = vst.msk [vmem:[%s2738_s12 + $0xf0] sm:$0xff] %vm1620_vm4, %v1811_v6 }
 0x2ad PF: > { %s24_s27 = sadd.s32 1, %s2660_s27   ;;  %s4305_s1 = smov %s2652_s25 }
 0x2ae   : > { %p21_p11 = scmp.ge.s32.totalorder %s24_s27, 14   ;;  %s4306_s24 = smov %s2656_s26 }
 0x2af   : > { %s4307_s25 = smov %s4310_s28  ;;  %s4308_s26 = smov %s4314_s29 }
 0x2b0   :  { %23 = sbr.rel (!%p21_p11) target bundleno = 28 (0x1c), region = 73 }

// kernel: graphconv_forward.10
= control target key start
LH: loop header
LB: loop body
LE: loop exit
PB: predicated region body
PF: predicated region fallthrough
CT: control target
= control target key end

     0   :  { %s2912_s9 = smov 0   ;;  %s2914_s10 = smov 0   ;;  %s4008_s0 = inlined_call_operand.vmem [shape: bf16[1024,32], index: 0, kind: input, shape index: {}, may-alias: {0,1}]   ;;  %s4009_s1 = inlined_call_operand.vmem [shape: bf16[1024,32], index: 1, kind: input, shape index: {}, may-alias: {0,1}]   ;;  %s4010_s2 = inlined_call_operand.vmem [shape: f32[1024,1024], index: 2, kind: output, shape index: {}]  }
   0x1   :  { %s2916_s11 = smov 0   ;;  %s2918_s12 = smov 0  }
   0x2   :  { %s2920_s13 = smov 0   ;;  %s2922_s14 = smov 0  }
   0x3   :  { %s2924_s15 = smov 0  }
   0x4 LB: > { %s21_s16 = sadd.s32 1, %s2887_s13  ;;  %s24_s17 = sadd.s32 1, %s2891_s14  ;;  %s2895_s15 = sphi %s2924_s15, %s12_s15   ;;  %s2891_s14 = sphi %s2922_s14, %s4017_s14   ;;  %s2887_s13 = sphi %s2920_s13, %s4016_s13   ;;  %s2883_s12 = sphi %s2918_s12, %s4015_s12   ;;  %s2879_s11 = sphi %s2916_s11, %s4014_s11   ;;  %s2875_s10 = sphi %s2914_s10, %s4013_s10   ;;  %s2871_s9 = sphi %s2912_s9, %s4012_s9  }
   0x5   : > { %p22_p0 = scmp.ge.s32.totalorder %s21_s16, 2  ;;  %s2399_s18 = sadd.s32 4294967295, %s2895_s15  }
   0x6   : > { %p95_p1 = scmp.ne.s32.totalorder %s2875_s10, %s2871_s9  ;;  %p96_p2 = scmp.eq.s32.totalorder %s2399_s18, 3 }
   0x7   : > { %s4019_s16 = smov (%p22_p0, %s21_s16), 0  ;;  %s4021_s17 = smov (!%p22_p0, %s24_s17), %s2891_s14 }
   0x8   : > { %s81_s19 = ssub.s32 %s2887_s13, %s4019_s16  ;;  %p26_p3 = scmp.ge.s32.totalorder %s4021_s17, 2 }
   0x9   : > { %p2403_p4 = scmp.ge.s32.totalorder %s2895_s15, 1  ;;  %p2958_p5 = por %p96_p2, %p95_p1 }
   0xa   : > { %p138_p6 = scmp.lt.s32.totalorder %s2895_s15, 5  ;;  %s4023_s17 = smov (%p26_p3, %s4021_s17), 0 }
   0xb   : > { %s80_s21 = ssub.s32 %s2891_s14, %s4023_s17  ;;  %s85_s23 = sadd.s32 1, %s2875_s10 }
   0xc   : > { %p139_p7 = pnand %p2403_p4, %p138_p6  ;;  %s82_s22 = sor.u32 %s81_s19, %s80_s21 }
   0xd   : > { %p83_p8 = scmp.eq.s32.totalorder %s82_s22, 0  ;;  %s2407_s25 = sshll.u32 (!%p139_p7), %s2879_s11, 6 }
   0xe   : > { %142 = sbr.rel (%p139_p7) target bundleno = 635 (0x27b), region = 28  ;;  %p171_p9 = scmp.lt.s32.totalorder (!%p139_p7), %s2407_s25, 127 }
   0xf   : > { %s2969_s24 = scalar_select %p83_p8, %s2875_s10, %s85_s23  }
  0x10   : > { %s2405_s30 = sshll.u32 (!%p139_p7), %s2883_s12, 6  ;;  %s161_s7 = sand.u32 (!%p139_p7), 1, %s2871_s9  }
  0x11   : > { %p165_p10 = scmp.lt.s32.totalorder (!%p139_p7), %s2405_s30, 127  ;;  %s2404_s8 = sshll.u32 (!%p139_p7), %s161_s7, 11 }
  0x12   : > { %s3173_s18 = scalar_lea.vmem (!%p139_p7), [#allocation2], %s2404_s8 }
  0x13   : > { %s4025_s25 = smov (!%p171_p9, %s2407_s25), 127  ;;  %vm627_vm0 = vcmask 261120   ;;  %s4027_s30 = smov (!%p165_p10, %s2405_s30), 127 }
  0x14   : > { %s2408_s26 = sshll.u32 %s4025_s25, 2  ;;  %s2406_s3 = sshll.u32 %s4027_s30, 2 }
  0x15   : > { %s2975_s29 = scalar_lea.vmem %s4009_s1, %s2408_s26  ;;  %s3015_s6 = scalar_lea.vmem %s4008_s0, %s2406_s3 }
  0x16   : > { %v2777_v0 = vld [vmem:[%s2975_s29 + $0x78] sm:$0xff]   ;;  %v2781_v5 = vld [vmem:[%s2975_s29 + $0x70] sm:$0xff]   ;;  %v2785_v11 = vld [vmem:[%s2975_s29 + $0x68] sm:$0xff]   ;;  %s2539_s9 = sshll.u32 (%p2958_p5), %s2879_s11, 2  ;;  %s2544_s19 = sshll.u32 (%p2958_p5), %s2883_s12, 9 }
  0x17   : > { %v2778_v1 = vld [vmem:[%s2975_s29 + $0xf8] sm:$0xff]   ;;  %2705 = vmatprep.subr.msk.bf16.mxu0 %vm627_vm0, %v2777_v0  ;;  %v2782_v7 = vld [vmem:[%s2975_s29 + $0xf0] sm:$0xff]   ;;  %v2786_v13 = vld [vmem:[%s2975_s29 + $0xe8] sm:$0xff]   ;;  %s1792_s20 = sadd.s32 (%p2958_p5), %s2544_s19, %s2539_s9 }
  0x18   : > { %v2779_v2 = vld [vmem:[%s2975_s29 + $0x38] sm:$0xff]   ;;  %2713 = vmatprep.subr.msk.bf16.mxu1 %vm627_vm0, %v2778_v1  ;;  %v2783_v8 = vld [vmem:[%s2975_s29 + $0x30] sm:$0xff]   ;;  %v2787_v14 = vld [vmem:[%s2975_s29 + $0x28] sm:$0xff]   ;;  %s2541_s21 = sshll.u32 (%p2958_p5), %s1792_s20, 3 }
  0x19   : > { %v2780_v3 = vld [vmem:[%s2975_s29 + $0xb8] sm:$0xff]   ;;  %v746_v4 = vsel %vm627_vm0, %v2779_v2, 0  ;;  %v2784_v9 = vld [vmem:[%s2975_s29 + $0xb0] sm:$0xff]   ;;  %v743_v10 = vsel %vm627_vm0, %v2783_v8, 0  ;;  %v2788_v15 = vld [vmem:[%s2975_s29 + $0xa8] sm:$0xff]   ;;  %v740_v16 = vsel %vm627_vm0, %v2787_v14, 0  ;;  %s3482_s25 = scalar_lea.vmem (%p2958_p5), %s4010_s2, %s2541_s21 }
  0x1a   : > { %2546 = vmatpush3.bf16.xpose.msra.mxu0 %v746_v4  ;;  %v794_v6 = vsel %vm627_vm0, %v2780_v3, 0  ;;  %v791_v12 = vsel %vm627_vm0, %v2784_v9, 0  ;;  %v2789_v17 = vld [vmem:[%s2975_s29 + $0x60] sm:$0xff]   ;;  %v788_v18 = vsel %vm627_vm0, %v2788_v15, 0  ;;  %v2793_v23 = vld [vmem:[%s2975_s29 + $0x58] sm:$0xff]   ;;  %v2797_v30 = vld [vmem:[%s2975_s29 + $0x50] sm:$0xff]  }
  0x1b   : > { %2626 = vmatpush3.bf16.xpose.msra.mxu1 %v794_v6  ;;  %2706 = vmatprep.subr.msk.bf16.mxu0 %vm627_vm0, %v2781_v5  ;;  %v2790_v19 = vld [vmem:[%s2975_s29 + $0xe0] sm:$0xff]   ;;  %v2794_v25 = vld [vmem:[%s2975_s29 + $0xd8] sm:$0xff]   ;;  %v2798_v32 = vld [vmem:[%s2975_s29 + $0xd0] sm:$0xff]  }
  0x1c   : > { %2714 = vmatprep.subr.msk.bf16.mxu1 %vm627_vm0, %v2782_v7  ;;  %v2791_v20 = vld [vmem:[%s2975_s29 + $0x20] sm:$0xff]   ;;  %v2795_v26 = vld [vmem:[%s2975_s29 + $0x18] sm:$0xff]   ;;  %v2799_v33 = vld [vmem:[%s2975_s29 + $0x10] sm:$0xff]  }
  0x1d   : > { %v2792_v21 = vld [vmem:[%s2975_s29 + $0xa0] sm:$0xff]   ;;  %v737_v22 = vsel %vm627_vm0, %v2791_v20, 0  ;;  %v2796_v27 = vld [vmem:[%s2975_s29 + $0x98] sm:$0xff]   ;;  %v734_v29 = vsel %vm627_vm0, %v2795_v26, 0  ;;  %v2800_v34 = vld [vmem:[%s2975_s29 + $0x90] sm:$0xff]   ;;  %v731_v37 = vsel %vm627_vm0, %v2799_v33, 0 }
  0x1e   : > { %v785_v24 = vsel %vm627_vm0, %v2792_v21, 0  ;;  %v2809_v28 = vld [vmem:[%s3015_s6] sm:$0xff]   ;;  %v782_v31 = vsel %vm627_vm0, %v2796_v27, 0  ;;  %v2801_v35 = vld [vmem:[%s2975_s29 + $0x48] sm:$0xff]   ;;  %v779_v39 = vsel %vm627_vm0, %v2800_v34, 0  ;;  %v2811_v50 = vld [vmem:[%s3015_s6 + $0x10] sm:$0xff]  }
  0x1f   : > { %2561 = vmatprep.mubr.msk.bf16.mxu0 %vm627_vm0, %v2809_v28  ;;  %2641 = vmatprep.mubr.msk.bf16.mxu1 %vm627_vm0, %v2809_v28  ;;  %v2803_v36 = vld [vmem:[%s2975_s29 + $0x8] sm:$0xff]   ;;  %v2805_v43 = vld [vmem:[%s2975_s29 + $0x40] sm:$0xff]   ;;  %v2812_v51 = vld [vmem:[%s3015_s6 + $0x18] sm:$0xff]  }
  0x20   : > { %v2804_v38 = vld [vmem:[%s2975_s29 + $0x88] sm:$0xff]   ;;  %v728_v41 = vsel %vm627_vm0, %v2803_v36, 0  ;;  %v2806_v44 = vld [vmem:[%s2975_s29 + $0xc0] sm:$0xff]   ;;  %v2815_v54 = vld [vmem:[%s3015_s6 + $0x30] sm:$0xff]  }
  0x21   : > { %v2802_v40 = vld [vmem:[%s2975_s29 + $0xc8] sm:$0xff]   ;;  %v776_v42 = vsel %vm627_vm0, %v2804_v38, 0  ;;  %v2807_v45 = vld [vmem:[%s2975_s29] sm:$0xff]   ;;  %v2816_v55 = vld [vmem:[%s3015_s6 + $0x38] sm:$0xff]  }
  0x22   : > { %2548 = vmatpush3.bf16.xpose.msra.mxu0 %v743_v10  ;;  %v2808_v46 = vld [vmem:[%s2975_s29 + $0x80] sm:$0xff]   ;;  %v725_v47 = vsel %vm627_vm0, %v2807_v45, 0  ;;  %v2810_v49 = vld [vmem:[%s3015_s6 + $0x8] sm:$0xff]   ;;  %v2819_v58 = vld [vmem:[%s3015_s6 + $0x50] sm:$0xff]  }
  0x23   : > { %2628 = vmatpush3.bf16.xpose.msra.mxu1 %v791_v12  ;;  %2707 = vmatprep.subr.msk.bf16.mxu0 %vm627_vm0, %v2785_v11  ;;  %v773_v48 = vsel %vm627_vm0, %v2808_v46, 0  ;;  %v2813_v52 = vld [vmem:[%s3015_s6 + $0x20] sm:$0xff]   ;;  %v2814_v53 = vld [vmem:[%s3015_s6 + $0x28] sm:$0xff]   ;;  %v2820_v59 = vld [vmem:[%s3015_s6 + $0x58] sm:$0xff]  }
  0x24   : > { %2715 = vmatprep.subr.msk.bf16.mxu1 %vm627_vm0, %v2786_v13  ;;  %v2817_v56 = vld [vmem:[%s3015_s6 + $0x40] sm:$0xff]   ;;  %v2818_v57 = vld [vmem:[%s3015_s6 + $0x48] sm:$0xff]   ;;  %v2823_v62 = vld [vmem:[%s3015_s6 + $0x70] sm:$0xff]  }
  0x25   : > { %v2821_v60 = vld [vmem:[%s3015_s6 + $0x60] sm:$0xff]   ;;  %v2822_v61 = vld [vmem:[%s3015_s6 + $0x68] sm:$0xff]   ;;  %v2824_v63 = vld [vmem:[%s3015_s6 + $0x78] sm:$0xff]  }
  0x26   : > { %v2825_v0 = vld [vmem:[%s3015_s6 + $0x80] sm:$0xff]   ;;  %v2826_v1 = vld [vmem:[%s3015_s6 + $0x88] sm:$0xff]   ;;  %v2827_v2 = vld [vmem:[%s3015_s6 + $0x90] sm:$0xff]  }
  0x27   : > { %v2828_v3 = vld [vmem:[%s3015_s6 + $0x98] sm:$0xff]   ;;  %v2829_v4 = vld [vmem:[%s3015_s6 + $0xa0] sm:$0xff]   ;;  %v2830_v5 = vld [vmem:[%s3015_s6 + $0xa8] sm:$0xff]  }
  0x28   : > { %v2831_v6 = vld [vmem:[%s3015_s6 + $0xb0] sm:$0xff]   ;;  %v2832_v7 = vld [vmem:[%s3015_s6 + $0xb8] sm:$0xff]   ;;  %v2833_v8 = vld [vmem:[%s3015_s6 + $0xc0] sm:$0xff]  }
  0x29   : > { %v2834_v9 = vld [vmem:[%s3015_s6 + $0xc8] sm:$0xff]   ;;  %v2837_v34 = vld [vmem:[%s3015_s6 + $0xe0] sm:$0xff]  }
  0x2a   : > { %2550 = vmatpush3.bf16.xpose.msra.mxu0 %v740_v16  ;;  %v2835_v16 = vld [vmem:[%s3015_s6 + $0xd0] sm:$0xff]  }
  0x2b   : > { %2630 = vmatpush3.bf16.xpose.msra.mxu1 %v788_v18  ;;  %2708 = vmatprep.subr.msk.bf16.mxu0 %vm627_vm0, %v2789_v17 }
  0x2c   : > { %2716 = vmatprep.subr.msk.bf16.mxu1 %vm627_vm0, %v2790_v19 }
  0x32   : > { %2552 = vmatpush3.bf16.xpose.msra.mxu0 %v737_v22 }
  0x33   : > { %2632 = vmatpush3.bf16.xpose.msra.mxu1 %v785_v24  ;;  %2709 = vmatprep.subr.msk.bf16.mxu0 %vm627_vm0, %v2793_v23 }
  0x34   : > { %2717 = vmatprep.subr.msk.bf16.mxu1 %vm627_vm0, %v2794_v25  ;;  %v2836_v25 = vld [vmem:[%s3015_s6 + $0xd8] sm:$0xff]  }
  0x3a   : > { %2554 = vmatpush3.bf16.xpose.msra.mxu0 %v734_v29 }
  0x3b   : > { %2634 = vmatpush3.bf16.xpose.msra.mxu1 %v782_v31  ;;  %2710 = vmatprep.subr.msk.bf16.mxu0 %vm627_vm0, %v2797_v30 }
  0x3c   : > { %2718 = vmatprep.subr.msk.bf16.mxu1 %vm627_vm0, %v2798_v32 }
  0x42   : > { %2556 = vmatpush3.bf16.xpose.msra.mxu0 %v731_v37 }
  0x43   : > { %2636 = vmatpush3.bf16.xpose.msra.mxu1 %v779_v39  ;;  %2711 = vmatprep.subr.msk.bf16.mxu0 %vm627_vm0, %v2801_v35 }
  0x44   : > { %2719 = vmatprep.subr.msk.bf16.mxu1 %vm627_vm0, %v2802_v40 }
  0x4a   : > { %2558 = vmatpush3.bf16.xpose.msra.mxu0 %v728_v41 }
  0x4b   : > { %2638 = vmatpush3.bf16.xpose.msra.mxu1 %v776_v42  ;;  %2712 = vmatprep.subr.msk.bf16.mxu0 %vm627_vm0, %v2805_v43  ;;  %v2838_v43 = vld [vmem:[%s3015_s6 + $0xe8] sm:$0xff]  }
  0x4c   : > { %2720 = vmatprep.subr.msk.bf16.mxu1 %vm627_vm0, %v2806_v44 }
  0x52   : > { %2560 = vmatpush3.bf16.xpose.msra.mxu0 %v725_v47 }
  0x53   : > { %2640 = vmatpush3.bf16.xpose.msra.mxu1 %v773_v48 }
  0x59   : > { %2562 = vmatmul.mubr.msk.bf16.vlgmr.msra.gmra.mxu0 %vm627_vm0, %v2809_v28 }
  0x5a   : > { %2642 = vmatmul.mubr.msk.bf16.vlgmr.msra.gmra.mxu1 %vm627_vm0, %v2809_v28  ;;  %2563 = vmatprep.mubr.msk.bf16.mxu0 %vm627_vm0, %v2810_v49 }
  0x5b   : > { %2643 = vmatprep.mubr.msk.bf16.mxu1 %vm627_vm0, %v2810_v49 }
  0x61   : > { %2564 = vmatmul.mubr.msk.bf16.gmra.mxu0 %vm627_vm0, %v2810_v49 }
  0x62   : > { %2644 = vmatmul.mubr.msk.bf16.gmra.mxu1 %vm627_vm0, %v2810_v49  ;;  %2565 = vmatprep.mubr.msk.bf16.mxu0 %vm627_vm0, %v2811_v50 }
  0x63   : > { %2645 = vmatprep.mubr.msk.bf16.mxu1 %vm627_vm0, %v2811_v50 }
  0x69   : > { %2566 = vmatmul.mubr.msk.bf16.gmra.mxu0 %vm627_vm0, %v2811_v50 }
  0x6a   : > { %2646 = vmatmul.mubr.msk.bf16.gmra.mxu1 %vm627_vm0, %v2811_v50  ;;  %2567 = vmatprep.mubr.msk.bf16.mxu0 %vm627_vm0, %v2812_v51 }
  0x6b   : > { %2647 = vmatprep.mubr.msk.bf16.mxu1 %vm627_vm0, %v2812_v51 }
  0x71   : > { %2568 = vmatmul.mubr.msk.bf16.gmra.mxu0 %vm627_vm0, %v2812_v51 }
  0x72   : > { %2648 = vmatmul.mubr.msk.bf16.gmra.mxu1 %vm627_vm0, %v2812_v51  ;;  %2569 = vmatprep.mubr.msk.bf16.mxu0 %vm627_vm0, %v2813_v52 }
  0x73   : > { %2649 = vmatprep.mubr.msk.bf16.mxu1 %vm627_vm0, %v2813_v52 }
  0x79   : > { %2570 = vmatmul.mubr.msk.bf16.gmra.mxu0 %vm627_vm0, %v2813_v52 }
  0x7a   : > { %2650 = vmatmul.mubr.msk.bf16.gmra.mxu1 %vm627_vm0, %v2813_v52  ;;  %2571 = vmatprep.mubr.msk.bf16.mxu0 %vm627_vm0, %v2814_v53  ;;  %v2839_v52 = vld [vmem:[%s3015_s6 + $0xf0] sm:$0xff]  }
  0x7b   : > { %2651 = vmatprep.mubr.msk.bf16.mxu1 %vm627_vm0, %v2814_v53 }
  0x81   : > { %2572 = vmatmul.mubr.msk.bf16.gmra.mxu0 %vm627_vm0, %v2814_v53 }
  0x82   : > { %2652 = vmatmul.mubr.msk.bf16.gmra.mxu1 %vm627_vm0, %v2814_v53  ;;  %2573 = vmatprep.mubr.msk.bf16.mxu0 %vm627_vm0, %v2815_v54 }
  0x83   : > { %2653 = vmatprep.mubr.msk.bf16.mxu1 %vm627_vm0, %v2815_v54 }
  0x89   : > { %2574 = vmatmul.mubr.msk.bf16.gmra.mxu0 %vm627_vm0, %v2815_v54 }
  0x8a   : > { %2654 = vmatmul.mubr.msk.bf16.gmra.mxu1 %vm627_vm0, %v2815_v54  ;;  %2575 = vmatprep.mubr.msk.bf16.mxu0 %vm627_vm0, %v2816_v55 }
  0x8b   : > { %2655 = vmatprep.mubr.msk.bf16.mxu1 %vm627_vm0, %v2816_v55 }
  0x91   : > { %2576 = vmatmul.mubr.msk.bf16.gmra.mxu0 %vm627_vm0, %v2816_v55 }
  0x92   : > { %2656 = vmatmul.mubr.msk.bf16.gmra.mxu1 %vm627_vm0, %v2816_v55  ;;  %2577 = vmatprep.mubr.msk.bf16.mxu0 %vm627_vm0, %v2817_v56 }
  0x93   : > { %2657 = vmatprep.mubr.msk.bf16.mxu1 %vm627_vm0, %v2817_v56 }
  0x99   : > { %2578 = vmatmul.mubr.msk.bf16.gmra.mxu0 %vm627_vm0, %v2817_v56 }
  0x9a   : > { %2658 = vmatmul.mubr.msk.bf16.gmra.mxu1 %vm627_vm0, %v2817_v56  ;;  %2579 = vmatprep.mubr.msk.bf16.mxu0 %vm627_vm0, %v2818_v57 }
  0x9b   : > { %2659 = vmatprep.mubr.msk.bf16.mxu1 %vm627_vm0, %v2818_v57 }
  0xa1   : > { %2580 = vmatmul.mubr.msk.bf16.gmra.mxu0 %vm627_vm0, %v2818_v57 }
  0xa2   : > { %2660 = vmatmul.mubr.msk.bf16.gmra.mxu1 %vm627_vm0, %v2818_v57  ;;  %2581 = vmatprep.mubr.msk.bf16.mxu0 %vm627_vm0, %v2819_v58 }
  0xa3   : > { %2661 = vmatprep.mubr.msk.bf16.mxu1 %vm627_vm0, %v2819_v58 }
  0xa9   : > { %2582 = vmatmul.mubr.msk.bf16.gmra.mxu0 %vm627_vm0, %v2819_v58 }
  0xaa   : > { %2662 = vmatmul.mubr.msk.bf16.gmra.mxu1 %vm627_vm0, %v2819_v58  ;;  %2583 = vmatprep.mubr.msk.bf16.mxu0 %vm627_vm0, %v2820_v59 }
  0xab   : > { %2663 = vmatprep.mubr.msk.bf16.mxu1 %vm627_vm0, %v2820_v59 }
  0xb1   : > { %2584 = vmatmul.mubr.msk.bf16.gmra.mxu0 %vm627_vm0, %v2820_v59 }
  0xb2   : > { %2664 = vmatmul.mubr.msk.bf16.gmra.mxu1 %vm627_vm0, %v2820_v59  ;;  %2585 = vmatprep.mubr.msk.bf16.mxu0 %vm627_vm0, %v2821_v60 }
  0xb3   : > { %2665 = vmatprep.mubr.msk.bf16.mxu1 %vm627_vm0, %v2821_v60 }
  0xb9   : > { %2586 = vmatmul.mubr.msk.bf16.gmra.mxu0 %vm627_vm0, %v2821_v60 }
  0xba   : > { %2666 = vmatmul.mubr.msk.bf16.gmra.mxu1 %vm627_vm0, %v2821_v60  ;;  %2587 = vmatprep.mubr.msk.bf16.mxu0 %vm627_vm0, %v2822_v61 }
  0xbb   : > { %2667 = vmatprep.mubr.msk.bf16.mxu1 %vm627_vm0, %v2822_v61 }
  0xc1   : > { %2588 = vmatmul.mubr.msk.bf16.gmra.mxu0 %vm627_vm0, %v2822_v61 }
  0xc2   : > { %2668 = vmatmul.mubr.msk.bf16.gmra.mxu1 %vm627_vm0, %v2822_v61  ;;  %2589 = vmatprep.mubr.msk.bf16.mxu0 %vm627_vm0, %v2823_v62  ;;  %v2840_v61 = vld [vmem:[%s3015_s6 + $0xf8] sm:$0xff]  }
  0xc3   : > { %2669 = vmatprep.mubr.msk.bf16.mxu1 %vm627_vm0, %v2823_v62 }
  0xc9   : > { %2590 = vmatmul.mubr.msk.bf16.gmra.mxu0 %vm627_vm0, %v2823_v62 }
  0xca   : > { %2670 = vmatmul.mubr.msk.bf16.gmra.mxu1 %vm627_vm0, %v2823_v62  ;;  %2591 = vmatprep.mubr.msk.bf16.mxu0 %vm627_vm0, %v2824_v63 }
  0xcb   : > { %2671 = vmatprep.mubr.msk.bf16.mxu1 %vm627_vm0, %v2824_v63 }
  0xd1   : > { %2592 = vmatmul.mubr.msk.bf16.gmra.mxu0 %vm627_vm0, %v2824_v63 }
  0xd2   : > { %2672 = vmatmul.mubr.msk.bf16.gmra.mxu1 %vm627_vm0, %v2824_v63  ;;  %2593 = vmatprep.mubr.msk.bf16.mxu0 %vm627_vm0, %v2825_v0 }
  0xd3   : > { %2673 = vmatprep.mubr.msk.bf16.mxu1 %vm627_vm0, %v2825_v0 }
  0xd9   : > { %2594 = vmatmul.mubr.msk.bf16.gmra.mxu0 %vm627_vm0, %v2825_v0 }
  0xda   : > { %2674 = vmatmul.mubr.msk.bf16.gmra.mxu1 %vm627_vm0, %v2825_v0  ;;  %2595 = vmatprep.mubr.msk.bf16.mxu0 %vm627_vm0, %v2826_v1 }
  0xdb   : > { %2675 = vmatprep.mubr.msk.bf16.mxu1 %vm627_vm0, %v2826_v1 }
  0xe1   : > { %2596 = vmatmul.mubr.msk.bf16.gmra.mxu0 %vm627_vm0, %v2826_v1 }
  0xe2   : > { %2676 = vmatmul.mubr.msk.bf16.gmra.mxu1 %vm627_vm0, %v2826_v1  ;;  %2597 = vmatprep.mubr.msk.bf16.mxu0 %vm627_vm0, %v2827_v2 }
  0xe3   : > { %2677 = vmatprep.mubr.msk.bf16.mxu1 %vm627_vm0, %v2827_v2 }
  0xe9   : > { %2598 = vmatmul.mubr.msk.bf16.gmra.mxu0 %vm627_vm0, %v2827_v2 }
  0xea   : > { %2678 = vmatmul.mubr.msk.bf16.gmra.mxu1 %vm627_vm0, %v2827_v2  ;;  %2599 = vmatprep.mubr.msk.bf16.mxu0 %vm627_vm0, %v2828_v3 }
  0xeb   : > { %2679 = vmatprep.mubr.msk.bf16.mxu1 %vm627_vm0, %v2828_v3 }
  0xf1   : > { %2600 = vmatmul.mubr.msk.bf16.gmra.mxu0 %vm627_vm0, %v2828_v3 }
  0xf2   : > { %2680 = vmatmul.mubr.msk.bf16.gmra.mxu1 %vm627_vm0, %v2828_v3  ;;  %2601 = vmatprep.mubr.msk.bf16.mxu0 %vm627_vm0, %v2829_v4 }
  0xf3   : > { %2681 = vmatprep.mubr.msk.bf16.mxu1 %vm627_vm0, %v2829_v4 }
  0xf9   : > { %2602 = vmatmul.mubr.msk.bf16.gmra.mxu0 %vm627_vm0, %v2829_v4 }
  0xfa   : > { %2682 = vmatmul.mubr.msk.bf16.gmra.mxu1 %vm627_vm0, %v2829_v4  ;;  %2603 = vmatprep.mubr.msk.bf16.mxu0 %vm627_vm0, %v2830_v5 }
  0xfb   : > { %2683 = vmatprep.mubr.msk.bf16.mxu1 %vm627_vm0, %v2830_v5 }
 0x101   : > { %2604 = vmatmul.mubr.msk.bf16.gmra.mxu0 %vm627_vm0, %v2830_v5 }
 0x102   : > { %2684 = vmatmul.mubr.msk.bf16.gmra.mxu1 %vm627_vm0, %v2830_v5  ;;  %2605 = vmatprep.mubr.msk.bf16.mxu0 %vm627_vm0, %v2831_v6 }
 0x103   : > { %2685 = vmatprep.mubr.msk.bf16.mxu1 %vm627_vm0, %v2831_v6 }
 0x109   : > { %2606 = vmatmul.mubr.msk.bf16.gmra.mxu0 %vm627_vm0, %v2831_v6 }
 0x10a   : > { %2686 = vmatmul.mubr.msk.bf16.gmra.mxu1 %vm627_vm0, %v2831_v6  ;;  %2607 = vmatprep.mubr.msk.bf16.mxu0 %vm627_vm0, %v2832_v7 }
 0x10b   : > { %2687 = vmatprep.mubr.msk.bf16.mxu1 %vm627_vm0, %v2832_v7 }
 0x111   : > { %2608 = vmatmul.mubr.msk.bf16.gmra.mxu0 %vm627_vm0, %v2832_v7 }
 0x112   : > { %2688 = vmatmul.mubr.msk.bf16.gmra.mxu1 %vm627_vm0, %v2832_v7  ;;  %2609 = vmatprep.mubr.msk.bf16.mxu0 %vm627_vm0, %v2833_v8 }
 0x113   : > { %2689 = vmatprep.mubr.msk.bf16.mxu1 %vm627_vm0, %v2833_v8 }
 0x119   : > { %v854_v10 = vpop.f32.mrf.mxu0  ;;  %2610 = vmatmul.mubr.msk.bf16.gmra.mxu0 %vm627_vm0, %v2833_v8 }
 0x11a   : > { %1526 = vst [vmem:[%s3173_s18] sm:$0xff] %v854_v10  ;;  %v1207_v11 = vpop.f32.mrf.mxu1  ;;  %2690 = vmatmul.mubr.msk.bf16.gmra.mxu1 %vm627_vm0, %v2833_v8  ;;  %2611 = vmatprep.mubr.msk.bf16.mxu0 %vm627_vm0, %v2834_v9 }
 0x11b   : > { %1528 = vst [vmem:[%s3173_s18 + $0x10] sm:$0xff] %v1207_v11  ;;  %v856_v12 = vpop.f32.mrf.mxu0  ;;  %2691 = vmatprep.mubr.msk.bf16.mxu1 %vm627_vm0, %v2834_v9 }
 0x11c   : > { %1527 = vst [vmem:[%s3173_s18 + $0x8] sm:$0xff] %v856_v12  ;;  %v1209_v13 = vpop.f32.mrf.mxu1 }
 0x11d   : > { %1529 = vst [vmem:[%s3173_s18 + $0x18] sm:$0xff] %v1209_v13  ;;  %v858_v14 = vpop.f32.mrf.mxu0 }
 0x11e   : > { %1530 = vst [vmem:[%s3173_s18 + $0x20] sm:$0xff] %v858_v14  ;;  %v1211_v15 = vpop.f32.mrf.mxu1 }
 0x11f   : > { %1532 = vst [vmem:[%s3173_s18 + $0x30] sm:$0xff] %v1211_v15  ;;  %v860_v17 = vpop.f32.mrf.mxu0 }
 0x120   : > { %1531 = vst [vmem:[%s3173_s18 + $0x28] sm:$0xff] %v860_v17  ;;  %v1213_v18 = vpop.f32.mrf.mxu1 }
 0x121   : > { %1533 = vst [vmem:[%s3173_s18 + $0x38] sm:$0xff] %v1213_v18  ;;  %v864_v19 = vpop.f32.mrf.mxu0  ;;  %2612 = vmatmul.mubr.msk.bf16.gmra.mxu0 %vm627_vm0, %v2834_v9 }
 0x122   : > { %1534 = vst [vmem:[%s3173_s18 + $0x40] sm:$0xff] %v864_v19  ;;  %v1217_v20 = vpop.f32.mrf.mxu1  ;;  %2692 = vmatmul.mubr.msk.bf16.gmra.mxu1 %vm627_vm0, %v2834_v9  ;;  %2613 = vmatprep.mubr.msk.bf16.mxu0 %vm627_vm0, %v2835_v16 }
 0x123   : > { %1536 = vst [vmem:[%s3173_s18 + $0x50] sm:$0xff] %v1217_v20  ;;  %v866_v21 = vpop.f32.mrf.mxu0  ;;  %2693 = vmatprep.mubr.msk.bf16.mxu1 %vm627_vm0, %v2835_v16 }
 0x124   : > { %1535 = vst [vmem:[%s3173_s18 + $0x48] sm:$0xff] %v866_v21  ;;  %v1219_v22 = vpop.f32.mrf.mxu1 }
 0x125   : > { %1537 = vst [vmem:[%s3173_s18 + $0x58] sm:$0xff] %v1219_v22  ;;  %v868_v23 = vpop.f32.mrf.mxu0 }
 0x126   : > { %1538 = vst [vmem:[%s3173_s18 + $0x60] sm:$0xff] %v868_v23  ;;  %v1221_v24 = vpop.f32.mrf.mxu1 }
 0x127   : > { %1540 = vst [vmem:[%s3173_s18 + $0x70] sm:$0xff] %v1221_v24  ;;  %v870_v26 = vpop.f32.mrf.mxu0 }
 0x128   : > { %1539 = vst [vmem:[%s3173_s18 + $0x68] sm:$0xff] %v870_v26  ;;  %v1223_v27 = vpop.f32.mrf.mxu1 }
 0x129   : > { %1541 = vst [vmem:[%s3173_s18 + $0x78] sm:$0xff] %v1223_v27  ;;  %v874_v28 = vpop.f32.mrf.mxu0  ;;  %2614 = vmatmul.mubr.msk.bf16.gmra.mxu0 %vm627_vm0, %v2835_v16 }
 0x12a   : > { %1542 = vst [vmem:[%s3173_s18 + $0x80] sm:$0xff] %v874_v28  ;;  %v1227_v29 = vpop.f32.mrf.mxu1  ;;  %2694 = vmatmul.mubr.msk.bf16.gmra.mxu1 %vm627_vm0, %v2835_v16  ;;  %2615 = vmatprep.mubr.msk.bf16.mxu0 %vm627_vm0, %v2836_v25 }
 0x12b   : > { %1544 = vst [vmem:[%s3173_s18 + $0x90] sm:$0xff] %v1227_v29  ;;  %v876_v30 = vpop.f32.mrf.mxu0  ;;  %2695 = vmatprep.mubr.msk.bf16.mxu1 %vm627_vm0, %v2836_v25 }
 0x12c   : > { %1543 = vst [vmem:[%s3173_s18 + $0x88] sm:$0xff] %v876_v30  ;;  %v1229_v31 = vpop.f32.mrf.mxu1 }
 0x12d   : > { %1545 = vst [vmem:[%s3173_s18 + $0x98] sm:$0xff] %v1229_v31  ;;  %v878_v32 = vpop.f32.mrf.mxu0 }
 0x12e   : > { %1546 = vst [vmem:[%s3173_s18 + $0xa0] sm:$0xff] %v878_v32  ;;  %v1231_v33 = vpop.f32.mrf.mxu1 }
 0x12f   : > { %1548 = vst [vmem:[%s3173_s18 + $0xb0] sm:$0xff] %v1231_v33  ;;  %v880_v35 = vpop.f32.mrf.mxu0 }
 0x130   : > { %1547 = vst [vmem:[%s3173_s18 + $0xa8] sm:$0xff] %v880_v35  ;;  %v1233_v36 = vpop.f32.mrf.mxu1 }
 0x131   : > { %1549 = vst [vmem:[%s3173_s18 + $0xb8] sm:$0xff] %v1233_v36  ;;  %v884_v37 = vpop.f32.mrf.mxu0  ;;  %2616 = vmatmul.mubr.msk.bf16.gmra.mxu0 %vm627_vm0, %v2836_v25 }
 0x132   : > { %1550 = vst [vmem:[%s3173_s18 + $0xc0] sm:$0xff] %v884_v37  ;;  %v1237_v38 = vpop.f32.mrf.mxu1  ;;  %2696 = vmatmul.mubr.msk.bf16.gmra.mxu1 %vm627_vm0, %v2836_v25  ;;  %2617 = vmatprep.mubr.msk.bf16.mxu0 %vm627_vm0, %v2837_v34 }
 0x133   : > { %1552 = vst [vmem:[%s3173_s18 + $0xd0] sm:$0xff] %v1237_v38  ;;  %v886_v39 = vpop.f32.mrf.mxu0  ;;  %2697 = vmatprep.mubr.msk.bf16.mxu1 %vm627_vm0, %v2837_v34 }
 0x134   : > { %1551 = vst [vmem:[%s3173_s18 + $0xc8] sm:$0xff] %v886_v39  ;;  %v1239_v40 = vpop.f32.mrf.mxu1 }
 0x135   : > { %1553 = vst [vmem:[%s3173_s18 + $0xd8] sm:$0xff] %v1239_v40  ;;  %v888_v41 = vpop.f32.mrf.mxu0 }
 0x136   : > { %1554 = vst [vmem:[%s3173_s18 + $0xe0] sm:$0xff] %v888_v41  ;;  %v1241_v42 = vpop.f32.mrf.mxu1 }
 0x137   : > { %1556 = vst [vmem:[%s3173_s18 + $0xf0] sm:$0xff] %v1241_v42  ;;  %v890_v44 = vpop.f32.mrf.mxu0 }
 0x138   : > { %1555 = vst [vmem:[%s3173_s18 + $0xe8] sm:$0xff] %v890_v44  ;;  %v1243_v45 = vpop.f32.mrf.mxu1 }
 0x139   : > { %1557 = vst [vmem:[%s3173_s18 + $0xf8] sm:$0xff] %v1243_v45  ;;  %v894_v46 = vpop.f32.mrf.mxu0  ;;  %2618 = vmatmul.mubr.msk.bf16.gmra.mxu0 %vm627_vm0, %v2837_v34 }
 0x13a   : > { %1558 = vst [vmem:[%s3173_s18 + $0x100] sm:$0xff] %v894_v46  ;;  %v1247_v47 = vpop.f32.mrf.mxu1  ;;  %2698 = vmatmul.mubr.msk.bf16.gmra.mxu1 %vm627_vm0, %v2837_v34  ;;  %2619 = vmatprep.mubr.msk.bf16.mxu0 %vm627_vm0, %v2838_v43 }
 0x13b   : > { %1560 = vst [vmem:[%s3173_s18 + $0x110] sm:$0xff] %v1247_v47  ;;  %v896_v48 = vpop.f32.mrf.mxu0  ;;  %2699 = vmatprep.mubr.msk.bf16.mxu1 %vm627_vm0, %v2838_v43 }
 0x13c   : > { %1559 = vst [vmem:[%s3173_s18 + $0x108] sm:$0xff] %v896_v48  ;;  %v1249_v49 = vpop.f32.mrf.mxu1 }
 0x13d   : > { %1561 = vst [vmem:[%s3173_s18 + $0x118] sm:$0xff] %v1249_v49  ;;  %v898_v50 = vpop.f32.mrf.mxu0 }
 0x13e   : > { %1562 = vst [vmem:[%s3173_s18 + $0x120] sm:$0xff] %v898_v50  ;;  %v1251_v51 = vpop.f32.mrf.mxu1 }
 0x13f   : > { %1564 = vst [vmem:[%s3173_s18 + $0x130] sm:$0xff] %v1251_v51  ;;  %v900_v53 = vpop.f32.mrf.mxu0 }
 0x140   : > { %1563 = vst [vmem:[%s3173_s18 + $0x128] sm:$0xff] %v900_v53  ;;  %v1253_v54 = vpop.f32.mrf.mxu1 }
 0x141   : > { %1565 = vst [vmem:[%s3173_s18 + $0x138] sm:$0xff] %v1253_v54  ;;  %v904_v55 = vpop.f32.mrf.mxu0  ;;  %2620 = vmatmul.mubr.msk.bf16.gmra.mxu0 %vm627_vm0, %v2838_v43 }
 0x142   : > { %1566 = vst [vmem:[%s3173_s18 + $0x140] sm:$0xff] %v904_v55  ;;  %v1257_v56 = vpop.f32.mrf.mxu1  ;;  %2700 = vmatmul.mubr.msk.bf16.gmra.mxu1 %vm627_vm0, %v2838_v43  ;;  %2621 = vmatprep.mubr.msk.bf16.mxu0 %vm627_vm0, %v2839_v52 }
 0x143   : > { %1568 = vst [vmem:[%s3173_s18 + $0x150] sm:$0xff] %v1257_v56  ;;  %v906_v57 = vpop.f32.mrf.mxu0  ;;  %2701 = vmatprep.mubr.msk.bf16.mxu1 %vm627_vm0, %v2839_v52 }
 0x144   : > { %1567 = vst [vmem:[%s3173_s18 + $0x148] sm:$0xff] %v906_v57  ;;  %v1259_v58 = vpop.f32.mrf.mxu1 }
 0x145   : > { %1569 = vst [vmem:[%s3173_s18 + $0x158] sm:$0xff] %v1259_v58  ;;  %v908_v59 = vpop.f32.mrf.mxu0 }
 0x146   : > { %1570 = vst [vmem:[%s3173_s18 + $0x160] sm:$0xff] %v908_v59  ;;  %v1261_v60 = vpop.f32.mrf.mxu1 }
 0x147   : > { %1572 = vst [vmem:[%s3173_s18 + $0x170] sm:$0xff] %v1261_v60  ;;  %v910_v62 = vpop.f32.mrf.mxu0 }
 0x148   : > { %1571 = vst [vmem:[%s3173_s18 + $0x168] sm:$0xff] %v910_v62  ;;  %v1263_v63 = vpop.f32.mrf.mxu1 }
 0x149   : > { %1573 = vst [vmem:[%s3173_s18 + $0x178] sm:$0xff] %v1263_v63  ;;  %v914_v0 = vpop.f32.mrf.mxu0  ;;  %2622 = vmatmul.mubr.msk.bf16.gmra.mxu0 %vm627_vm0, %v2839_v52 }
 0x14a   : > { %1574 = vst [vmem:[%s3173_s18 + $0x180] sm:$0xff] %v914_v0  ;;  %v1267_v1 = vpop.f32.mrf.mxu1  ;;  %2702 = vmatmul.mubr.msk.bf16.gmra.mxu1 %vm627_vm0, %v2839_v52  ;;  %2623 = vmatprep.mubr.msk.bf16.mxu0 %vm627_vm0, %v2840_v61 }
 0x14b   : > { %1576 = vst [vmem:[%s3173_s18 + $0x190] sm:$0xff] %v1267_v1  ;;  %v916_v2 = vpop.f32.mrf.mxu0  ;;  %2703 = vmatprep.mubr.msk.bf16.mxu1 %vm627_vm0, %v2840_v61 }
 0x14c   : > { %1575 = vst [vmem:[%s3173_s18 + $0x188] sm:$0xff] %v916_v2  ;;  %v1269_v3 = vpop.f32.mrf.mxu1 }
 0x14d   : > { %1577 = vst [vmem:[%s3173_s18 + $0x198] sm:$0xff] %v1269_v3  ;;  %v918_v4 = vpop.f32.mrf.mxu0 }
 0x14e   : > { %1578 = vst [vmem:[%s3173_s18 + $0x1a0] sm:$0xff] %v918_v4  ;;  %v1271_v5 = vpop.f32.mrf.mxu1 }
 0x14f   : > { %1580 = vst [vmem:[%s3173_s18 + $0x1b0] sm:$0xff] %v1271_v5  ;;  %v920_v6 = vpop.f32.mrf.mxu0 }
 0x150   : > { %1579 = vst [vmem:[%s3173_s18 + $0x1a8] sm:$0xff] %v920_v6  ;;  %v1273_v7 = vpop.f32.mrf.mxu1 }
 0x151   : > { %1581 = vst [vmem:[%s3173_s18 + $0x1b8] sm:$0xff] %v1273_v7  ;;  %v924_v8 = vpop.f32.mrf.mxu0  ;;  %2624 = vmatmul.mubr.msk.bf16.gmra.mxu0 %vm627_vm0, %v2840_v61 }
 0x152   : > { %1582 = vst [vmem:[%s3173_s18 + $0x1c0] sm:$0xff] %v924_v8  ;;  %v1277_v9 = vpop.f32.mrf.mxu1  ;;  %2704 = vmatmul.mubr.msk.bf16.gmra.mxu1 %vm627_vm0, %v2840_v61 }
 0x153   : > { %1584 = vst [vmem:[%s3173_s18 + $0x1d0] sm:$0xff] %v1277_v9  ;;  %v926_v10 = vpop.f32.mrf.mxu0 }
 0x154   : > { %1583 = vst [vmem:[%s3173_s18 + $0x1c8] sm:$0xff] %v926_v10  ;;  %v1279_v11 = vpop.f32.mrf.mxu1 }
 0x155   : > { %1585 = vst [vmem:[%s3173_s18 + $0x1d8] sm:$0xff] %v1279_v11  ;;  %v928_v12 = vpop.f32.mrf.mxu0 }
 0x156   : > { %1586 = vst [vmem:[%s3173_s18 + $0x1e0] sm:$0xff] %v928_v12  ;;  %v1281_v13 = vpop.f32.mrf.mxu1 }
 0x157   : > { %1588 = vst [vmem:[%s3173_s18 + $0x1f0] sm:$0xff] %v1281_v13  ;;  %v930_v14 = vpop.f32.mrf.mxu0 }
 0x158   : > { %1587 = vst [vmem:[%s3173_s18 + $0x1e8] sm:$0xff] %v930_v14  ;;  %v1283_v15 = vpop.f32.mrf.mxu1 }
 0x159   : > { %1589 = vst [vmem:[%s3173_s18 + $0x1f8] sm:$0xff] %v1283_v15  ;;  %v934_v16 = vpop.f32.mrf.mxu0 }
 0x15a   : > { %1590 = vst [vmem:[%s3173_s18 + $0x200] sm:$0xff] %v934_v16  ;;  %v1287_v17 = vpop.f32.mrf.mxu1 }
 0x15b   : > { %1592 = vst [vmem:[%s3173_s18 + $0x210] sm:$0xff] %v1287_v17  ;;  %v936_v18 = vpop.f32.mrf.mxu0 }
 0x15c   : > { %1591 = vst [vmem:[%s3173_s18 + $0x208] sm:$0xff] %v936_v18  ;;  %v1289_v19 = vpop.f32.mrf.mxu1 }
 0x15d   : > { %1593 = vst [vmem:[%s3173_s18 + $0x218] sm:$0xff] %v1289_v19  ;;  %v938_v20 = vpop.f32.mrf.mxu0 }
 0x15e   : > { %1594 = vst [vmem:[%s3173_s18 + $0x220] sm:$0xff] %v938_v20  ;;  %v1291_v21 = vpop.f32.mrf.mxu1 }
 0x15f   : > { %1596 = vst [vmem:[%s3173_s18 + $0x230] sm:$0xff] %v1291_v21  ;;  %v940_v22 = vpop.f32.mrf.mxu0 }
 0x160   : > { %1595 = vst [vmem:[%s3173_s18 + $0x228] sm:$0xff] %v940_v22  ;;  %v1293_v23 = vpop.f32.mrf.mxu1 }
 0x161   : > { %1597 = vst [vmem:[%s3173_s18 + $0x238] sm:$0xff] %v1293_v23  ;;  %v944_v24 = vpop.f32.mrf.mxu0 }
 0x162   : > { %1598 = vst [vmem:[%s3173_s18 + $0x240] sm:$0xff] %v944_v24  ;;  %v1297_v25 = vpop.f32.mrf.mxu1 }
 0x163   : > { %1600 = vst [vmem:[%s3173_s18 + $0x250] sm:$0xff] %v1297_v25  ;;  %v946_v26 = vpop.f32.mrf.mxu0 }
 0x164   : > { %1599 = vst [vmem:[%s3173_s18 + $0x248] sm:$0xff] %v946_v26  ;;  %v1299_v27 = vpop.f32.mrf.mxu1 }
 0x165   : > { %1601 = vst [vmem:[%s3173_s18 + $0x258] sm:$0xff] %v1299_v27  ;;  %v948_v28 = vpop.f32.mrf.mxu0 }
 0x166   : > { %1602 = vst [vmem:[%s3173_s18 + $0x260] sm:$0xff] %v948_v28  ;;  %v1301_v29 = vpop.f32.mrf.mxu1 }
 0x167   : > { %1604 = vst [vmem:[%s3173_s18 + $0x270] sm:$0xff] %v1301_v29  ;;  %v950_v30 = vpop.f32.mrf.mxu0 }
 0x168   : > { %1603 = vst [vmem:[%s3173_s18 + $0x268] sm:$0xff] %v950_v30  ;;  %v1303_v31 = vpop.f32.mrf.mxu1 }
 0x169   : > { %1605 = vst [vmem:[%s3173_s18 + $0x278] sm:$0xff] %v1303_v31  ;;  %v954_v32 = vpop.f32.mrf.mxu0 }
 0x16a   : > { %1606 = vst [vmem:[%s3173_s18 + $0x280] sm:$0xff] %v954_v32  ;;  %v1307_v33 = vpop.f32.mrf.mxu1 }
 0x16b   : > { %1608 = vst [vmem:[%s3173_s18 + $0x290] sm:$0xff] %v1307_v33  ;;  %v956_v34 = vpop.f32.mrf.mxu0 }
 0x16c   : > { %1607 = vst [vmem:[%s3173_s18 + $0x288] sm:$0xff] %v956_v34  ;;  %v1309_v35 = vpop.f32.mrf.mxu1 }
 0x16d   : > { %1609 = vst [vmem:[%s3173_s18 + $0x298] sm:$0xff] %v1309_v35  ;;  %v958_v36 = vpop.f32.mrf.mxu0 }
 0x16e   : > { %1610 = vst [vmem:[%s3173_s18 + $0x2a0] sm:$0xff] %v958_v36  ;;  %v1311_v37 = vpop.f32.mrf.mxu1 }
 0x16f   : > { %1612 = vst [vmem:[%s3173_s18 + $0x2b0] sm:$0xff] %v1311_v37  ;;  %v960_v38 = vpop.f32.mrf.mxu0 }
 0x170   : > { %1611 = vst [vmem:[%s3173_s18 + $0x2a8] sm:$0xff] %v960_v38  ;;  %v1313_v39 = vpop.f32.mrf.mxu1 }
 0x171   : > { %1613 = vst [vmem:[%s3173_s18 + $0x2b8] sm:$0xff] %v1313_v39  ;;  %v964_v40 = vpop.f32.mrf.mxu0 }
 0x172   : > { %1614 = vst [vmem:[%s3173_s18 + $0x2c0] sm:$0xff] %v964_v40  ;;  %v1317_v41 = vpop.f32.mrf.mxu1 }
 0x173   : > { %1616 = vst [vmem:[%s3173_s18 + $0x2d0] sm:$0xff] %v1317_v41  ;;  %v966_v42 = vpop.f32.mrf.mxu0 }
 0x174   : > { %1615 = vst [vmem:[%s3173_s18 + $0x2c8] sm:$0xff] %v966_v42  ;;  %v1319_v43 = vpop.f32.mrf.mxu1 }
 0x175   : > { %1617 = vst [vmem:[%s3173_s18 + $0x2d8] sm:$0xff] %v1319_v43  ;;  %v968_v44 = vpop.f32.mrf.mxu0 }
 0x176   : > { %1618 = vst [vmem:[%s3173_s18 + $0x2e0] sm:$0xff] %v968_v44  ;;  %v1321_v45 = vpop.f32.mrf.mxu1 }
 0x177   : > { %1620 = vst [vmem:[%s3173_s18 + $0x2f0] sm:$0xff] %v1321_v45  ;;  %v970_v46 = vpop.f32.mrf.mxu0 }
 0x178   : > { %1619 = vst [vmem:[%s3173_s18 + $0x2e8] sm:$0xff] %v970_v46  ;;  %v1323_v47 = vpop.f32.mrf.mxu1 }
 0x179   : > { %1621 = vst [vmem:[%s3173_s18 + $0x2f8] sm:$0xff] %v1323_v47  ;;  %v974_v48 = vpop.f32.mrf.mxu0 }
 0x17a   : > { %1622 = vst [vmem:[%s3173_s18 + $0x300] sm:$0xff] %v974_v48  ;;  %v1327_v49 = vpop.f32.mrf.mxu1 }
 0x17b   : > { %1624 = vst [vmem:[%s3173_s18 + $0x310] sm:$0xff] %v1327_v49  ;;  %v976_v50 = vpop.f32.mrf.mxu0 }
 0x17c   : > { %1623 = vst [vmem:[%s3173_s18 + $0x308] sm:$0xff] %v976_v50  ;;  %v1329_v51 = vpop.f32.mrf.mxu1 }
 0x17d   : > { %1625 = vst [vmem:[%s3173_s18 + $0x318] sm:$0xff] %v1329_v51  ;;  %v978_v52 = vpop.f32.mrf.mxu0 }
 0x17e   : > { %1626 = vst [vmem:[%s3173_s18 + $0x320] sm:$0xff] %v978_v52  ;;  %v1331_v53 = vpop.f32.mrf.mxu1 }
 0x17f   : > { %1628 = vst [vmem:[%s3173_s18 + $0x330] sm:$0xff] %v1331_v53  ;;  %v980_v54 = vpop.f32.mrf.mxu0 }
 0x180   : > { %1627 = vst [vmem:[%s3173_s18 + $0x328] sm:$0xff] %v980_v54  ;;  %v1333_v55 = vpop.f32.mrf.mxu1 }
 0x181   : > { %1629 = vst [vmem:[%s3173_s18 + $0x338] sm:$0xff] %v1333_v55  ;;  %v984_v56 = vpop.f32.mrf.mxu0 }
 0x182   : > { %1630 = vst [vmem:[%s3173_s18 + $0x340] sm:$0xff] %v984_v56  ;;  %v1337_v57 = vpop.f32.mrf.mxu1 }
 0x183   : > { %1632 = vst [vmem:[%s3173_s18 + $0x350] sm:$0xff] %v1337_v57  ;;  %v986_v58 = vpop.f32.mrf.mxu0 }
 0x184   : > { %1631 = vst [vmem:[%s3173_s18 + $0x348] sm:$0xff] %v986_v58  ;;  %v1339_v59 = vpop.f32.mrf.mxu1 }
 0x185   : > { %1633 = vst [vmem:[%s3173_s18 + $0x358] sm:$0xff] %v1339_v59  ;;  %v988_v60 = vpop.f32.mrf.mxu0 }
 0x186   : > { %1634 = vst [vmem:[%s3173_s18 + $0x360] sm:$0xff] %v988_v60  ;;  %v1341_v61 = vpop.f32.mrf.mxu1 }
 0x187   : > { %1636 = vst [vmem:[%s3173_s18 + $0x370] sm:$0xff] %v1341_v61  ;;  %v990_v62 = vpop.f32.mrf.mxu0 }
 0x188   : > { %1635 = vst [vmem:[%s3173_s18 + $0x368] sm:$0xff] %v990_v62  ;;  %v1343_v63 = vpop.f32.mrf.mxu1 }
 0x189   : > { %1637 = vst [vmem:[%s3173_s18 + $0x378] sm:$0xff] %v1343_v63  ;;  %v994_v0 = vpop.f32.mrf.mxu0 }
 0x18a   : > { %1638 = vst [vmem:[%s3173_s18 + $0x380] sm:$0xff] %v994_v0  ;;  %v1347_v1 = vpop.f32.mrf.mxu1 }
 0x18b   : > { %1640 = vst [vmem:[%s3173_s18 + $0x390] sm:$0xff] %v1347_v1  ;;  %v996_v2 = vpop.f32.mrf.mxu0 }
 0x18c   : > { %1639 = vst [vmem:[%s3173_s18 + $0x388] sm:$0xff] %v996_v2  ;;  %v1349_v3 = vpop.f32.mrf.mxu1 }
 0x18d   : > { %1641 = vst [vmem:[%s3173_s18 + $0x398] sm:$0xff] %v1349_v3  ;;  %v998_v4 = vpop.f32.mrf.mxu0 }
 0x18e   : > { %1642 = vst [vmem:[%s3173_s18 + $0x3a0] sm:$0xff] %v998_v4  ;;  %v1351_v5 = vpop.f32.mrf.mxu1 }
 0x18f   : > { %1644 = vst [vmem:[%s3173_s18 + $0x3b0] sm:$0xff] %v1351_v5  ;;  %v1000_v6 = vpop.f32.mrf.mxu0 }
 0x190   : > { %1643 = vst [vmem:[%s3173_s18 + $0x3a8] sm:$0xff] %v1000_v6  ;;  %v1353_v7 = vpop.f32.mrf.mxu1 }
 0x191   : > { %1645 = vst [vmem:[%s3173_s18 + $0x3b8] sm:$0xff] %v1353_v7  ;;  %v1004_v8 = vpop.f32.mrf.mxu0 }
 0x192   : > { %1646 = vst [vmem:[%s3173_s18 + $0x3c0] sm:$0xff] %v1004_v8  ;;  %v1357_v9 = vpop.f32.mrf.mxu1 }
 0x193   : > { %1648 = vst [vmem:[%s3173_s18 + $0x3d0] sm:$0xff] %v1357_v9  ;;  %v1006_v10 = vpop.f32.mrf.mxu0 }
 0x194   : > { %1647 = vst [vmem:[%s3173_s18 + $0x3c8] sm:$0xff] %v1006_v10  ;;  %v1359_v11 = vpop.f32.mrf.mxu1 }
 0x195   : > { %1649 = vst [vmem:[%s3173_s18 + $0x3d8] sm:$0xff] %v1359_v11  ;;  %v1008_v12 = vpop.f32.mrf.mxu0 }
 0x196   : > { %1650 = vst [vmem:[%s3173_s18 + $0x3e0] sm:$0xff] %v1008_v12  ;;  %v1361_v13 = vpop.f32.mrf.mxu1 }
 0x197   : > { %1652 = vst [vmem:[%s3173_s18 + $0x3f0] sm:$0xff] %v1361_v13  ;;  %v1010_v14 = vpop.f32.mrf.mxu0 }
 0x198   : > { %1651 = vst [vmem:[%s3173_s18 + $0x3e8] sm:$0xff] %v1010_v14  ;;  %v1363_v15 = vpop.f32.mrf.mxu1 }
 0x199   : > { %1653 = vst [vmem:[%s3173_s18 + $0x3f8] sm:$0xff] %v1363_v15  ;;  %v1014_v16 = vpop.f32.mrf.mxu0 }
 0x19a   : > { %1654 = vst [vmem:[%s3173_s18 + $0x400] sm:$0xff] %v1014_v16  ;;  %v1367_v17 = vpop.f32.mrf.mxu1 }
 0x19b   : > { %1656 = vst [vmem:[%s3173_s18 + $0x410] sm:$0xff] %v1367_v17  ;;  %v1016_v18 = vpop.f32.mrf.mxu0 }
 0x19c   : > { %1655 = vst [vmem:[%s3173_s18 + $0x408] sm:$0xff] %v1016_v18  ;;  %v1369_v19 = vpop.f32.mrf.mxu1 }
 0x19d   : > { %1657 = vst [vmem:[%s3173_s18 + $0x418] sm:$0xff] %v1369_v19  ;;  %v1018_v20 = vpop.f32.mrf.mxu0 }
 0x19e   : > { %1658 = vst [vmem:[%s3173_s18 + $0x420] sm:$0xff] %v1018_v20  ;;  %v1371_v21 = vpop.f32.mrf.mxu1 }
 0x19f   : > { %1660 = vst [vmem:[%s3173_s18 + $0x430] sm:$0xff] %v1371_v21  ;;  %v1020_v22 = vpop.f32.mrf.mxu0 }
 0x1a0   : > { %1659 = vst [vmem:[%s3173_s18 + $0x428] sm:$0xff] %v1020_v22  ;;  %v1373_v23 = vpop.f32.mrf.mxu1 }
 0x1a1   : > { %1661 = vst [vmem:[%s3173_s18 + $0x438] sm:$0xff] %v1373_v23  ;;  %v1024_v24 = vpop.f32.mrf.mxu0 }
 0x1a2   : > { %1662 = vst [vmem:[%s3173_s18 + $0x440] sm:$0xff] %v1024_v24  ;;  %v1377_v25 = vpop.f32.mrf.mxu1 }
 0x1a3   : > { %1664 = vst [vmem:[%s3173_s18 + $0x450] sm:$0xff] %v1377_v25  ;;  %v1026_v26 = vpop.f32.mrf.mxu0 }
 0x1a4   : > { %1663 = vst [vmem:[%s3173_s18 + $0x448] sm:$0xff] %v1026_v26  ;;  %v1379_v27 = vpop.f32.mrf.mxu1 }
 0x1a5   : > { %1665 = vst [vmem:[%s3173_s18 + $0x458] sm:$0xff] %v1379_v27  ;;  %v1028_v28 = vpop.f32.mrf.mxu0 }
 0x1a6   : > { %1666 = vst [vmem:[%s3173_s18 + $0x460] sm:$0xff] %v1028_v28  ;;  %v1381_v29 = vpop.f32.mrf.mxu1 }
 0x1a7   : > { %1668 = vst [vmem:[%s3173_s18 + $0x470] sm:$0xff] %v1381_v29  ;;  %v1030_v30 = vpop.f32.mrf.mxu0 }
 0x1a8   : > { %1667 = vst [vmem:[%s3173_s18 + $0x468] sm:$0xff] %v1030_v30  ;;  %v1383_v31 = vpop.f32.mrf.mxu1 }
 0x1a9   : > { %1669 = vst [vmem:[%s3173_s18 + $0x478] sm:$0xff] %v1383_v31  ;;  %v1034_v32 = vpop.f32.mrf.mxu0 }
 0x1aa   : > { %1670 = vst [vmem:[%s3173_s18 + $0x480] sm:$0xff] %v1034_v32  ;;  %v1387_v33 = vpop.f32.mrf.mxu1 }
 0x1ab   : > { %1672 = vst [vmem:[%s3173_s18 + $0x490] sm:$0xff] %v1387_v33  ;;  %v1036_v34 = vpop.f32.mrf.mxu0 }
 0x1ac   : > { %1671 = vst [vmem:[%s3173_s18 + $0x488] sm:$0xff] %v1036_v34  ;;  %v1389_v35 = vpop.f32.mrf.mxu1 }
 0x1ad   : > { %1673 = vst [vmem:[%s3173_s18 + $0x498] sm:$0xff] %v1389_v35  ;;  %v1038_v36 = vpop.f32.mrf.mxu0 }
 0x1ae   : > { %1674 = vst [vmem:[%s3173_s18 + $0x4a0] sm:$0xff] %v1038_v36  ;;  %v1391_v37 = vpop.f32.mrf.mxu1 }
 0x1af   : > { %1676 = vst [vmem:[%s3173_s18 + $0x4b0] sm:$0xff] %v1391_v37  ;;  %v1040_v38 = vpop.f32.mrf.mxu0 }
 0x1b0   : > { %1675 = vst [vmem:[%s3173_s18 + $0x4a8] sm:$0xff] %v1040_v38  ;;  %v1393_v39 = vpop.f32.mrf.mxu1 }
 0x1b1   : > { %1677 = vst [vmem:[%s3173_s18 + $0x4b8] sm:$0xff] %v1393_v39  ;;  %v1044_v40 = vpop.f32.mrf.mxu0 }
 0x1b2   : > { %1678 = vst [vmem:[%s3173_s18 + $0x4c0] sm:$0xff] %v1044_v40  ;;  %v1397_v41 = vpop.f32.mrf.mxu1 }
 0x1b3   : > { %1680 = vst [vmem:[%s3173_s18 + $0x4d0] sm:$0xff] %v1397_v41  ;;  %v1046_v42 = vpop.f32.mrf.mxu0 }
 0x1b4   : > { %1679 = vst [vmem:[%s3173_s18 + $0x4c8] sm:$0xff] %v1046_v42  ;;  %v1399_v43 = vpop.f32.mrf.mxu1 }
 0x1b5   : > { %1681 = vst [vmem:[%s3173_s18 + $0x4d8] sm:$0xff] %v1399_v43  ;;  %v1048_v44 = vpop.f32.mrf.mxu0 }
 0x1b6   : > { %1682 = vst [vmem:[%s3173_s18 + $0x4e0] sm:$0xff] %v1048_v44  ;;  %v1401_v45 = vpop.f32.mrf.mxu1 }
 0x1b7   : > { %1684 = vst [vmem:[%s3173_s18 + $0x4f0] sm:$0xff] %v1401_v45  ;;  %v1050_v46 = vpop.f32.mrf.mxu0 }
 0x1b8   : > { %1683 = vst [vmem:[%s3173_s18 + $0x4e8] sm:$0xff] %v1050_v46  ;;  %v1403_v47 = vpop.f32.mrf.mxu1 }
 0x1b9   : > { %1685 = vst [vmem:[%s3173_s18 + $0x4f8] sm:$0xff] %v1403_v47  ;;  %v1054_v48 = vpop.f32.mrf.mxu0 }
 0x1ba   : > { %1686 = vst [vmem:[%s3173_s18 + $0x500] sm:$0xff] %v1054_v48  ;;  %v1407_v49 = vpop.f32.mrf.mxu1 }
 0x1bb   : > { %1688 = vst [vmem:[%s3173_s18 + $0x510] sm:$0xff] %v1407_v49  ;;  %v1056_v50 = vpop.f32.mrf.mxu0 }
 0x1bc   : > { %1687 = vst [vmem:[%s3173_s18 + $0x508] sm:$0xff] %v1056_v50  ;;  %v1409_v51 = vpop.f32.mrf.mxu1 }
 0x1bd   : > { %1689 = vst [vmem:[%s3173_s18 + $0x518] sm:$0xff] %v1409_v51  ;;  %v1058_v52 = vpop.f32.mrf.mxu0 }
 0x1be   : > { %1690 = vst [vmem:[%s3173_s18 + $0x520] sm:$0xff] %v1058_v52  ;;  %v1411_v53 = vpop.f32.mrf.mxu1 }
 0x1bf   : > { %1692 = vst [vmem:[%s3173_s18 + $0x530] sm:$0xff] %v1411_v53  ;;  %v1060_v54 = vpop.f32.mrf.mxu0 }
 0x1c0   : > { %1691 = vst [vmem:[%s3173_s18 + $0x528] sm:$0xff] %v1060_v54  ;;  %v1413_v55 = vpop.f32.mrf.mxu1 }
 0x1c1   : > { %1693 = vst [vmem:[%s3173_s18 + $0x538] sm:$0xff] %v1413_v55  ;;  %v1064_v56 = vpop.f32.mrf.mxu0 }
 0x1c2   : > { %1694 = vst [vmem:[%s3173_s18 + $0x540] sm:$0xff] %v1064_v56  ;;  %v1417_v57 = vpop.f32.mrf.mxu1 }
 0x1c3   : > { %1696 = vst [vmem:[%s3173_s18 + $0x550] sm:$0xff] %v1417_v57  ;;  %v1066_v58 = vpop.f32.mrf.mxu0 }
 0x1c4   : > { %1695 = vst [vmem:[%s3173_s18 + $0x548] sm:$0xff] %v1066_v58  ;;  %v1419_v59 = vpop.f32.mrf.mxu1 }
 0x1c5   : > { %1697 = vst [vmem:[%s3173_s18 + $0x558] sm:$0xff] %v1419_v59  ;;  %v1068_v60 = vpop.f32.mrf.mxu0 }
 0x1c6   : > { %1698 = vst [vmem:[%s3173_s18 + $0x560] sm:$0xff] %v1068_v60  ;;  %v1421_v61 = vpop.f32.mrf.mxu1 }
 0x1c7   : > { %1700 = vst [vmem:[%s3173_s18 + $0x570] sm:$0xff] %v1421_v61  ;;  %v1070_v62 = vpop.f32.mrf.mxu0 }
 0x1c8   : > { %1699 = vst [vmem:[%s3173_s18 + $0x568] sm:$0xff] %v1070_v62  ;;  %v1423_v63 = vpop.f32.mrf.mxu1 }
 0x1c9   : > { %1701 = vst [vmem:[%s3173_s18 + $0x578] sm:$0xff] %v1423_v63  ;;  %v1074_v0 = vpop.f32.mrf.mxu0 }
 0x1ca   : > { %1702 = vst [vmem:[%s3173_s18 + $0x580] sm:$0xff] %v1074_v0  ;;  %v1427_v1 = vpop.f32.mrf.mxu1 }
 0x1cb   : > { %1704 = vst [vmem:[%s3173_s18 + $0x590] sm:$0xff] %v1427_v1  ;;  %v1076_v2 = vpop.f32.mrf.mxu0 }
 0x1cc   : > { %1703 = vst [vmem:[%s3173_s18 + $0x588] sm:$0xff] %v1076_v2  ;;  %v1429_v3 = vpop.f32.mrf.mxu1 }
 0x1cd   : > { %1705 = vst [vmem:[%s3173_s18 + $0x598] sm:$0xff] %v1429_v3  ;;  %v1078_v4 = vpop.f32.mrf.mxu0 }
 0x1ce   : > { %1706 = vst [vmem:[%s3173_s18 + $0x5a0] sm:$0xff] %v1078_v4  ;;  %v1431_v5 = vpop.f32.mrf.mxu1 }
 0x1cf   : > { %1708 = vst [vmem:[%s3173_s18 + $0x5b0] sm:$0xff] %v1431_v5  ;;  %v1080_v6 = vpop.f32.mrf.mxu0 }
 0x1d0   : > { %1707 = vst [vmem:[%s3173_s18 + $0x5a8] sm:$0xff] %v1080_v6  ;;  %v1433_v7 = vpop.f32.mrf.mxu1 }
 0x1d1   : > { %1709 = vst [vmem:[%s3173_s18 + $0x5b8] sm:$0xff] %v1433_v7  ;;  %v1084_v8 = vpop.f32.mrf.mxu0 }
 0x1d2   : > { %1710 = vst [vmem:[%s3173_s18 + $0x5c0] sm:$0xff] %v1084_v8  ;;  %v1437_v9 = vpop.f32.mrf.mxu1 }
 0x1d3   : > { %1712 = vst [vmem:[%s3173_s18 + $0x5d0] sm:$0xff] %v1437_v9  ;;  %v1086_v10 = vpop.f32.mrf.mxu0 }
 0x1d4   : > { %1711 = vst [vmem:[%s3173_s18 + $0x5c8] sm:$0xff] %v1086_v10  ;;  %v1439_v11 = vpop.f32.mrf.mxu1 }
 0x1d5   : > { %1713 = vst [vmem:[%s3173_s18 + $0x5d8] sm:$0xff] %v1439_v11  ;;  %v1088_v12 = vpop.f32.mrf.mxu0 }
 0x1d6   : > { %1714 = vst [vmem:[%s3173_s18 + $0x5e0] sm:$0xff] %v1088_v12  ;;  %v1441_v13 = vpop.f32.mrf.mxu1 }
 0x1d7   : > { %1716 = vst [vmem:[%s3173_s18 + $0x5f0] sm:$0xff] %v1441_v13  ;;  %v1090_v14 = vpop.f32.mrf.mxu0 }
 0x1d8   : > { %1715 = vst [vmem:[%s3173_s18 + $0x5e8] sm:$0xff] %v1090_v14  ;;  %v1443_v15 = vpop.f32.mrf.mxu1 }
 0x1d9   : > { %1717 = vst [vmem:[%s3173_s18 + $0x5f8] sm:$0xff] %v1443_v15  ;;  %v1094_v16 = vpop.f32.mrf.mxu0 }
 0x1da   : > { %1718 = vst [vmem:[%s3173_s18 + $0x600] sm:$0xff] %v1094_v16  ;;  %v1447_v17 = vpop.f32.mrf.mxu1  ;;  %v1807_v16 = vld [vmem:[%s3173_s18] sm:$0xff] (%p2958_p5) }
 0x1db   : > { %1720 = vst [vmem:[%s3173_s18 + $0x610] sm:$0xff] %v1447_v17  ;;  %v1096_v18 = vpop.f32.mrf.mxu0  ;;  %v1809_v17 = vld [vmem:[%s3173_s18 + $0x8] sm:$0xff] (%p2958_p5)  ;;  %1808 = vst [vmem:[%s3482_s25] sm:$0xff] (%p2958_p5), %v1807_v16  ;;  %v1935_v16 = vld [vmem:[%s3173_s18 + $0x200] sm:$0xff] (%p2958_p5) }
 0x1dc   : > { %1719 = vst [vmem:[%s3173_s18 + $0x608] sm:$0xff] %v1096_v18  ;;  %v1449_v19 = vpop.f32.mrf.mxu1  ;;  %v1811_v18 = vld [vmem:[%s3173_s18 + $0x10] sm:$0xff] (%p2958_p5)  ;;  %1810 = vst [vmem:[%s3482_s25 + $0x8] sm:$0xff] (%p2958_p5), %v1809_v17  ;;  %v1937_v17 = vld [vmem:[%s3173_s18 + $0x208] sm:$0xff] (%p2958_p5) }
 0x1dd   : > { %1721 = vst [vmem:[%s3173_s18 + $0x618] sm:$0xff] %v1449_v19  ;;  %v1098_v20 = vpop.f32.mrf.mxu0  ;;  %v1813_v19 = vld [vmem:[%s3173_s18 + $0x18] sm:$0xff] (%p2958_p5)  ;;  %1812 = vst [vmem:[%s3482_s25 + $0x10] sm:$0xff] (%p2958_p5), %v1811_v18  ;;  %v1939_v18 = vld [vmem:[%s3173_s18 + $0x210] sm:$0xff] (%p2958_p5) }
 0x1de   : > { %1722 = vst [vmem:[%s3173_s18 + $0x620] sm:$0xff] %v1098_v20  ;;  %v1451_v21 = vpop.f32.mrf.mxu1  ;;  %v1815_v20 = vld [vmem:[%s3173_s18 + $0x20] sm:$0xff] (%p2958_p5)  ;;  %1814 = vst [vmem:[%s3482_s25 + $0x18] sm:$0xff] (%p2958_p5), %v1813_v19  ;;  %v1941_v19 = vld [vmem:[%s3173_s18 + $0x218] sm:$0xff] (%p2958_p5) }
 0x1df   : > { %1724 = vst [vmem:[%s3173_s18 + $0x630] sm:$0xff] %v1451_v21  ;;  %v1100_v22 = vpop.f32.mrf.mxu0  ;;  %v1817_v21 = vld [vmem:[%s3173_s18 + $0x28] sm:$0xff] (%p2958_p5)  ;;  %1816 = vst [vmem:[%s3482_s25 + $0x40] sm:$0xff] (%p2958_p5), %v1815_v20  ;;  %v1943_v20 = vld [vmem:[%s3173_s18 + $0x220] sm:$0xff] (%p2958_p5) }
 0x1e0   : > { %1723 = vst [vmem:[%s3173_s18 + $0x628] sm:$0xff] %v1100_v22  ;;  %v1453_v23 = vpop.f32.mrf.mxu1  ;;  %v1819_v22 = vld [vmem:[%s3173_s18 + $0x30] sm:$0xff] (%p2958_p5)  ;;  %1818 = vst [vmem:[%s3482_s25 + $0x48] sm:$0xff] (%p2958_p5), %v1817_v21  ;;  %v1945_v21 = vld [vmem:[%s3173_s18 + $0x228] sm:$0xff] (%p2958_p5) }
 0x1e1   : > { %1725 = vst [vmem:[%s3173_s18 + $0x638] sm:$0xff] %v1453_v23  ;;  %v1104_v24 = vpop.f32.mrf.mxu0  ;;  %v1821_v23 = vld [vmem:[%s3173_s18 + $0x38] sm:$0xff] (%p2958_p5)  ;;  %1820 = vst [vmem:[%s3482_s25 + $0x50] sm:$0xff] (%p2958_p5), %v1819_v22  ;;  %v1947_v22 = vld [vmem:[%s3173_s18 + $0x230] sm:$0xff] (%p2958_p5) }
 0x1e2   : > { %1726 = vst [vmem:[%s3173_s18 + $0x640] sm:$0xff] %v1104_v24  ;;  %v1457_v25 = vpop.f32.mrf.mxu1  ;;  %v1823_v24 = vld [vmem:[%s3173_s18 + $0x40] sm:$0xff] (%p2958_p5)  ;;  %1822 = vst [vmem:[%s3482_s25 + $0x58] sm:$0xff] (%p2958_p5), %v1821_v23  ;;  %v1949_v23 = vld [vmem:[%s3173_s18 + $0x238] sm:$0xff] (%p2958_p5) }
 0x1e3   : > { %1728 = vst [vmem:[%s3173_s18 + $0x650] sm:$0xff] %v1457_v25  ;;  %v1106_v26 = vpop.f32.mrf.mxu0  ;;  %v1825_v25 = vld [vmem:[%s3173_s18 + $0x48] sm:$0xff] (%p2958_p5)  ;;  %1824 = vst [vmem:[%s3482_s25 + $0x80] sm:$0xff] (%p2958_p5), %v1823_v24  ;;  %v1951_v24 = vld [vmem:[%s3173_s18 + $0x240] sm:$0xff] (%p2958_p5) }
 0x1e4   : > { %1727 = vst [vmem:[%s3173_s18 + $0x648] sm:$0xff] %v1106_v26  ;;  %v1459_v27 = vpop.f32.mrf.mxu1  ;;  %v1827_v26 = vld [vmem:[%s3173_s18 + $0x50] sm:$0xff] (%p2958_p5)  ;;  %1826 = vst [vmem:[%s3482_s25 + $0x88] sm:$0xff] (%p2958_p5), %v1825_v25  ;;  %v1953_v25 = vld [vmem:[%s3173_s18 + $0x248] sm:$0xff] (%p2958_p5) }
 0x1e5   : > { %1729 = vst [vmem:[%s3173_s18 + $0x658] sm:$0xff] %v1459_v27  ;;  %v1108_v28 = vpop.f32.mrf.mxu0  ;;  %v1829_v27 = vld [vmem:[%s3173_s18 + $0x58] sm:$0xff] (%p2958_p5)  ;;  %1828 = vst [vmem:[%s3482_s25 + $0x90] sm:$0xff] (%p2958_p5), %v1827_v26  ;;  %v1955_v26 = vld [vmem:[%s3173_s18 + $0x250] sm:$0xff] (%p2958_p5) }
 0x1e6   : > { %1730 = vst [vmem:[%s3173_s18 + $0x660] sm:$0xff] %v1108_v28  ;;  %v1461_v29 = vpop.f32.mrf.mxu1  ;;  %1830 = vst [vmem:[%s3482_s25 + $0x98] sm:$0xff] (%p2958_p5), %v1829_v27  ;;  %v1831_v28 = vld [vmem:[%s3173_s18 + $0x60] sm:$0xff] (%p2958_p5)  ;;  %v1957_v27 = vld [vmem:[%s3173_s18 + $0x258] sm:$0xff] (%p2958_p5) }
 0x1e7   : > { %1732 = vst [vmem:[%s3173_s18 + $0x670] sm:$0xff] %v1461_v29  ;;  %v1110_v30 = vpop.f32.mrf.mxu0  ;;  %v1833_v29 = vld [vmem:[%s3173_s18 + $0x68] sm:$0xff] (%p2958_p5)  ;;  %1832 = vst [vmem:[%s3482_s25 + $0xc0] sm:$0xff] (%p2958_p5), %v1831_v28  ;;  %v1959_v28 = vld [vmem:[%s3173_s18 + $0x260] sm:$0xff] (%p2958_p5) }
 0x1e8   : > { %1731 = vst [vmem:[%s3173_s18 + $0x668] sm:$0xff] %v1110_v30  ;;  %v1463_v31 = vpop.f32.mrf.mxu1  ;;  %v1835_v30 = vld [vmem:[%s3173_s18 + $0x70] sm:$0xff] (%p2958_p5)  ;;  %1834 = vst [vmem:[%s3482_s25 + $0xc8] sm:$0xff] (%p2958_p5), %v1833_v29  ;;  %v1961_v29 = vld [vmem:[%s3173_s18 + $0x268] sm:$0xff] (%p2958_p5) }
 0x1e9   : > { %1733 = vst [vmem:[%s3173_s18 + $0x678] sm:$0xff] %v1463_v31  ;;  %v1114_v32 = vpop.f32.mrf.mxu0  ;;  %1836 = vst [vmem:[%s3482_s25 + $0xd0] sm:$0xff] (%p2958_p5), %v1835_v30  ;;  %v1837_v31 = vld [vmem:[%s3173_s18 + $0x78] sm:$0xff] (%p2958_p5)  ;;  %v1963_v30 = vld [vmem:[%s3173_s18 + $0x270] sm:$0xff] (%p2958_p5) }
 0x1ea   : > { %1734 = vst [vmem:[%s3173_s18 + $0x680] sm:$0xff] %v1114_v32  ;;  %v1467_v33 = vpop.f32.mrf.mxu1  ;;  %v1839_v32 = vld [vmem:[%s3173_s18 + $0x80] sm:$0xff] (%p2958_p5)  ;;  %1838 = vst [vmem:[%s3482_s25 + $0xd8] sm:$0xff] (%p2958_p5), %v1837_v31  ;;  %v1965_v31 = vld [vmem:[%s3173_s18 + $0x278] sm:$0xff] (%p2958_p5) }
 0x1eb   : > { %1736 = vst [vmem:[%s3173_s18 + $0x690] sm:$0xff] %v1467_v33  ;;  %v1116_v34 = vpop.f32.mrf.mxu0  ;;  %v1841_v33 = vld [vmem:[%s3173_s18 + $0x88] sm:$0xff] (%p2958_p5)  ;;  %1840 = vst [vmem:[%s3482_s25 + $0x100] sm:$0xff] (%p2958_p5), %v1839_v32  ;;  %v1967_v32 = vld [vmem:[%s3173_s18 + $0x280] sm:$0xff] (%p2958_p5) }
 0x1ec   : > { %1735 = vst [vmem:[%s3173_s18 + $0x688] sm:$0xff] %v1116_v34  ;;  %v1469_v35 = vpop.f32.mrf.mxu1  ;;  %1842 = vst [vmem:[%s3482_s25 + $0x108] sm:$0xff] (%p2958_p5), %v1841_v33  ;;  %v1843_v34 = vld [vmem:[%s3173_s18 + $0x90] sm:$0xff] (%p2958_p5)  ;;  %v1969_v33 = vld [vmem:[%s3173_s18 + $0x288] sm:$0xff] (%p2958_p5) }
 0x1ed   : > { %1737 = vst [vmem:[%s3173_s18 + $0x698] sm:$0xff] %v1469_v35  ;;  %v1118_v36 = vpop.f32.mrf.mxu0  ;;  %v1845_v35 = vld [vmem:[%s3173_s18 + $0x98] sm:$0xff] (%p2958_p5)  ;;  %1844 = vst [vmem:[%s3482_s25 + $0x110] sm:$0xff] (%p2958_p5), %v1843_v34  ;;  %v1971_v34 = vld [vmem:[%s3173_s18 + $0x290] sm:$0xff] (%p2958_p5) }
 0x1ee   : > { %1738 = vst [vmem:[%s3173_s18 + $0x6a0] sm:$0xff] %v1118_v36  ;;  %v1471_v37 = vpop.f32.mrf.mxu1  ;;  %v1847_v36 = vld [vmem:[%s3173_s18 + $0xa0] sm:$0xff] (%p2958_p5)  ;;  %1846 = vst [vmem:[%s3482_s25 + $0x118] sm:$0xff] (%p2958_p5), %v1845_v35  ;;  %v1973_v35 = vld [vmem:[%s3173_s18 + $0x298] sm:$0xff] (%p2958_p5) }
 0x1ef   : > { %1740 = vst [vmem:[%s3173_s18 + $0x6b0] sm:$0xff] %v1471_v37  ;;  %v1120_v38 = vpop.f32.mrf.mxu0  ;;  %1848 = vst [vmem:[%s3482_s25 + $0x140] sm:$0xff] (%p2958_p5), %v1847_v36  ;;  %v1849_v37 = vld [vmem:[%s3173_s18 + $0xa8] sm:$0xff] (%p2958_p5)  ;;  %v1975_v36 = vld [vmem:[%s3173_s18 + $0x2a0] sm:$0xff] (%p2958_p5) }
 0x1f0   : > { %1739 = vst [vmem:[%s3173_s18 + $0x6a8] sm:$0xff] %v1120_v38  ;;  %v1473_v39 = vpop.f32.mrf.mxu1  ;;  %v1851_v38 = vld [vmem:[%s3173_s18 + $0xb0] sm:$0xff] (%p2958_p5)  ;;  %1850 = vst [vmem:[%s3482_s25 + $0x148] sm:$0xff] (%p2958_p5), %v1849_v37  ;;  %v1977_v37 = vld [vmem:[%s3173_s18 + $0x2a8] sm:$0xff] (%p2958_p5) }
 0x1f1   : > { %1741 = vst [vmem:[%s3173_s18 + $0x6b8] sm:$0xff] %v1473_v39  ;;  %v1124_v40 = vpop.f32.mrf.mxu0  ;;  %v1853_v39 = vld [vmem:[%s3173_s18 + $0xb8] sm:$0xff] (%p2958_p5)  ;;  %1852 = vst [vmem:[%s3482_s25 + $0x150] sm:$0xff] (%p2958_p5), %v1851_v38  ;;  %v1979_v38 = vld [vmem:[%s3173_s18 + $0x2b0] sm:$0xff] (%p2958_p5) }
 0x1f2   : > { %1742 = vst [vmem:[%s3173_s18 + $0x6c0] sm:$0xff] %v1124_v40  ;;  %v1477_v41 = vpop.f32.mrf.mxu1  ;;  %1854 = vst [vmem:[%s3482_s25 + $0x158] sm:$0xff] (%p2958_p5), %v1853_v39  ;;  %v1855_v40 = vld [vmem:[%s3173_s18 + $0xc0] sm:$0xff] (%p2958_p5)  ;;  %v1981_v39 = vld [vmem:[%s3173_s18 + $0x2b8] sm:$0xff] (%p2958_p5) }
 0x1f3   : > { %1744 = vst [vmem:[%s3173_s18 + $0x6d0] sm:$0xff] %v1477_v41  ;;  %v1126_v42 = vpop.f32.mrf.mxu0  ;;  %v1857_v41 = vld [vmem:[%s3173_s18 + $0xc8] sm:$0xff] (%p2958_p5)  ;;  %1856 = vst [vmem:[%s3482_s25 + $0x180] sm:$0xff] (%p2958_p5), %v1855_v40  ;;  %v1983_v40 = vld [vmem:[%s3173_s18 + $0x2c0] sm:$0xff] (%p2958_p5) }
 0x1f4   : > { %1743 = vst [vmem:[%s3173_s18 + $0x6c8] sm:$0xff] %v1126_v42  ;;  %v1479_v43 = vpop.f32.mrf.mxu1  ;;  %v1859_v42 = vld [vmem:[%s3173_s18 + $0xd0] sm:$0xff] (%p2958_p5)  ;;  %1858 = vst [vmem:[%s3482_s25 + $0x188] sm:$0xff] (%p2958_p5), %v1857_v41  ;;  %v1985_v41 = vld [vmem:[%s3173_s18 + $0x2c8] sm:$0xff] (%p2958_p5) }
 0x1f5   : > { %1745 = vst [vmem:[%s3173_s18 + $0x6d8] sm:$0xff] %v1479_v43  ;;  %v1128_v44 = vpop.f32.mrf.mxu0  ;;  %1860 = vst [vmem:[%s3482_s25 + $0x190] sm:$0xff] (%p2958_p5), %v1859_v42  ;;  %v1861_v43 = vld [vmem:[%s3173_s18 + $0xd8] sm:$0xff] (%p2958_p5)  ;;  %v1987_v42 = vld [vmem:[%s3173_s18 + $0x2d0] sm:$0xff] (%p2958_p5) }
 0x1f6   : > { %1746 = vst [vmem:[%s3173_s18 + $0x6e0] sm:$0xff] %v1128_v44  ;;  %v1481_v45 = vpop.f32.mrf.mxu1  ;;  %v1863_v44 = vld [vmem:[%s3173_s18 + $0xe0] sm:$0xff] (%p2958_p5)  ;;  %1862 = vst [vmem:[%s3482_s25 + $0x198] sm:$0xff] (%p2958_p5), %v1861_v43  ;;  %v1989_v43 = vld [vmem:[%s3173_s18 + $0x2d8] sm:$0xff] (%p2958_p5) }
 0x1f7   : > { %1748 = vst [vmem:[%s3173_s18 + $0x6f0] sm:$0xff] %v1481_v45  ;;  %v1130_v46 = vpop.f32.mrf.mxu0  ;;  %v1865_v45 = vld [vmem:[%s3173_s18 + $0xe8] sm:$0xff] (%p2958_p5)  ;;  %1864 = vst [vmem:[%s3482_s25 + $0x1c0] sm:$0xff] (%p2958_p5), %v1863_v44  ;;  %v1991_v44 = vld [vmem:[%s3173_s18 + $0x2e0] sm:$0xff] (%p2958_p5) }
 0x1f8   : > { %1747 = vst [vmem:[%s3173_s18 + $0x6e8] sm:$0xff] %v1130_v46  ;;  %v1483_v47 = vpop.f32.mrf.mxu1  ;;  %1866 = vst [vmem:[%s3482_s25 + $0x1c8] sm:$0xff] (%p2958_p5), %v1865_v45  ;;  %v1867_v46 = vld [vmem:[%s3173_s18 + $0xf0] sm:$0xff] (%p2958_p5)  ;;  %v1993_v45 = vld [vmem:[%s3173_s18 + $0x2e8] sm:$0xff] (%p2958_p5) }
 0x1f9   : > { %1749 = vst [vmem:[%s3173_s18 + $0x6f8] sm:$0xff] %v1483_v47  ;;  %v1134_v48 = vpop.f32.mrf.mxu0  ;;  %v1869_v47 = vld [vmem:[%s3173_s18 + $0xf8] sm:$0xff] (%p2958_p5)  ;;  %1868 = vst [vmem:[%s3482_s25 + $0x1d0] sm:$0xff] (%p2958_p5), %v1867_v46  ;;  %v1995_v46 = vld [vmem:[%s3173_s18 + $0x2f0] sm:$0xff] (%p2958_p5) }
 0x1fa   : > { %1750 = vst [vmem:[%s3173_s18 + $0x700] sm:$0xff] %v1134_v48  ;;  %v1487_v49 = vpop.f32.mrf.mxu1  ;;  %v1871_v48 = vld [vmem:[%s3173_s18 + $0x100] sm:$0xff] (%p2958_p5)  ;;  %1870 = vst [vmem:[%s3482_s25 + $0x1d8] sm:$0xff] (%p2958_p5), %v1869_v47  ;;  %v1997_v47 = vld [vmem:[%s3173_s18 + $0x2f8] sm:$0xff] (%p2958_p5) }
 0x1fb   : > { %1752 = vst [vmem:[%s3173_s18 + $0x710] sm:$0xff] %v1487_v49  ;;  %v1136_v50 = vpop.f32.mrf.mxu0  ;;  %1872 = vst [vmem:[%s3482_s25 + $0x200] sm:$0xff] (%p2958_p5), %v1871_v48  ;;  %v1873_v49 = vld [vmem:[%s3173_s18 + $0x108] sm:$0xff] (%p2958_p5)  ;;  %v1999_v48 = vld [vmem:[%s3173_s18 + $0x300] sm:$0xff] (%p2958_p5) }
 0x1fc   : > { %1751 = vst [vmem:[%s3173_s18 + $0x708] sm:$0xff] %v1136_v50  ;;  %v1489_v51 = vpop.f32.mrf.mxu1  ;;  %v1875_v50 = vld [vmem:[%s3173_s18 + $0x110] sm:$0xff] (%p2958_p5)  ;;  %1874 = vst [vmem:[%s3482_s25 + $0x208] sm:$0xff] (%p2958_p5), %v1873_v49  ;;  %v2001_v49 = vld [vmem:[%s3173_s18 + $0x308] sm:$0xff] (%p2958_p5) }
 0x1fd   : > { %1753 = vst [vmem:[%s3173_s18 + $0x718] sm:$0xff] %v1489_v51  ;;  %v1138_v52 = vpop.f32.mrf.mxu0  ;;  %v1877_v51 = vld [vmem:[%s3173_s18 + $0x118] sm:$0xff] (%p2958_p5)  ;;  %1876 = vst [vmem:[%s3482_s25 + $0x210] sm:$0xff] (%p2958_p5), %v1875_v50  ;;  %v2003_v50 = vld [vmem:[%s3173_s18 + $0x310] sm:$0xff] (%p2958_p5) }
 0x1fe   : > { %1754 = vst [vmem:[%s3173_s18 + $0x720] sm:$0xff] %v1138_v52  ;;  %v1491_v53 = vpop.f32.mrf.mxu1  ;;  %1878 = vst [vmem:[%s3482_s25 + $0x218] sm:$0xff] (%p2958_p5), %v1877_v51  ;;  %v1879_v52 = vld [vmem:[%s3173_s18 + $0x120] sm:$0xff] (%p2958_p5)  ;;  %v2005_v51 = vld [vmem:[%s3173_s18 + $0x318] sm:$0xff] (%p2958_p5) }
 0x1ff   : > { %1756 = vst [vmem:[%s3173_s18 + $0x730] sm:$0xff] %v1491_v53  ;;  %v1140_v54 = vpop.f32.mrf.mxu0  ;;  %v1881_v53 = vld [vmem:[%s3173_s18 + $0x128] sm:$0xff] (%p2958_p5)  ;;  %1880 = vst [vmem:[%s3482_s25 + $0x240] sm:$0xff] (%p2958_p5), %v1879_v52  ;;  %v2007_v52 = vld [vmem:[%s3173_s18 + $0x320] sm:$0xff] (%p2958_p5) }
 0x200   : > { %1755 = vst [vmem:[%s3173_s18 + $0x728] sm:$0xff] %v1140_v54  ;;  %v1493_v55 = vpop.f32.mrf.mxu1  ;;  %v1883_v54 = vld [vmem:[%s3173_s18 + $0x130] sm:$0xff] (%p2958_p5)  ;;  %1882 = vst [vmem:[%s3482_s25 + $0x248] sm:$0xff] (%p2958_p5), %v1881_v53  ;;  %v2009_v53 = vld [vmem:[%s3173_s18 + $0x328] sm:$0xff] (%p2958_p5) }
 0x201   : > { %1757 = vst [vmem:[%s3173_s18 + $0x738] sm:$0xff] %v1493_v55  ;;  %v1144_v56 = vpop.f32.mrf.mxu0  ;;  %1884 = vst [vmem:[%s3482_s25 + $0x250] sm:$0xff] (%p2958_p5), %v1883_v54  ;;  %v1885_v55 = vld [vmem:[%s3173_s18 + $0x138] sm:$0xff] (%p2958_p5)  ;;  %v2011_v54 = vld [vmem:[%s3173_s18 + $0x330] sm:$0xff] (%p2958_p5) }
 0x202   : > { %1758 = vst [vmem:[%s3173_s18 + $0x740] sm:$0xff] %v1144_v56  ;;  %v1497_v57 = vpop.f32.mrf.mxu1  ;;  %v1887_v56 = vld [vmem:[%s3173_s18 + $0x140] sm:$0xff] (%p2958_p5)  ;;  %1886 = vst [vmem:[%s3482_s25 + $0x258] sm:$0xff] (%p2958_p5), %v1885_v55  ;;  %v2013_v55 = vld [vmem:[%s3173_s18 + $0x338] sm:$0xff] (%p2958_p5) }
 0x203   : > { %1760 = vst [vmem:[%s3173_s18 + $0x750] sm:$0xff] %v1497_v57  ;;  %v1146_v58 = vpop.f32.mrf.mxu0  ;;  %v1889_v57 = vld [vmem:[%s3173_s18 + $0x148] sm:$0xff] (%p2958_p5)  ;;  %1888 = vst [vmem:[%s3482_s25 + $0x280] sm:$0xff] (%p2958_p5), %v1887_v56  ;;  %v2015_v56 = vld [vmem:[%s3173_s18 + $0x340] sm:$0xff] (%p2958_p5) }
 0x204   : > { %1759 = vst [vmem:[%s3173_s18 + $0x748] sm:$0xff] %v1146_v58  ;;  %v1499_v59 = vpop.f32.mrf.mxu1  ;;  %1890 = vst [vmem:[%s3482_s25 + $0x288] sm:$0xff] (%p2958_p5), %v1889_v57  ;;  %v1891_v58 = vld [vmem:[%s3173_s18 + $0x150] sm:$0xff] (%p2958_p5)  ;;  %v2017_v57 = vld [vmem:[%s3173_s18 + $0x348] sm:$0xff] (%p2958_p5) }
 0x205   : > { %1761 = vst [vmem:[%s3173_s18 + $0x758] sm:$0xff] %v1499_v59  ;;  %v1148_v60 = vpop.f32.mrf.mxu0  ;;  %v1893_v59 = vld [vmem:[%s3173_s18 + $0x158] sm:$0xff] (%p2958_p5)  ;;  %1892 = vst [vmem:[%s3482_s25 + $0x290] sm:$0xff] (%p2958_p5), %v1891_v58  ;;  %v2019_v58 = vld [vmem:[%s3173_s18 + $0x350] sm:$0xff] (%p2958_p5) }
 0x206   : > { %1762 = vst [vmem:[%s3173_s18 + $0x760] sm:$0xff] %v1148_v60  ;;  %v1501_v61 = vpop.f32.mrf.mxu1  ;;  %v1895_v60 = vld [vmem:[%s3173_s18 + $0x160] sm:$0xff] (%p2958_p5)  ;;  %1894 = vst [vmem:[%s3482_s25 + $0x298] sm:$0xff] (%p2958_p5), %v1893_v59  ;;  %v2021_v59 = vld [vmem:[%s3173_s18 + $0x358] sm:$0xff] (%p2958_p5) }
 0x207   : > { %1764 = vst [vmem:[%s3173_s18 + $0x770] sm:$0xff] %v1501_v61  ;;  %v1150_v62 = vpop.f32.mrf.mxu0  ;;  %1896 = vst [vmem:[%s3482_s25 + $0x2c0] sm:$0xff] (%p2958_p5), %v1895_v60  ;;  %v1897_v61 = vld [vmem:[%s3173_s18 + $0x168] sm:$0xff] (%p2958_p5)  ;;  %v2023_v60 = vld [vmem:[%s3173_s18 + $0x360] sm:$0xff] (%p2958_p5) }
 0x208   : > { %1763 = vst [vmem:[%s3173_s18 + $0x768] sm:$0xff] %v1150_v62  ;;  %v1503_v63 = vpop.f32.mrf.mxu1  ;;  %v1899_v62 = vld [vmem:[%s3173_s18 + $0x170] sm:$0xff] (%p2958_p5)  ;;  %1898 = vst [vmem:[%s3482_s25 + $0x2c8] sm:$0xff] (%p2958_p5), %v1897_v61  ;;  %v2025_v61 = vld [vmem:[%s3173_s18 + $0x368] sm:$0xff] (%p2958_p5) }
 0x209   : > { %1765 = vst [vmem:[%s3173_s18 + $0x778] sm:$0xff] %v1503_v63  ;;  %v1154_v0 = vpop.f32.mrf.mxu0  ;;  %v1901_v63 = vld [vmem:[%s3173_s18 + $0x178] sm:$0xff] (%p2958_p5)  ;;  %1900 = vst [vmem:[%s3482_s25 + $0x2d0] sm:$0xff] (%p2958_p5), %v1899_v62  ;;  %v2027_v62 = vld [vmem:[%s3173_s18 + $0x370] sm:$0xff] (%p2958_p5) }
 0x20a   : > { %1766 = vst [vmem:[%s3173_s18 + $0x780] sm:$0xff] %v1154_v0  ;;  %v1507_v1 = vpop.f32.mrf.mxu1  ;;  %1902 = vst [vmem:[%s3482_s25 + $0x2d8] sm:$0xff] (%p2958_p5), %v1901_v63  ;;  %v1903_v0 = vld [vmem:[%s3173_s18 + $0x180] sm:$0xff] (%p2958_p5)  ;;  %v2029_v63 = vld [vmem:[%s3173_s18 + $0x378] sm:$0xff] (%p2958_p5) }
 0x20b   : > { %1768 = vst [vmem:[%s3173_s18 + $0x790] sm:$0xff] %v1507_v1  ;;  %v1156_v2 = vpop.f32.mrf.mxu0  ;;  %v1905_v1 = vld [vmem:[%s3173_s18 + $0x188] sm:$0xff] (%p2958_p5)  ;;  %1904 = vst [vmem:[%s3482_s25 + $0x300] sm:$0xff] (%p2958_p5), %v1903_v0  ;;  %v2031_v0 = vld [vmem:[%s3173_s18 + $0x380] sm:$0xff] (%p2958_p5) }
 0x20c   : > { %1767 = vst [vmem:[%s3173_s18 + $0x788] sm:$0xff] %v1156_v2  ;;  %v1509_v3 = vpop.f32.mrf.mxu1  ;;  %v1907_v2 = vld [vmem:[%s3173_s18 + $0x190] sm:$0xff] (%p2958_p5)  ;;  %1906 = vst [vmem:[%s3482_s25 + $0x308] sm:$0xff] (%p2958_p5), %v1905_v1  ;;  %v2033_v1 = vld [vmem:[%s3173_s18 + $0x388] sm:$0xff] (%p2958_p5) }
 0x20d   : > { %1769 = vst [vmem:[%s3173_s18 + $0x798] sm:$0xff] %v1509_v3  ;;  %v1158_v4 = vpop.f32.mrf.mxu0  ;;  %1908 = vst [vmem:[%s3482_s25 + $0x310] sm:$0xff] (%p2958_p5), %v1907_v2  ;;  %v1909_v3 = vld [vmem:[%s3173_s18 + $0x198] sm:$0xff] (%p2958_p5)  ;;  %v2035_v2 = vld [vmem:[%s3173_s18 + $0x390] sm:$0xff] (%p2958_p5) }
 0x20e   : > { %1770 = vst [vmem:[%s3173_s18 + $0x7a0] sm:$0xff] %v1158_v4  ;;  %v1511_v5 = vpop.f32.mrf.mxu1  ;;  %v1911_v4 = vld [vmem:[%s3173_s18 + $0x1a0] sm:$0xff] (%p2958_p5)  ;;  %1910 = vst [vmem:[%s3482_s25 + $0x318] sm:$0xff] (%p2958_p5), %v1909_v3  ;;  %v2037_v3 = vld [vmem:[%s3173_s18 + $0x398] sm:$0xff] (%p2958_p5) }
 0x20f   : > { %1772 = vst [vmem:[%s3173_s18 + $0x7b0] sm:$0xff] %v1511_v5  ;;  %v1160_v6 = vpop.f32.mrf.mxu0  ;;  %v1913_v5 = vld [vmem:[%s3173_s18 + $0x1a8] sm:$0xff] (%p2958_p5)  ;;  %1912 = vst [vmem:[%s3482_s25 + $0x340] sm:$0xff] (%p2958_p5), %v1911_v4  ;;  %v2039_v4 = vld [vmem:[%s3173_s18 + $0x3a0] sm:$0xff] (%p2958_p5) }
 0x210   : > { %1771 = vst [vmem:[%s3173_s18 + $0x7a8] sm:$0xff] %v1160_v6  ;;  %v1513_v7 = vpop.f32.mrf.mxu1  ;;  %1914 = vst [vmem:[%s3482_s25 + $0x348] sm:$0xff] (%p2958_p5), %v1913_v5  ;;  %v1915_v6 = vld [vmem:[%s3173_s18 + $0x1b0] sm:$0xff] (%p2958_p5)  ;;  %v2041_v5 = vld [vmem:[%s3173_s18 + $0x3a8] sm:$0xff] (%p2958_p5) }
 0x211   : > { %1773 = vst [vmem:[%s3173_s18 + $0x7b8] sm:$0xff] %v1513_v7  ;;  %v1164_v8 = vpop.f32.mrf.mxu0  ;;  %v1917_v7 = vld [vmem:[%s3173_s18 + $0x1b8] sm:$0xff] (%p2958_p5)  ;;  %1916 = vst [vmem:[%s3482_s25 + $0x350] sm:$0xff] (%p2958_p5), %v1915_v6  ;;  %v2043_v6 = vld [vmem:[%s3173_s18 + $0x3b0] sm:$0xff] (%p2958_p5) }
 0x212   : > { %1774 = vst [vmem:[%s3173_s18 + $0x7c0] sm:$0xff] %v1164_v8  ;;  %v1517_v9 = vpop.f32.mrf.mxu1  ;;  %v1919_v8 = vld [vmem:[%s3173_s18 + $0x1c0] sm:$0xff] (%p2958_p5)  ;;  %1918 = vst [vmem:[%s3482_s25 + $0x358] sm:$0xff] (%p2958_p5), %v1917_v7  ;;  %v2045_v7 = vld [vmem:[%s3173_s18 + $0x3b8] sm:$0xff] (%p2958_p5) }
 0x213   : > { %1776 = vst [vmem:[%s3173_s18 + $0x7d0] sm:$0xff] %v1517_v9  ;;  %v1166_v10 = vpop.f32.mrf.mxu0  ;;  %1920 = vst [vmem:[%s3482_s25 + $0x380] sm:$0xff] (%p2958_p5), %v1919_v8  ;;  %v1921_v9 = vld [vmem:[%s3173_s18 + $0x1c8] sm:$0xff] (%p2958_p5)  ;;  %v2047_v8 = vld [vmem:[%s3173_s18 + $0x3c0] sm:$0xff] (%p2958_p5) }
 0x214   : > { %1775 = vst [vmem:[%s3173_s18 + $0x7c8] sm:$0xff] %v1166_v10  ;;  %v1519_v11 = vpop.f32.mrf.mxu1  ;;  %v1923_v10 = vld [vmem:[%s3173_s18 + $0x1d0] sm:$0xff] (%p2958_p5)  ;;  %1922 = vst [vmem:[%s3482_s25 + $0x388] sm:$0xff] (%p2958_p5), %v1921_v9  ;;  %v2049_v9 = vld [vmem:[%s3173_s18 + $0x3c8] sm:$0xff] (%p2958_p5) }
 0x215   : > { %1777 = vst [vmem:[%s3173_s18 + $0x7d8] sm:$0xff] %v1519_v11  ;;  %v1168_v12 = vpop.f32.mrf.mxu0  ;;  %1788 = sbr.rel (!%p2958_p5) target bundleno = 635 (0x27b), region = 32  ;;  %v1925_v11 = vld [vmem:[%s3173_s18 + $0x1d8] sm:$0xff] (%p2958_p5)  ;;  %1924 = vst [vmem:[%s3482_s25 + $0x390] sm:$0xff] (%p2958_p5), %v1923_v10  ;;  %v2051_v10 = vld [vmem:[%s3173_s18 + $0x3d0] sm:$0xff] (%p2958_p5) }
 0x216   : > { %1778 = vst [vmem:[%s3173_s18 + $0x7e0] sm:$0xff] %v1168_v12  ;;  %v1521_v13 = vpop.f32.mrf.mxu1  ;;  %1926 = vst [vmem:[%s3482_s25 + $0x398] sm:$0xff] (%p2958_p5), %v1925_v11  ;;  %v1927_v12 = vld [vmem:[%s3173_s18 + $0x1e0] sm:$0xff] (%p2958_p5)  ;;  %v2053_v11 = vld [vmem:[%s3173_s18 + $0x3d8] sm:$0xff] (%p2958_p5) }
 0x217   : > { %1780 = vst [vmem:[%s3173_s18 + $0x7f0] sm:$0xff] %v1521_v13  ;;  %v1170_v14 = vpop.f32.mrf.mxu0  ;;  %v1929_v13 = vld [vmem:[%s3173_s18 + $0x1e8] sm:$0xff] (%p2958_p5)  ;;  %1928 = vst [vmem:[%s3482_s25 + $0x3c0] sm:$0xff] (%p2958_p5), %v1927_v12  ;;  %v2055_v12 = vld [vmem:[%s3173_s18 + $0x3e0] sm:$0xff] (%p2958_p5) }
 0x218   : > { %1779 = vst [vmem:[%s3173_s18 + $0x7e8] sm:$0xff] %v1170_v14  ;;  %v1523_v15 = vpop.f32.mrf.mxu1  ;;  %v1931_v14 = vld [vmem:[%s3173_s18 + $0x1f0] sm:$0xff] (%p2958_p5)  ;;  %1930 = vst [vmem:[%s3482_s25 + $0x3c8] sm:$0xff] (%p2958_p5), %v1929_v13  ;;  %v2057_v13 = vld [vmem:[%s3173_s18 + $0x3e8] sm:$0xff] (%p2958_p5) }
 0x219   : > { %1781 = vst [vmem:[%s3173_s18 + $0x7f8] sm:$0xff] %v1523_v15  ;;  %1932 = vst [vmem:[%s3482_s25 + $0x3d0] sm:$0xff] (%p2958_p5), %v1931_v14  ;;  %v1933_v15 = vld [vmem:[%s3173_s18 + $0x1f8] sm:$0xff] (%p2958_p5)  ;;  %v2059_v14 = vld [vmem:[%s3173_s18 + $0x3f0] sm:$0xff] (%p2958_p5) }
 0x21a   : > { %1934 = vst [vmem:[%s3482_s25 + $0x3d8] sm:$0xff] %v1933_v15  ;;  %1936 = vst [vmem:[%s3482_s25 + $0x400] sm:$0xff] %v1935_v16  ;;  %v2061_v15 = vld [vmem:[%s3173_s18 + $0x3f8] sm:$0xff]  ;;  %v2063_v16 = vld [vmem:[%s3173_s18 + $0x400] sm:$0xff] }
 0x21b   : > { %1938 = vst [vmem:[%s3482_s25 + $0x408] sm:$0xff] %v1937_v17  ;;  %1940 = vst [vmem:[%s3482_s25 + $0x410] sm:$0xff] %v1939_v18  ;;  %v2065_v17 = vld [vmem:[%s3173_s18 + $0x408] sm:$0xff]  ;;  %v2067_v18 = vld [vmem:[%s3173_s18 + $0x410] sm:$0xff] }
 0x21c   : > { %1942 = vst [vmem:[%s3482_s25 + $0x418] sm:$0xff] %v1941_v19  ;;  %1944 = vst [vmem:[%s3482_s25 + $0x440] sm:$0xff] %v1943_v20  ;;  %v2069_v19 = vld [vmem:[%s3173_s18 + $0x418] sm:$0xff]  ;;  %v2071_v20 = vld [vmem:[%s3173_s18 + $0x420] sm:$0xff] }
 0x21d   : > { %1946 = vst [vmem:[%s3482_s25 + $0x448] sm:$0xff] %v1945_v21  ;;  %1948 = vst [vmem:[%s3482_s25 + $0x450] sm:$0xff] %v1947_v22  ;;  %v2073_v21 = vld [vmem:[%s3173_s18 + $0x428] sm:$0xff]  ;;  %v2075_v22 = vld [vmem:[%s3173_s18 + $0x430] sm:$0xff] }
 0x21e   : > { %1950 = vst [vmem:[%s3482_s25 + $0x458] sm:$0xff] %v1949_v23  ;;  %1952 = vst [vmem:[%s3482_s25 + $0x480] sm:$0xff] %v1951_v24  ;;  %v2077_v23 = vld [vmem:[%s3173_s18 + $0x438] sm:$0xff]  ;;  %v2079_v24 = vld [vmem:[%s3173_s18 + $0x440] sm:$0xff] }
 0x21f   : > { %1954 = vst [vmem:[%s3482_s25 + $0x488] sm:$0xff] %v1953_v25  ;;  %1956 = vst [vmem:[%s3482_s25 + $0x490] sm:$0xff] %v1955_v26  ;;  %v2081_v25 = vld [vmem:[%s3173_s18 + $0x448] sm:$0xff]  ;;  %v2083_v26 = vld [vmem:[%s3173_s18 + $0x450] sm:$0xff] }
 0x220   : > { %1958 = vst [vmem:[%s3482_s25 + $0x498] sm:$0xff] %v1957_v27  ;;  %1960 = vst [vmem:[%s3482_s25 + $0x4c0] sm:$0xff] %v1959_v28  ;;  %v2085_v27 = vld [vmem:[%s3173_s18 + $0x458] sm:$0xff]  ;;  %v2087_v28 = vld [vmem:[%s3173_s18 + $0x460] sm:$0xff] }
 0x221   : > { %1962 = vst [vmem:[%s3482_s25 + $0x4c8] sm:$0xff] %v1961_v29  ;;  %1964 = vst [vmem:[%s3482_s25 + $0x4d0] sm:$0xff] %v1963_v30  ;;  %v2089_v29 = vld [vmem:[%s3173_s18 + $0x468] sm:$0xff]  ;;  %v2091_v30 = vld [vmem:[%s3173_s18 + $0x470] sm:$0xff] }
 0x222   : > { %1966 = vst [vmem:[%s3482_s25 + $0x4d8] sm:$0xff] %v1965_v31  ;;  %1968 = vst [vmem:[%s3482_s25 + $0x500] sm:$0xff] %v1967_v32  ;;  %v2093_v31 = vld [vmem:[%s3173_s18 + $0x478] sm:$0xff]  ;;  %v2095_v32 = vld [vmem:[%s3173_s18 + $0x480] sm:$0xff] }
 0x223   : > { %1970 = vst [vmem:[%s3482_s25 + $0x508] sm:$0xff] %v1969_v33  ;;  %1972 = vst [vmem:[%s3482_s25 + $0x510] sm:$0xff] %v1971_v34  ;;  %v2097_v33 = vld [vmem:[%s3173_s18 + $0x488] sm:$0xff]  ;;  %v2099_v34 = vld [vmem:[%s3173_s18 + $0x490] sm:$0xff] }
 0x224   : > { %1974 = vst [vmem:[%s3482_s25 + $0x518] sm:$0xff] %v1973_v35  ;;  %1976 = vst [vmem:[%s3482_s25 + $0x540] sm:$0xff] %v1975_v36  ;;  %v2101_v35 = vld [vmem:[%s3173_s18 + $0x498] sm:$0xff]  ;;  %v2103_v36 = vld [vmem:[%s3173_s18 + $0x4a0] sm:$0xff] }
 0x225   : > { %1978 = vst [vmem:[%s3482_s25 + $0x548] sm:$0xff] %v1977_v37  ;;  %1980 = vst [vmem:[%s3482_s25 + $0x550] sm:$0xff] %v1979_v38  ;;  %v2105_v37 = vld [vmem:[%s3173_s18 + $0x4a8] sm:$0xff]  ;;  %v2107_v38 = vld [vmem:[%s3173_s18 + $0x4b0] sm:$0xff] }
 0x226   : > { %1982 = vst [vmem:[%s3482_s25 + $0x558] sm:$0xff] %v1981_v39  ;;  %1984 = vst [vmem:[%s3482_s25 + $0x580] sm:$0xff] %v1983_v40  ;;  %v2109_v39 = vld [vmem:[%s3173_s18 + $0x4b8] sm:$0xff]  ;;  %v2111_v40 = vld [vmem:[%s3173_s18 + $0x4c0] sm:$0xff] }
 0x227   : > { %1986 = vst [vmem:[%s3482_s25 + $0x588] sm:$0xff] %v1985_v41  ;;  %1988 = vst [vmem:[%s3482_s25 + $0x590] sm:$0xff] %v1987_v42  ;;  %v2113_v41 = vld [vmem:[%s3173_s18 + $0x4c8] sm:$0xff]  ;;  %v2115_v42 = vld [vmem:[%s3173_s18 + $0x4d0] sm:$0xff] }
 0x228   : > { %1990 = vst [vmem:[%s3482_s25 + $0x598] sm:$0xff] %v1989_v43  ;;  %1992 = vst [vmem:[%s3482_s25 + $0x5c0] sm:$0xff] %v1991_v44  ;;  %v2117_v43 = vld [vmem:[%s3173_s18 + $0x4d8] sm:$0xff]  ;;  %v2119_v44 = vld [vmem:[%s3173_s18 + $0x4e0] sm:$0xff] }
 0x229   : > { %1994 = vst [vmem:[%s3482_s25 + $0x5c8] sm:$0xff] %v1993_v45  ;;  %1996 = vst [vmem:[%s3482_s25 + $0x5d0] sm:$0xff] %v1995_v46  ;;  %v2121_v45 = vld [vmem:[%s3173_s18 + $0x4e8] sm:$0xff]  ;;  %v2123_v46 = vld [vmem:[%s3173_s18 + $0x4f0] sm:$0xff] }
 0x22a   : > { %1998 = vst [vmem:[%s3482_s25 + $0x5d8] sm:$0xff] %v1997_v47  ;;  %2000 = vst [vmem:[%s3482_s25 + $0x600] sm:$0xff] %v1999_v48  ;;  %v2125_v47 = vld [vmem:[%s3173_s18 + $0x4f8] sm:$0xff]  ;;  %v2127_v48 = vld [vmem:[%s3173_s18 + $0x500] sm:$0xff] }
 0x22b   : > { %2002 = vst [vmem:[%s3482_s25 + $0x608] sm:$0xff] %v2001_v49  ;;  %2004 = vst [vmem:[%s3482_s25 + $0x610] sm:$0xff] %v2003_v50  ;;  %v2129_v49 = vld [vmem:[%s3173_s18 + $0x508] sm:$0xff]  ;;  %v2131_v50 = vld [vmem:[%s3173_s18 + $0x510] sm:$0xff] }
 0x22c   : > { %2006 = vst [vmem:[%s3482_s25 + $0x618] sm:$0xff] %v2005_v51  ;;  %2008 = vst [vmem:[%s3482_s25 + $0x640] sm:$0xff] %v2007_v52  ;;  %v2133_v51 = vld [vmem:[%s3173_s18 + $0x518] sm:$0xff]  ;;  %v2135_v52 = vld [vmem:[%s3173_s18 + $0x520] sm:$0xff] }
 0x22d   : > { %2010 = vst [vmem:[%s3482_s25 + $0x648] sm:$0xff] %v2009_v53  ;;  %2012 = vst [vmem:[%s3482_s25 + $0x650] sm:$0xff] %v2011_v54  ;;  %v2137_v53 = vld [vmem:[%s3173_s18 + $0x528] sm:$0xff]  ;;  %v2139_v54 = vld [vmem:[%s3173_s18 + $0x530] sm:$0xff] }
 0x22e   : > { %2014 = vst [vmem:[%s3482_s25 + $0x658] sm:$0xff] %v2013_v55  ;;  %2016 = vst [vmem:[%s3482_s25 + $0x680] sm:$0xff] %v2015_v56  ;;  %v2141_v55 = vld [vmem:[%s3173_s18 + $0x538] sm:$0xff]  ;;  %v2143_v56 = vld [vmem:[%s3173_s18 + $0x540] sm:$0xff] }
 0x22f   : > { %2018 = vst [vmem:[%s3482_s25 + $0x688] sm:$0xff] %v2017_v57  ;;  %2020 = vst [vmem:[%s3482_s25 + $0x690] sm:$0xff] %v2019_v58  ;;  %v2145_v57 = vld [vmem:[%s3173_s18 + $0x548] sm:$0xff]  ;;  %v2147_v58 = vld [vmem:[%s3173_s18 + $0x550] sm:$0xff] }
 0x230   : > { %2022 = vst [vmem:[%s3482_s25 + $0x698] sm:$0xff] %v2021_v59  ;;  %2024 = vst [vmem:[%s3482_s25 + $0x6c0] sm:$0xff] %v2023_v60  ;;  %v2149_v59 = vld [vmem:[%s3173_s18 + $0x558] sm:$0xff]  ;;  %v2151_v60 = vld [vmem:[%s3173_s18 + $0x560] sm:$0xff] }
 0x231   : > { %2026 = vst [vmem:[%s3482_s25 + $0x6c8] sm:$0xff] %v2025_v61  ;;  %2028 = vst [vmem:[%s3482_s25 + $0x6d0] sm:$0xff] %v2027_v62  ;;  %v2153_v61 = vld [vmem:[%s3173_s18 + $0x568] sm:$0xff]  ;;  %v2155_v62 = vld [vmem:[%s3173_s18 + $0x570] sm:$0xff] }
 0x232   : > { %2030 = vst [vmem:[%s3482_s25 + $0x6d8] sm:$0xff] %v2029_v63  ;;  %2032 = vst [vmem:[%s3482_s25 + $0x700] sm:$0xff] %v2031_v0  ;;  %v2157_v63 = vld [vmem:[%s3173_s18 + $0x578] sm:$0xff]  ;;  %v2159_v0 = vld [vmem:[%s3173_s18 + $0x580] sm:$0xff] }
 0x233   : > { %2034 = vst [vmem:[%s3482_s25 + $0x708] sm:$0xff] %v2033_v1  ;;  %2036 = vst [vmem:[%s3482_s25 + $0x710] sm:$0xff] %v2035_v2  ;;  %v2161_v1 = vld [vmem:[%s3173_s18 + $0x588] sm:$0xff]  ;;  %v2163_v2 = vld [vmem:[%s3173_s18 + $0x590] sm:$0xff] }
 0x234   : > { %2038 = vst [vmem:[%s3482_s25 + $0x718] sm:$0xff] %v2037_v3  ;;  %2040 = vst [vmem:[%s3482_s25 + $0x740] sm:$0xff] %v2039_v4  ;;  %v2165_v3 = vld [vmem:[%s3173_s18 + $0x598] sm:$0xff]  ;;  %v2167_v4 = vld [vmem:[%s3173_s18 + $0x5a0] sm:$0xff] }
 0x235   : > { %2042 = vst [vmem:[%s3482_s25 + $0x748] sm:$0xff] %v2041_v5  ;;  %2044 = vst [vmem:[%s3482_s25 + $0x750] sm:$0xff] %v2043_v6  ;;  %v2169_v5 = vld [vmem:[%s3173_s18 + $0x5a8] sm:$0xff]  ;;  %v2171_v6 = vld [vmem:[%s3173_s18 + $0x5b0] sm:$0xff] }
 0x236   : > { %2046 = vst [vmem:[%s3482_s25 + $0x758] sm:$0xff] %v2045_v7  ;;  %2048 = vst [vmem:[%s3482_s25 + $0x780] sm:$0xff] %v2047_v8  ;;  %v2173_v7 = vld [vmem:[%s3173_s18 + $0x5b8] sm:$0xff]  ;;  %v2175_v8 = vld [vmem:[%s3173_s18 + $0x5c0] sm:$0xff] }
 0x237   : > { %2050 = vst [vmem:[%s3482_s25 + $0x788] sm:$0xff] %v2049_v9  ;;  %2052 = vst [vmem:[%s3482_s25 + $0x790] sm:$0xff] %v2051_v10  ;;  %v2177_v9 = vld [vmem:[%s3173_s18 + $0x5c8] sm:$0xff]  ;;  %v2179_v10 = vld [vmem:[%s3173_s18 + $0x5d0] sm:$0xff] }
 0x238   : > { %2054 = vst [vmem:[%s3482_s25 + $0x798] sm:$0xff] %v2053_v11  ;;  %2056 = vst [vmem:[%s3482_s25 + $0x7c0] sm:$0xff] %v2055_v12  ;;  %v2181_v11 = vld [vmem:[%s3173_s18 + $0x5d8] sm:$0xff]  ;;  %v2183_v12 = vld [vmem:[%s3173_s18 + $0x5e0] sm:$0xff] }
 0x239   : > { %2058 = vst [vmem:[%s3482_s25 + $0x7c8] sm:$0xff] %v2057_v13  ;;  %2060 = vst [vmem:[%s3482_s25 + $0x7d0] sm:$0xff] %v2059_v14  ;;  %v2185_v13 = vld [vmem:[%s3173_s18 + $0x5e8] sm:$0xff]  ;;  %v2187_v14 = vld [vmem:[%s3173_s18 + $0x5f0] sm:$0xff] }
 0x23a   : > { %2062 = vst [vmem:[%s3482_s25 + $0x7d8] sm:$0xff] %v2061_v15  ;;  %2064 = vst [vmem:[%s3482_s25 + $0x800] sm:$0xff] %v2063_v16  ;;  %v2189_v15 = vld [vmem:[%s3173_s18 + $0x5f8] sm:$0xff]  ;;  %v2191_v16 = vld [vmem:[%s3173_s18 + $0x600] sm:$0xff] }
 0x23b   : > { %2066 = vst [vmem:[%s3482_s25 + $0x808] sm:$0xff] %v2065_v17  ;;  %2068 = vst [vmem:[%s3482_s25 + $0x810] sm:$0xff] %v2067_v18  ;;  %v2193_v17 = vld [vmem:[%s3173_s18 + $0x608] sm:$0xff]  ;;  %v2195_v18 = vld [vmem:[%s3173_s18 + $0x610] sm:$0xff] }
 0x23c   : > { %2070 = vst [vmem:[%s3482_s25 + $0x818] sm:$0xff] %v2069_v19  ;;  %2072 = vst [vmem:[%s3482_s25 + $0x840] sm:$0xff] %v2071_v20  ;;  %v2197_v19 = vld [vmem:[%s3173_s18 + $0x618] sm:$0xff]  ;;  %v2199_v20 = vld [vmem:[%s3173_s18 + $0x620] sm:$0xff] }
 0x23d   : > { %2074 = vst [vmem:[%s3482_s25 + $0x848] sm:$0xff] %v2073_v21  ;;  %2076 = vst [vmem:[%s3482_s25 + $0x850] sm:$0xff] %v2075_v22  ;;  %v2201_v21 = vld [vmem:[%s3173_s18 + $0x628] sm:$0xff]  ;;  %v2203_v22 = vld [vmem:[%s3173_s18 + $0x630] sm:$0xff] }
 0x23e   : > { %2078 = vst [vmem:[%s3482_s25 + $0x858] sm:$0xff] %v2077_v23  ;;  %2080 = vst [vmem:[%s3482_s25 + $0x880] sm:$0xff] %v2079_v24  ;;  %v2205_v23 = vld [vmem:[%s3173_s18 + $0x638] sm:$0xff]  ;;  %v2207_v24 = vld [vmem:[%s3173_s18 + $0x640] sm:$0xff] }
 0x23f   : > { %2082 = vst [vmem:[%s3482_s25 + $0x888] sm:$0xff] %v2081_v25  ;;  %2084 = vst [vmem:[%s3482_s25 + $0x890] sm:$0xff] %v2083_v26  ;;  %v2209_v25 = vld [vmem:[%s3173_s18 + $0x648] sm:$0xff]  ;;  %v2211_v26 = vld [vmem:[%s3173_s18 + $0x650] sm:$0xff] }
 0x240   : > { %2086 = vst [vmem:[%s3482_s25 + $0x898] sm:$0xff] %v2085_v27  ;;  %2088 = vst [vmem:[%s3482_s25 + $0x8c0] sm:$0xff] %v2087_v28  ;;  %v2213_v27 = vld [vmem:[%s3173_s18 + $0x658] sm:$0xff]  ;;  %v2215_v28 = vld [vmem:[%s3173_s18 + $0x660] sm:$0xff] }
 0x241   : > { %2090 = vst [vmem:[%s3482_s25 + $0x8c8] sm:$0xff] %v2089_v29  ;;  %2092 = vst [vmem:[%s3482_s25 + $0x8d0] sm:$0xff] %v2091_v30  ;;  %v2217_v29 = vld [vmem:[%s3173_s18 + $0x668] sm:$0xff]  ;;  %v2219_v30 = vld [vmem:[%s3173_s18 + $0x670] sm:$0xff] }
 0x242   : > { %2094 = vst [vmem:[%s3482_s25 + $0x8d8] sm:$0xff] %v2093_v31  ;;  %2096 = vst [vmem:[%s3482_s25 + $0x900] sm:$0xff] %v2095_v32  ;;  %v2221_v31 = vld [vmem:[%s3173_s18 + $0x678] sm:$0xff]  ;;  %v2223_v32 = vld [vmem:[%s3173_s18 + $0x680] sm:$0xff] }
 0x243   : > { %2098 = vst [vmem:[%s3482_s25 + $0x908] sm:$0xff] %v2097_v33  ;;  %2100 = vst [vmem:[%s3482_s25 + $0x910] sm:$0xff] %v2099_v34  ;;  %v2225_v33 = vld [vmem:[%s3173_s18 + $0x688] sm:$0xff]  ;;  %v2227_v34 = vld [vmem:[%s3173_s18 + $0x690] sm:$0xff] }
 0x244   : > { %2102 = vst [vmem:[%s3482_s25 + $0x918] sm:$0xff] %v2101_v35  ;;  %2104 = vst [vmem:[%s3482_s25 + $0x940] sm:$0xff] %v2103_v36  ;;  %v2229_v35 = vld [vmem:[%s3173_s18 + $0x698] sm:$0xff]  ;;  %v2231_v36 = vld [vmem:[%s3173_s18 + $0x6a0] sm:$0xff] }
 0x245   : > { %2106 = vst [vmem:[%s3482_s25 + $0x948] sm:$0xff] %v2105_v37  ;;  %2108 = vst [vmem:[%s3482_s25 + $0x950] sm:$0xff] %v2107_v38  ;;  %v2233_v37 = vld [vmem:[%s3173_s18 + $0x6a8] sm:$0xff]  ;;  %v2235_v38 = vld [vmem:[%s3173_s18 + $0x6b0] sm:$0xff] }
 0x246   : > { %2110 = vst [vmem:[%s3482_s25 + $0x958] sm:$0xff] %v2109_v39  ;;  %2112 = vst [vmem:[%s3482_s25 + $0x980] sm:$0xff] %v2111_v40  ;;  %v2237_v39 = vld [vmem:[%s3173_s18 + $0x6b8] sm:$0xff]  ;;  %v2239_v40 = vld [vmem:[%s3173_s18 + $0x6c0] sm:$0xff] }
 0x247   : > { %2114 = vst [vmem:[%s3482_s25 + $0x988] sm:$0xff] %v2113_v41  ;;  %2116 = vst [vmem:[%s3482_s25 + $0x990] sm:$0xff] %v2115_v42  ;;  %v2241_v41 = vld [vmem:[%s3173_s18 + $0x6c8] sm:$0xff]  ;;  %v2243_v42 = vld [vmem:[%s3173_s18 + $0x6d0] sm:$0xff] }
 0x248   : > { %2118 = vst [vmem:[%s3482_s25 + $0x998] sm:$0xff] %v2117_v43  ;;  %2120 = vst [vmem:[%s3482_s25 + $0x9c0] sm:$0xff] %v2119_v44  ;;  %v2245_v43 = vld [vmem:[%s3173_s18 + $0x6d8] sm:$0xff]  ;;  %v2247_v44 = vld [vmem:[%s3173_s18 + $0x6e0] sm:$0xff] }
 0x249   : > { %2122 = vst [vmem:[%s3482_s25 + $0x9c8] sm:$0xff] %v2121_v45  ;;  %2124 = vst [vmem:[%s3482_s25 + $0x9d0] sm:$0xff] %v2123_v46  ;;  %v2249_v45 = vld [vmem:[%s3173_s18 + $0x6e8] sm:$0xff]  ;;  %v2251_v46 = vld [vmem:[%s3173_s18 + $0x6f0] sm:$0xff] }
 0x24a   : > { %2126 = vst [vmem:[%s3482_s25 + $0x9d8] sm:$0xff] %v2125_v47  ;;  %2128 = vst [vmem:[%s3482_s25 + $0xa00] sm:$0xff] %v2127_v48  ;;  %v2253_v47 = vld [vmem:[%s3173_s18 + $0x6f8] sm:$0xff]  ;;  %v2255_v48 = vld [vmem:[%s3173_s18 + $0x700] sm:$0xff] }
 0x24b   : > { %2130 = vst [vmem:[%s3482_s25 + $0xa08] sm:$0xff] %v2129_v49  ;;  %2132 = vst [vmem:[%s3482_s25 + $0xa10] sm:$0xff] %v2131_v50  ;;  %v2257_v49 = vld [vmem:[%s3173_s18 + $0x708] sm:$0xff]  ;;  %v2259_v50 = vld [vmem:[%s3173_s18 + $0x710] sm:$0xff] }
 0x24c   : > { %2134 = vst [vmem:[%s3482_s25 + $0xa18] sm:$0xff] %v2133_v51  ;;  %2136 = vst [vmem:[%s3482_s25 + $0xa40] sm:$0xff] %v2135_v52  ;;  %v2261_v51 = vld [vmem:[%s3173_s18 + $0x718] sm:$0xff]  ;;  %v2263_v52 = vld [vmem:[%s3173_s18 + $0x720] sm:$0xff] }
 0x24d   : > { %2138 = vst [vmem:[%s3482_s25 + $0xa48] sm:$0xff] %v2137_v53  ;;  %2140 = vst [vmem:[%s3482_s25 + $0xa50] sm:$0xff] %v2139_v54  ;;  %v2265_v53 = vld [vmem:[%s3173_s18 + $0x728] sm:$0xff]  ;;  %v2267_v54 = vld [vmem:[%s3173_s18 + $0x730] sm:$0xff] }
 0x24e   : > { %2142 = vst [vmem:[%s3482_s25 + $0xa58] sm:$0xff] %v2141_v55  ;;  %2144 = vst [vmem:[%s3482_s25 + $0xa80] sm:$0xff] %v2143_v56  ;;  %v2269_v55 = vld [vmem:[%s3173_s18 + $0x738] sm:$0xff]  ;;  %v2271_v56 = vld [vmem:[%s3173_s18 + $0x740] sm:$0xff] }
 0x24f   : > { %2146 = vst [vmem:[%s3482_s25 + $0xa88] sm:$0xff] %v2145_v57  ;;  %2148 = vst [vmem:[%s3482_s25 + $0xa90] sm:$0xff] %v2147_v58  ;;  %v2273_v57 = vld [vmem:[%s3173_s18 + $0x748] sm:$0xff]  ;;  %v2275_v58 = vld [vmem:[%s3173_s18 + $0x750] sm:$0xff] }
 0x250   : > { %2150 = vst [vmem:[%s3482_s25 + $0xa98] sm:$0xff] %v2149_v59  ;;  %2152 = vst [vmem:[%s3482_s25 + $0xac0] sm:$0xff] %v2151_v60  ;;  %v2277_v59 = vld [vmem:[%s3173_s18 + $0x758] sm:$0xff]  ;;  %v2279_v60 = vld [vmem:[%s3173_s18 + $0x760] sm:$0xff] }
 0x251   : > { %2154 = vst [vmem:[%s3482_s25 + $0xac8] sm:$0xff] %v2153_v61  ;;  %2156 = vst [vmem:[%s3482_s25 + $0xad0] sm:$0xff] %v2155_v62  ;;  %v2281_v61 = vld [vmem:[%s3173_s18 + $0x768] sm:$0xff]  ;;  %v2283_v62 = vld [vmem:[%s3173_s18 + $0x770] sm:$0xff] }
 0x252   : > { %2158 = vst [vmem:[%s3482_s25 + $0xad8] sm:$0xff] %v2157_v63  ;;  %2160 = vst [vmem:[%s3482_s25 + $0xb00] sm:$0xff] %v2159_v0  ;;  %v2285_v63 = vld [vmem:[%s3173_s18 + $0x778] sm:$0xff]  ;;  %v2287_v0 = vld [vmem:[%s3173_s18 + $0x780] sm:$0xff] }
 0x253   : > { %2162 = vst [vmem:[%s3482_s25 + $0xb08] sm:$0xff] %v2161_v1  ;;  %2164 = vst [vmem:[%s3482_s25 + $0xb10] sm:$0xff] %v2163_v2  ;;  %v2289_v1 = vld [vmem:[%s3173_s18 + $0x788] sm:$0xff]  ;;  %v2291_v2 = vld [vmem:[%s3173_s18 + $0x790] sm:$0xff] }
 0x254   : > { %2166 = vst [vmem:[%s3482_s25 + $0xb18] sm:$0xff] %v2165_v3  ;;  %2168 = vst [vmem:[%s3482_s25 + $0xb40] sm:$0xff] %v2167_v4  ;;  %v2293_v3 = vld [vmem:[%s3173_s18 + $0x798] sm:$0xff]  ;;  %v2295_v4 = vld [vmem:[%s3173_s18 + $0x7a0] sm:$0xff] }
 0x255   : > { %2170 = vst [vmem:[%s3482_s25 + $0xb48] sm:$0xff] %v2169_v5  ;;  %2172 = vst [vmem:[%s3482_s25 + $0xb50] sm:$0xff] %v2171_v6  ;;  %v2297_v5 = vld [vmem:[%s3173_s18 + $0x7a8] sm:$0xff]  ;;  %v2299_v6 = vld [vmem:[%s3173_s18 + $0x7b0] sm:$0xff] }
 0x256   : > { %2174 = vst [vmem:[%s3482_s25 + $0xb58] sm:$0xff] %v2173_v7  ;;  %2176 = vst [vmem:[%s3482_s25 + $0xb80] sm:$0xff] %v2175_v8  ;;  %v2301_v7 = vld [vmem:[%s3173_s18 + $0x7b8] sm:$0xff]  ;;  %v2303_v8 = vld [vmem:[%s3173_s18 + $0x7c0] sm:$0xff] }
 0x257   : > { %2178 = vst [vmem:[%s3482_s25 + $0xb88] sm:$0xff] %v2177_v9  ;;  %2180 = vst [vmem:[%s3482_s25 + $0xb90] sm:$0xff] %v2179_v10  ;;  %v2305_v9 = vld [vmem:[%s3173_s18 + $0x7c8] sm:$0xff]  ;;  %v2307_v10 = vld [vmem:[%s3173_s18 + $0x7d0] sm:$0xff] }
 0x258   : > { %2182 = vst [vmem:[%s3482_s25 + $0xb98] sm:$0xff] %v2181_v11  ;;  %2184 = vst [vmem:[%s3482_s25 + $0xbc0] sm:$0xff] %v2183_v12  ;;  %v2309_v11 = vld [vmem:[%s3173_s18 + $0x7d8] sm:$0xff]  ;;  %v2311_v12 = vld [vmem:[%s3173_s18 + $0x7e0] sm:$0xff] }
 0x259   : > { %2186 = vst [vmem:[%s3482_s25 + $0xbc8] sm:$0xff] %v2185_v13  ;;  %2188 = vst [vmem:[%s3482_s25 + $0xbd0] sm:$0xff] %v2187_v14  ;;  %v2313_v13 = vld [vmem:[%s3173_s18 + $0x7e8] sm:$0xff]  ;;  %v2315_v14 = vld [vmem:[%s3173_s18 + $0x7f0] sm:$0xff] }
 0x25a   : > { %2190 = vst [vmem:[%s3482_s25 + $0xbd8] sm:$0xff] %v2189_v15  ;;  %2192 = vst [vmem:[%s3482_s25 + $0xc00] sm:$0xff] %v2191_v16  ;;  %v2317_v15 = vld [vmem:[%s3173_s18 + $0x7f8] sm:$0xff] }
 0x25b   : > { %2194 = vst [vmem:[%s3482_s25 + $0xc08] sm:$0xff] %v2193_v17  ;;  %2196 = vst [vmem:[%s3482_s25 + $0xc10] sm:$0xff] %v2195_v18 }
 0x25c   : > { %2198 = vst [vmem:[%s3482_s25 + $0xc18] sm:$0xff] %v2197_v19  ;;  %2200 = vst [vmem:[%s3482_s25 + $0xc40] sm:$0xff] %v2199_v20 }
 0x25d   : > { %2202 = vst [vmem:[%s3482_s25 + $0xc48] sm:$0xff] %v2201_v21  ;;  %2204 = vst [vmem:[%s3482_s25 + $0xc50] sm:$0xff] %v2203_v22 }
 0x25e   : > { %2206 = vst [vmem:[%s3482_s25 + $0xc58] sm:$0xff] %v2205_v23  ;;  %2208 = vst [vmem:[%s3482_s25 + $0xc80] sm:$0xff] %v2207_v24 }
 0x25f   : > { %2210 = vst [vmem:[%s3482_s25 + $0xc88] sm:$0xff] %v2209_v25  ;;  %2212 = vst [vmem:[%s3482_s25 + $0xc90] sm:$0xff] %v2211_v26 }
 0x260   : > { %2214 = vst [vmem:[%s3482_s25 + $0xc98] sm:$0xff] %v2213_v27  ;;  %2216 = vst [vmem:[%s3482_s25 + $0xcc0] sm:$0xff] %v2215_v28 }
 0x261   : > { %2218 = vst [vmem:[%s3482_s25 + $0xcc8] sm:$0xff] %v2217_v29  ;;  %2220 = vst [vmem:[%s3482_s25 + $0xcd0] sm:$0xff] %v2219_v30 }
 0x262   : > { %2222 = vst [vmem:[%s3482_s25 + $0xcd8] sm:$0xff] %v2221_v31  ;;  %2224 = vst [vmem:[%s3482_s25 + $0xd00] sm:$0xff] %v2223_v32 }
 0x263   : > { %2226 = vst [vmem:[%s3482_s25 + $0xd08] sm:$0xff] %v2225_v33  ;;  %2228 = vst [vmem:[%s3482_s25 + $0xd10] sm:$0xff] %v2227_v34 }
 0x264   : > { %2230 = vst [vmem:[%s3482_s25 + $0xd18] sm:$0xff] %v2229_v35  ;;  %2232 = vst [vmem:[%s3482_s25 + $0xd40] sm:$0xff] %v2231_v36 }
 0x265   : > { %2234 = vst [vmem:[%s3482_s25 + $0xd48] sm:$0xff] %v2233_v37  ;;  %2236 = vst [vmem:[%s3482_s25 + $0xd50] sm:$0xff] %v2235_v38 }
 0x266   : > { %2238 = vst [vmem:[%s3482_s25 + $0xd58] sm:$0xff] %v2237_v39  ;;  %2240 = vst [vmem:[%s3482_s25 + $0xd80] sm:$0xff] %v2239_v40 }
 0x267   : > { %2242 = vst [vmem:[%s3482_s25 + $0xd88] sm:$0xff] %v2241_v41  ;;  %2244 = vst [vmem:[%s3482_s25 + $0xd90] sm:$0xff] %v2243_v42 }
 0x268   : > { %2246 = vst [vmem:[%s3482_s25 + $0xd98] sm:$0xff] %v2245_v43  ;;  %2248 = vst [vmem:[%s3482_s25 + $0xdc0] sm:$0xff] %v2247_v44 }
 0x269   : > { %2250 = vst [vmem:[%s3482_s25 + $0xdc8] sm:$0xff] %v2249_v45  ;;  %2252 = vst [vmem:[%s3482_s25 + $0xdd0] sm:$0xff] %v2251_v46 }
 0x26a   : > { %2254 = vst [vmem:[%s3482_s25 + $0xdd8] sm:$0xff] %v2253_v47  ;;  %2256 = vst [vmem:[%s3482_s25 + $0xe00] sm:$0xff] %v2255_v48 }
 0x26b   : > { %2258 = vst [vmem:[%s3482_s25 + $0xe08] sm:$0xff] %v2257_v49  ;;  %2260 = vst [vmem:[%s3482_s25 + $0xe10] sm:$0xff] %v2259_v50 }
 0x26c   : > { %2262 = vst [vmem:[%s3482_s25 + $0xe18] sm:$0xff] %v2261_v51  ;;  %2264 = vst [vmem:[%s3482_s25 + $0xe40] sm:$0xff] %v2263_v52 }
 0x26d   : > { %2266 = vst [vmem:[%s3482_s25 + $0xe48] sm:$0xff] %v2265_v53  ;;  %2268 = vst [vmem:[%s3482_s25 + $0xe50] sm:$0xff] %v2267_v54 }
 0x26e   : > { %2270 = vst [vmem:[%s3482_s25 + $0xe58] sm:$0xff] %v2269_v55  ;;  %2272 = vst [vmem:[%s3482_s25 + $0xe80] sm:$0xff] %v2271_v56 }
 0x26f   : > { %2274 = vst [vmem:[%s3482_s25 + $0xe88] sm:$0xff] %v2273_v57  ;;  %2276 = vst [vmem:[%s3482_s25 + $0xe90] sm:$0xff] %v2275_v58 }
 0x270   : > { %2278 = vst [vmem:[%s3482_s25 + $0xe98] sm:$0xff] %v2277_v59  ;;  %2280 = vst [vmem:[%s3482_s25 + $0xec0] sm:$0xff] %v2279_v60 }
 0x271   : > { %2282 = vst [vmem:[%s3482_s25 + $0xec8] sm:$0xff] %v2281_v61  ;;  %2284 = vst [vmem:[%s3482_s25 + $0xed0] sm:$0xff] %v2283_v62 }
 0x272   : > { %2286 = vst [vmem:[%s3482_s25 + $0xed8] sm:$0xff] %v2285_v63  ;;  %2288 = vst [vmem:[%s3482_s25 + $0xf00] sm:$0xff] %v2287_v0 }
 0x273   : > { %2290 = vst [vmem:[%s3482_s25 + $0xf08] sm:$0xff] %v2289_v1  ;;  %2292 = vst [vmem:[%s3482_s25 + $0xf10] sm:$0xff] %v2291_v2 }
 0x274   : > { %2294 = vst [vmem:[%s3482_s25 + $0xf18] sm:$0xff] %v2293_v3  ;;  %2296 = vst [vmem:[%s3482_s25 + $0xf40] sm:$0xff] %v2295_v4 }
 0x275   : > { %2298 = vst [vmem:[%s3482_s25 + $0xf48] sm:$0xff] %v2297_v5  ;;  %2300 = vst [vmem:[%s3482_s25 + $0xf50] sm:$0xff] %v2299_v6 }
 0x276   : > { %2302 = vst [vmem:[%s3482_s25 + $0xf58] sm:$0xff] %v2301_v7  ;;  %2304 = vst [vmem:[%s3482_s25 + $0xf80] sm:$0xff] %v2303_v8 }
 0x277   : > { %2306 = vst [vmem:[%s3482_s25 + $0xf88] sm:$0xff] %v2305_v9  ;;  %2308 = vst [vmem:[%s3482_s25 + $0xf90] sm:$0xff] %v2307_v10 }
 0x278   : > { %2310 = vst [vmem:[%s3482_s25 + $0xf98] sm:$0xff] %v2309_v11  ;;  %2312 = vst [vmem:[%s3482_s25 + $0xfc0] sm:$0xff] %v2311_v12 }
 0x279   : > { %2314 = vst [vmem:[%s3482_s25 + $0xfc8] sm:$0xff] %v2313_v13  ;;  %2316 = vst [vmem:[%s3482_s25 + $0xfd0] sm:$0xff] %v2315_v14 }
 0x27a   : > { %2318 = vst [vmem:[%s3482_s25 + $0xfd8] sm:$0xff] %v2317_v15 }
 0x27b PF: > { %s12_s15 = sadd.s32 1, %s2895_s15   ;;  %s4012_s9 = smov %s2875_s10 }
 0x27c   : > { %p9_p11 = scmp.ge.s32.totalorder %s12_s15, 6   ;;  %s4013_s10 = smov %s2969_s24 }
 0x27d   : > { %s4014_s11 = smov %s2887_s13  ;;  %s4015_s12 = smov %s2891_s14 }
 0x27e   : > { %s4016_s13 = smov %s4019_s16  ;;  %s4017_s14 = smov %s4023_s17 }
 0x27f   :  { %11 = sbr.rel (!%p9_p11) target bundleno = 4 (0x4), region = 84 }

</bundles_post_ra>
